<compile_context>
chip_gen: v7x
topology: tpu7x:2x2x1
jax: 0.10.0
libtpu: 0.0.40
codegen_flags: <defaults>
</compile_context>

<pallas_src>
import math
from functools import partial

import jax
import jax.numpy as jnp
from jax.experimental import pallas as pl
from jax.experimental.pallas import tpu as pltpu

BN_EPS = 1e-5


# ----------------------------------------------------------------------------
# Fused ResBlock kernel
# ----------------------------------------------------------------------------
def _resblock_kernel(xpad_ref, w1_ref, g1_ref, b1_ref, w2_ref, g2_ref, b2_ref,
                     res_ref, mask_ref, o_ref, h1_ref, hpad_ref, h2_ref,
                     *, n_batch, height, width):
    Wp = width + 2                     # padded row width in the flat frame
    Rv = height * Wp                   # rows of the "top-left aligned" output frame
    cout = h1_ref.shape[2]
    count = float(n_batch * height * width)
    mask = mask_ref[...]               # (Rv, 1) f32, 1.0 on valid (j < W) rows

    taps = [(ki, kj) for ki in range(3) for kj in range(3)]

    # ---- conv1: 9 shifted-slice MXU matmuls (bf16 operands, fp32 accumulation) ----
    for n in range(n_batch):
        acc = jnp.zeros((Rv, cout), jnp.float32)
        for t, (ki, kj) in enumerate(taps):
            start = ki * Wp + kj
            a = xpad_ref[n, pl.ds(start, Rv), :].astype(jnp.bfloat16)
            acc = acc + jnp.dot(a, w1_ref[t], preferred_element_type=jnp.float32)
        h1_ref[n] = acc

    # ---- BN1 (batch stats over valid rows, fp32) ----
    s = jnp.zeros((1, cout), jnp.float32)
    for n in range(n_batch):
        s = s + jnp.sum(h1_ref[n] * mask, axis=0, keepdims=True)
    mean1 = s / count
    v = jnp.zeros((1, cout), jnp.float32)
    for n in range(n_batch):
        d = (h1_ref[n] - mean1) * mask
        v = v + jnp.sum(d * d, axis=0, keepdims=True)
    var1 = v / count
    scale1 = g1_ref[...] * jax.lax.rsqrt(var1 + BN_EPS)     # EUP rsqrt
    shift1 = b1_ref[...] - mean1 * scale1

    # ReLU, zero the junk rows (this reconstitutes conv2's zero padding), and place
    # the result at offset Wp+1 of the padded frame (shift from top-left to centered).
    hpad_ref[...] = jnp.zeros(hpad_ref.shape, hpad_ref.dtype)
    for n in range(n_batch):
        hn = jnp.maximum(h1_ref[n] * scale1 + shift1, 0.0) * mask
        hpad_ref[n, pl.ds(Wp + 1, Rv), :] = hn

    # ---- conv2: same 9-tap accumulation over the re-padded hidden activation ----
    for n in range(n_batch):
        acc = jnp.zeros((Rv, cout), jnp.float32)
        for t, (ki, kj) in enumerate(taps):
            start = ki * Wp + kj
            a = hpad_ref[n, pl.ds(start, Rv), :].astype(jnp.bfloat16)
            acc = acc + jnp.dot(a, w2_ref[t], preferred_element_type=jnp.float32)
        h2_ref[n] = acc

    # ---- BN2 + identity residual + ReLU ----
    s = jnp.zeros((1, cout), jnp.float32)
    for n in range(n_batch):
        s = s + jnp.sum(h2_ref[n] * mask, axis=0, keepdims=True)
    mean2 = s / count
    v = jnp.zeros((1, cout), jnp.float32)
    for n in range(n_batch):
        d = (h2_ref[n] - mean2) * mask
        v = v + jnp.sum(d * d, axis=0, keepdims=True)
    var2 = v / count
    scale2 = g2_ref[...] * jax.lax.rsqrt(var2 + BN_EPS)
    shift2 = b2_ref[...] - mean2 * scale2

    for n in range(n_batch):
        y = h2_ref[n] * scale2 + shift2 + res_ref[n]
        o_ref[n] = jnp.maximum(y, 0.0)


# ----------------------------------------------------------------------------
# Wrapper: layout plumbing (NCHW -> flat padded NHWC frame) + pallas_call
# ----------------------------------------------------------------------------
def resblock_forward(x_nchw, params):
    w1, g1, b1 = params["w1"], params["g1"], params["b1"]
    w2, g2, b2 = params["w2"], params["g2"], params["b2"]

    x = jnp.transpose(x_nchw, (0, 2, 3, 1)).astype(jnp.float32)   # NCHW -> NHWC
    N, H, W, C = x.shape
    Cout = w1.shape[-1]
    assert C == Cout, "identity residual requires in_planes == out_planes"
    Wp = W + 2
    Rv = H * Wp                         # rows of the flat output frame
    Rp = (H + 2) * Wp + 2               # padded rows so every shifted slice is in-bounds

    # Zero-padded input, flattened per sample: row index = a*(W+2) + b.
    xpad = jnp.pad(x, ((0, 0), (1, 1), (1, 1), (0, 0))).reshape(N, (H + 2) * Wp, C)
    xpad = jnp.pad(xpad, ((0, 0), (0, Rp - (H + 2) * Wp), (0, 0)))

    # Identity residual in the same flat frame (exact fp32 copy of x).
    res = jnp.pad(x, ((0, 0), (0, 0), (0, 2), (0, 0))).reshape(N, Rv, C)

    # Valid-row mask for the flat frame (1 where the column index < W).
    mask = (jnp.arange(Rv) % Wp < W).astype(jnp.float32).reshape(Rv, 1)

    # Weights as 9 taps, bf16 for the MXU.
    w1f = w1.reshape(9, C, Cout).astype(jnp.bfloat16)
    w2f = w2.reshape(9, Cout, Cout).astype(jnp.bfloat16)

    out_flat = pl.pallas_call(
        partial(_resblock_kernel, n_batch=N, height=H, width=W),
        out_shape=jax.ShapeDtypeStruct((N, Rv, Cout), jnp.float32),
        scratch_shapes=[
            pltpu.VMEM((N, Rv, Cout), jnp.float32),     # conv1 accumulator
            pltpu.VMEM((N, Rp, Cout), jnp.float32),     # re-padded BN1/ReLU output
            pltpu.VMEM((N, Rv, Cout), jnp.float32),     # conv2 accumulator
        ],
        compiler_params=pltpu.CompilerParams(vmem_limit_bytes=32 * 1024 * 1024),
    )(xpad, w1f, g1.reshape(1, Cout), b1.reshape(1, Cout),
      w2f, g2.reshape(1, Cout), b2.reshape(1, Cout), res, mask)

    out = out_flat.reshape(N, H, Wp, Cout)[:, :, :W, :]           # drop junk columns
    return jnp.transpose(out, (0, 3, 1, 2))                       # NHWC -> NCHW


# ----------------------------------------------------------------------------
# Deterministic params + plain-JAX reference (for a self-check)
# ----------------------------------------------------------------------------
def init_params(key, planes):
    k1, k2 = jax.random.split(key)
    std = math.sqrt(2.0 / (9 * planes))
    return dict(
        w1=jax.random.normal(k1, (3, 3, planes, planes), jnp.float32) * std,
        g1=jnp.ones((planes,), jnp.float32), b1=jnp.zeros((planes,), jnp.float32),
        w2=jax.random.normal(k2, (3, 3, planes, planes), jnp.float32) * std,
        g2=jnp.ones((planes,), jnp.float32), b2=jnp.zeros((planes,), jnp.float32),
    )


def resblock_reference(x_nchw, params):
    x = jnp.transpose(x_nchw, (0, 2, 3, 1)).astype(jnp.float32)

    def conv(h, w):
        return jax.lax.conv_general_dilated(
            h, w, (1, 1), ((1, 1), (1, 1)),
            dimension_numbers=("NHWC", "HWIO", "NHWC"))

    def bn(h, g, b):
        mean = jnp.mean(h, axis=(0, 1, 2))
        var = jnp.mean((h - mean) ** 2, axis=(0, 1, 2))
        return (h - mean) * jax.lax.rsqrt(var + BN_EPS) * g + b

    out = jax.nn.relu(bn(conv(x, params["w1"]), params["g1"], params["b1"]))
    out = bn(conv(out, params["w2"]), params["g2"], params["b2"]) + x
    out = jax.nn.relu(out)
    return jnp.transpose(out, (0, 3, 1, 2))


# ----------------------------------------------------------------------------
if __name__ == "__main__":
    key = jax.random.PRNGKey(0)
    k_param, k_x = jax.random.split(key)

    N, C, H, W = 2, 64, 16, 16
    params = init_params(k_param, C)
    x = jax.random.normal(k_x, (N, C, H, W), jnp.float32)

    fwd = jax.jit(resblock_forward)
    out = fwd(x, params)
    jax.block_until_ready(out)
    assert out.shape == (N, C, H, W), out.shape

    ref = resblock_reference(x, params)
    max_err = float(jnp.max(jnp.abs(out - ref)))
    assert max_err < 1e-1, f"max abs err vs reference = {max_err}"

    print("KERNEL_OK")
</pallas_src>

<mosaic_0001>
module attributes {stable_mosaic.version = 11 : i64} {
  func.func @_resblock_kernel(%arg0: memref<2x326x64xf32, #tpu.memory_space<vmem>>, %arg1: memref<9x64x64xbf16, #tpu.memory_space<vmem>>, %arg2: memref<1x64xf32, #tpu.memory_space<vmem>>, %arg3: memref<1x64xf32, #tpu.memory_space<vmem>>, %arg4: memref<9x64x64xbf16, #tpu.memory_space<vmem>>, %arg5: memref<1x64xf32, #tpu.memory_space<vmem>>, %arg6: memref<1x64xf32, #tpu.memory_space<vmem>>, %arg7: memref<2x288x64xf32, #tpu.memory_space<vmem>>, %arg8: memref<288x1xf32, #tpu.memory_space<vmem>>, %arg9: memref<2x288x64xf32, #tpu.memory_space<vmem>>, %arg10: memref<2x288x64xf32, #tpu.memory_space<vmem>>, %arg11: memref<2x326x64xf32, #tpu.memory_space<vmem>>, %arg12: memref<2x288x64xf32, #tpu.memory_space<vmem>>) attributes {dimension_semantics = [], scalar_prefetch = 0 : i64, scratch_operands = 3 : i64, tpu.core_type = #tpu.core_type<tc>} {
    %c0 = arith.constant 0 : index
    %c0_0 = arith.constant 0 : index
    %0 = vector.load %arg8[%c0, %c0_0] : memref<288x1xf32, #tpu.memory_space<vmem>>, vector<288x1xf32>
    %cst = arith.constant 0.000000e+00 : f32
    %1 = vector.broadcast %cst : f32 to vector<288x64xf32>
    %c0_1 = arith.constant 0 : index
    %c0_2 = arith.constant 0 : index
    %c0_3 = arith.constant 0 : index
    %2 = vector.load %arg0[%c0_1, %c0_2, %c0_3] : memref<2x326x64xf32, #tpu.memory_space<vmem>>, vector<1x288x64xf32>
    %3 = vector.shape_cast %2 : vector<1x288x64xf32> to vector<288x64xf32>
    %4 = arith.truncf %3 : vector<288x64xf32> to vector<288x64xbf16>
    %c0_4 = arith.constant 0 : index
    %c0_5 = arith.constant 0 : index
    %c0_6 = arith.constant 0 : index
    %5 = vector.load %arg1[%c0_4, %c0_5, %c0_6] : memref<9x64x64xbf16, #tpu.memory_space<vmem>>, vector<1x64x64xbf16>
    %6 = vector.shape_cast %5 : vector<1x64x64xbf16> to vector<64x64xbf16>
    %cst_7 = arith.constant dense<0.000000e+00> : vector<288x64xf32>
    %7 = tpu.matmul %4, %6, %cst_7 {dimension_numbers = #tpu.dot_dimension_numbers<[1], [0], [0], [1], [0, 0, 1, 1], [], []>} : vector<288x64xbf16>, vector<64x64xbf16>, vector<288x64xf32> -> vector<288x64xf32>
    %8 = arith.addf %1, %7 : vector<288x64xf32>
    %c0_8 = arith.constant 0 : index
    %c1 = arith.constant 1 : index
    %c0_9 = arith.constant 0 : index
    %9 = vector.load %arg0[%c0_8, %c1, %c0_9] : memref<2x326x64xf32, #tpu.memory_space<vmem>>, vector<1x288x64xf32>
    %10 = vector.shape_cast %9 : vector<1x288x64xf32> to vector<288x64xf32>
    %11 = arith.truncf %10 : vector<288x64xf32> to vector<288x64xbf16>
    %c1_10 = arith.constant 1 : index
    %c0_11 = arith.constant 0 : index
    %c0_12 = arith.constant 0 : index
    %12 = vector.load %arg1[%c1_10, %c0_11, %c0_12] : memref<9x64x64xbf16, #tpu.memory_space<vmem>>, vector<1x64x64xbf16>
    %13 = vector.shape_cast %12 : vector<1x64x64xbf16> to vector<64x64xbf16>
    %cst_13 = arith.constant dense<0.000000e+00> : vector<288x64xf32>
    %14 = tpu.matmul %11, %13, %cst_13 {dimension_numbers = #tpu.dot_dimension_numbers<[1], [0], [0], [1], [0, 0, 1, 1], [], []>} : vector<288x64xbf16>, vector<64x64xbf16>, vector<288x64xf32> -> vector<288x64xf32>
    %15 = arith.addf %8, %14 : vector<288x64xf32>
    %c0_14 = arith.constant 0 : index
    %c2 = arith.constant 2 : index
    %c0_15 = arith.constant 0 : index
    %16 = vector.load %arg0[%c0_14, %c2, %c0_15] : memref<2x326x64xf32, #tpu.memory_space<vmem>>, vector<1x288x64xf32>
    %17 = vector.shape_cast %16 : vector<1x288x64xf32> to vector<288x64xf32>
    %18 = arith.truncf %17 : vector<288x64xf32> to vector<288x64xbf16>
    %c2_16 = arith.constant 2 : index
    %c0_17 = arith.constant 0 : index
    %c0_18 = arith.constant 0 : index
    %19 = vector.load %arg1[%c2_16, %c0_17, %c0_18] : memref<9x64x64xbf16, #tpu.memory_space<vmem>>, vector<1x64x64xbf16>
    %20 = vector.shape_cast %19 : vector<1x64x64xbf16> to vector<64x64xbf16>
    %cst_19 = arith.constant dense<0.000000e+00> : vector<288x64xf32>
    %21 = tpu.matmul %18, %20, %cst_19 {dimension_numbers = #tpu.dot_dimension_numbers<[1], [0], [0], [1], [0, 0, 1, 1], [], []>} : vector<288x64xbf16>, vector<64x64xbf16>, vector<288x64xf32> -> vector<288x64xf32>
    %22 = arith.addf %15, %21 : vector<288x64xf32>
    %c0_20 = arith.constant 0 : index
    %c18 = arith.constant 18 : index
    %c0_21 = arith.constant 0 : index
    %23 = vector.load %arg0[%c0_20, %c18, %c0_21] : memref<2x326x64xf32, #tpu.memory_space<vmem>>, vector<1x288x64xf32>
    %24 = vector.shape_cast %23 : vector<1x288x64xf32> to vector<288x64xf32>
    %25 = arith.truncf %24 : vector<288x64xf32> to vector<288x64xbf16>
    %c3 = arith.constant 3 : index
    %c0_22 = arith.constant 0 : index
    %c0_23 = arith.constant 0 : index
    %26 = vector.load %arg1[%c3, %c0_22, %c0_23] : memref<9x64x64xbf16, #tpu.memory_space<vmem>>, vector<1x64x64xbf16>
    %27 = vector.shape_cast %26 : vector<1x64x64xbf16> to vector<64x64xbf16>
    %cst_24 = arith.constant dense<0.000000e+00> : vector<288x64xf32>
    %28 = tpu.matmul %25, %27, %cst_24 {dimension_numbers = #tpu.dot_dimension_numbers<[1], [0], [0], [1], [0, 0, 1, 1], [], []>} : vector<288x64xbf16>, vector<64x64xbf16>, vector<288x64xf32> -> vector<288x64xf32>
    %29 = arith.addf %22, %28 : vector<288x64xf32>
    %c0_25 = arith.constant 0 : index
    %c19 = arith.constant 19 : index
    %c0_26 = arith.constant 0 : index
    %30 = vector.load %arg0[%c0_25, %c19, %c0_26] : memref<2x326x64xf32, #tpu.memory_space<vmem>>, vector<1x288x64xf32>
    %31 = vector.shape_cast %30 : vector<1x288x64xf32> to vector<288x64xf32>
    %32 = arith.truncf %31 : vector<288x64xf32> to vector<288x64xbf16>
    %c4 = arith.constant 4 : index
    %c0_27 = arith.constant 0 : index
    %c0_28 = arith.constant 0 : index
    %33 = vector.load %arg1[%c4, %c0_27, %c0_28] : memref<9x64x64xbf16, #tpu.memory_space<vmem>>, vector<1x64x64xbf16>
    %34 = vector.shape_cast %33 : vector<1x64x64xbf16> to vector<64x64xbf16>
    %cst_29 = arith.constant dense<0.000000e+00> : vector<288x64xf32>
    %35 = tpu.matmul %32, %34, %cst_29 {dimension_numbers = #tpu.dot_dimension_numbers<[1], [0], [0], [1], [0, 0, 1, 1], [], []>} : vector<288x64xbf16>, vector<64x64xbf16>, vector<288x64xf32> -> vector<288x64xf32>
    %36 = arith.addf %29, %35 : vector<288x64xf32>
    %c0_30 = arith.constant 0 : index
    %c20 = arith.constant 20 : index
    %c0_31 = arith.constant 0 : index
    %37 = vector.load %arg0[%c0_30, %c20, %c0_31] : memref<2x326x64xf32, #tpu.memory_space<vmem>>, vector<1x288x64xf32>
    %38 = vector.shape_cast %37 : vector<1x288x64xf32> to vector<288x64xf32>
    %39 = arith.truncf %38 : vector<288x64xf32> to vector<288x64xbf16>
    %c5 = arith.constant 5 : index
    %c0_32 = arith.constant 0 : index
    %c0_33 = arith.constant 0 : index
    %40 = vector.load %arg1[%c5, %c0_32, %c0_33] : memref<9x64x64xbf16, #tpu.memory_space<vmem>>, vector<1x64x64xbf16>
    %41 = vector.shape_cast %40 : vector<1x64x64xbf16> to vector<64x64xbf16>
    %cst_34 = arith.constant dense<0.000000e+00> : vector<288x64xf32>
    %42 = tpu.matmul %39, %41, %cst_34 {dimension_numbers = #tpu.dot_dimension_numbers<[1], [0], [0], [1], [0, 0, 1, 1], [], []>} : vector<288x64xbf16>, vector<64x64xbf16>, vector<288x64xf32> -> vector<288x64xf32>
    %43 = arith.addf %36, %42 : vector<288x64xf32>
    %c0_35 = arith.constant 0 : index
    %c36 = arith.constant 36 : index
    %c0_36 = arith.constant 0 : index
    %44 = vector.load %arg0[%c0_35, %c36, %c0_36] : memref<2x326x64xf32, #tpu.memory_space<vmem>>, vector<1x288x64xf32>
    %45 = vector.shape_cast %44 : vector<1x288x64xf32> to vector<288x64xf32>
    %46 = arith.truncf %45 : vector<288x64xf32> to vector<288x64xbf16>
    %c6 = arith.constant 6 : index
    %c0_37 = arith.constant 0 : index
    %c0_38 = arith.constant 0 : index
    %47 = vector.load %arg1[%c6, %c0_37, %c0_38] : memref<9x64x64xbf16, #tpu.memory_space<vmem>>, vector<1x64x64xbf16>
    %48 = vector.shape_cast %47 : vector<1x64x64xbf16> to vector<64x64xbf16>
    %cst_39 = arith.constant dense<0.000000e+00> : vector<288x64xf32>
    %49 = tpu.matmul %46, %48, %cst_39 {dimension_numbers = #tpu.dot_dimension_numbers<[1], [0], [0], [1], [0, 0, 1, 1], [], []>} : vector<288x64xbf16>, vector<64x64xbf16>, vector<288x64xf32> -> vector<288x64xf32>
    %50 = arith.addf %43, %49 : vector<288x64xf32>
    %c0_40 = arith.constant 0 : index
    %c37 = arith.constant 37 : index
    %c0_41 = arith.constant 0 : index
    %51 = vector.load %arg0[%c0_40, %c37, %c0_41] : memref<2x326x64xf32, #tpu.memory_space<vmem>>, vector<1x288x64xf32>
    %52 = vector.shape_cast %51 : vector<1x288x64xf32> to vector<288x64xf32>
    %53 = arith.truncf %52 : vector<288x64xf32> to vector<288x64xbf16>
    %c7 = arith.constant 7 : index
    %c0_42 = arith.constant 0 : index
    %c0_43 = arith.constant 0 : index
    %54 = vector.load %arg1[%c7, %c0_42, %c0_43] : memref<9x64x64xbf16, #tpu.memory_space<vmem>>, vector<1x64x64xbf16>
    %55 = vector.shape_cast %54 : vector<1x64x64xbf16> to vector<64x64xbf16>
    %cst_44 = arith.constant dense<0.000000e+00> : vector<288x64xf32>
    %56 = tpu.matmul %53, %55, %cst_44 {dimension_numbers = #tpu.dot_dimension_numbers<[1], [0], [0], [1], [0, 0, 1, 1], [], []>} : vector<288x64xbf16>, vector<64x64xbf16>, vector<288x64xf32> -> vector<288x64xf32>
    %57 = arith.addf %50, %56 : vector<288x64xf32>
    %c0_45 = arith.constant 0 : index
    %c38 = arith.constant 38 : index
    %c0_46 = arith.constant 0 : index
    %58 = vector.load %arg0[%c0_45, %c38, %c0_46] : memref<2x326x64xf32, #tpu.memory_space<vmem>>, vector<1x288x64xf32>
    %59 = vector.shape_cast %58 : vector<1x288x64xf32> to vector<288x64xf32>
    %60 = arith.truncf %59 : vector<288x64xf32> to vector<288x64xbf16>
    %c8 = arith.constant 8 : index
    %c0_47 = arith.constant 0 : index
    %c0_48 = arith.constant 0 : index
    %61 = vector.load %arg1[%c8, %c0_47, %c0_48] : memref<9x64x64xbf16, #tpu.memory_space<vmem>>, vector<1x64x64xbf16>
    %62 = vector.shape_cast %61 : vector<1x64x64xbf16> to vector<64x64xbf16>
    %cst_49 = arith.constant dense<0.000000e+00> : vector<288x64xf32>
    %63 = tpu.matmul %60, %62, %cst_49 {dimension_numbers = #tpu.dot_dimension_numbers<[1], [0], [0], [1], [0, 0, 1, 1], [], []>} : vector<288x64xbf16>, vector<64x64xbf16>, vector<288x64xf32> -> vector<288x64xf32>
    %64 = arith.addf %57, %63 : vector<288x64xf32>
    %c0_50 = arith.constant 0 : index
    %c0_51 = arith.constant 0 : index
    %c0_52 = arith.constant 0 : index
    %65 = vector.load %arg10[%c0_50, %c0_51, %c0_52] : memref<2x288x64xf32, #tpu.memory_space<vmem>>, vector<1x288x64xf32>
    %66 = vector.shape_cast %65 : vector<1x288x64xf32> to vector<288x64xf32>
    %67 = vector.shape_cast %64 : vector<288x64xf32> to vector<1x288x64xf32>
    tpu.vector_store %arg10[%c0_50, %c0_51, %c0_52], %67 {strides = array<i32>} : memref<2x288x64xf32, #tpu.memory_space<vmem>>, vector<1x288x64xf32>,
    %cst_53 = arith.constant 0.000000e+00 : f32
    %68 = vector.broadcast %cst_53 : f32 to vector<288x64xf32>
    %c1_54 = arith.constant 1 : index
    %c0_55 = arith.constant 0 : index
    %c0_56 = arith.constant 0 : index
    %69 = vector.load %arg0[%c1_54, %c0_55, %c0_56] : memref<2x326x64xf32, #tpu.memory_space<vmem>>, vector<1x288x64xf32>
    %70 = vector.shape_cast %69 : vector<1x288x64xf32> to vector<288x64xf32>
    %71 = arith.truncf %70 : vector<288x64xf32> to vector<288x64xbf16>
    %c0_57 = arith.constant 0 : index
    %c0_58 = arith.constant 0 : index
    %c0_59 = arith.constant 0 : index
    %72 = vector.load %arg1[%c0_57, %c0_58, %c0_59] : memref<9x64x64xbf16, #tpu.memory_space<vmem>>, vector<1x64x64xbf16>
    %73 = vector.shape_cast %72 : vector<1x64x64xbf16> to vector<64x64xbf16>
    %cst_60 = arith.constant dense<0.000000e+00> : vector<288x64xf32>
    %74 = tpu.matmul %71, %73, %cst_60 {dimension_numbers = #tpu.dot_dimension_numbers<[1], [0], [0], [1], [0, 0, 1, 1], [], []>} : vector<288x64xbf16>, vector<64x64xbf16>, vector<288x64xf32> -> vector<288x64xf32>
    %75 = arith.addf %68, %74 : vector<288x64xf32>
    %c1_61 = arith.constant 1 : index
    %c1_62 = arith.constant 1 : index
    %c0_63 = arith.constant 0 : index
    %76 = vector.load %arg0[%c1_61, %c1_62, %c0_63] : memref<2x326x64xf32, #tpu.memory_space<vmem>>, vector<1x288x64xf32>
    %77 = vector.shape_cast %76 : vector<1x288x64xf32> to vector<288x64xf32>
    %78 = arith.truncf %77 : vector<288x64xf32> to vector<288x64xbf16>
    %c1_64 = arith.constant 1 : index
    %c0_65 = arith.constant 0 : index
    %c0_66 = arith.constant 0 : index
    %79 = vector.load %arg1[%c1_64, %c0_65, %c0_66] : memref<9x64x64xbf16, #tpu.memory_space<vmem>>, vector<1x64x64xbf16>
    %80 = vector.shape_cast %79 : vector<1x64x64xbf16> to vector<64x64xbf16>
    %cst_67 = arith.constant dense<0.000000e+00> : vector<288x64xf32>
    %81 = tpu.matmul %78, %80, %cst_67 {dimension_numbers = #tpu.dot_dimension_numbers<[1], [0], [0], [1], [0, 0, 1, 1], [], []>} : vector<288x64xbf16>, vector<64x64xbf16>, vector<288x64xf32> -> vector<288x64xf32>
    %82 = arith.addf %75, %81 : vector<288x64xf32>
    %c1_68 = arith.constant 1 : index
    %c2_69 = arith.constant 2 : index
    %c0_70 = arith.constant 0 : index
    %83 = vector.load %arg0[%c1_68, %c2_69, %c0_70] : memref<2x326x64xf32, #tpu.memory_space<vmem>>, vector<1x288x64xf32>
    %84 = vector.shape_cast %83 : vector<1x288x64xf32> to vector<288x64xf32>
    %85 = arith.truncf %84 : vector<288x64xf32> to vector<288x64xbf16>
    %c2_71 = arith.constant 2 : index
    %c0_72 = arith.constant 0 : index
    %c0_73 = arith.constant 0 : index
    %86 = vector.load %arg1[%c2_71, %c0_72, %c0_73] : memref<9x64x64xbf16, #tpu.memory_space<vmem>>, vector<1x64x64xbf16>
    %87 = vector.shape_cast %86 : vector<1x64x64xbf16> to vector<64x64xbf16>
    %cst_74 = arith.constant dense<0.000000e+00> : vector<288x64xf32>
    %88 = tpu.matmul %85, %87, %cst_74 {dimension_numbers = #tpu.dot_dimension_numbers<[1], [0], [0], [1], [0, 0, 1, 1], [], []>} : vector<288x64xbf16>, vector<64x64xbf16>, vector<288x64xf32> -> vector<288x64xf32>
    %89 = arith.addf %82, %88 : vector<288x64xf32>
    %c1_75 = arith.constant 1 : index
    %c18_76 = arith.constant 18 : index
    %c0_77 = arith.constant 0 : index
    %90 = vector.load %arg0[%c1_75, %c18_76, %c0_77] : memref<2x326x64xf32, #tpu.memory_space<vmem>>, vector<1x288x64xf32>
    %91 = vector.shape_cast %90 : vector<1x288x64xf32> to vector<288x64xf32>
    %92 = arith.truncf %91 : vector<288x64xf32> to vector<288x64xbf16>
    %c3_78 = arith.constant 3 : index
    %c0_79 = arith.constant 0 : index
    %c0_80 = arith.constant 0 : index
    %93 = vector.load %arg1[%c3_78, %c0_79, %c0_80] : memref<9x64x64xbf16, #tpu.memory_space<vmem>>, vector<1x64x64xbf16>
    %94 = vector.shape_cast %93 : vector<1x64x64xbf16> to vector<64x64xbf16>
    %cst_81 = arith.constant dense<0.000000e+00> : vector<288x64xf32>
    %95 = tpu.matmul %92, %94, %cst_81 {dimension_numbers = #tpu.dot_dimension_numbers<[1], [0], [0], [1], [0, 0, 1, 1], [], []>} : vector<288x64xbf16>, vector<64x64xbf16>, vector<288x64xf32> -> vector<288x64xf32>
    %96 = arith.addf %89, %95 : vector<288x64xf32>
    %c1_82 = arith.constant 1 : index
    %c19_83 = arith.constant 19 : index
    %c0_84 = arith.constant 0 : index
    %97 = vector.load %arg0[%c1_82, %c19_83, %c0_84] : memref<2x326x64xf32, #tpu.memory_space<vmem>>, vector<1x288x64xf32>
    %98 = vector.shape_cast %97 : vector<1x288x64xf32> to vector<288x64xf32>
    %99 = arith.truncf %98 : vector<288x64xf32> to vector<288x64xbf16>
    %c4_85 = arith.constant 4 : index
    %c0_86 = arith.constant 0 : index
    %c0_87 = arith.constant 0 : index
    %100 = vector.load %arg1[%c4_85, %c0_86, %c0_87] : memref<9x64x64xbf16, #tpu.memory_space<vmem>>, vector<1x64x64xbf16>
    %101 = vector.shape_cast %100 : vector<1x64x64xbf16> to vector<64x64xbf16>
    %cst_88 = arith.constant dense<0.000000e+00> : vector<288x64xf32>
    %102 = tpu.matmul %99, %101, %cst_88 {dimension_numbers = #tpu.dot_dimension_numbers<[1], [0], [0], [1], [0, 0, 1, 1], [], []>} : vector<288x64xbf16>, vector<64x64xbf16>, vector<288x64xf32> -> vector<288x64xf32>
    %103 = arith.addf %96, %102 : vector<288x64xf32>
    %c1_89 = arith.constant 1 : index
    %c20_90 = arith.constant 20 : index
    %c0_91 = arith.constant 0 : index
    %104 = vector.load %arg0[%c1_89, %c20_90, %c0_91] : memref<2x326x64xf32, #tpu.memory_space<vmem>>, vector<1x288x64xf32>
    %105 = vector.shape_cast %104 : vector<1x288x64xf32> to vector<288x64xf32>
    %106 = arith.truncf %105 : vector<288x64xf32> to vector<288x64xbf16>
    %c5_92 = arith.constant 5 : index
    %c0_93 = arith.constant 0 : index
    %c0_94 = arith.constant 0 : index
    %107 = vector.load %arg1[%c5_92, %c0_93, %c0_94] : memref<9x64x64xbf16, #tpu.memory_space<vmem>>, vector<1x64x64xbf16>
    %108 = vector.shape_cast %107 : vector<1x64x64xbf16> to vector<64x64xbf16>
    %cst_95 = arith.constant dense<0.000000e+00> : vector<288x64xf32>
    %109 = tpu.matmul %106, %108, %cst_95 {dimension_numbers = #tpu.dot_dimension_numbers<[1], [0], [0], [1], [0, 0, 1, 1], [], []>} : vector<288x64xbf16>, vector<64x64xbf16>, vector<288x64xf32> -> vector<288x64xf32>
    %110 = arith.addf %103, %109 : vector<288x64xf32>
    %c1_96 = arith.constant 1 : index
    %c36_97 = arith.constant 36 : index
    %c0_98 = arith.constant 0 : index
    %111 = vector.load %arg0[%c1_96, %c36_97, %c0_98] : memref<2x326x64xf32, #tpu.memory_space<vmem>>, vector<1x288x64xf32>
    %112 = vector.shape_cast %111 : vector<1x288x64xf32> to vector<288x64xf32>
    %113 = arith.truncf %112 : vector<288x64xf32> to vector<288x64xbf16>
    %c6_99 = arith.constant 6 : index
    %c0_100 = arith.constant 0 : index
    %c0_101 = arith.constant 0 : index
    %114 = vector.load %arg1[%c6_99, %c0_100, %c0_101] : memref<9x64x64xbf16, #tpu.memory_space<vmem>>, vector<1x64x64xbf16>
    %115 = vector.shape_cast %114 : vector<1x64x64xbf16> to vector<64x64xbf16>
    %cst_102 = arith.constant dense<0.000000e+00> : vector<288x64xf32>
    %116 = tpu.matmul %113, %115, %cst_102 {dimension_numbers = #tpu.dot_dimension_numbers<[1], [0], [0], [1], [0, 0, 1, 1], [], []>} : vector<288x64xbf16>, vector<64x64xbf16>, vector<288x64xf32> -> vector<288x64xf32>
    %117 = arith.addf %110, %116 : vector<288x64xf32>
    %c1_103 = arith.constant 1 : index
    %c37_104 = arith.constant 37 : index
    %c0_105 = arith.constant 0 : index
    %118 = vector.load %arg0[%c1_103, %c37_104, %c0_105] : memref<2x326x64xf32, #tpu.memory_space<vmem>>, vector<1x288x64xf32>
    %119 = vector.shape_cast %118 : vector<1x288x64xf32> to vector<288x64xf32>
    %120 = arith.truncf %119 : vector<288x64xf32> to vector<288x64xbf16>
    %c7_106 = arith.constant 7 : index
    %c0_107 = arith.constant 0 : index
    %c0_108 = arith.constant 0 : index
    %121 = vector.load %arg1[%c7_106, %c0_107, %c0_108] : memref<9x64x64xbf16, #tpu.memory_space<vmem>>, vector<1x64x64xbf16>
    %122 = vector.shape_cast %121 : vector<1x64x64xbf16> to vector<64x64xbf16>
    %cst_109 = arith.constant dense<0.000000e+00> : vector<288x64xf32>
    %123 = tpu.matmul %120, %122, %cst_109 {dimension_numbers = #tpu.dot_dimension_numbers<[1], [0], [0], [1], [0, 0, 1, 1], [], []>} : vector<288x64xbf16>, vector<64x64xbf16>, vector<288x64xf32> -> vector<288x64xf32>
    %124 = arith.addf %117, %123 : vector<288x64xf32>
    %c1_110 = arith.constant 1 : index
    %c38_111 = arith.constant 38 : index
    %c0_112 = arith.constant 0 : index
    %125 = vector.load %arg0[%c1_110, %c38_111, %c0_112] : memref<2x326x64xf32, #tpu.memory_space<vmem>>, vector<1x288x64xf32>
    %126 = vector.shape_cast %125 : vector<1x288x64xf32> to vector<288x64xf32>
    %127 = arith.truncf %126 : vector<288x64xf32> to vector<288x64xbf16>
    %c8_113 = arith.constant 8 : index
    %c0_114 = arith.constant 0 : index
    %c0_115 = arith.constant 0 : index
    %128 = vector.load %arg1[%c8_113, %c0_114, %c0_115] : memref<9x64x64xbf16, #tpu.memory_space<vmem>>, vector<1x64x64xbf16>
    %129 = vector.shape_cast %128 : vector<1x64x64xbf16> to vector<64x64xbf16>
    %cst_116 = arith.constant dense<0.000000e+00> : vector<288x64xf32>
    %130 = tpu.matmul %127, %129, %cst_116 {dimension_numbers = #tpu.dot_dimension_numbers<[1], [0], [0], [1], [0, 0, 1, 1], [], []>} : vector<288x64xbf16>, vector<64x64xbf16>, vector<288x64xf32> -> vector<288x64xf32>
    %131 = arith.addf %124, %130 : vector<288x64xf32>
    %c1_117 = arith.constant 1 : index
    %c0_118 = arith.constant 0 : index
    %c0_119 = arith.constant 0 : index
    %132 = vector.load %arg10[%c1_117, %c0_118, %c0_119] : memref<2x288x64xf32, #tpu.memory_space<vmem>>, vector<1x288x64xf32>
    %133 = vector.shape_cast %132 : vector<1x288x64xf32> to vector<288x64xf32>
    %134 = vector.shape_cast %131 : vector<288x64xf32> to vector<1x288x64xf32>
    tpu.vector_store %arg10[%c1_117, %c0_118, %c0_119], %134 {strides = array<i32>} : memref<2x288x64xf32, #tpu.memory_space<vmem>>, vector<1x288x64xf32>,
    %cst_120 = arith.constant 0.000000e+00 : f32
    %135 = vector.broadcast %cst_120 : f32 to vector<1x64xf32>
    %c0_121 = arith.constant 0 : index
    %c0_122 = arith.constant 0 : index
    %c0_123 = arith.constant 0 : index
    %136 = vector.load %arg10[%c0_121, %c0_122, %c0_123] : memref<2x288x64xf32, #tpu.memory_space<vmem>>, vector<1x288x64xf32>
    %137 = vector.shape_cast %136 : vector<1x288x64xf32> to vector<288x64xf32>
    %138 = vector.broadcast %0 : vector<288x1xf32> to vector<288x64xf32>
    %139 = arith.mulf %137, %138 : vector<288x64xf32>
    %cst_124 = arith.constant dense<0.000000e+00> : vector<64xf32>
    %140 = vector.multi_reduction <add>, %139, %cst_124 [0] : vector<288x64xf32> to vector<64xf32>
    %141 = vector.shape_cast %140 : vector<64xf32> to vector<1x64xf32>
    %142 = arith.addf %135, %141 : vector<1x64xf32>
    %c1_125 = arith.constant 1 : index
    %c0_126 = arith.constant 0 : index
    %c0_127 = arith.constant 0 : index
    %143 = vector.load %arg10[%c1_125, %c0_126, %c0_127] : memref<2x288x64xf32, #tpu.memory_space<vmem>>, vector<1x288x64xf32>
    %144 = vector.shape_cast %143 : vector<1x288x64xf32> to vector<288x64xf32>
    %145 = vector.broadcast %0 : vector<288x1xf32> to vector<288x64xf32>
    %146 = arith.mulf %144, %145 : vector<288x64xf32>
    %cst_128 = arith.constant dense<0.000000e+00> : vector<64xf32>
    %147 = vector.multi_reduction <add>, %146, %cst_128 [0] : vector<288x64xf32> to vector<64xf32>
    %148 = vector.shape_cast %147 : vector<64xf32> to vector<1x64xf32>
    %149 = arith.addf %142, %148 : vector<1x64xf32>
    %cst_129 = arith.constant 5.120000e+02 : f32
    %150 = vector.broadcast %cst_129 : f32 to vector<1x64xf32>
    %151 = arith.divf %149, %150 : vector<1x64xf32>
    %cst_130 = arith.constant 0.000000e+00 : f32
    %152 = vector.broadcast %cst_130 : f32 to vector<1x64xf32>
    %c0_131 = arith.constant 0 : index
    %c0_132 = arith.constant 0 : index
    %c0_133 = arith.constant 0 : index
    %153 = vector.load %arg10[%c0_131, %c0_132, %c0_133] : memref<2x288x64xf32, #tpu.memory_space<vmem>>, vector<1x288x64xf32>
    %154 = vector.shape_cast %153 : vector<1x288x64xf32> to vector<288x64xf32>
    %155 = vector.broadcast %151 : vector<1x64xf32> to vector<288x64xf32>
    %156 = arith.subf %154, %155 : vector<288x64xf32>
    %157 = vector.broadcast %0 : vector<288x1xf32> to vector<288x64xf32>
    %158 = arith.mulf %156, %157 : vector<288x64xf32>
    %159 = arith.mulf %158, %158 : vector<288x64xf32>
    %cst_134 = arith.constant dense<0.000000e+00> : vector<64xf32>
    %160 = vector.multi_reduction <add>, %159, %cst_134 [0] : vector<288x64xf32> to vector<64xf32>
    %161 = vector.shape_cast %160 : vector<64xf32> to vector<1x64xf32>
    %162 = arith.addf %152, %161 : vector<1x64xf32>
    %c1_135 = arith.constant 1 : index
    %c0_136 = arith.constant 0 : index
    %c0_137 = arith.constant 0 : index
    %163 = vector.load %arg10[%c1_135, %c0_136, %c0_137] : memref<2x288x64xf32, #tpu.memory_space<vmem>>, vector<1x288x64xf32>
    %164 = vector.shape_cast %163 : vector<1x288x64xf32> to vector<288x64xf32>
    %165 = vector.broadcast %151 : vector<1x64xf32> to vector<288x64xf32>
    %166 = arith.subf %164, %165 : vector<288x64xf32>
    %167 = vector.broadcast %0 : vector<288x1xf32> to vector<288x64xf32>
    %168 = arith.mulf %166, %167 : vector<288x64xf32>
    %169 = arith.mulf %168, %168 : vector<288x64xf32>
    %cst_138 = arith.constant dense<0.000000e+00> : vector<64xf32>
    %170 = vector.multi_reduction <add>, %169, %cst_138 [0] : vector<288x64xf32> to vector<64xf32>
    %171 = vector.shape_cast %170 : vector<64xf32> to vector<1x64xf32>
    %172 = arith.addf %162, %171 : vector<1x64xf32>
    %cst_139 = arith.constant 5.120000e+02 : f32
    %173 = vector.broadcast %cst_139 : f32 to vector<1x64xf32>
    %174 = arith.divf %172, %173 : vector<1x64xf32>
    %c0_140 = arith.constant 0 : index
    %c0_141 = arith.constant 0 : index
    %175 = vector.load %arg2[%c0_140, %c0_141] : memref<1x64xf32, #tpu.memory_space<vmem>>, vector<1x64xf32>
    %cst_142 = arith.constant 9.99999974E-6 : f32
    %176 = vector.broadcast %cst_142 : f32 to vector<1x64xf32>
    %177 = arith.addf %174, %176 : vector<1x64xf32>
    %178 = math.rsqrt %177 : vector<1x64xf32>
    %179 = arith.mulf %175, %178 : vector<1x64xf32>
    %c0_143 = arith.constant 0 : index
    %c0_144 = arith.constant 0 : index
    %180 = vector.load %arg3[%c0_143, %c0_144] : memref<1x64xf32, #tpu.memory_space<vmem>>, vector<1x64xf32>
    %181 = arith.mulf %151, %179 : vector<1x64xf32>
    %182 = arith.subf %180, %181 : vector<1x64xf32>
    %cst_145 = arith.constant 0.000000e+00 : f32
    %183 = vector.broadcast %cst_145 : f32 to vector<2x326x64xf32>
    %c0_146 = arith.constant 0 : index
    %c0_147 = arith.constant 0 : index
    %c0_148 = arith.constant 0 : index
    %184 = vector.load %arg11[%c0_146, %c0_147, %c0_148] : memref<2x326x64xf32, #tpu.memory_space<vmem>>, vector<2x326x64xf32>
    tpu.vector_store %arg11[%c0_146, %c0_147, %c0_148], %183 {strides = array<i32>} : memref<2x326x64xf32, #tpu.memory_space<vmem>>, vector<2x326x64xf32>,
    %c0_149 = arith.constant 0 : index
    %c0_150 = arith.constant 0 : index
    %c0_151 = arith.constant 0 : index
    %185 = vector.load %arg10[%c0_149, %c0_150, %c0_151] : memref<2x288x64xf32, #tpu.memory_space<vmem>>, vector<1x288x64xf32>
    %186 = vector.shape_cast %185 : vector<1x288x64xf32> to vector<288x64xf32>
    %187 = vector.broadcast %179 : vector<1x64xf32> to vector<288x64xf32>
    %188 = arith.mulf %186, %187 : vector<288x64xf32>
    %189 = vector.broadcast %182 : vector<1x64xf32> to vector<288x64xf32>
    %190 = arith.addf %188, %189 : vector<288x64xf32>
    %cst_152 = arith.constant 0.000000e+00 : f32
    %191 = vector.broadcast %cst_152 : f32 to vector<288x64xf32>
    %192 = arith.maximumf %190, %191 : vector<288x64xf32>
    %193 = vector.broadcast %0 : vector<288x1xf32> to vector<288x64xf32>
    %194 = arith.mulf %192, %193 : vector<288x64xf32>
    %c0_153 = arith.constant 0 : index
    %c19_154 = arith.constant 19 : index
    %c0_155 = arith.constant 0 : index
    %195 = vector.load %arg11[%c0_153, %c19_154, %c0_155] : memref<2x326x64xf32, #tpu.memory_space<vmem>>, vector<1x288x64xf32>
    %196 = vector.shape_cast %195 : vector<1x288x64xf32> to vector<288x64xf32>
    %197 = vector.shape_cast %194 : vector<288x64xf32> to vector<1x288x64xf32>
    tpu.vector_store %arg11[%c0_153, %c19_154, %c0_155], %197 {strides = array<i32>} : memref<2x326x64xf32, #tpu.memory_space<vmem>>, vector<1x288x64xf32>,
    %c1_156 = arith.constant 1 : index
    %c0_157 = arith.constant 0 : index
    %c0_158 = arith.constant 0 : index
    %198 = vector.load %arg10[%c1_156, %c0_157, %c0_158] : memref<2x288x64xf32, #tpu.memory_space<vmem>>, vector<1x288x64xf32>
    %199 = vector.shape_cast %198 : vector<1x288x64xf32> to vector<288x64xf32>
    %200 = vector.broadcast %179 : vector<1x64xf32> to vector<288x64xf32>
    %201 = arith.mulf %199, %200 : vector<288x64xf32>
    %202 = vector.broadcast %182 : vector<1x64xf32> to vector<288x64xf32>
    %203 = arith.addf %201, %202 : vector<288x64xf32>
    %cst_159 = arith.constant 0.000000e+00 : f32
    %204 = vector.broadcast %cst_159 : f32 to vector<288x64xf32>
    %205 = arith.maximumf %203, %204 : vector<288x64xf32>
    %206 = vector.broadcast %0 : vector<288x1xf32> to vector<288x64xf32>
    %207 = arith.mulf %205, %206 : vector<288x64xf32>
    %c1_160 = arith.constant 1 : index
    %c19_161 = arith.constant 19 : index
    %c0_162 = arith.constant 0 : index
    %208 = vector.load %arg11[%c1_160, %c19_161, %c0_162] : memref<2x326x64xf32, #tpu.memory_space<vmem>>, vector<1x288x64xf32>
    %209 = vector.shape_cast %208 : vector<1x288x64xf32> to vector<288x64xf32>
    %210 = vector.shape_cast %207 : vector<288x64xf32> to vector<1x288x64xf32>
    tpu.vector_store %arg11[%c1_160, %c19_161, %c0_162], %210 {strides = array<i32>} : memref<2x326x64xf32, #tpu.memory_space<vmem>>, vector<1x288x64xf32>,
    %cst_163 = arith.constant 0.000000e+00 : f32
    %211 = vector.broadcast %cst_163 : f32 to vector<288x64xf32>
    %c0_164 = arith.constant 0 : index
    %c0_165 = arith.constant 0 : index
    %c0_166 = arith.constant 0 : index
    %212 = vector.load %arg11[%c0_164, %c0_165, %c0_166] : memref<2x326x64xf32, #tpu.memory_space<vmem>>, vector<1x288x64xf32>
    %213 = vector.shape_cast %212 : vector<1x288x64xf32> to vector<288x64xf32>
    %214 = arith.truncf %213 : vector<288x64xf32> to vector<288x64xbf16>
    %c0_167 = arith.constant 0 : index
    %c0_168 = arith.constant 0 : index
    %c0_169 = arith.constant 0 : index
    %215 = vector.load %arg4[%c0_167, %c0_168, %c0_169] : memref<9x64x64xbf16, #tpu.memory_space<vmem>>, vector<1x64x64xbf16>
    %216 = vector.shape_cast %215 : vector<1x64x64xbf16> to vector<64x64xbf16>
    %cst_170 = arith.constant dense<0.000000e+00> : vector<288x64xf32>
    %217 = tpu.matmul %214, %216, %cst_170 {dimension_numbers = #tpu.dot_dimension_numbers<[1], [0], [0], [1], [0, 0, 1, 1], [], []>} : vector<288x64xbf16>, vector<64x64xbf16>, vector<288x64xf32> -> vector<288x64xf32>
    %218 = arith.addf %211, %217 : vector<288x64xf32>
    %c0_171 = arith.constant 0 : index
    %c1_172 = arith.constant 1 : index
    %c0_173 = arith.constant 0 : index
    %219 = vector.load %arg11[%c0_171, %c1_172, %c0_173] : memref<2x326x64xf32, #tpu.memory_space<vmem>>, vector<1x288x64xf32>
    %220 = vector.shape_cast %219 : vector<1x288x64xf32> to vector<288x64xf32>
    %221 = arith.truncf %220 : vector<288x64xf32> to vector<288x64xbf16>
    %c1_174 = arith.constant 1 : index
    %c0_175 = arith.constant 0 : index
    %c0_176 = arith.constant 0 : index
    %222 = vector.load %arg4[%c1_174, %c0_175, %c0_176] : memref<9x64x64xbf16, #tpu.memory_space<vmem>>, vector<1x64x64xbf16>
    %223 = vector.shape_cast %222 : vector<1x64x64xbf16> to vector<64x64xbf16>
    %cst_177 = arith.constant dense<0.000000e+00> : vector<288x64xf32>
    %224 = tpu.matmul %221, %223, %cst_177 {dimension_numbers = #tpu.dot_dimension_numbers<[1], [0], [0], [1], [0, 0, 1, 1], [], []>} : vector<288x64xbf16>, vector<64x64xbf16>, vector<288x64xf32> -> vector<288x64xf32>
    %225 = arith.addf %218, %224 : vector<288x64xf32>
    %c0_178 = arith.constant 0 : index
    %c2_179 = arith.constant 2 : index
    %c0_180 = arith.constant 0 : index
    %226 = vector.load %arg11[%c0_178, %c2_179, %c0_180] : memref<2x326x64xf32, #tpu.memory_space<vmem>>, vector<1x288x64xf32>
    %227 = vector.shape_cast %226 : vector<1x288x64xf32> to vector<288x64xf32>
    %228 = arith.truncf %227 : vector<288x64xf32> to vector<288x64xbf16>
    %c2_181 = arith.constant 2 : index
    %c0_182 = arith.constant 0 : index
    %c0_183 = arith.constant 0 : index
    %229 = vector.load %arg4[%c2_181, %c0_182, %c0_183] : memref<9x64x64xbf16, #tpu.memory_space<vmem>>, vector<1x64x64xbf16>
    %230 = vector.shape_cast %229 : vector<1x64x64xbf16> to vector<64x64xbf16>
    %cst_184 = arith.constant dense<0.000000e+00> : vector<288x64xf32>
    %231 = tpu.matmul %228, %230, %cst_184 {dimension_numbers = #tpu.dot_dimension_numbers<[1], [0], [0], [1], [0, 0, 1, 1], [], []>} : vector<288x64xbf16>, vector<64x64xbf16>, vector<288x64xf32> -> vector<288x64xf32>
    %232 = arith.addf %225, %231 : vector<288x64xf32>
    %c0_185 = arith.constant 0 : index
    %c18_186 = arith.constant 18 : index
    %c0_187 = arith.constant 0 : index
    %233 = vector.load %arg11[%c0_185, %c18_186, %c0_187] : memref<2x326x64xf32, #tpu.memory_space<vmem>>, vector<1x288x64xf32>
    %234 = vector.shape_cast %233 : vector<1x288x64xf32> to vector<288x64xf32>
    %235 = arith.truncf %234 : vector<288x64xf32> to vector<288x64xbf16>
    %c3_188 = arith.constant 3 : index
    %c0_189 = arith.constant 0 : index
    %c0_190 = arith.constant 0 : index
    %236 = vector.load %arg4[%c3_188, %c0_189, %c0_190] : memref<9x64x64xbf16, #tpu.memory_space<vmem>>, vector<1x64x64xbf16>
    %237 = vector.shape_cast %236 : vector<1x64x64xbf16> to vector<64x64xbf16>
    %cst_191 = arith.constant dense<0.000000e+00> : vector<288x64xf32>
    %238 = tpu.matmul %235, %237, %cst_191 {dimension_numbers = #tpu.dot_dimension_numbers<[1], [0], [0], [1], [0, 0, 1, 1], [], []>} : vector<288x64xbf16>, vector<64x64xbf16>, vector<288x64xf32> -> vector<288x64xf32>
    %239 = arith.addf %232, %238 : vector<288x64xf32>
    %c0_192 = arith.constant 0 : index
    %c19_193 = arith.constant 19 : index
    %c0_194 = arith.constant 0 : index
    %240 = vector.load %arg11[%c0_192, %c19_193, %c0_194] : memref<2x326x64xf32, #tpu.memory_space<vmem>>, vector<1x288x64xf32>
    %241 = vector.shape_cast %240 : vector<1x288x64xf32> to vector<288x64xf32>
    %242 = arith.truncf %241 : vector<288x64xf32> to vector<288x64xbf16>
    %c4_195 = arith.constant 4 : index
    %c0_196 = arith.constant 0 : index
    %c0_197 = arith.constant 0 : index
    %243 = vector.load %arg4[%c4_195, %c0_196, %c0_197] : memref<9x64x64xbf16, #tpu.memory_space<vmem>>, vector<1x64x64xbf16>
    %244 = vector.shape_cast %243 : vector<1x64x64xbf16> to vector<64x64xbf16>
    %cst_198 = arith.constant dense<0.000000e+00> : vector<288x64xf32>
    %245 = tpu.matmul %242, %244, %cst_198 {dimension_numbers = #tpu.dot_dimension_numbers<[1], [0], [0], [1], [0, 0, 1, 1], [], []>} : vector<288x64xbf16>, vector<64x64xbf16>, vector<288x64xf32> -> vector<288x64xf32>
    %246 = arith.addf %239, %245 : vector<288x64xf32>
    %c0_199 = arith.constant 0 : index
    %c20_200 = arith.constant 20 : index
    %c0_201 = arith.constant 0 : index
    %247 = vector.load %arg11[%c0_199, %c20_200, %c0_201] : memref<2x326x64xf32, #tpu.memory_space<vmem>>, vector<1x288x64xf32>
    %248 = vector.shape_cast %247 : vector<1x288x64xf32> to vector<288x64xf32>
    %249 = arith.truncf %248 : vector<288x64xf32> to vector<288x64xbf16>
    %c5_202 = arith.constant 5 : index
    %c0_203 = arith.constant 0 : index
    %c0_204 = arith.constant 0 : index
    %250 = vector.load %arg4[%c5_202, %c0_203, %c0_204] : memref<9x64x64xbf16, #tpu.memory_space<vmem>>, vector<1x64x64xbf16>
    %251 = vector.shape_cast %250 : vector<1x64x64xbf16> to vector<64x64xbf16>
    %cst_205 = arith.constant dense<0.000000e+00> : vector<288x64xf32>
    %252 = tpu.matmul %249, %251, %cst_205 {dimension_numbers = #tpu.dot_dimension_numbers<[1], [0], [0], [1], [0, 0, 1, 1], [], []>} : vector<288x64xbf16>, vector<64x64xbf16>, vector<288x64xf32> -> vector<288x64xf32>
    %253 = arith.addf %246, %252 : vector<288x64xf32>
    %c0_206 = arith.constant 0 : index
    %c36_207 = arith.constant 36 : index
    %c0_208 = arith.constant 0 : index
    %254 = vector.load %arg11[%c0_206, %c36_207, %c0_208] : memref<2x326x64xf32, #tpu.memory_space<vmem>>, vector<1x288x64xf32>
    %255 = vector.shape_cast %254 : vector<1x288x64xf32> to vector<288x64xf32>
    %256 = arith.truncf %255 : vector<288x64xf32> to vector<288x64xbf16>
    %c6_209 = arith.constant 6 : index
    %c0_210 = arith.constant 0 : index
    %c0_211 = arith.constant 0 : index
    %257 = vector.load %arg4[%c6_209, %c0_210, %c0_211] : memref<9x64x64xbf16, #tpu.memory_space<vmem>>, vector<1x64x64xbf16>
    %258 = vector.shape_cast %257 : vector<1x64x64xbf16> to vector<64x64xbf16>
    %cst_212 = arith.constant dense<0.000000e+00> : vector<288x64xf32>
    %259 = tpu.matmul %256, %258, %cst_212 {dimension_numbers = #tpu.dot_dimension_numbers<[1], [0], [0], [1], [0, 0, 1, 1], [], []>} : vector<288x64xbf16>, vector<64x64xbf16>, vector<288x64xf32> -> vector<288x64xf32>
    %260 = arith.addf %253, %259 : vector<288x64xf32>
    %c0_213 = arith.constant 0 : index
    %c37_214 = arith.constant 37 : index
    %c0_215 = arith.constant 0 : index
    %261 = vector.load %arg11[%c0_213, %c37_214, %c0_215] : memref<2x326x64xf32, #tpu.memory_space<vmem>>, vector<1x288x64xf32>
    %262 = vector.shape_cast %261 : vector<1x288x64xf32> to vector<288x64xf32>
    %263 = arith.truncf %262 : vector<288x64xf32> to vector<288x64xbf16>
    %c7_216 = arith.constant 7 : index
    %c0_217 = arith.constant 0 : index
    %c0_218 = arith.constant 0 : index
    %264 = vector.load %arg4[%c7_216, %c0_217, %c0_218] : memref<9x64x64xbf16, #tpu.memory_space<vmem>>, vector<1x64x64xbf16>
    %265 = vector.shape_cast %264 : vector<1x64x64xbf16> to vector<64x64xbf16>
    %cst_219 = arith.constant dense<0.000000e+00> : vector<288x64xf32>
    %266 = tpu.matmul %263, %265, %cst_219 {dimension_numbers = #tpu.dot_dimension_numbers<[1], [0], [0], [1], [0, 0, 1, 1], [], []>} : vector<288x64xbf16>, vector<64x64xbf16>, vector<288x64xf32> -> vector<288x64xf32>
    %267 = arith.addf %260, %266 : vector<288x64xf32>
    %c0_220 = arith.constant 0 : index
    %c38_221 = arith.constant 38 : index
    %c0_222 = arith.constant 0 : index
    %268 = vector.load %arg11[%c0_220, %c38_221, %c0_222] : memref<2x326x64xf32, #tpu.memory_space<vmem>>, vector<1x288x64xf32>
    %269 = vector.shape_cast %268 : vector<1x288x64xf32> to vector<288x64xf32>
    %270 = arith.truncf %269 : vector<288x64xf32> to vector<288x64xbf16>
    %c8_223 = arith.constant 8 : index
    %c0_224 = arith.constant 0 : index
    %c0_225 = arith.constant 0 : index
    %271 = vector.load %arg4[%c8_223, %c0_224, %c0_225] : memref<9x64x64xbf16, #tpu.memory_space<vmem>>, vector<1x64x64xbf16>
    %272 = vector.shape_cast %271 : vector<1x64x64xbf16> to vector<64x64xbf16>
    %cst_226 = arith.constant dense<0.000000e+00> : vector<288x64xf32>
    %273 = tpu.matmul %270, %272, %cst_226 {dimension_numbers = #tpu.dot_dimension_numbers<[1], [0], [0], [1], [0, 0, 1, 1], [], []>} : vector<288x64xbf16>, vector<64x64xbf16>, vector<288x64xf32> -> vector<288x64xf32>
    %274 = arith.addf %267, %273 : vector<288x64xf32>
    %c0_227 = arith.constant 0 : index
    %c0_228 = arith.constant 0 : index
    %c0_229 = arith.constant 0 : index
    %275 = vector.load %arg12[%c0_227, %c0_228, %c0_229] : memref<2x288x64xf32, #tpu.memory_space<vmem>>, vector<1x288x64xf32>
    %276 = vector.shape_cast %275 : vector<1x288x64xf32> to vector<288x64xf32>
    %277 = vector.shape_cast %274 : vector<288x64xf32> to vector<1x288x64xf32>
    tpu.vector_store %arg12[%c0_227, %c0_228, %c0_229], %277 {strides = array<i32>} : memref<2x288x64xf32, #tpu.memory_space<vmem>>, vector<1x288x64xf32>,
    %cst_230 = arith.constant 0.000000e+00 : f32
    %278 = vector.broadcast %cst_230 : f32 to vector<288x64xf32>
    %c1_231 = arith.constant 1 : index
    %c0_232 = arith.constant 0 : index
    %c0_233 = arith.constant 0 : index
    %279 = vector.load %arg11[%c1_231, %c0_232, %c0_233] : memref<2x326x64xf32, #tpu.memory_space<vmem>>, vector<1x288x64xf32>
    %280 = vector.shape_cast %279 : vector<1x288x64xf32> to vector<288x64xf32>
    %281 = arith.truncf %280 : vector<288x64xf32> to vector<288x64xbf16>
    %c0_234 = arith.constant 0 : index
    %c0_235 = arith.constant 0 : index
    %c0_236 = arith.constant 0 : index
    %282 = vector.load %arg4[%c0_234, %c0_235, %c0_236] : memref<9x64x64xbf16, #tpu.memory_space<vmem>>, vector<1x64x64xbf16>
    %283 = vector.shape_cast %282 : vector<1x64x64xbf16> to vector<64x64xbf16>
    %cst_237 = arith.constant dense<0.000000e+00> : vector<288x64xf32>
    %284 = tpu.matmul %281, %283, %cst_237 {dimension_numbers = #tpu.dot_dimension_numbers<[1], [0], [0], [1], [0, 0, 1, 1], [], []>} : vector<288x64xbf16>, vector<64x64xbf16>, vector<288x64xf32> -> vector<288x64xf32>
    %285 = arith.addf %278, %284 : vector<288x64xf32>
    %c1_238 = arith.constant 1 : index
    %c1_239 = arith.constant 1 : index
    %c0_240 = arith.constant 0 : index
    %286 = vector.load %arg11[%c1_238, %c1_239, %c0_240] : memref<2x326x64xf32, #tpu.memory_space<vmem>>, vector<1x288x64xf32>
    %287 = vector.shape_cast %286 : vector<1x288x64xf32> to vector<288x64xf32>
    %288 = arith.truncf %287 : vector<288x64xf32> to vector<288x64xbf16>
    %c1_241 = arith.constant 1 : index
    %c0_242 = arith.constant 0 : index
    %c0_243 = arith.constant 0 : index
    %289 = vector.load %arg4[%c1_241, %c0_242, %c0_243] : memref<9x64x64xbf16, #tpu.memory_space<vmem>>, vector<1x64x64xbf16>
    %290 = vector.shape_cast %289 : vector<1x64x64xbf16> to vector<64x64xbf16>
    %cst_244 = arith.constant dense<0.000000e+00> : vector<288x64xf32>
    %291 = tpu.matmul %288, %290, %cst_244 {dimension_numbers = #tpu.dot_dimension_numbers<[1], [0], [0], [1], [0, 0, 1, 1], [], []>} : vector<288x64xbf16>, vector<64x64xbf16>, vector<288x64xf32> -> vector<288x64xf32>
    %292 = arith.addf %285, %291 : vector<288x64xf32>
    %c1_245 = arith.constant 1 : index
    %c2_246 = arith.constant 2 : index
    %c0_247 = arith.constant 0 : index
    %293 = vector.load %arg11[%c1_245, %c2_246, %c0_247] : memref<2x326x64xf32, #tpu.memory_space<vmem>>, vector<1x288x64xf32>
    %294 = vector.shape_cast %293 : vector<1x288x64xf32> to vector<288x64xf32>
    %295 = arith.truncf %294 : vector<288x64xf32> to vector<288x64xbf16>
    %c2_248 = arith.constant 2 : index
    %c0_249 = arith.constant 0 : index
    %c0_250 = arith.constant 0 : index
    %296 = vector.load %arg4[%c2_248, %c0_249, %c0_250] : memref<9x64x64xbf16, #tpu.memory_space<vmem>>, vector<1x64x64xbf16>
    %297 = vector.shape_cast %296 : vector<1x64x64xbf16> to vector<64x64xbf16>
    %cst_251 = arith.constant dense<0.000000e+00> : vector<288x64xf32>
    %298 = tpu.matmul %295, %297, %cst_251 {dimension_numbers = #tpu.dot_dimension_numbers<[1], [0], [0], [1], [0, 0, 1, 1], [], []>} : vector<288x64xbf16>, vector<64x64xbf16>, vector<288x64xf32> -> vector<288x64xf32>
    %299 = arith.addf %292, %298 : vector<288x64xf32>
    %c1_252 = arith.constant 1 : index
    %c18_253 = arith.constant 18 : index
    %c0_254 = arith.constant 0 : index
    %300 = vector.load %arg11[%c1_252, %c18_253, %c0_254] : memref<2x326x64xf32, #tpu.memory_space<vmem>>, vector<1x288x64xf32>
    %301 = vector.shape_cast %300 : vector<1x288x64xf32> to vector<288x64xf32>
    %302 = arith.truncf %301 : vector<288x64xf32> to vector<288x64xbf16>
    %c3_255 = arith.constant 3 : index
    %c0_256 = arith.constant 0 : index
    %c0_257 = arith.constant 0 : index
    %303 = vector.load %arg4[%c3_255, %c0_256, %c0_257] : memref<9x64x64xbf16, #tpu.memory_space<vmem>>, vector<1x64x64xbf16>
    %304 = vector.shape_cast %303 : vector<1x64x64xbf16> to vector<64x64xbf16>
    %cst_258 = arith.constant dense<0.000000e+00> : vector<288x64xf32>
    %305 = tpu.matmul %302, %304, %cst_258 {dimension_numbers = #tpu.dot_dimension_numbers<[1], [0], [0], [1], [0, 0, 1, 1], [], []>} : vector<288x64xbf16>, vector<64x64xbf16>, vector<288x64xf32> -> vector<288x64xf32>
    %306 = arith.addf %299, %305 : vector<288x64xf32>
    %c1_259 = arith.constant 1 : index
    %c19_260 = arith.constant 19 : index
    %c0_261 = arith.constant 0 : index
    %307 = vector.load %arg11[%c1_259, %c19_260, %c0_261] : memref<2x326x64xf32, #tpu.memory_space<vmem>>, vector<1x288x64xf32>
    %308 = vector.shape_cast %307 : vector<1x288x64xf32> to vector<288x64xf32>
    %309 = arith.truncf %308 : vector<288x64xf32> to vector<288x64xbf16>
    %c4_262 = arith.constant 4 : index
    %c0_263 = arith.constant 0 : index
    %c0_264 = arith.constant 0 : index
    %310 = vector.load %arg4[%c4_262, %c0_263, %c0_264] : memref<9x64x64xbf16, #tpu.memory_space<vmem>>, vector<1x64x64xbf16>
    %311 = vector.shape_cast %310 : vector<1x64x64xbf16> to vector<64x64xbf16>
    %cst_265 = arith.constant dense<0.000000e+00> : vector<288x64xf32>
    %312 = tpu.matmul %309, %311, %cst_265 {dimension_numbers = #tpu.dot_dimension_numbers<[1], [0], [0], [1], [0, 0, 1, 1], [], []>} : vector<288x64xbf16>, vector<64x64xbf16>, vector<288x64xf32> -> vector<288x64xf32>
    %313 = arith.addf %306, %312 : vector<288x64xf32>
    %c1_266 = arith.constant 1 : index
    %c20_267 = arith.constant 20 : index
    %c0_268 = arith.constant 0 : index
    %314 = vector.load %arg11[%c1_266, %c20_267, %c0_268] : memref<2x326x64xf32, #tpu.memory_space<vmem>>, vector<1x288x64xf32>
    %315 = vector.shape_cast %314 : vector<1x288x64xf32> to vector<288x64xf32>
    %316 = arith.truncf %315 : vector<288x64xf32> to vector<288x64xbf16>
    %c5_269 = arith.constant 5 : index
    %c0_270 = arith.constant 0 : index
    %c0_271 = arith.constant 0 : index
    %317 = vector.load %arg4[%c5_269, %c0_270, %c0_271] : memref<9x64x64xbf16, #tpu.memory_space<vmem>>, vector<1x64x64xbf16>
    %318 = vector.shape_cast %317 : vector<1x64x64xbf16> to vector<64x64xbf16>
    %cst_272 = arith.constant dense<0.000000e+00> : vector<288x64xf32>
    %319 = tpu.matmul %316, %318, %cst_272 {dimension_numbers = #tpu.dot_dimension_numbers<[1], [0], [0], [1], [0, 0, 1, 1], [], []>} : vector<288x64xbf16>, vector<64x64xbf16>, vector<288x64xf32> -> vector<288x64xf32>
    %320 = arith.addf %313, %319 : vector<288x64xf32>
    %c1_273 = arith.constant 1 : index
    %c36_274 = arith.constant 36 : index
    %c0_275 = arith.constant 0 : index
    %321 = vector.load %arg11[%c1_273, %c36_274, %c0_275] : memref<2x326x64xf32, #tpu.memory_space<vmem>>, vector<1x288x64xf32>
    %322 = vector.shape_cast %321 : vector<1x288x64xf32> to vector<288x64xf32>
    %323 = arith.truncf %322 : vector<288x64xf32> to vector<288x64xbf16>
    %c6_276 = arith.constant 6 : index
    %c0_277 = arith.constant 0 : index
    %c0_278 = arith.constant 0 : index
    %324 = vector.load %arg4[%c6_276, %c0_277, %c0_278] : memref<9x64x64xbf16, #tpu.memory_space<vmem>>, vector<1x64x64xbf16>
    %325 = vector.shape_cast %324 : vector<1x64x64xbf16> to vector<64x64xbf16>
    %cst_279 = arith.constant dense<0.000000e+00> : vector<288x64xf32>
    %326 = tpu.matmul %323, %325, %cst_279 {dimension_numbers = #tpu.dot_dimension_numbers<[1], [0], [0], [1], [0, 0, 1, 1], [], []>} : vector<288x64xbf16>, vector<64x64xbf16>, vector<288x64xf32> -> vector<288x64xf32>
    %327 = arith.addf %320, %326 : vector<288x64xf32>
    %c1_280 = arith.constant 1 : index
    %c37_281 = arith.constant 37 : index
    %c0_282 = arith.constant 0 : index
    %328 = vector.load %arg11[%c1_280, %c37_281, %c0_282] : memref<2x326x64xf32, #tpu.memory_space<vmem>>, vector<1x288x64xf32>
    %329 = vector.shape_cast %328 : vector<1x288x64xf32> to vector<288x64xf32>
    %330 = arith.truncf %329 : vector<288x64xf32> to vector<288x64xbf16>
    %c7_283 = arith.constant 7 : index
    %c0_284 = arith.constant 0 : index
    %c0_285 = arith.constant 0 : index
    %331 = vector.load %arg4[%c7_283, %c0_284, %c0_285] : memref<9x64x64xbf16, #tpu.memory_space<vmem>>, vector<1x64x64xbf16>
    %332 = vector.shape_cast %331 : vector<1x64x64xbf16> to vector<64x64xbf16>
    %cst_286 = arith.constant dense<0.000000e+00> : vector<288x64xf32>
    %333 = tpu.matmul %330, %332, %cst_286 {dimension_numbers = #tpu.dot_dimension_numbers<[1], [0], [0], [1], [0, 0, 1, 1], [], []>} : vector<288x64xbf16>, vector<64x64xbf16>, vector<288x64xf32> -> vector<288x64xf32>
    %334 = arith.addf %327, %333 : vector<288x64xf32>
    %c1_287 = arith.constant 1 : index
    %c38_288 = arith.constant 38 : index
    %c0_289 = arith.constant 0 : index
    %335 = vector.load %arg11[%c1_287, %c38_288, %c0_289] : memref<2x326x64xf32, #tpu.memory_space<vmem>>, vector<1x288x64xf32>
    %336 = vector.shape_cast %335 : vector<1x288x64xf32> to vector<288x64xf32>
    %337 = arith.truncf %336 : vector<288x64xf32> to vector<288x64xbf16>
    %c8_290 = arith.constant 8 : index
    %c0_291 = arith.constant 0 : index
    %c0_292 = arith.constant 0 : index
    %338 = vector.load %arg4[%c8_290, %c0_291, %c0_292] : memref<9x64x64xbf16, #tpu.memory_space<vmem>>, vector<1x64x64xbf16>
    %339 = vector.shape_cast %338 : vector<1x64x64xbf16> to vector<64x64xbf16>
    %cst_293 = arith.constant dense<0.000000e+00> : vector<288x64xf32>
    %340 = tpu.matmul %337, %339, %cst_293 {dimension_numbers = #tpu.dot_dimension_numbers<[1], [0], [0], [1], [0, 0, 1, 1], [], []>} : vector<288x64xbf16>, vector<64x64xbf16>, vector<288x64xf32> -> vector<288x64xf32>
    %341 = arith.addf %334, %340 : vector<288x64xf32>
    %c1_294 = arith.constant 1 : index
    %c0_295 = arith.constant 0 : index
    %c0_296 = arith.constant 0 : index
    %342 = vector.load %arg12[%c1_294, %c0_295, %c0_296] : memref<2x288x64xf32, #tpu.memory_space<vmem>>, vector<1x288x64xf32>
    %343 = vector.shape_cast %342 : vector<1x288x64xf32> to vector<288x64xf32>
    %344 = vector.shape_cast %341 : vector<288x64xf32> to vector<1x288x64xf32>
    tpu.vector_store %arg12[%c1_294, %c0_295, %c0_296], %344 {strides = array<i32>} : memref<2x288x64xf32, #tpu.memory_space<vmem>>, vector<1x288x64xf32>,
    %cst_297 = arith.constant 0.000000e+00 : f32
    %345 = vector.broadcast %cst_297 : f32 to vector<1x64xf32>
    %c0_298 = arith.constant 0 : index
    %c0_299 = arith.constant 0 : index
    %c0_300 = arith.constant 0 : index
    %346 = vector.load %arg12[%c0_298, %c0_299, %c0_300] : memref<2x288x64xf32, #tpu.memory_space<vmem>>, vector<1x288x64xf32>
    %347 = vector.shape_cast %346 : vector<1x288x64xf32> to vector<288x64xf32>
    %348 = vector.broadcast %0 : vector<288x1xf32> to vector<288x64xf32>
    %349 = arith.mulf %347, %348 : vector<288x64xf32>
    %cst_301 = arith.constant dense<0.000000e+00> : vector<64xf32>
    %350 = vector.multi_reduction <add>, %349, %cst_301 [0] : vector<288x64xf32> to vector<64xf32>
    %351 = vector.shape_cast %350 : vector<64xf32> to vector<1x64xf32>
    %352 = arith.addf %345, %351 : vector<1x64xf32>
    %c1_302 = arith.constant 1 : index
    %c0_303 = arith.constant 0 : index
    %c0_304 = arith.constant 0 : index
    %353 = vector.load %arg12[%c1_302, %c0_303, %c0_304] : memref<2x288x64xf32, #tpu.memory_space<vmem>>, vector<1x288x64xf32>
    %354 = vector.shape_cast %353 : vector<1x288x64xf32> to vector<288x64xf32>
    %355 = vector.broadcast %0 : vector<288x1xf32> to vector<288x64xf32>
    %356 = arith.mulf %354, %355 : vector<288x64xf32>
    %cst_305 = arith.constant dense<0.000000e+00> : vector<64xf32>
    %357 = vector.multi_reduction <add>, %356, %cst_305 [0] : vector<288x64xf32> to vector<64xf32>
    %358 = vector.shape_cast %357 : vector<64xf32> to vector<1x64xf32>
    %359 = arith.addf %352, %358 : vector<1x64xf32>
    %cst_306 = arith.constant 5.120000e+02 : f32
    %360 = vector.broadcast %cst_306 : f32 to vector<1x64xf32>
    %361 = arith.divf %359, %360 : vector<1x64xf32>
    %cst_307 = arith.constant 0.000000e+00 : f32
    %362 = vector.broadcast %cst_307 : f32 to vector<1x64xf32>
    %c0_308 = arith.constant 0 : index
    %c0_309 = arith.constant 0 : index
    %c0_310 = arith.constant 0 : index
    %363 = vector.load %arg12[%c0_308, %c0_309, %c0_310] : memref<2x288x64xf32, #tpu.memory_space<vmem>>, vector<1x288x64xf32>
    %364 = vector.shape_cast %363 : vector<1x288x64xf32> to vector<288x64xf32>
    %365 = vector.broadcast %361 : vector<1x64xf32> to vector<288x64xf32>
    %366 = arith.subf %364, %365 : vector<288x64xf32>
    %367 = vector.broadcast %0 : vector<288x1xf32> to vector<288x64xf32>
    %368 = arith.mulf %366, %367 : vector<288x64xf32>
    %369 = arith.mulf %368, %368 : vector<288x64xf32>
    %cst_311 = arith.constant dense<0.000000e+00> : vector<64xf32>
    %370 = vector.multi_reduction <add>, %369, %cst_311 [0] : vector<288x64xf32> to vector<64xf32>
    %371 = vector.shape_cast %370 : vector<64xf32> to vector<1x64xf32>
    %372 = arith.addf %362, %371 : vector<1x64xf32>
    %c1_312 = arith.constant 1 : index
    %c0_313 = arith.constant 0 : index
    %c0_314 = arith.constant 0 : index
    %373 = vector.load %arg12[%c1_312, %c0_313, %c0_314] : memref<2x288x64xf32, #tpu.memory_space<vmem>>, vector<1x288x64xf32>
    %374 = vector.shape_cast %373 : vector<1x288x64xf32> to vector<288x64xf32>
    %375 = vector.broadcast %361 : vector<1x64xf32> to vector<288x64xf32>
    %376 = arith.subf %374, %375 : vector<288x64xf32>
    %377 = vector.broadcast %0 : vector<288x1xf32> to vector<288x64xf32>
    %378 = arith.mulf %376, %377 : vector<288x64xf32>
    %379 = arith.mulf %378, %378 : vector<288x64xf32>
    %cst_315 = arith.constant dense<0.000000e+00> : vector<64xf32>
    %380 = vector.multi_reduction <add>, %379, %cst_315 [0] : vector<288x64xf32> to vector<64xf32>
    %381 = vector.shape_cast %380 : vector<64xf32> to vector<1x64xf32>
    %382 = arith.addf %372, %381 : vector<1x64xf32>
    %cst_316 = arith.constant 5.120000e+02 : f32
    %383 = vector.broadcast %cst_316 : f32 to vector<1x64xf32>
    %384 = arith.divf %382, %383 : vector<1x64xf32>
    %c0_317 = arith.constant 0 : index
    %c0_318 = arith.constant 0 : index
    %385 = vector.load %arg5[%c0_317, %c0_318] : memref<1x64xf32, #tpu.memory_space<vmem>>, vector<1x64xf32>
    %cst_319 = arith.constant 9.99999974E-6 : f32
    %386 = vector.broadcast %cst_319 : f32 to vector<1x64xf32>
    %387 = arith.addf %384, %386 : vector<1x64xf32>
    %388 = math.rsqrt %387 : vector<1x64xf32>
    %389 = arith.mulf %385, %388 : vector<1x64xf32>
    %c0_320 = arith.constant 0 : index
    %c0_321 = arith.constant 0 : index
    %390 = vector.load %arg6[%c0_320, %c0_321] : memref<1x64xf32, #tpu.memory_space<vmem>>, vector<1x64xf32>
    %391 = arith.mulf %361, %389 : vector<1x64xf32>
    %392 = arith.subf %390, %391 : vector<1x64xf32>
    %c0_322 = arith.constant 0 : index
    %c0_323 = arith.constant 0 : index
    %c0_324 = arith.constant 0 : index
    %393 = vector.load %arg12[%c0_322, %c0_323, %c0_324] : memref<2x288x64xf32, #tpu.memory_space<vmem>>, vector<1x288x64xf32>
    %394 = vector.shape_cast %393 : vector<1x288x64xf32> to vector<288x64xf32>
    %395 = vector.broadcast %389 : vector<1x64xf32> to vector<288x64xf32>
    %396 = arith.mulf %394, %395 : vector<288x64xf32>
    %397 = vector.broadcast %392 : vector<1x64xf32> to vector<288x64xf32>
    %398 = arith.addf %396, %397 : vector<288x64xf32>
    %c0_325 = arith.constant 0 : index
    %c0_326 = arith.constant 0 : index
    %c0_327 = arith.constant 0 : index
    %399 = vector.load %arg7[%c0_325, %c0_326, %c0_327] : memref<2x288x64xf32, #tpu.memory_space<vmem>>, vector<1x288x64xf32>
    %400 = vector.shape_cast %399 : vector<1x288x64xf32> to vector<288x64xf32>
    %401 = arith.addf %398, %400 : vector<288x64xf32>
    %cst_328 = arith.constant 0.000000e+00 : f32
    %402 = vector.broadcast %cst_328 : f32 to vector<288x64xf32>
    %403 = arith.maximumf %401, %402 : vector<288x64xf32>
    %c0_329 = arith.constant 0 : index
    %c0_330 = arith.constant 0 : index
    %c0_331 = arith.constant 0 : index
    %404 = vector.load %arg9[%c0_329, %c0_330, %c0_331] : memref<2x288x64xf32, #tpu.memory_space<vmem>>, vector<1x288x64xf32>
    %405 = vector.shape_cast %404 : vector<1x288x64xf32> to vector<288x64xf32>
    %406 = vector.shape_cast %403 : vector<288x64xf32> to vector<1x288x64xf32>
    tpu.vector_store %arg9[%c0_329, %c0_330, %c0_331], %406 {strides = array<i32>} : memref<2x288x64xf32, #tpu.memory_space<vmem>>, vector<1x288x64xf32>,
    %c1_332 = arith.constant 1 : index
    %c0_333 = arith.constant 0 : index
    %c0_334 = arith.constant 0 : index
    %407 = vector.load %arg12[%c1_332, %c0_333, %c0_334] : memref<2x288x64xf32, #tpu.memory_space<vmem>>, vector<1x288x64xf32>
    %408 = vector.shape_cast %407 : vector<1x288x64xf32> to vector<288x64xf32>
    %409 = vector.broadcast %389 : vector<1x64xf32> to vector<288x64xf32>
    %410 = arith.mulf %408, %409 : vector<288x64xf32>
    %411 = vector.broadcast %392 : vector<1x64xf32> to vector<288x64xf32>
    %412 = arith.addf %410, %411 : vector<288x64xf32>
    %c1_335 = arith.constant 1 : index
    %c0_336 = arith.constant 0 : index
    %c0_337 = arith.constant 0 : index
    %413 = vector.load %arg7[%c1_335, %c0_336, %c0_337] : memref<2x288x64xf32, #tpu.memory_space<vmem>>, vector<1x288x64xf32>
    %414 = vector.shape_cast %413 : vector<1x288x64xf32> to vector<288x64xf32>
    %415 = arith.addf %412, %414 : vector<288x64xf32>
    %cst_338 = arith.constant 0.000000e+00 : f32
    %416 = vector.broadcast %cst_338 : f32 to vector<288x64xf32>
    %417 = arith.maximumf %415, %416 : vector<288x64xf32>
    %c1_339 = arith.constant 1 : index
    %c0_340 = arith.constant 0 : index
    %c0_341 = arith.constant 0 : index
    %418 = vector.load %arg9[%c1_339, %c0_340, %c0_341] : memref<2x288x64xf32, #tpu.memory_space<vmem>>, vector<1x288x64xf32>
    %419 = vector.shape_cast %418 : vector<1x288x64xf32> to vector<288x64xf32>
    %420 = vector.shape_cast %417 : vector<288x64xf32> to vector<1x288x64xf32>
    tpu.vector_store %arg9[%c1_339, %c0_340, %c0_341], %420 {strides = array<i32>} : memref<2x288x64xf32, #tpu.memory_space<vmem>>, vector<1x288x64xf32>,
    return
  }
}

</mosaic_0001>

<bundles_post_ra>
// kernel: resblock_forward.1
= control target key start
LH: loop header
LB: loop body
LE: loop exit
PB: predicated region body
PF: predicated region fallthrough
CT: control target
= control target key end

     0   :  { %vm218_vm0 = vcmask 523264   ;;  %vm7264_vm1 = vcmask 521216   ;;  %s27428_s1 = inlined_call_operand.vmem [shape: bf16[9,64,64], index: 1, kind: input, shape index: {}]   ;;  %s27429_s0 = inlined_call_operand.vmem [shape: f32[2,326,64], index: 0, kind: input, shape index: {}]   ;;  %s27430_s8 = inlined_call_operand.vmem [shape: f32[288,1], index: 8, kind: input, shape index: {}]   ;;  %s27431_s4 = inlined_call_operand.vmem [shape: bf16[9,64,64], index: 4, kind: input, shape index: {}]   ;;  %s27432_s2 = inlined_call_operand.vmem [shape: f32[1,64], index: 2, kind: input, shape index: {}]   ;;  %s27433_s3 = inlined_call_operand.vmem [shape: f32[1,64], index: 3, kind: input, shape index: {}]   ;;  %s27434_s5 = inlined_call_operand.vmem [shape: f32[1,64], index: 5, kind: input, shape index: {}]   ;;  %s27435_s6 = inlined_call_operand.vmem [shape: f32[1,64], index: 6, kind: input, shape index: {}]   ;;  %s27436_s7 = inlined_call_operand.vmem [shape: f32[2,288,64], index: 7, kind: input, shape index: {}]   ;;  %s27437_s9 = inlined_call_operand.vmem [shape: f32[2,288,64], index: 9, kind: output, shape index: {}]  }
   0x1   :  { %v20186_v0 = vld [vmem:[%s27428_s1 + $0x20] sm:$0xff]   ;;  %v20188_v2 = vld [vmem:[%s27428_s1 + $0x28] sm:$0xff]   ;;  %v20190_v4 = vld [vmem:[%s27428_s1 + $0x30] sm:$0xff]  }
   0x2   :  { %v20187_v1 = vld [vmem:[%s27428_s1 + $0x20] sm:$0xff]   ;;  %17446 = vmatprep.subr.bf16.mxu0 %v20186_v0  ;;  %v20189_v3 = vld [vmem:[%s27428_s1 + $0x28] sm:$0xff]   ;;  %v20191_v5 = vld [vmem:[%s27428_s1 + $0x30] sm:$0xff]  }
   0x3   :  { %17842 = vmatprep.subr.bf16.mxu1 %v20187_v1  ;;  %17447 = vmatpush3.bf16.msra.mxu0 %v20186_v0  ;;  %v20192_v6 = vld [vmem:[%s27428_s1 + $0x38] sm:$0xff]   ;;  %v131_v7 = vld [vmem:[%s27429_s0 + $0x1] sm:$0xff]  ;;  %v132_v8 = vld [vmem:[%s27429_s0 + $0x9] sm:$0xff] }
   0x4   :  { %17843 = vmatpush3.bf16.msra.mxu1 %v20187_v1  ;;  %17448 = vmatprep.subr.bf16.mxu0 %v20188_v2  ;;  %v15508_v9 = vld [vmem:[%s27429_s0 + $0x149] sm:$0xff]  ;;  %v20193_v10 = vld [vmem:[%s27428_s1 + $0x38] sm:$0xff]   ;;  %v167_v11 = vpack.c.bf16 %v132_v8, %v131_v7  ;;  %v20194_v16 = vld [vmem:[%s27428_s1] sm:$0xff]  }
   0x5   :  { %17844 = vmatprep.subr.bf16.mxu1 %v20189_v3  ;;  %v15509_v12 = vld [vmem:[%s27429_s0 + $0x151] sm:$0xff]  ;;  %v134_v15 = vld [vmem:[%s27429_s0 + $0x19] sm:$0xff]  ;;  %v15511_v18 = vld [vmem:[%s27429_s0 + $0x161] sm:$0xff] }
   0x6   :  { %v3318_v13 = vpack.c.bf16 %v15509_v12, %v15508_v9  ;;  %v133_v14 = vld [vmem:[%s27429_s0 + $0x11] sm:$0xff]  ;;  %17454 = vmatprep.mubr.msk.bf16.mxu0 %vm218_vm0, %v167_v11  ;;  %v15510_v17 = vld [vmem:[%s27429_s0 + $0x159] sm:$0xff]  ;;  %v135_v20 = vld [vmem:[%s27429_s0 + $0x21] sm:$0xff] }
   0x7   :  { %17449 = vmatpush3.bf16.msra.mxu0 %v20188_v2  ;;  %v20195_v19 = vld [vmem:[%s27428_s1] sm:$0xff]   ;;  %v136_v21 = vld [vmem:[%s27429_s0 + $0x29] sm:$0xff]  ;;  %v168_v22 = vpack.c.bf16 %v134_v15, %v133_v14  ;;  %v15513_v24 = vld [vmem:[%s27429_s0 + $0x171] sm:$0xff]  ;;  %v3319_v25 = vpack.c.bf16 %v15511_v18, %v15510_v17 }
   0x8   :  { %17845 = vmatpush3.bf16.msra.mxu1 %v20189_v3  ;;  %17450 = vmatprep.subr.bf16.mxu0 %v20190_v4  ;;  %v15512_v23 = vld [vmem:[%s27429_s0 + $0x169] sm:$0xff]  ;;  %v169_v26 = vpack.c.bf16 %v136_v21, %v135_v20  ;;  %v137_v28 = vld [vmem:[%s27429_s0 + $0x31] sm:$0xff]  ;;  %v138_v29 = vld [vmem:[%s27429_s0 + $0x39] sm:$0xff] }
   0x9   :  { %17846 = vmatprep.subr.bf16.mxu1 %v20191_v5  ;;  %17850 = vmatprep.mubr.msk.bf16.mxu1 %vm218_vm0, %v3318_v13  ;;  %v3320_v27 = vpack.c.bf16 %v15513_v24, %v15512_v23  ;;  %v15514_v30 = vld [vmem:[%s27429_s0 + $0x179] sm:$0xff]  ;;  %v20196_v31 = vld [vmem:[%s27428_s1 + $0x8] sm:$0xff]   ;;  %v15517_v37 = vld [vmem:[%s27429_s0 + $0x191] sm:$0xff]  ;;  %v170_v38 = vpack.c.bf16 %v138_v29, %v137_v28 }
   0xa   :  { %v20197_v32 = vld [vmem:[%s27428_s1 + $0x8] sm:$0xff]   ;;  %v141_v42 = vld [vmem:[%s27429_s0 + $0x51] sm:$0xff]  ;;  %v142_v44 = vld [vmem:[%s27429_s0 + $0x59] sm:$0xff] }
   0xb   :  { %17451 = vmatpush3.bf16.msra.mxu0 %v20190_v4  ;;  %v15515_v33 = vld [vmem:[%s27429_s0 + $0x181] sm:$0xff]  ;;  %v140_v35 = vld [vmem:[%s27429_s0 + $0x49] sm:$0xff]  ;;  %v15518_v45 = vld [vmem:[%s27429_s0 + $0x199] sm:$0xff]  ;;  %v172_v52 = vpack.c.bf16 %v142_v44, %v141_v42 }
   0xc   :  { %17847 = vmatpush3.bf16.msra.mxu1 %v20191_v5  ;;  %17452 = vmatprep.subr.bf16.mxu0 %v20192_v6  ;;  %v139_v34 = vld [vmem:[%s27429_s0 + $0x41] sm:$0xff]  ;;  %v15516_v36 = vld [vmem:[%s27429_s0 + $0x189] sm:$0xff]  ;;  %v3321_v39 = vpack.c.bf16 %v15515_v33, %v15514_v30  ;;  %v15521_v51 = vld [vmem:[%s27429_s0 + $0x1b1] sm:$0xff] }
   0xd   :  { %17848 = vmatprep.subr.bf16.mxu1 %v20193_v10  ;;  %v171_v40 = vpack.c.bf16 %v140_v35, %v139_v34  ;;  %v3322_v41 = vpack.c.bf16 %v15517_v37, %v15516_v36  ;;  %v20198_v43 = vld [vmem:[%s27428_s1 + $0x10] sm:$0xff]   ;;  %v15519_v47 = vld [vmem:[%s27429_s0 + $0x1a1] sm:$0xff]  ;;  %v20200_v56 = vld [vmem:[%s27428_s1 + $0x18] sm:$0xff]  }
   0xe   :  { %v20199_v46 = vld [vmem:[%s27428_s1 + $0x10] sm:$0xff]   ;;  %v143_v48 = vld [vmem:[%s27429_s0 + $0x61] sm:$0xff]  ;;  %v3323_v53 = vpack.c.bf16 %v15519_v47, %v15518_v45  ;;  %v20201_v57 = vld [vmem:[%s27428_s1 + $0x18] sm:$0xff]  }
   0xf   :  { %17453 = vmatpush3.bf16.msra.mxu0 %v20192_v6  ;;  %v144_v49 = vld [vmem:[%s27429_s0 + $0x69] sm:$0xff]  ;;  %v145_v58 = vld [vmem:[%s27429_s0 + $0x71] sm:$0xff]  ;;  %v146_v59 = vld [vmem:[%s27429_s0 + $0x79] sm:$0xff] }
  0x10   :  { %17849 = vmatpush3.bf16.msra.mxu1 %v20193_v10  ;;  %17490 = vmatprep.subr.bf16.mxu0 %v20194_v16  ;;  %v15520_v50 = vld [vmem:[%s27429_s0 + $0x1a9] sm:$0xff]  ;;  %v173_v54 = vpack.c.bf16 %v144_v49, %v143_v48  ;;  %v15522_v60 = vld [vmem:[%s27429_s0 + $0x1b9] sm:$0xff]  ;;  %v15523_v61 = vld [vmem:[%s27429_s0 + $0x1c1] sm:$0xff]  ;;  %v174_v2 = vpack.c.bf16 %v146_v59, %v145_v58 }
  0x11   :  { %17886 = vmatprep.subr.bf16.mxu1 %v20195_v19  ;;  %v3324_v55 = vpack.c.bf16 %v15521_v51, %v15520_v50  ;;  %v147_v62 = vld [vmem:[%s27429_s0 + $0x81] sm:$0xff]  ;;  %v148_v63 = vld [vmem:[%s27429_s0 + $0x89] sm:$0xff]  ;;  %v15525_v1 = vld [vmem:[%s27429_s0 + $0x1d1] sm:$0xff]  ;;  %v3325_v3 = vpack.c.bf16 %v15523_v61, %v15522_v60 }
  0x12   :  { %17455 = vmatmul.mubr.msk.bf16.vlgmr.msra.gmra.mrb[0].mxu0 %vm218_vm0, %v168_v22  ;;  %v15524_v0 = vld [vmem:[%s27429_s0 + $0x1c9] sm:$0xff]  ;;  %v175_v4 = vpack.c.bf16 %v148_v63, %v147_v62  ;;  %v149_v6 = vld [vmem:[%s27429_s0 + $0x91] sm:$0xff]  ;;  %v150_v7 = vld [vmem:[%s27429_s0 + $0x99] sm:$0xff] }
  0x13   :  { %17851 = vmatmul.mubr.msk.bf16.vlgmr.msra.gmra.mrb[0].mxu1 %vm218_vm0, %v3319_v25  ;;  %17491 = vmatpush3.bf16.msra.mxu0 %v20194_v16  ;;  %v3326_v5 = vpack.c.bf16 %v15525_v1, %v15524_v0  ;;  %v15526_v8 = vld [vmem:[%s27429_s0 + $0x1d9] sm:$0xff]  ;;  %v15527_v10 = vld [vmem:[%s27429_s0 + $0x1e1] sm:$0xff]  ;;  %v152_v12 = vld [vmem:[%s27429_s0 + $0xa9] sm:$0xff]  ;;  %v176_v16 = vpack.c.bf16 %v150_v7, %v149_v6 }
  0x14   :  { %17887 = vmatpush3.bf16.msra.mxu1 %v20195_v19  ;;  %17458 = vmatprep.mubr.msk.bf16.mxu0 %vm218_vm0, %v169_v26  ;;  %v20705_v9 = vld [vmem:[%s27428_s1 + $0x40] sm:$0xff]   ;;  %v15528_v14 = vld [vmem:[%s27429_s0 + $0x1e9] sm:$0xff]  ;;  %v15529_v15 = vld [vmem:[%s27429_s0 + $0x1f1] sm:$0xff]  ;;  %v3327_v17 = vpack.c.bf16 %v15527_v10, %v15526_v8 }
  0x15   :  { %17854 = vmatprep.mubr.msk.bf16.mxu1 %vm218_vm0, %v3320_v27  ;;  %17492 = vmatprep.subr.bf16.mxu0 %v20196_v31  ;;  %v151_v11 = vld [vmem:[%s27429_s0 + $0xa1] sm:$0xff]  ;;  %v3328_v19 = vpack.c.bf16 %v15529_v15, %v15528_v14  ;;  %v153_v20 = vld [vmem:[%s27429_s0 + $0xb1] sm:$0xff]  ;;  %v154_v21 = vld [vmem:[%s27429_s0 + $0xb9] sm:$0xff] }
  0x16   :  { %17888 = vmatprep.subr.bf16.mxu1 %v20197_v32  ;;  %v20723_v13 = vld [vmem:[%s27428_s1 + $0x40] sm:$0xff]   ;;  %v177_v18 = vpack.c.bf16 %v152_v12, %v151_v11  ;;  %v156_v25 = vld [vmem:[%s27429_s0 + $0xc9] sm:$0xff]  ;;  %v15533_v27 = vld [vmem:[%s27429_s0 + $0x211] sm:$0xff]  ;;  %v178_v28 = vpack.c.bf16 %v154_v21, %v153_v20 }
  0x17   :  { %17493 = vmatpush3.bf16.msra.mxu0 %v20196_v31  ;;  %v15530_v22 = vld [vmem:[%s27429_s0 + $0x1f9] sm:$0xff]  ;;  %v15531_v23 = vld [vmem:[%s27429_s0 + $0x201] sm:$0xff]  ;;  %v15532_v26 = vld [vmem:[%s27429_s0 + $0x209] sm:$0xff] }
  0x18   :  { %17889 = vmatpush3.bf16.msra.mxu1 %v20197_v32  ;;  %17494 = vmatprep.subr.bf16.mxu0 %v20198_v43  ;;  %v155_v24 = vld [vmem:[%s27429_s0 + $0xc1] sm:$0xff]  ;;  %v3329_v29 = vpack.c.bf16 %v15531_v23, %v15530_v22  ;;  %v3330_v31 = vpack.c.bf16 %v15533_v27, %v15532_v26  ;;  %v157_v32 = vld [vmem:[%s27429_s0 + $0xd1] sm:$0xff]  ;;  %v158_v33 = vld [vmem:[%s27429_s0 + $0xd9] sm:$0xff] }
  0x19   :  { %17890 = vmatprep.subr.bf16.mxu1 %v20199_v46  ;;  %v179_v30 = vpack.c.bf16 %v156_v25, %v155_v24  ;;  %v15534_v34 = vld [vmem:[%s27429_s0 + $0x219] sm:$0xff]  ;;  %v15535_v35 = vld [vmem:[%s27429_s0 + $0x221] sm:$0xff]  ;;  %v160_v37 = vld [vmem:[%s27429_s0 + $0xe9] sm:$0xff] }
  0x1a   :  { %17459 = vmatmul.mubr.msk.bf16.gmra.mrb[4].mxu0 %vm218_vm0, %v170_v38  ;;  %v159_v36 = vld [vmem:[%s27429_s0 + $0xe1] sm:$0xff]  ;;  %v15536_v38 = vld [vmem:[%s27429_s0 + $0x229] sm:$0xff]  ;;  %v161_v44 = vld [vmem:[%s27429_s0 + $0xf1] sm:$0xff] }
  0x1b   :  { %17855 = vmatmul.mubr.msk.bf16.gmra.mrb[4].mxu1 %vm218_vm0, %v3321_v39  ;;  %17462 = vmatprep.mubr.msk.bf16.mxu0 %vm218_vm0, %v171_v40  ;;  %v15537_v39 = vld [vmem:[%s27429_s0 + $0x231] sm:$0xff]  ;;  %v180_v40 = vpack.c.bf16 %v158_v33, %v157_v32  ;;  %v181_v42 = vpack.c.bf16 %v160_v37, %v159_v36  ;;  %v162_v45 = vld [vmem:[%s27429_s0 + $0xf9] sm:$0xff]  ;;  %v15539_v47 = vld [vmem:[%s27429_s0 + $0x241] sm:$0xff] }
  0x1c   :  { %17858 = vmatprep.mubr.msk.bf16.mxu1 %vm218_vm0, %v3322_v41  ;;  %17495 = vmatpush3.bf16.msra.mxu0 %v20198_v43  ;;  %v3331_v41 = vpack.c.bf16 %v15535_v35, %v15534_v34  ;;  %v3332_v43 = vpack.c.bf16 %v15537_v39, %v15536_v38  ;;  %v163_v48 = vld [vmem:[%s27429_s0 + $0x101] sm:$0xff]  ;;  %v164_v49 = vld [vmem:[%s27429_s0 + $0x109] sm:$0xff]  ;;  %v15541_v51 = vld [vmem:[%s27429_s0 + $0x251] sm:$0xff] }
  0x1d   :  { %17891 = vmatpush3.bf16.msra.mxu1 %v20199_v46  ;;  %17496 = vmatprep.subr.bf16.mxu0 %v20200_v56  ;;  %v15538_v46 = vld [vmem:[%s27429_s0 + $0x239] sm:$0xff]  ;;  %v15540_v50 = vld [vmem:[%s27429_s0 + $0x249] sm:$0xff]  ;;  %v15543_v59 = vld [vmem:[%s27429_s0 + $0x261] sm:$0xff] }
  0x1e   :  { %17892 = vmatprep.subr.bf16.mxu1 %v20201_v57  ;;  %v15542_v58 = vld [vmem:[%s27429_s0 + $0x259] sm:$0xff]  ;;  %v70_v61 = vld [vmem:[%s27429_s0 + $0x8] sm:$0xff]  ;;  %v15473_v63 = vld [vmem:[%s27429_s0 + $0x150] sm:$0xff] }
  0x1f   :  { %v69_v60 = vld [vmem:[%s27429_s0] sm:$0xff]  ;;  %v15472_v62 = vld [vmem:[%s27429_s0 + $0x148] sm:$0xff]  ;;  %v3335_v1 = vpack.c.bf16 %v15543_v59, %v15542_v58  ;;  %v15474_v6 = vld [vmem:[%s27429_s0 + $0x158] sm:$0xff] }
  0x20   :  { %17497 = vmatpush3.bf16.msra.mxu0 %v20200_v56  ;;  %v165_v56 = vld [vmem:[%s27429_s0 + $0x111] sm:$0xff]  ;;  %v15475_v7 = vld [vmem:[%s27429_s0 + $0x160] sm:$0xff]  ;;  %v74_v10 = vld [vmem:[%s27429_s0 + $0x28] sm:$0xff] }
  0x21   :  { %17893 = vmatpush3.bf16.msra.mxu1 %v20201_v57  ;;  %17534 = vmatprep.subr.bf16.mxu0 %v20705_v9  ;;  %v166_v57 = vld [vmem:[%s27429_s0 + $0x119] sm:$0xff]  ;;  %v15476_v12 = vld [vmem:[%s27429_s0 + $0x168] sm:$0xff]  ;;  %v15477_v14 = vld [vmem:[%s27429_s0 + $0x170] sm:$0xff]  ;;  %v3257_v15 = vpack.c.bf16 %v15475_v7, %v15474_v6 }
  0x22   :  { %17463 = vmatmul.mubr.msk.bf16.gmra.mrb[8].mxu0 %vm218_vm0, %v172_v52  ;;  %17930 = vmatprep.subr.bf16.mxu1 %v20723_v13  ;;  %v182_v52 = vpack.c.bf16 %v162_v45, %v161_v44  ;;  %v184_v0 = vpack.c.bf16 %v166_v57, %v165_v56  ;;  %v73_v8 = vld [vmem:[%s27429_s0 + $0x20] sm:$0xff]  ;;  %v20205_v20 = vld [vmem:[%s27428_s1 + $0x48] sm:$0xff]   ;;  %v76_v21 = vld [vmem:[%s27429_s0 + $0x38] sm:$0xff] }
  0x23   :  { %17859 = vmatmul.mubr.msk.bf16.gmra.mrb[8].mxu1 %vm218_vm0, %v3323_v53  ;;  %17466 = vmatprep.mubr.msk.bf16.mxu0 %vm218_vm0, %v173_v54  ;;  %v3333_v53 = vpack.c.bf16 %v15539_v47, %v15538_v46  ;;  %v183_v54 = vpack.c.bf16 %v164_v49, %v163_v48  ;;  %v15478_v22 = vld [vmem:[%s27429_s0 + $0x178] sm:$0xff]  ;;  %v15479_v23 = vld [vmem:[%s27429_s0 + $0x180] sm:$0xff]  ;;  %v78_v24 = vld [vmem:[%s27429_s0 + $0x48] sm:$0xff] }
  0x24   :  { %17862 = vmatprep.mubr.msk.bf16.mxu1 %vm218_vm0, %v3324_v55  ;;  %v3334_v55 = vpack.c.bf16 %v15541_v51, %v15540_v50  ;;  %v20206_v25 = vld [vmem:[%s27428_s1 + $0x50] sm:$0xff]   ;;  %v20208_v32 = vld [vmem:[%s27428_s1 + $0x58] sm:$0xff]   ;;  %v15483_v37 = vld [vmem:[%s27429_s0 + $0x1a0] sm:$0xff] }
  0x25   :  { %v15481_v26 = vld [vmem:[%s27429_s0 + $0x190] sm:$0xff]  ;;  %v20209_v33 = vld [vmem:[%s27428_s1 + $0x58] sm:$0xff]   ;;  %v81_v38 = vld [vmem:[%s27429_s0 + $0x60] sm:$0xff] }
  0x26   :  { %v20207_v27 = vld [vmem:[%s27428_s1 + $0x50] sm:$0xff]   ;;  %v80_v35 = vld [vmem:[%s27429_s0 + $0x58] sm:$0xff]  ;;  %v82_v39 = vld [vmem:[%s27429_s0 + $0x68] sm:$0xff] }
  0x27   :  { %v79_v34 = vld [vmem:[%s27429_s0 + $0x50] sm:$0xff]  ;;  %v15482_v36 = vld [vmem:[%s27429_s0 + $0x198] sm:$0xff]  ;;  %v20956_v44 = vld [vmem:[%s27428_s1 + $0x60] sm:$0xff]   ;;  %v111_v46 = vpack.c.bf16 %v82_v39, %v81_v38 }
  0x28   :  { %v3261_v45 = vpack.c.bf16 %v15483_v37, %v15482_v36  ;;  %v83_v48 = vld [vmem:[%s27429_s0 + $0x70] sm:$0xff]  ;;  %v84_v49 = vld [vmem:[%s27429_s0 + $0x78] sm:$0xff]  ;;  %v15487_v51 = vld [vmem:[%s27429_s0 + $0x1c0] sm:$0xff] }
  0x29   :  { %v15486_v50 = vld [vmem:[%s27429_s0 + $0x1b8] sm:$0xff]  ;;  %v112_v56 = vpack.c.bf16 %v84_v49, %v83_v48  ;;  %v101_v36 = vld [vmem:[%s27429_s0 + $0x100] sm:$0xff]  ;;  %v102_v37 = vld [vmem:[%s27429_s0 + $0x108] sm:$0xff] }
  0x2a   :  { %17467 = vmatmul.mubr.msk.bf16.gmra.mrb[12].mxu0 %vm218_vm0, %v174_v2  ;;  %v105_v2 = vpack.c.bf16 %v70_v61, %v69_v60  ;;  %v3263_v57 = vpack.c.bf16 %v15487_v51, %v15486_v50  ;;  %v87_v60 = vld [vmem:[%s27429_s0 + $0x90] sm:$0xff]  ;;  %v88_v61 = vld [vmem:[%s27429_s0 + $0x98] sm:$0xff]  ;;  %v15504_v38 = vld [vmem:[%s27429_s0 + $0x248] sm:$0xff] }
  0x2b   :  { %17863 = vmatmul.mubr.msk.bf16.gmra.mrb[12].mxu1 %vm218_vm0, %v3325_v3  ;;  %17470 = vmatprep.mubr.msk.bf16.mxu0 %vm218_vm0, %v175_v4  ;;  %v3256_v3 = vpack.c.bf16 %v15473_v63, %v15472_v62  ;;  %v71_v4 = vld [vmem:[%s27429_s0 + $0x10] sm:$0xff]  ;;  %v15490_v62 = vld [vmem:[%s27429_s0 + $0x1d8] sm:$0xff]  ;;  %v15491_v63 = vld [vmem:[%s27429_s0 + $0x1e0] sm:$0xff] }
  0x2c   :  { %17866 = vmatprep.mubr.msk.bf16.mxu1 %vm218_vm0, %v3326_v5  ;;  %v72_v5 = vld [vmem:[%s27429_s0 + $0x18] sm:$0xff]  ;;  %v15505_v39 = vld [vmem:[%s27429_s0 + $0x250] sm:$0xff]  ;;  %v15507_v49 = vld [vmem:[%s27429_s0 + $0x260] sm:$0xff] }
  0x2d   :  { %v106_v11 = vpack.c.bf16 %v72_v5, %v71_v4  ;;  %v114_v4 = vpack.c.bf16 %v88_v61, %v87_v60  ;;  %v3265_v5 = vpack.c.bf16 %v15491_v63, %v15490_v62  ;;  %v15506_v48 = vld [vmem:[%s27429_s0 + $0x258] sm:$0xff]  ;;  %v705_v50 = vld [vmem:[%s27429_s0 + $0x2] sm:$0xff]  ;;  %v706_v51 = vld [vmem:[%s27429_s0 + $0xa] sm:$0xff] }
  0x2e   :  { %v15598_v60 = vld [vmem:[%s27429_s0 + $0x15a] sm:$0xff]  ;;  %v15599_v61 = vld [vmem:[%s27429_s0 + $0x162] sm:$0xff]  ;;  %v710_v63 = vld [vmem:[%s27429_s0 + $0x2a] sm:$0xff] }
  0x2f   :  { %v709_v62 = vld [vmem:[%s27429_s0 + $0x22] sm:$0xff] }
  0x32   :  { %17471 = vmatmul.mubr.msk.bf16.gmra.mrb[16].mxu0 %vm218_vm0, %v176_v16  ;;  %v107_v16 = vpack.c.bf16 %v74_v10, %v73_v8  ;;  %v91_v8 = vld [vmem:[%s27429_s0 + $0xb0] sm:$0xff]  ;;  %v92_v10 = vld [vmem:[%s27429_s0 + $0xb8] sm:$0xff] }
  0x33   :  { %17867 = vmatmul.mubr.msk.bf16.gmra.mrb[16].mxu1 %vm218_vm0, %v3327_v17  ;;  %17474 = vmatprep.mubr.msk.bf16.mxu0 %vm218_vm0, %v177_v18  ;;  %v3258_v17 = vpack.c.bf16 %v15477_v14, %v15476_v12  ;;  %v75_v18 = vld [vmem:[%s27429_s0 + $0x30] sm:$0xff]  ;;  %v15495_v12 = vld [vmem:[%s27429_s0 + $0x200] sm:$0xff] }
  0x34   :  { %17870 = vmatprep.mubr.msk.bf16.mxu1 %vm218_vm0, %v3328_v19  ;;  %v20204_v19 = vld [vmem:[%s27428_s1 + $0x48] sm:$0xff]   ;;  %v93_v14 = vld [vmem:[%s27429_s0 + $0xc0] sm:$0xff] }
  0x3a   :  { %17475 = vmatmul.mubr.msk.bf16.gmra.mrb[20].mxu0 %vm218_vm0, %v178_v28  ;;  %v108_v28 = vpack.c.bf16 %v76_v21, %v75_v18  ;;  %v116_v18 = vpack.c.bf16 %v92_v10, %v91_v8  ;;  %v20213_v8 = vld [vmem:[%s27428_s1 + $0x68] sm:$0xff]   ;;  %v712_v10 = vld [vmem:[%s27429_s0 + $0x3a] sm:$0xff] }
  0x3b   :  { %17871 = vmatmul.mubr.msk.bf16.gmra.mrb[20].mxu1 %vm218_vm0, %v3329_v29  ;;  %17478 = vmatprep.mubr.msk.bf16.mxu0 %vm218_vm0, %v179_v30  ;;  %v3259_v29 = vpack.c.bf16 %v15479_v23, %v15478_v22  ;;  %v95_v22 = vld [vmem:[%s27429_s0 + $0xd0] sm:$0xff]  ;;  %v96_v23 = vld [vmem:[%s27429_s0 + $0xd8] sm:$0xff] }
  0x3c   :  { %17874 = vmatprep.mubr.msk.bf16.mxu1 %vm218_vm0, %v3330_v31 }
  0x42   :  { %17479 = vmatmul.mubr.msk.bf16.gmra.mrb[24].mxu0 %vm218_vm0, %v180_v40  ;;  %v15484_v40 = vld [vmem:[%s27429_s0 + $0x1a8] sm:$0xff] }
  0x43   :  { %17875 = vmatmul.mubr.msk.bf16.gmra.mrb[24].mxu1 %vm218_vm0, %v3331_v41  ;;  %17482 = vmatprep.mubr.msk.bf16.mxu0 %vm218_vm0, %v181_v42  ;;  %v15485_v41 = vld [vmem:[%s27429_s0 + $0x1b0] sm:$0xff]  ;;  %v20951_v42 = vld [vmem:[%s27428_s1 + $0x60] sm:$0xff]  }
  0x44   :  { %17878 = vmatprep.mubr.msk.bf16.mxu1 %vm218_vm0, %v3332_v43  ;;  %v110_v43 = vpack.c.bf16 %v80_v35, %v79_v34  ;;  %v3262_v47 = vpack.c.bf16 %v15485_v41, %v15484_v40  ;;  %v15502_v34 = vld [vmem:[%s27429_s0 + $0x238] sm:$0xff]  ;;  %v15503_v35 = vld [vmem:[%s27429_s0 + $0x240] sm:$0xff] }
  0x45   :  { %v3271_v41 = vpack.c.bf16 %v15503_v35, %v15502_v34 }
  0x4a   :  { %17483 = vmatmul.mubr.msk.bf16.gmra.mrb[28].mxu0 %vm218_vm0, %v182_v52  ;;  %v85_v52 = vld [vmem:[%s27429_s0 + $0x80] sm:$0xff] }
  0x4b   :  { %17879 = vmatmul.mubr.msk.bf16.gmra.mrb[28].mxu1 %vm218_vm0, %v3333_v53  ;;  %17486 = vmatprep.mubr.msk.bf16.mxu0 %vm218_vm0, %v183_v54  ;;  %v86_v53 = vld [vmem:[%s27429_s0 + $0x88] sm:$0xff] }
  0x4c   :  { %17882 = vmatprep.mubr.msk.bf16.mxu1 %vm218_vm0, %v3334_v55  ;;  %v15488_v54 = vld [vmem:[%s27429_s0 + $0x1c8] sm:$0xff]  ;;  %v15489_v55 = vld [vmem:[%s27429_s0 + $0x1d0] sm:$0xff]  ;;  %v113_v58 = vpack.c.bf16 %v86_v53, %v85_v52 }
  0x4d   :  { %v3264_v59 = vpack.c.bf16 %v15489_v55, %v15488_v54  ;;  %v15596_v52 = vld [vmem:[%s27429_s0 + $0x14a] sm:$0xff]  ;;  %v15597_v53 = vld [vmem:[%s27429_s0 + $0x152] sm:$0xff]  ;;  %v3273_v55 = vpack.c.bf16 %v15507_v49, %v15506_v48 }
  0x52   :  { %17487 = vmatmul.mubr.msk.bf16.gmra.mrb[32].mxu0 %vm218_vm0, %v184_v0  ;;  %v89_v0 = vld [vmem:[%s27429_s0 + $0xa0] sm:$0xff] }
  0x53   :  { %17883 = vmatmul.mubr.msk.bf16.gmra.mrb[32].mxu1 %vm218_vm0, %v3335_v1  ;;  %17498 = vmatprep.mubr.msk.bf16.mxu0 %vm218_vm0, %v105_v2  ;;  %v90_v1 = vld [vmem:[%s27429_s0 + $0xa8] sm:$0xff] }
  0x54   :  { %17894 = vmatprep.mubr.msk.bf16.mxu1 %vm218_vm0, %v3256_v3  ;;  %v15492_v2 = vld [vmem:[%s27429_s0 + $0x1e8] sm:$0xff]  ;;  %v15493_v3 = vld [vmem:[%s27429_s0 + $0x1f0] sm:$0xff]  ;;  %v115_v6 = vpack.c.bf16 %v90_v1, %v89_v0 }
  0x55   :  { %v3266_v7 = vpack.c.bf16 %v15493_v3, %v15492_v2  ;;  %v15600_v1 = vld [vmem:[%s27429_s0 + $0x16a] sm:$0xff]  ;;  %v15601_v2 = vld [vmem:[%s27429_s0 + $0x172] sm:$0xff]  ;;  %v21158_v3 = vpack.c.bf16 %v15599_v61, %v15598_v60 }
  0x5a   :  { %17499 = vmatmul.mubr.msk.bf16.vlgmr.msra.gmra.mrb[0].mxu0 %vm218_vm0, %v106_v11  ;;  %v15494_v11 = vld [vmem:[%s27429_s0 + $0x1f8] sm:$0xff] }
  0x5b   :  { %17895 = vmatmul.mubr.msk.bf16.vlgmr.msra.gmra.mrb[0].mxu1 %vm218_vm0, %v3257_v15  ;;  %17535 = vmatpush3.bf16.msra.mxu0 %v20705_v9  ;;  %v77_v9 = vld [vmem:[%s27429_s0 + $0x40] sm:$0xff]  ;;  %v94_v15 = vld [vmem:[%s27429_s0 + $0xc8] sm:$0xff] }
  0x5c   :  { %17931 = vmatpush3.bf16.msra.mxu1 %v20723_v13  ;;  %17502 = vmatprep.mubr.msk.bf16.mxu0 %vm218_vm0, %v107_v16  ;;  %v15480_v13 = vld [vmem:[%s27429_s0 + $0x188] sm:$0xff]  ;;  %v109_v30 = vpack.c.bf16 %v78_v24, %v77_v9  ;;  %v15498_v9 = vld [vmem:[%s27429_s0 + $0x218] sm:$0xff]  ;;  %v15499_v24 = vld [vmem:[%s27429_s0 + $0x220] sm:$0xff] }
  0x5d   :  { %17898 = vmatprep.mubr.msk.bf16.mxu1 %vm218_vm0, %v3258_v17  ;;  %17536 = vmatprep.subr.bf16.mxu0 %v20204_v19  ;;  %v3260_v31 = vpack.c.bf16 %v15481_v26, %v15480_v13  ;;  %v15496_v16 = vld [vmem:[%s27429_s0 + $0x208] sm:$0xff]  ;;  %v15497_v17 = vld [vmem:[%s27429_s0 + $0x210] sm:$0xff] }
  0x5e   :  { %17932 = vmatprep.subr.bf16.mxu1 %v20205_v20  ;;  %v3268_v21 = vpack.c.bf16 %v15497_v17, %v15496_v16  ;;  %v98_v13 = vld [vmem:[%s27429_s0 + $0xe8] sm:$0xff]  ;;  %v15605_v16 = vld [vmem:[%s27429_s0 + $0x192] sm:$0xff] }
  0x5f   :  { %17537 = vmatpush3.bf16.msra.mxu0 %v20204_v19  ;;  %v3267_v19 = vpack.c.bf16 %v15495_v12, %v15494_v11  ;;  %v15500_v26 = vld [vmem:[%s27429_s0 + $0x228] sm:$0xff]  ;;  %v15602_v11 = vld [vmem:[%s27429_s0 + $0x17a] sm:$0xff]  ;;  %v20215_v17 = vld [vmem:[%s27428_s1 + $0x70] sm:$0xff]  }
  0x60   :  { %17933 = vmatpush3.bf16.msra.mxu1 %v20205_v20  ;;  %17538 = vmatprep.subr.bf16.mxu0 %v20206_v25  ;;  %v117_v20 = vpack.c.bf16 %v94_v15, %v93_v14  ;;  %v15603_v12 = vld [vmem:[%s27429_s0 + $0x182] sm:$0xff]  ;;  %v714_v14 = vld [vmem:[%s27429_s0 + $0x4a] sm:$0xff] }
  0x61   :  { %17934 = vmatprep.subr.bf16.mxu1 %v20207_v27  ;;  %v20214_v15 = vld [vmem:[%s27428_s1 + $0x70] sm:$0xff]  }
  0x62   :  { %17503 = vmatmul.mubr.msk.bf16.gmra.mrb[4].mxu0 %vm218_vm0, %v108_v28  ;;  %v118_v28 = vpack.c.bf16 %v96_v23, %v95_v22  ;;  %v20216_v22 = vld [vmem:[%s27428_s1 + $0x78] sm:$0xff]  }
  0x63   :  { %17899 = vmatmul.mubr.msk.bf16.gmra.mrb[4].mxu1 %vm218_vm0, %v3259_v29  ;;  %17506 = vmatprep.mubr.msk.bf16.mxu0 %vm218_vm0, %v109_v30  ;;  %v3269_v29 = vpack.c.bf16 %v15499_v24, %v15498_v9  ;;  %v20217_v23 = vld [vmem:[%s27428_s1 + $0x78] sm:$0xff]  }
  0x64   :  { %17902 = vmatprep.mubr.msk.bf16.mxu1 %vm218_vm0, %v3260_v31  ;;  %17539 = vmatpush3.bf16.msra.mxu0 %v20206_v25  ;;  %v97_v25 = vld [vmem:[%s27429_s0 + $0xe0] sm:$0xff]  ;;  %v715_v9 = vld [vmem:[%s27429_s0 + $0x52] sm:$0xff] }
  0x65   :  { %17935 = vmatpush3.bf16.msra.mxu1 %v20207_v27  ;;  %17540 = vmatprep.subr.bf16.mxu0 %v20208_v32  ;;  %v15501_v27 = vld [vmem:[%s27429_s0 + $0x230] sm:$0xff]  ;;  %v119_v30 = vpack.c.bf16 %v98_v13, %v97_v25  ;;  %v716_v24 = vld [vmem:[%s27429_s0 + $0x5a] sm:$0xff]  ;;  %v15607_v13 = vld [vmem:[%s27429_s0 + $0x1a2] sm:$0xff] }
  0x66   :  { %17936 = vmatprep.subr.bf16.mxu1 %v20209_v33  ;;  %v3270_v31 = vpack.c.bf16 %v15501_v27, %v15500_v26  ;;  %v15606_v25 = vld [vmem:[%s27429_s0 + $0x19a] sm:$0xff]  ;;  %v717_v26 = vld [vmem:[%s27429_s0 + $0x62] sm:$0xff]  ;;  %v718_v27 = vld [vmem:[%s27429_s0 + $0x6a] sm:$0xff] }
  0x67   :  { %v21270_v34 = vpack.c.bf16 %v718_v27, %v717_v26 }
  0x68   :  { %17541 = vmatpush3.bf16.msra.mxu0 %v20208_v32  ;;  %v99_v32 = vld [vmem:[%s27429_s0 + $0xf0] sm:$0xff] }
  0x69   :  { %17937 = vmatpush3.bf16.msra.mxu1 %v20209_v33  ;;  %17578 = vmatprep.subr.bf16.mxu0 %v20951_v42  ;;  %v100_v33 = vld [vmem:[%s27429_s0 + $0xf8] sm:$0xff] }
  0x6a   :  { %17507 = vmatmul.mubr.msk.bf16.gmra.mrb[8].mxu0 %vm218_vm0, %v110_v43  ;;  %17974 = vmatprep.subr.bf16.mxu1 %v20956_v44  ;;  %v120_v40 = vpack.c.bf16 %v100_v33, %v99_v32  ;;  %v121_v43 = vpack.c.bf16 %v102_v37, %v101_v36  ;;  %v21266_v32 = vld [vmem:[%s27428_s1 + $0x80] sm:$0xff]   ;;  %v21268_v33 = vpack.c.bf16 %v15607_v13, %v15606_v25  ;;  %v719_v36 = vld [vmem:[%s27429_s0 + $0x72] sm:$0xff] }
  0x6b   :  { %17903 = vmatmul.mubr.msk.bf16.gmra.mrb[8].mxu1 %vm218_vm0, %v3261_v45  ;;  %17510 = vmatprep.mubr.msk.bf16.mxu0 %vm218_vm0, %v111_v46  ;;  %v3272_v45 = vpack.c.bf16 %v15505_v39, %v15504_v38  ;;  %v103_v46 = vld [vmem:[%s27429_s0 + $0x110] sm:$0xff]  ;;  %v720_v37 = vld [vmem:[%s27429_s0 + $0x7a] sm:$0xff]  ;;  %v15611_v39 = vld [vmem:[%s27429_s0 + $0x1c2] sm:$0xff] }
  0x6c   :  { %17906 = vmatprep.mubr.msk.bf16.mxu1 %vm218_vm0, %v3262_v47  ;;  %v104_v47 = vld [vmem:[%s27429_s0 + $0x118] sm:$0xff] }
  0x6d   :  { %v122_v54 = vpack.c.bf16 %v104_v47, %v103_v46  ;;  %v15610_v38 = vld [vmem:[%s27429_s0 + $0x1ba] sm:$0xff]  ;;  %v21308_v46 = vpack.c.bf16 %v720_v37, %v719_v36  ;;  %v15627_v37 = vld [vmem:[%s27429_s0 + $0x242] sm:$0xff] }
  0x6e   :  { %v21310_v47 = vpack.c.bf16 %v15611_v39, %v15610_v38  ;;  %v15626_v36 = vld [vmem:[%s27429_s0 + $0x23a] sm:$0xff]  ;;  %v737_v38 = vld [vmem:[%s27429_s0 + $0x102] sm:$0xff]  ;;  %v738_v39 = vld [vmem:[%s27429_s0 + $0x10a] sm:$0xff] }
  0x72   :  { %17511 = vmatmul.mubr.msk.bf16.gmra.mrb[12].mxu0 %vm218_vm0, %v112_v56  ;;  %v741_v56 = vpack.c.bf16 %v706_v51, %v705_v50  ;;  %v723_v50 = vld [vmem:[%s27429_s0 + $0x92] sm:$0xff]  ;;  %v724_v51 = vld [vmem:[%s27429_s0 + $0x9a] sm:$0xff] }
  0x73   :  { %17907 = vmatmul.mubr.msk.bf16.gmra.mrb[12].mxu1 %vm218_vm0, %v3263_v57  ;;  %17514 = vmatprep.mubr.msk.bf16.mxu0 %vm218_vm0, %v113_v58  ;;  %v3890_v57 = vpack.c.bf16 %v15597_v53, %v15596_v52  ;;  %v707_v58 = vld [vmem:[%s27429_s0 + $0x12] sm:$0xff]  ;;  %v15614_v52 = vld [vmem:[%s27429_s0 + $0x1da] sm:$0xff]  ;;  %v15615_v53 = vld [vmem:[%s27429_s0 + $0x1e2] sm:$0xff] }
  0x74   :  { %17910 = vmatprep.mubr.msk.bf16.mxu1 %vm218_vm0, %v3264_v59  ;;  %v708_v59 = vld [vmem:[%s27429_s0 + $0x1a] sm:$0xff] }
  0x75   :  { %v21150_v0 = vpack.c.bf16 %v708_v59, %v707_v58  ;;  %v21348_v58 = vpack.c.bf16 %v724_v51, %v723_v50  ;;  %v21350_v59 = vpack.c.bf16 %v15615_v53, %v15614_v52  ;;  %v21472_v50 = vpack.c.bf16 %v738_v39, %v737_v38  ;;  %v739_v52 = vld [vmem:[%s27429_s0 + $0x112] sm:$0xff]  ;;  %v740_v53 = vld [vmem:[%s27429_s0 + $0x11a] sm:$0xff]  ;;  %v1423_v38 = vld [vmem:[%s27429_s0 + $0x63] sm:$0xff] }
  0x76   :  { %v1424_v39 = vld [vmem:[%s27429_s0 + $0x6b] sm:$0xff] }
  0x7a   :  { %17515 = vmatmul.mubr.msk.bf16.gmra.mrb[16].mxu0 %vm218_vm0, %v114_v4  ;;  %v21160_v4 = vpack.c.bf16 %v710_v63, %v709_v62  ;;  %v727_v62 = vld [vmem:[%s27429_s0 + $0xb2] sm:$0xff]  ;;  %v728_v63 = vld [vmem:[%s27429_s0 + $0xba] sm:$0xff] }
  0x7b   :  { %17911 = vmatmul.mubr.msk.bf16.gmra.mrb[16].mxu1 %vm218_vm0, %v3265_v5  ;;  %17518 = vmatprep.mubr.msk.bf16.mxu0 %vm218_vm0, %v115_v6  ;;  %v21162_v5 = vpack.c.bf16 %v15601_v2, %v15600_v1  ;;  %v20212_v6 = vld [vmem:[%s27428_s1 + $0x68] sm:$0xff]   ;;  %v15618_v1 = vld [vmem:[%s27429_s0 + $0x1fa] sm:$0xff] }
  0x7c   :  { %17914 = vmatprep.mubr.msk.bf16.mxu1 %vm218_vm0, %v3266_v7  ;;  %v711_v7 = vld [vmem:[%s27429_s0 + $0x32] sm:$0xff]  ;;  %v15619_v2 = vld [vmem:[%s27429_s0 + $0x202] sm:$0xff] }
  0x82   :  { %17519 = vmatmul.mubr.msk.bf16.gmra.mrb[20].mxu0 %vm218_vm0, %v116_v18  ;;  %v21210_v18 = vpack.c.bf16 %v712_v10, %v711_v7  ;;  %v730_v7 = vld [vmem:[%s27429_s0 + $0xca] sm:$0xff]  ;;  %v15621_v10 = vld [vmem:[%s27429_s0 + $0x212] sm:$0xff] }
  0x83   :  { %17915 = vmatmul.mubr.msk.bf16.gmra.mrb[20].mxu1 %vm218_vm0, %v3267_v19  ;;  %17522 = vmatprep.mubr.msk.bf16.mxu0 %vm218_vm0, %v117_v20  ;;  %v21212_v19 = vpack.c.bf16 %v15603_v12, %v15602_v11  ;;  %v21388_v11 = vpack.c.bf16 %v728_v63, %v727_v62  ;;  %v21390_v12 = vpack.c.bf16 %v15619_v2, %v15618_v1  ;;  %v20220_v62 = vld [vmem:[%s27428_s1 + $0x88] sm:$0xff]   ;;  %v1417_v1 = vld [vmem:[%s27429_s0 + $0x33] sm:$0xff]  ;;  %v1418_v2 = vld [vmem:[%s27429_s0 + $0x3b] sm:$0xff] }
  0x84   :  { %17918 = vmatprep.mubr.msk.bf16.mxu1 %vm218_vm0, %v3268_v21  ;;  %v20221_v63 = vld [vmem:[%s27428_s1 + $0x88] sm:$0xff]  }
  0x8a   :  { %17523 = vmatmul.mubr.msk.bf16.gmra.mrb[24].mxu0 %vm218_vm0, %v118_v28  ;;  %v15608_v28 = vld [vmem:[%s27429_s0 + $0x1aa] sm:$0xff] }
  0x8b   :  { %17919 = vmatmul.mubr.msk.bf16.gmra.mrb[24].mxu1 %vm218_vm0, %v3269_v29  ;;  %17526 = vmatprep.mubr.msk.bf16.mxu0 %vm218_vm0, %v119_v30  ;;  %v15609_v29 = vld [vmem:[%s27429_s0 + $0x1b2] sm:$0xff]  ;;  %v21259_v30 = vld [vmem:[%s27428_s1 + $0x80] sm:$0xff]  }
  0x8c   :  { %17922 = vmatprep.mubr.msk.bf16.mxu1 %vm218_vm0, %v3270_v31  ;;  %v21261_v31 = vpack.c.bf16 %v716_v24, %v715_v9  ;;  %v21272_v35 = vpack.c.bf16 %v15609_v29, %v15608_v28  ;;  %v15624_v9 = vld [vmem:[%s27429_s0 + $0x22a] sm:$0xff]  ;;  %v15625_v24 = vld [vmem:[%s27429_s0 + $0x232] sm:$0xff]  ;;  %v736_v29 = vld [vmem:[%s27429_s0 + $0xfa] sm:$0xff] }
  0x8d   :  { %v21434_v27 = vpack.c.bf16 %v15625_v24, %v15624_v9  ;;  %v735_v28 = vld [vmem:[%s27429_s0 + $0xf2] sm:$0xff]  ;;  %v15736_v24 = vld [vmem:[%s27429_s0 + $0x19b] sm:$0xff] }
  0x8e   :  { %v20230_v9 = vld [vmem:[%s27428_s1 + $0xb0] sm:$0xff]  }
  0x92   :  { %17527 = vmatmul.mubr.msk.bf16.gmra.mrb[28].mxu0 %vm218_vm0, %v120_v40  ;;  %v721_v40 = vld [vmem:[%s27429_s0 + $0x82] sm:$0xff] }
  0x93   :  { %17923 = vmatmul.mubr.msk.bf16.gmra.mrb[28].mxu1 %vm218_vm0, %v3271_v41  ;;  %17530 = vmatprep.mubr.msk.bf16.mxu0 %vm218_vm0, %v121_v43  ;;  %v722_v41 = vld [vmem:[%s27429_s0 + $0x8a] sm:$0xff] }
  0x94   :  { %17926 = vmatprep.mubr.msk.bf16.mxu1 %vm218_vm0, %v3272_v45  ;;  %v15612_v43 = vld [vmem:[%s27429_s0 + $0x1ca] sm:$0xff]  ;;  %v15613_v45 = vld [vmem:[%s27429_s0 + $0x1d2] sm:$0xff]  ;;  %v21312_v48 = vpack.c.bf16 %v722_v41, %v721_v40 }
  0x95   :  { %v21314_v49 = vpack.c.bf16 %v15613_v45, %v15612_v43  ;;  %v15628_v40 = vld [vmem:[%s27429_s0 + $0x24a] sm:$0xff]  ;;  %v15629_v41 = vld [vmem:[%s27429_s0 + $0x252] sm:$0xff]  ;;  %v21468_v43 = vpack.c.bf16 %v736_v29, %v735_v28  ;;  %v21470_v45 = vpack.c.bf16 %v15627_v37, %v15626_v36 }
  0x96   :  { %v21474_v51 = vpack.c.bf16 %v15629_v41, %v15628_v40  ;;  %v20232_v36 = vld [vmem:[%s27428_s1 + $0xb8] sm:$0xff]   ;;  %v15738_v40 = vld [vmem:[%s27429_s0 + $0x1ab] sm:$0xff] }
  0x97   :  { %v20233_v37 = vld [vmem:[%s27428_s1 + $0xb8] sm:$0xff]  }
  0x98   :  { %v15739_v41 = vld [vmem:[%s27429_s0 + $0x1b3] sm:$0xff] }
  0x9a   :  { %17531 = vmatmul.mubr.msk.bf16.gmra.mrb[32].mxu0 %vm218_vm0, %v122_v54  ;;  %v725_v54 = vld [vmem:[%s27429_s0 + $0xa2] sm:$0xff] }
  0x9b   :  { %17927 = vmatmul.mubr.msk.bf16.gmra.mrb[32].mxu1 %vm218_vm0, %v3273_v55  ;;  %17542 = vmatprep.mubr.msk.bf16.mxu0 %vm218_vm0, %v741_v56  ;;  %v726_v55 = vld [vmem:[%s27429_s0 + $0xaa] sm:$0xff] }
  0x9c   :  { %17938 = vmatprep.mubr.msk.bf16.mxu1 %vm218_vm0, %v3890_v57  ;;  %v15616_v56 = vld [vmem:[%s27429_s0 + $0x1ea] sm:$0xff]  ;;  %v15617_v57 = vld [vmem:[%s27429_s0 + $0x1f2] sm:$0xff]  ;;  %v21352_v60 = vpack.c.bf16 %v726_v55, %v725_v54  ;;  %v15630_v54 = vld [vmem:[%s27429_s0 + $0x25a] sm:$0xff] }
  0x9d   :  { %v21354_v61 = vpack.c.bf16 %v15617_v57, %v15616_v56  ;;  %v15631_v55 = vld [vmem:[%s27429_s0 + $0x262] sm:$0xff]  ;;  %v758_v56 = vpack.c.bf16 %v740_v53, %v739_v52  ;;  %v1454_v53 = vpack.c.bf16 %v1424_v39, %v1423_v38  ;;  %v15758_v38 = vld [vmem:[%s27429_s0 + $0x24b] sm:$0xff]  ;;  %v15759_v39 = vld [vmem:[%s27429_s0 + $0x253] sm:$0xff] }
  0x9e   :  { %v21496_v57 = vpack.c.bf16 %v15631_v55, %v15630_v54  ;;  %v21731_v52 = vld [vmem:[%s27428_s1 + $0xc0] sm:$0xff]   ;;  %v4601_v55 = vpack.c.bf16 %v15739_v41, %v15738_v40  ;;  %v1445_v40 = vld [vmem:[%s27429_s0 + $0x113] sm:$0xff] }
  0x9f   :  { %v21736_v54 = vld [vmem:[%s27428_s1 + $0xc0] sm:$0xff]  }
  0xa0   :  { %v1446_v41 = vld [vmem:[%s27429_s0 + $0x11b] sm:$0xff] }
  0xa2   :  { %17543 = vmatmul.mubr.msk.bf16.vlgmr.msra.gmra.mrb[0].mxu0 %vm218_vm0, %v21150_v0 }
  0xa3   :  { %17939 = vmatmul.mubr.msk.bf16.vlgmr.msra.gmra.mrb[0].mxu1 %vm218_vm0, %v21158_v3  ;;  %17579 = vmatpush3.bf16.msra.mxu0 %v20951_v42  ;;  %v713_v42 = vld [vmem:[%s27429_s0 + $0x42] sm:$0xff] }
  0xa4   :  { %17975 = vmatpush3.bf16.msra.mxu1 %v20956_v44  ;;  %17546 = vmatprep.mubr.msk.bf16.mxu0 %vm218_vm0, %v21160_v4  ;;  %v15604_v44 = vld [vmem:[%s27429_s0 + $0x18a] sm:$0xff]  ;;  %v21214_v20 = vpack.c.bf16 %v714_v14, %v713_v42 }
  0xa5   :  { %17942 = vmatprep.mubr.msk.bf16.mxu1 %vm218_vm0, %v21162_v5  ;;  %17580 = vmatprep.subr.bf16.mxu0 %v20212_v6  ;;  %v21216_v21 = vpack.c.bf16 %v15605_v16, %v15604_v44  ;;  %v732_v44 = vld [vmem:[%s27429_s0 + $0xda] sm:$0xff] }
  0xa6   :  { %17976 = vmatprep.subr.bf16.mxu1 %v20213_v8  ;;  %v15622_v16 = vld [vmem:[%s27429_s0 + $0x21a] sm:$0xff] }
  0xa7   :  { %17581 = vmatpush3.bf16.msra.mxu0 %v20212_v6  ;;  %v729_v6 = vld [vmem:[%s27429_s0 + $0xc2] sm:$0xff] }
  0xa8   :  { %17977 = vmatpush3.bf16.msra.mxu1 %v20213_v8  ;;  %17582 = vmatprep.subr.bf16.mxu0 %v20214_v15  ;;  %v15620_v8 = vld [vmem:[%s27429_s0 + $0x20a] sm:$0xff]  ;;  %v21392_v42 = vpack.c.bf16 %v730_v7, %v729_v6  ;;  %v15732_v7 = vld [vmem:[%s27429_s0 + $0x17b] sm:$0xff] }
  0xa9   :  { %17978 = vmatprep.subr.bf16.mxu1 %v20215_v17  ;;  %v21394_v14 = vpack.c.bf16 %v15621_v10, %v15620_v8  ;;  %v15733_v8 = vld [vmem:[%s27429_s0 + $0x183] sm:$0xff] }
  0xaa   :  { %17547 = vmatmul.mubr.msk.bf16.gmra.mrb[4].mxu0 %vm218_vm0, %v21210_v18 }
  0xab   :  { %17943 = vmatmul.mubr.msk.bf16.gmra.mrb[4].mxu1 %vm218_vm0, %v21212_v19  ;;  %17550 = vmatprep.mubr.msk.bf16.mxu0 %vm218_vm0, %v21214_v20 }
  0xac   :  { %17946 = vmatprep.mubr.msk.bf16.mxu1 %vm218_vm0, %v21216_v21  ;;  %17583 = vmatpush3.bf16.msra.mxu0 %v20214_v15  ;;  %v731_v15 = vld [vmem:[%s27429_s0 + $0xd2] sm:$0xff] }
  0xad   :  { %17979 = vmatpush3.bf16.msra.mxu1 %v20215_v17  ;;  %17584 = vmatprep.subr.bf16.mxu0 %v20216_v22  ;;  %v15623_v17 = vld [vmem:[%s27429_s0 + $0x222] sm:$0xff]  ;;  %v21428_v25 = vpack.c.bf16 %v732_v44, %v731_v15  ;;  %v1420_v44 = vld [vmem:[%s27429_s0 + $0x4b] sm:$0xff] }
  0xae   :  { %17980 = vmatprep.subr.bf16.mxu1 %v20217_v23  ;;  %v21430_v13 = vpack.c.bf16 %v15623_v17, %v15622_v16  ;;  %v20229_v15 = vld [vmem:[%s27428_s1 + $0xa8] sm:$0xff]   ;;  %v15735_v17 = vld [vmem:[%s27429_s0 + $0x193] sm:$0xff] }
  0xaf   :  { %v15734_v16 = vld [vmem:[%s27429_s0 + $0x18b] sm:$0xff] }
  0xb0   :  { %17585 = vmatpush3.bf16.msra.mxu0 %v20216_v22  ;;  %v733_v22 = vld [vmem:[%s27429_s0 + $0xe2] sm:$0xff] }
  0xb1   :  { %17981 = vmatpush3.bf16.msra.mxu1 %v20217_v23  ;;  %17622 = vmatprep.subr.bf16.mxu0 %v21259_v30  ;;  %v734_v23 = vld [vmem:[%s27429_s0 + $0xea] sm:$0xff] }
  0xb2   :  { %17551 = vmatmul.mubr.msk.bf16.gmra.mrb[8].mxu0 %vm218_vm0, %v21261_v31  ;;  %18018 = vmatprep.subr.bf16.mxu1 %v21266_v32  ;;  %v21432_v26 = vpack.c.bf16 %v734_v23, %v733_v22  ;;  %v1421_v22 = vld [vmem:[%s27429_s0 + $0x53] sm:$0xff]  ;;  %v1422_v23 = vld [vmem:[%s27429_s0 + $0x5b] sm:$0xff] }
  0xb3   :  { %17947 = vmatmul.mubr.msk.bf16.gmra.mrb[8].mxu1 %vm218_vm0, %v21268_v33  ;;  %17554 = vmatprep.mubr.msk.bf16.mxu0 %vm218_vm0, %v21270_v34  ;;  %v1453_v28 = vpack.c.bf16 %v1422_v23, %v1421_v22  ;;  %v15754_v22 = vld [vmem:[%s27429_s0 + $0x22b] sm:$0xff]  ;;  %v15755_v23 = vld [vmem:[%s27429_s0 + $0x233] sm:$0xff] }
  0xb4   :  { %17950 = vmatprep.mubr.msk.bf16.mxu1 %vm218_vm0, %v21272_v35 }
  0xba   :  { %17555 = vmatmul.mubr.msk.bf16.gmra.mrb[12].mxu0 %vm218_vm0, %v21308_v46 }
  0xbb   :  { %17951 = vmatmul.mubr.msk.bf16.gmra.mrb[12].mxu1 %vm218_vm0, %v21310_v47  ;;  %17558 = vmatprep.mubr.msk.bf16.mxu0 %vm218_vm0, %v21312_v48 }
  0xbc   :  { %17954 = vmatprep.mubr.msk.bf16.mxu1 %vm218_vm0, %v21314_v49 }
  0xc2   :  { %17559 = vmatmul.mubr.msk.bf16.gmra.mrb[16].mxu0 %vm218_vm0, %v21348_v58 }
  0xc3   :  { %17955 = vmatmul.mubr.msk.bf16.gmra.mrb[16].mxu1 %vm218_vm0, %v21350_v59  ;;  %17562 = vmatprep.mubr.msk.bf16.mxu0 %vm218_vm0, %v21352_v60 }
  0xc4   :  { %17958 = vmatprep.mubr.msk.bf16.mxu1 %vm218_vm0, %v21354_v61 }
  0xca   :  { %17563 = vmatmul.mubr.msk.bf16.gmra.mrb[20].mxu0 %vm218_vm0, %v21388_v11 }
  0xcb   :  { %17959 = vmatmul.mubr.msk.bf16.gmra.mrb[20].mxu1 %vm218_vm0, %v21390_v12  ;;  %17566 = vmatprep.mubr.msk.bf16.mxu0 %vm218_vm0, %v21392_v42 }
  0xcc   :  { %17962 = vmatprep.mubr.msk.bf16.mxu1 %vm218_vm0, %v21394_v14 }
  0xd2   :  { %17567 = vmatmul.mubr.msk.bf16.gmra.mrb[24].mxu0 %vm218_vm0, %v21428_v25 }
  0xd3   :  { %17963 = vmatmul.mubr.msk.bf16.gmra.mrb[24].mxu1 %vm218_vm0, %v21430_v13  ;;  %17570 = vmatprep.mubr.msk.bf16.mxu0 %vm218_vm0, %v21432_v26 }
  0xd4   :  { %17966 = vmatprep.mubr.msk.bf16.mxu1 %vm218_vm0, %v21434_v27 }
  0xda   :  { %17571 = vmatmul.mubr.msk.bf16.gmra.mrb[28].mxu0 %vm218_vm0, %v21468_v43 }
  0xdb   :  { %17967 = vmatmul.mubr.msk.bf16.gmra.mrb[28].mxu1 %vm218_vm0, %v21470_v45  ;;  %17574 = vmatprep.mubr.msk.bf16.mxu0 %vm218_vm0, %v21472_v50 }
  0xdc   :  { %17970 = vmatprep.mubr.msk.bf16.mxu1 %vm218_vm0, %v21474_v51 }
  0xe2   :  { %17575 = vmatmul.mubr.msk.bf16.gmra.mrb[32].mxu0 %vm218_vm0, %v758_v56 }
  0xe3   :  { %17971 = vmatmul.mubr.msk.bf16.gmra.mrb[32].mxu1 %vm218_vm0, %v21496_v57  ;;  %17586 = vmatprep.mubr.msk.bf16.mxu0 %vm218_vm0, %v21150_v0  ;;  %v20222_v0 = vld [vmem:[%s27428_s1 + $0x90] sm:$0xff]  }
  0xe4   :  { %17982 = vmatprep.mubr.msk.bf16.mxu1 %vm218_vm0, %v21158_v3  ;;  %v20223_v3 = vld [vmem:[%s27428_s1 + $0x90] sm:$0xff]  }
  0xea   :  { %17587 = vmatmul.mubr.msk.bf16.vlgmr.msra.gmra.mrb[0].mxu0 %vm218_vm0, %v21160_v4  ;;  %v20224_v4 = vld [vmem:[%s27428_s1 + $0x98] sm:$0xff]  }
  0xeb   :  { %17983 = vmatmul.mubr.msk.bf16.vlgmr.msra.gmra.mrb[0].mxu1 %vm218_vm0, %v21162_v5  ;;  %17623 = vmatpush3.bf16.msra.mxu0 %v21259_v30  ;;  %v20225_v5 = vld [vmem:[%s27428_s1 + $0x98] sm:$0xff]   ;;  %v15696_v30 = vld [vmem:[%s27429_s0 + $0x26a] sm:$0xff] }
  0xec   :  { %18019 = vmatpush3.bf16.msra.mxu1 %v21266_v32  ;;  %17590 = vmatprep.mubr.msk.bf16.mxu0 %vm218_vm0, %v21210_v18  ;;  %v21544_v18 = vld [vmem:[%s27428_s1 + $0xa0] sm:$0xff]   ;;  %v1413_v32 = vld [vmem:[%s27429_s0 + $0x13] sm:$0xff] }
  0xed   :  { %17986 = vmatprep.mubr.msk.bf16.mxu1 %vm218_vm0, %v21212_v19  ;;  %17624 = vmatprep.subr.bf16.mxu0 %v20220_v62  ;;  %v21549_v19 = vld [vmem:[%s27428_s1 + $0xa0] sm:$0xff]  }
  0xee   :  { %18020 = vmatprep.subr.bf16.mxu1 %v20221_v63 }
  0xef   :  { %17625 = vmatpush3.bf16.msra.mxu0 %v20220_v62  ;;  %v1427_v62 = vld [vmem:[%s27429_s0 + $0x83] sm:$0xff] }
  0xf0   :  { %18021 = vmatpush3.bf16.msra.mxu1 %v20221_v63  ;;  %17626 = vmatprep.subr.bf16.mxu0 %v20222_v0  ;;  %v1428_v63 = vld [vmem:[%s27429_s0 + $0x8b] sm:$0xff] }
  0xf1   :  { %18022 = vmatprep.subr.bf16.mxu1 %v20223_v3 }
  0xf2   :  { %17591 = vmatmul.mubr.msk.bf16.gmra.mrb[4].mxu0 %vm218_vm0, %v21214_v20  ;;  %v1093_v20 = vld [vmem:[%s27429_s0 + $0x122] sm:$0xff] }
  0xf3   :  { %17987 = vmatmul.mubr.msk.bf16.gmra.mrb[4].mxu1 %vm218_vm0, %v21216_v21  ;;  %17594 = vmatprep.mubr.msk.bf16.mxu0 %vm218_vm0, %v21261_v31  ;;  %v1094_v21 = vld [vmem:[%s27429_s0 + $0x12a] sm:$0xff]  ;;  %v15697_v31 = vld [vmem:[%s27429_s0 + $0x272] sm:$0xff] }
  0xf4   :  { %17990 = vmatprep.mubr.msk.bf16.mxu1 %vm218_vm0, %v21268_v33  ;;  %17627 = vmatpush3.bf16.msra.mxu0 %v20222_v0  ;;  %v1414_v33 = vld [vmem:[%s27429_s0 + $0x1b] sm:$0xff]  ;;  %v15742_v0 = vld [vmem:[%s27429_s0 + $0x1cb] sm:$0xff] }
  0xf5   :  { %18023 = vmatpush3.bf16.msra.mxu1 %v20223_v3  ;;  %17628 = vmatprep.subr.bf16.mxu0 %v20224_v4  ;;  %v15743_v3 = vld [vmem:[%s27429_s0 + $0x1d3] sm:$0xff] }
  0xf6   :  { %18024 = vmatprep.subr.bf16.mxu1 %v20225_v5 }
  0xf8   :  { %17629 = vmatpush3.bf16.msra.mxu0 %v20224_v4  ;;  %v1429_v4 = vld [vmem:[%s27429_s0 + $0x93] sm:$0xff] }
  0xf9   :  { %18025 = vmatpush3.bf16.msra.mxu1 %v20225_v5  ;;  %17666 = vmatprep.subr.bf16.mxu0 %v21544_v18  ;;  %v1430_v5 = vld [vmem:[%s27429_s0 + $0x9b] sm:$0xff] }
  0xfa   :  { %17595 = vmatmul.mubr.msk.bf16.gmra.mrb[8].mxu0 %vm218_vm0, %v21270_v34  ;;  %18062 = vmatprep.subr.bf16.mxu1 %v21549_v19  ;;  %v15728_v34 = vld [vmem:[%s27429_s0 + $0x15b] sm:$0xff] }
  0xfb   :  { %17991 = vmatmul.mubr.msk.bf16.gmra.mrb[8].mxu1 %vm218_vm0, %v21272_v35  ;;  %17598 = vmatprep.mubr.msk.bf16.mxu0 %vm218_vm0, %v21308_v46  ;;  %v15729_v35 = vld [vmem:[%s27429_s0 + $0x163] sm:$0xff]  ;;  %v1112_v46 = vpack.c.bf16 %v1094_v21, %v1093_v20  ;;  %v1456_v20 = vpack.c.bf16 %v1428_v63, %v1427_v62  ;;  %v4603_v21 = vpack.c.bf16 %v15743_v3, %v15742_v0  ;;  %v15762_v62 = vld [vmem:[%s27429_s0 + $0x26b] sm:$0xff]  ;;  %v15763_v63 = vld [vmem:[%s27429_s0 + $0x273] sm:$0xff] }
  0xfc   :  { %17994 = vmatprep.mubr.msk.bf16.mxu1 %vm218_vm0, %v21310_v47  ;;  %v4260_v47 = vpack.c.bf16 %v15697_v31, %v15696_v30  ;;  %v1457_v30 = vpack.c.bf16 %v1430_v5, %v1429_v4  ;;  %v1767_v0 = vld [vmem:[%s27429_s0 + $0x14] sm:$0xff]  ;;  %v1768_v3 = vld [vmem:[%s27429_s0 + $0x1c] sm:$0xff]  ;;  %v15795_v5 = vld [vmem:[%s27429_s0 + $0x164] sm:$0xff] }
  0xfd   :  { %v15794_v4 = vld [vmem:[%s27429_s0 + $0x15c] sm:$0xff] }
 0x102   :  { %17599 = vmatmul.mubr.msk.bf16.gmra.mrb[12].mxu0 %vm218_vm0, %v21312_v48  ;;  %v1449_v48 = vpack.c.bf16 %v1414_v33, %v1413_v32  ;;  %v1431_v32 = vld [vmem:[%s27429_s0 + $0xa3] sm:$0xff]  ;;  %v1432_v33 = vld [vmem:[%s27429_s0 + $0xab] sm:$0xff] }
 0x103   :  { %17995 = vmatmul.mubr.msk.bf16.gmra.mrb[12].mxu1 %vm218_vm0, %v21314_v49  ;;  %17602 = vmatprep.mubr.msk.bf16.mxu0 %vm218_vm0, %v21348_v58  ;;  %v4596_v49 = vpack.c.bf16 %v15729_v35, %v15728_v34  ;;  %v1415_v58 = vld [vmem:[%s27429_s0 + $0x23] sm:$0xff]  ;;  %v15746_v34 = vld [vmem:[%s27429_s0 + $0x1eb] sm:$0xff]  ;;  %v15747_v35 = vld [vmem:[%s27429_s0 + $0x1f3] sm:$0xff] }
 0x104   :  { %17998 = vmatprep.mubr.msk.bf16.mxu1 %vm218_vm0, %v21350_v59  ;;  %v1416_v59 = vld [vmem:[%s27429_s0 + $0x2b] sm:$0xff] }
 0x105   :  { %v1450_v6 = vpack.c.bf16 %v1416_v59, %v1415_v58  ;;  %v1458_v58 = vpack.c.bf16 %v1432_v33, %v1431_v32  ;;  %v4605_v59 = vpack.c.bf16 %v15747_v35, %v15746_v34  ;;  %v15796_v32 = vld [vmem:[%s27429_s0 + $0x16c] sm:$0xff]  ;;  %v15797_v33 = vld [vmem:[%s27429_s0 + $0x174] sm:$0xff]  ;;  %v1772_v35 = vld [vmem:[%s27429_s0 + $0x3c] sm:$0xff] }
 0x106   :  { %v1771_v34 = vld [vmem:[%s27429_s0 + $0x34] sm:$0xff] }
 0x10a   :  { %17603 = vmatmul.mubr.msk.bf16.gmra.mrb[16].mxu0 %vm218_vm0, %v21352_v60  ;;  %v15730_v60 = vld [vmem:[%s27429_s0 + $0x16b] sm:$0xff] }
 0x10b   :  { %17999 = vmatmul.mubr.msk.bf16.gmra.mrb[16].mxu1 %vm218_vm0, %v21354_v61  ;;  %17606 = vmatprep.mubr.msk.bf16.mxu0 %vm218_vm0, %v21388_v11  ;;  %v15731_v61 = vld [vmem:[%s27429_s0 + $0x173] sm:$0xff]  ;;  %v1451_v11 = vpack.c.bf16 %v1418_v2, %v1417_v1  ;;  %v1435_v1 = vld [vmem:[%s27429_s0 + $0xc3] sm:$0xff]  ;;  %v1436_v2 = vld [vmem:[%s27429_s0 + $0xcb] sm:$0xff] }
 0x10c   :  { %18002 = vmatprep.mubr.msk.bf16.mxu1 %vm218_vm0, %v21390_v12  ;;  %v4597_v10 = vpack.c.bf16 %v15731_v61, %v15730_v60  ;;  %v4598_v12 = vpack.c.bf16 %v15733_v8, %v15732_v7  ;;  %v15751_v7 = vld [vmem:[%s27429_s0 + $0x213] sm:$0xff] }
 0x10d   :  { %v1437_v8 = vld [vmem:[%s27429_s0 + $0xd3] sm:$0xff] }
 0x112   :  { %17607 = vmatmul.mubr.msk.bf16.gmra.mrb[20].mxu0 %vm218_vm0, %v21392_v42  ;;  %v20228_v42 = vld [vmem:[%s27428_s1 + $0xa8] sm:$0xff]  }
 0x113   :  { %18003 = vmatmul.mubr.msk.bf16.gmra.mrb[20].mxu1 %vm218_vm0, %v21394_v14  ;;  %17610 = vmatprep.mubr.msk.bf16.mxu0 %vm218_vm0, %v21428_v25  ;;  %v1419_v14 = vld [vmem:[%s27429_s0 + $0x43] sm:$0xff] }
 0x114   :  { %18006 = vmatprep.mubr.msk.bf16.mxu1 %vm218_vm0, %v21430_v13  ;;  %v15737_v25 = vld [vmem:[%s27429_s0 + $0x1a3] sm:$0xff]  ;;  %v20231_v13 = vld [vmem:[%s27428_s1 + $0xb0] sm:$0xff]  }
 0x115   :  { %v4600_v29 = vpack.c.bf16 %v15737_v25, %v15736_v24  ;;  %v1442_v24 = vld [vmem:[%s27429_s0 + $0xfb] sm:$0xff] }
 0x116   :  { %v15756_v25 = vld [vmem:[%s27429_s0 + $0x23b] sm:$0xff] }
 0x11a   :  { %17611 = vmatmul.mubr.msk.bf16.gmra.mrb[24].mxu0 %vm218_vm0, %v21432_v26  ;;  %v1452_v26 = vpack.c.bf16 %v1420_v44, %v1419_v14 }
 0x11b   :  { %18007 = vmatmul.mubr.msk.bf16.gmra.mrb[24].mxu1 %vm218_vm0, %v21434_v27  ;;  %17614 = vmatprep.mubr.msk.bf16.mxu0 %vm218_vm0, %v21468_v43  ;;  %v4599_v27 = vpack.c.bf16 %v15735_v17, %v15734_v16  ;;  %v1425_v43 = vld [vmem:[%s27429_s0 + $0x73] sm:$0xff]  ;;  %v1439_v16 = vld [vmem:[%s27429_s0 + $0xe3] sm:$0xff]  ;;  %v1440_v17 = vld [vmem:[%s27429_s0 + $0xeb] sm:$0xff] }
 0x11c   :  { %18010 = vmatprep.mubr.msk.bf16.mxu1 %vm218_vm0, %v21470_v45  ;;  %v1426_v45 = vld [vmem:[%s27429_s0 + $0x7b] sm:$0xff] }
 0x122   :  { %17615 = vmatmul.mubr.msk.bf16.gmra.mrb[28].mxu0 %vm218_vm0, %v21472_v50  ;;  %v15740_v50 = vld [vmem:[%s27429_s0 + $0x1bb] sm:$0xff] }
 0x123   :  { %18011 = vmatmul.mubr.msk.bf16.gmra.mrb[28].mxu1 %vm218_vm0, %v21474_v51  ;;  %17618 = vmatprep.mubr.msk.bf16.mxu0 %vm218_vm0, %v758_v56  ;;  %v15741_v51 = vld [vmem:[%s27429_s0 + $0x1c3] sm:$0xff]  ;;  %v1455_v56 = vpack.c.bf16 %v1426_v45, %v1425_v43  ;;  %v15760_v43 = vld [vmem:[%s27429_s0 + $0x25b] sm:$0xff] }
 0x124   :  { %18014 = vmatprep.mubr.msk.bf16.mxu1 %vm218_vm0, %v21496_v57  ;;  %v4602_v57 = vpack.c.bf16 %v15741_v51, %v15740_v50  ;;  %v15761_v45 = vld [vmem:[%s27429_s0 + $0x263] sm:$0xff]  ;;  %v4611_v51 = vpack.c.bf16 %v15759_v39, %v15758_v38 }
 0x12a   :  { %17619 = vmatmul.mubr.msk.bf16.gmra.mrb[32].mxu0 %vm218_vm0, %v1112_v46  ;;  %v1433_v46 = vld [vmem:[%s27429_s0 + $0xb3] sm:$0xff] }
 0x12b   :  { %18015 = vmatmul.mubr.msk.bf16.gmra.mrb[32].mxu1 %vm218_vm0, %v4260_v47  ;;  %17630 = vmatprep.mubr.msk.bf16.mxu0 %vm218_vm0, %v1449_v48  ;;  %v1434_v47 = vld [vmem:[%s27429_s0 + $0xbb] sm:$0xff] }
 0x12c   :  { %18026 = vmatprep.mubr.msk.bf16.mxu1 %vm218_vm0, %v4596_v49  ;;  %v15748_v48 = vld [vmem:[%s27429_s0 + $0x1fb] sm:$0xff]  ;;  %v15749_v49 = vld [vmem:[%s27429_s0 + $0x203] sm:$0xff]  ;;  %v1459_v60 = vpack.c.bf16 %v1434_v47, %v1433_v46 }
 0x12d   :  { %v4606_v61 = vpack.c.bf16 %v15749_v49, %v15748_v48  ;;  %v15798_v47 = vld [vmem:[%s27429_s0 + $0x17c] sm:$0xff]  ;;  %v15799_v48 = vld [vmem:[%s27429_s0 + $0x184] sm:$0xff]  ;;  %v21938_v49 = vpack.c.bf16 %v15797_v33, %v15796_v32 }
 0x132   :  { %17631 = vmatmul.mubr.msk.bf16.vlgmr.msra.gmra.mrb[0].mxu0 %vm218_vm0, %v1450_v6  ;;  %v15750_v6 = vld [vmem:[%s27429_s0 + $0x20b] sm:$0xff] }
 0x133   :  { %18027 = vmatmul.mubr.msk.bf16.vlgmr.msra.gmra.mrb[0].mxu1 %vm218_vm0, %v4597_v10  ;;  %17667 = vmatpush3.bf16.msra.mxu0 %v21544_v18  ;;  %v15744_v18 = vld [vmem:[%s27429_s0 + $0x1db] sm:$0xff]  ;;  %v4607_v14 = vpack.c.bf16 %v15751_v7, %v15750_v6  ;;  %v15800_v6 = vld [vmem:[%s27429_s0 + $0x18c] sm:$0xff] }
 0x134   :  { %18063 = vmatpush3.bf16.msra.mxu1 %v21549_v19  ;;  %17634 = vmatprep.mubr.msk.bf16.mxu0 %vm218_vm0, %v1451_v11  ;;  %v15745_v19 = vld [vmem:[%s27429_s0 + $0x1e3] sm:$0xff]  ;;  %v1438_v10 = vld [vmem:[%s27429_s0 + $0xdb] sm:$0xff] }
 0x135   :  { %18030 = vmatprep.mubr.msk.bf16.mxu1 %vm218_vm0, %v4598_v12  ;;  %17668 = vmatprep.subr.bf16.mxu0 %v20228_v42  ;;  %v4604_v31 = vpack.c.bf16 %v15745_v19, %v15744_v18  ;;  %v15752_v11 = vld [vmem:[%s27429_s0 + $0x21b] sm:$0xff]  ;;  %v15753_v12 = vld [vmem:[%s27429_s0 + $0x223] sm:$0xff]  ;;  %v4613_v19 = vpack.c.bf16 %v15763_v63, %v15762_v62 }
 0x136   :  { %18064 = vmatprep.subr.bf16.mxu1 %v20229_v15  ;;  %v4608_v44 = vpack.c.bf16 %v15753_v12, %v15752_v11  ;;  %v15801_v7 = vld [vmem:[%s27429_s0 + $0x194] sm:$0xff]  ;;  %v15803_v11 = vld [vmem:[%s27429_s0 + $0x1a4] sm:$0xff] }
 0x137   :  { %17669 = vmatpush3.bf16.msra.mxu0 %v20228_v42  ;;  %v1460_v42 = vpack.c.bf16 %v1436_v2, %v1435_v1  ;;  %v20237_v1 = vld [vmem:[%s27428_s1 + $0xc8] sm:$0xff]   ;;  %v20239_v12 = vld [vmem:[%s27428_s1 + $0xd0] sm:$0xff]  }
 0x138   :  { %18065 = vmatpush3.bf16.msra.mxu1 %v20229_v15  ;;  %17670 = vmatprep.subr.bf16.mxu0 %v20230_v9  ;;  %v1461_v15 = vpack.c.bf16 %v1438_v10, %v1437_v8  ;;  %v1774_v2 = vld [vmem:[%s27429_s0 + $0x4c] sm:$0xff]  ;;  %v1776_v8 = vld [vmem:[%s27429_s0 + $0x5c] sm:$0xff] }
 0x139   :  { %18066 = vmatprep.subr.bf16.mxu1 %v20231_v13  ;;  %v20238_v10 = vld [vmem:[%s27428_s1 + $0xd0] sm:$0xff]  }
 0x13a   :  { %17635 = vmatmul.mubr.msk.bf16.gmra.mrb[4].mxu0 %vm218_vm0, %v1452_v26  ;;  %v1462_v26 = vpack.c.bf16 %v1440_v17, %v1439_v16  ;;  %v20240_v16 = vld [vmem:[%s27428_s1 + $0xd8] sm:$0xff]  }
 0x13b   :  { %18031 = vmatmul.mubr.msk.bf16.gmra.mrb[4].mxu1 %vm218_vm0, %v4599_v27  ;;  %17638 = vmatprep.mubr.msk.bf16.mxu0 %vm218_vm0, %v1453_v28  ;;  %v4609_v27 = vpack.c.bf16 %v15755_v23, %v15754_v22  ;;  %v20241_v17 = vld [vmem:[%s27428_s1 + $0xd8] sm:$0xff]   ;;  %v1777_v22 = vld [vmem:[%s27429_s0 + $0x64] sm:$0xff]  ;;  %v1778_v23 = vld [vmem:[%s27429_s0 + $0x6c] sm:$0xff] }
 0x13c   :  { %18034 = vmatprep.mubr.msk.bf16.mxu1 %vm218_vm0, %v4600_v29  ;;  %17671 = vmatpush3.bf16.msra.mxu0 %v20230_v9  ;;  %v1441_v9 = vld [vmem:[%s27429_s0 + $0xf3] sm:$0xff] }
 0x13d   :  { %18067 = vmatpush3.bf16.msra.mxu1 %v20231_v13  ;;  %17672 = vmatprep.subr.bf16.mxu0 %v20232_v36  ;;  %v15757_v13 = vld [vmem:[%s27429_s0 + $0x243] sm:$0xff]  ;;  %v1463_v28 = vpack.c.bf16 %v1442_v24, %v1441_v9  ;;  %v15804_v9 = vld [vmem:[%s27429_s0 + $0x1ac] sm:$0xff]  ;;  %v15805_v24 = vld [vmem:[%s27429_s0 + $0x1b4] sm:$0xff] }
 0x13e   :  { %18068 = vmatprep.subr.bf16.mxu1 %v20233_v37  ;;  %v4610_v29 = vpack.c.bf16 %v15757_v13, %v15756_v25  ;;  %v1779_v25 = vld [vmem:[%s27429_s0 + $0x74] sm:$0xff]  ;;  %v1780_v13 = vld [vmem:[%s27429_s0 + $0x7c] sm:$0xff] }
 0x13f   :  { %v22050_v38 = vpack.c.bf16 %v1780_v13, %v1779_v25 }
 0x140   :  { %17673 = vmatpush3.bf16.msra.mxu0 %v20232_v36  ;;  %v1443_v36 = vld [vmem:[%s27429_s0 + $0x103] sm:$0xff] }
 0x141   :  { %18069 = vmatpush3.bf16.msra.mxu1 %v20233_v37  ;;  %17710 = vmatprep.subr.bf16.mxu0 %v21731_v52  ;;  %v1444_v37 = vld [vmem:[%s27429_s0 + $0x10b] sm:$0xff] }
 0x142   :  { %17639 = vmatmul.mubr.msk.bf16.gmra.mrb[8].mxu0 %vm218_vm0, %v1454_v53  ;;  %18106 = vmatprep.subr.bf16.mxu1 %v21736_v54  ;;  %v1464_v50 = vpack.c.bf16 %v1444_v37, %v1443_v36  ;;  %v1465_v53 = vpack.c.bf16 %v1446_v41, %v1445_v40  ;;  %v22046_v36 = vld [vmem:[%s27428_s1 + $0xe0] sm:$0xff]   ;;  %v22048_v37 = vpack.c.bf16 %v15805_v24, %v15804_v9  ;;  %v1782_v41 = vld [vmem:[%s27429_s0 + $0x8c] sm:$0xff] }
 0x143   :  { %18035 = vmatmul.mubr.msk.bf16.gmra.mrb[8].mxu1 %vm218_vm0, %v4601_v55  ;;  %17642 = vmatprep.mubr.msk.bf16.mxu0 %vm218_vm0, %v1455_v56  ;;  %v4612_v55 = vpack.c.bf16 %v15761_v45, %v15760_v43  ;;  %v1447_v56 = vld [vmem:[%s27429_s0 + $0x123] sm:$0xff]  ;;  %v15808_v43 = vld [vmem:[%s27429_s0 + $0x1cc] sm:$0xff]  ;;  %v15809_v45 = vld [vmem:[%s27429_s0 + $0x1d4] sm:$0xff] }
 0x144   :  { %18038 = vmatprep.mubr.msk.bf16.mxu1 %vm218_vm0, %v4602_v57  ;;  %v1448_v57 = vld [vmem:[%s27429_s0 + $0x12b] sm:$0xff] }
 0x145   :  { %v1466_v18 = vpack.c.bf16 %v1448_v57, %v1447_v56  ;;  %v1781_v40 = vld [vmem:[%s27429_s0 + $0x84] sm:$0xff]  ;;  %v22090_v57 = vpack.c.bf16 %v15809_v45, %v15808_v43  ;;  %v1799_v43 = vld [vmem:[%s27429_s0 + $0x114] sm:$0xff]  ;;  %v1800_v45 = vld [vmem:[%s27429_s0 + $0x11c] sm:$0xff] }
 0x146   :  { %v22088_v56 = vpack.c.bf16 %v1782_v41, %v1781_v40  ;;  %v15824_v40 = vld [vmem:[%s27429_s0 + $0x24c] sm:$0xff]  ;;  %v15825_v41 = vld [vmem:[%s27429_s0 + $0x254] sm:$0xff] }
 0x14a   :  { %17643 = vmatmul.mubr.msk.bf16.gmra.mrb[12].mxu0 %vm218_vm0, %v1456_v20  ;;  %v1803_v20 = vpack.c.bf16 %v1768_v3, %v1767_v0  ;;  %v1785_v0 = vld [vmem:[%s27429_s0 + $0xa4] sm:$0xff]  ;;  %v1786_v3 = vld [vmem:[%s27429_s0 + $0xac] sm:$0xff] }
 0x14b   :  { %18039 = vmatmul.mubr.msk.bf16.gmra.mrb[12].mxu1 %vm218_vm0, %v4603_v21  ;;  %17646 = vmatprep.mubr.msk.bf16.mxu0 %vm218_vm0, %v1457_v30  ;;  %v4949_v21 = vpack.c.bf16 %v15795_v5, %v15794_v4  ;;  %v1769_v30 = vld [vmem:[%s27429_s0 + $0x24] sm:$0xff]  ;;  %v15812_v4 = vld [vmem:[%s27429_s0 + $0x1ec] sm:$0xff]  ;;  %v15813_v5 = vld [vmem:[%s27429_s0 + $0x1f4] sm:$0xff] }
 0x14c   :  { %18042 = vmatprep.mubr.msk.bf16.mxu1 %vm218_vm0, %v4604_v31  ;;  %v1770_v31 = vld [vmem:[%s27429_s0 + $0x2c] sm:$0xff] }
 0x14d   :  { %v21930_v46 = vpack.c.bf16 %v1770_v31, %v1769_v30  ;;  %v22128_v30 = vpack.c.bf16 %v1786_v3, %v1785_v0  ;;  %v22130_v31 = vpack.c.bf16 %v15813_v5, %v15812_v4  ;;  %v22252_v0 = vpack.c.bf16 %v1800_v45, %v1799_v43  ;;  %v1801_v4 = vld [vmem:[%s27429_s0 + $0x124] sm:$0xff]  ;;  %v1802_v5 = vld [vmem:[%s27429_s0 + $0x12c] sm:$0xff]  ;;  %v2481_v43 = vld [vmem:[%s27429_s0 + $0x55] sm:$0xff] }
 0x14e   :  { %v20252_v45 = vld [vmem:[%s27428_s1 + $0x108] sm:$0xff]  }
 0x152   :  { %17647 = vmatmul.mubr.msk.bf16.gmra.mrb[16].mxu0 %vm218_vm0, %v1458_v58  ;;  %v21940_v58 = vpack.c.bf16 %v1772_v35, %v1771_v34  ;;  %v1789_v34 = vld [vmem:[%s27429_s0 + $0xc4] sm:$0xff]  ;;  %v1790_v35 = vld [vmem:[%s27429_s0 + $0xcc] sm:$0xff] }
 0x153   :  { %18043 = vmatmul.mubr.msk.bf16.gmra.mrb[16].mxu1 %vm218_vm0, %v4605_v59  ;;  %17650 = vmatprep.mubr.msk.bf16.mxu0 %vm218_vm0, %v1459_v60  ;;  %v21942_v59 = vpack.c.bf16 %v15799_v48, %v15798_v47  ;;  %v20236_v60 = vld [vmem:[%s27428_s1 + $0xc8] sm:$0xff]   ;;  %v15817_v48 = vld [vmem:[%s27429_s0 + $0x214] sm:$0xff] }
 0x154   :  { %18046 = vmatprep.mubr.msk.bf16.mxu1 %vm218_vm0, %v4606_v61  ;;  %v1773_v61 = vld [vmem:[%s27429_s0 + $0x44] sm:$0xff]  ;;  %v15816_v47 = vld [vmem:[%s27429_s0 + $0x20c] sm:$0xff] }
 0x15a   :  { %17651 = vmatmul.mubr.msk.bf16.gmra.mrb[20].mxu0 %vm218_vm0, %v1460_v42  ;;  %v21990_v42 = vpack.c.bf16 %v1774_v2, %v1773_v61  ;;  %v1792_v61 = vld [vmem:[%s27429_s0 + $0xdc] sm:$0xff]  ;;  %v15819_v2 = vld [vmem:[%s27429_s0 + $0x224] sm:$0xff] }
 0x15b   :  { %18047 = vmatmul.mubr.msk.bf16.gmra.mrb[20].mxu1 %vm218_vm0, %v4607_v14  ;;  %17654 = vmatprep.mubr.msk.bf16.mxu0 %vm218_vm0, %v1461_v15  ;;  %v21992_v14 = vpack.c.bf16 %v15801_v7, %v15800_v6  ;;  %v22168_v6 = vpack.c.bf16 %v1790_v35, %v1789_v34  ;;  %v22170_v7 = vpack.c.bf16 %v15817_v48, %v15816_v47  ;;  %v20244_v34 = vld [vmem:[%s27428_s1 + $0xe8] sm:$0xff]  }
 0x15c   :  { %18050 = vmatprep.mubr.msk.bf16.mxu1 %vm218_vm0, %v4608_v44  ;;  %v20245_v35 = vld [vmem:[%s27428_s1 + $0xe8] sm:$0xff]  }
 0x15d   :  { %v2475_v47 = vld [vmem:[%s27429_s0 + $0x25] sm:$0xff]  ;;  %v2476_v48 = vld [vmem:[%s27429_s0 + $0x2d] sm:$0xff] }
 0x162   :  { %17655 = vmatmul.mubr.msk.bf16.gmra.mrb[24].mxu0 %vm218_vm0, %v1462_v26  ;;  %v15806_v26 = vld [vmem:[%s27429_s0 + $0x1bc] sm:$0xff] }
 0x163   :  { %18051 = vmatmul.mubr.msk.bf16.gmra.mrb[24].mxu1 %vm218_vm0, %v4609_v27  ;;  %17658 = vmatprep.mubr.msk.bf16.mxu0 %vm218_vm0, %v1463_v28  ;;  %v15807_v27 = vld [vmem:[%s27429_s0 + $0x1c4] sm:$0xff] }
 0x164   :  { %18054 = vmatprep.mubr.msk.bf16.mxu1 %vm218_vm0, %v4610_v29  ;;  %v22039_v28 = vld [vmem:[%s27428_s1 + $0xe0] sm:$0xff]   ;;  %v22041_v29 = vpack.c.bf16 %v1778_v23, %v1777_v22  ;;  %v22052_v39 = vpack.c.bf16 %v15807_v27, %v15806_v26  ;;  %v1798_v27 = vld [vmem:[%s27429_s0 + $0x10c] sm:$0xff] }
 0x165   :  { %v15822_v22 = vld [vmem:[%s27429_s0 + $0x23c] sm:$0xff]  ;;  %v15823_v23 = vld [vmem:[%s27429_s0 + $0x244] sm:$0xff] }
 0x166   :  { %v22214_v13 = vpack.c.bf16 %v15823_v23, %v15822_v22  ;;  %v1797_v26 = vld [vmem:[%s27429_s0 + $0x104] sm:$0xff]  ;;  %v2480_v23 = vld [vmem:[%s27429_s0 + $0x4d] sm:$0xff] }
 0x167   :  { %v2479_v22 = vld [vmem:[%s27429_s0 + $0x45] sm:$0xff] }
 0x16a   :  { %17659 = vmatmul.mubr.msk.bf16.gmra.mrb[28].mxu0 %vm218_vm0, %v1464_v50  ;;  %v1783_v50 = vld [vmem:[%s27429_s0 + $0x94] sm:$0xff] }
 0x16b   :  { %18055 = vmatmul.mubr.msk.bf16.gmra.mrb[28].mxu1 %vm218_vm0, %v4611_v51  ;;  %17662 = vmatprep.mubr.msk.bf16.mxu0 %vm218_vm0, %v1465_v53  ;;  %v1784_v51 = vld [vmem:[%s27429_s0 + $0x9c] sm:$0xff] }
 0x16c   :  { %18058 = vmatprep.mubr.msk.bf16.mxu1 %vm218_vm0, %v4612_v55  ;;  %v15810_v53 = vld [vmem:[%s27429_s0 + $0x1dc] sm:$0xff]  ;;  %v15811_v55 = vld [vmem:[%s27429_s0 + $0x1e4] sm:$0xff]  ;;  %v22092_v62 = vpack.c.bf16 %v1784_v51, %v1783_v50 }
 0x16d   :  { %v22094_v63 = vpack.c.bf16 %v15811_v55, %v15810_v53  ;;  %v15826_v50 = vld [vmem:[%s27429_s0 + $0x25c] sm:$0xff]  ;;  %v15827_v51 = vld [vmem:[%s27429_s0 + $0x264] sm:$0xff]  ;;  %v22248_v53 = vpack.c.bf16 %v1798_v27, %v1797_v26  ;;  %v22250_v55 = vpack.c.bf16 %v15825_v41, %v15824_v40  ;;  %v2513_v40 = vpack.c.bf16 %v2480_v23, %v2479_v22 }
 0x16e   :  { %v22254_v3 = vpack.c.bf16 %v15827_v51, %v15826_v50  ;;  %v49_v26 = vld [vmem:[%s27430_s8 + $0x80] sm:$0xff] }
 0x16f   :  { %v2482_v50 = vld [vmem:[%s27429_s0 + $0x5d] sm:$0xff] }
 0x170   :  { %v15932_v51 = vld [vmem:[%s27429_s0 + $0x19d] sm:$0xff] }
 0x171   :  { %v2494_v22 = vld [vmem:[%s27429_s0 + $0xbd] sm:$0xff] }
 0x172   :  { %17663 = vmatmul.mubr.msk.bf16.gmra.mrb[32].mxu0 %vm218_vm0, %v1466_v18  ;;  %v1787_v18 = vld [vmem:[%s27429_s0 + $0xb4] sm:$0xff]  ;;  %v15944_v23 = vld [vmem:[%s27429_s0 + $0x1fd] sm:$0xff] }
 0x173   :  { %18059 = vmatmul.mubr.msk.bf16.gmra.mrb[32].mxu1 %vm218_vm0, %v4613_v19  ;;  %17674 = vmatprep.mubr.msk.bf16.mxu0 %vm218_vm0, %v1803_v20  ;;  %v1788_v19 = vld [vmem:[%s27429_s0 + $0xbc] sm:$0xff] }
 0x174   :  { %18070 = vmatprep.mubr.msk.bf16.mxu1 %vm218_vm0, %v4949_v21  ;;  %v15814_v20 = vld [vmem:[%s27429_s0 + $0x1fc] sm:$0xff]  ;;  %v15815_v21 = vld [vmem:[%s27429_s0 + $0x204] sm:$0xff]  ;;  %v22132_v32 = vpack.c.bf16 %v1788_v19, %v1787_v18  ;;  %v15828_v18 = vld [vmem:[%s27429_s0 + $0x26c] sm:$0xff] }
 0x175   :  { %v22134_v33 = vpack.c.bf16 %v15815_v21, %v15814_v20  ;;  %v15829_v19 = vld [vmem:[%s27429_s0 + $0x274] sm:$0xff]  ;;  %v22276_v20 = vpack.c.bf16 %v1802_v5, %v1801_v4 }
 0x176   :  { %v22278_v21 = vpack.c.bf16 %v15829_v19, %v15828_v18  ;;  %v2484_v4 = vld [vmem:[%s27429_s0 + $0x6d] sm:$0xff] }
 0x177   :  { %v20254_v5 = vld [vmem:[%s27428_s1 + $0x110] sm:$0xff]  }
 0x178   :  { %v51_v18 = vld [vmem:[%s27430_s8 + $0x90] sm:$0xff] }
 0x179   :  { %v15934_v19 = vld [vmem:[%s27429_s0 + $0x1ad] sm:$0xff] }
 0x17a   :  { %17675 = vmatmul.mubr.msk.bf16.vlgmr.msra.gmra.mrb[0].mxu0 %vm218_vm0, %v21930_v46 }
 0x17b   :  { %18071 = vmatmul.mubr.msk.bf16.vlgmr.msra.gmra.mrb[0].mxu1 %vm218_vm0, %v21938_v49  ;;  %17711 = vmatpush3.bf16.msra.mxu0 %v21731_v52  ;;  %v1775_v52 = vld [vmem:[%s27429_s0 + $0x54] sm:$0xff] }
 0x17c   :  { %18107 = vmatpush3.bf16.msra.mxu1 %v21736_v54  ;;  %17678 = vmatprep.mubr.msk.bf16.mxu0 %vm218_vm0, %v21940_v58  ;;  %v15802_v54 = vld [vmem:[%s27429_s0 + $0x19c] sm:$0xff]  ;;  %v21994_v15 = vpack.c.bf16 %v1776_v8, %v1775_v52 }
 0x17d   :  { %18074 = vmatprep.mubr.msk.bf16.mxu1 %vm218_vm0, %v21942_v59  ;;  %17712 = vmatprep.subr.bf16.mxu0 %v20236_v60  ;;  %v21996_v44 = vpack.c.bf16 %v15803_v11, %v15802_v54  ;;  %v1794_v54 = vld [vmem:[%s27429_s0 + $0xec] sm:$0xff] }
 0x17e   :  { %18108 = vmatprep.subr.bf16.mxu1 %v20237_v1  ;;  %v15820_v11 = vld [vmem:[%s27429_s0 + $0x22c] sm:$0xff] }
 0x17f   :  { %17713 = vmatpush3.bf16.msra.mxu0 %v20236_v60  ;;  %v1791_v60 = vld [vmem:[%s27429_s0 + $0xd4] sm:$0xff] }
 0x180   :  { %18109 = vmatpush3.bf16.msra.mxu1 %v20237_v1  ;;  %17714 = vmatprep.subr.bf16.mxu0 %v20238_v10  ;;  %v15818_v1 = vld [vmem:[%s27429_s0 + $0x21c] sm:$0xff]  ;;  %v22172_v52 = vpack.c.bf16 %v1792_v61, %v1791_v60  ;;  %v15926_v60 = vld [vmem:[%s27429_s0 + $0x16d] sm:$0xff] }
 0x181   :  { %18110 = vmatprep.subr.bf16.mxu1 %v20239_v12  ;;  %v22174_v8 = vpack.c.bf16 %v15819_v2, %v15818_v1  ;;  %v15927_v61 = vld [vmem:[%s27429_s0 + $0x175] sm:$0xff] }
 0x182   :  { %17679 = vmatmul.mubr.msk.bf16.gmra.mrb[4].mxu0 %vm218_vm0, %v21990_v42  ;;  %v44_v1 = vld [vmem:[%s27430_s8 + $0x58] sm:$0xff] }
 0x183   :  { %18075 = vmatmul.mubr.msk.bf16.gmra.mrb[4].mxu1 %vm218_vm0, %v21992_v14  ;;  %17682 = vmatprep.mubr.msk.bf16.mxu0 %vm218_vm0, %v21994_v15 }
 0x184   :  { %18078 = vmatprep.mubr.msk.bf16.mxu1 %vm218_vm0, %v21996_v44  ;;  %17715 = vmatpush3.bf16.msra.mxu0 %v20238_v10  ;;  %v1793_v10 = vld [vmem:[%s27429_s0 + $0xe4] sm:$0xff] }
 0x185   :  { %18111 = vmatpush3.bf16.msra.mxu1 %v20239_v12  ;;  %17716 = vmatprep.subr.bf16.mxu0 %v20240_v16  ;;  %v15821_v12 = vld [vmem:[%s27429_s0 + $0x234] sm:$0xff]  ;;  %v22208_v9 = vpack.c.bf16 %v1794_v54, %v1793_v10  ;;  %v2478_v54 = vld [vmem:[%s27429_s0 + $0x3d] sm:$0xff] }
 0x186   :  { %18112 = vmatprep.subr.bf16.mxu1 %v20241_v17  ;;  %v22210_v24 = vpack.c.bf16 %v15821_v12, %v15820_v11  ;;  %v2477_v10 = vld [vmem:[%s27429_s0 + $0x35] sm:$0xff]  ;;  %v46_v11 = vld [vmem:[%s27430_s8 + $0x68] sm:$0xff] }
 0x187   :  { %v47_v12 = vld [vmem:[%s27430_s8 + $0x70] sm:$0xff] }
 0x188   :  { %17717 = vmatpush3.bf16.msra.mxu0 %v20240_v16  ;;  %v1795_v16 = vld [vmem:[%s27429_s0 + $0xf4] sm:$0xff] }
 0x189   :  { %18113 = vmatpush3.bf16.msra.mxu1 %v20241_v17  ;;  %17754 = vmatprep.subr.bf16.mxu0 %v22039_v28  ;;  %v1796_v17 = vld [vmem:[%s27429_s0 + $0xfc] sm:$0xff] }
 0x18a   :  { %17683 = vmatmul.mubr.msk.bf16.gmra.mrb[8].mxu0 %vm218_vm0, %v22041_v29  ;;  %18150 = vmatprep.subr.bf16.mxu1 %v22046_v36  ;;  %v22212_v25 = vpack.c.bf16 %v1796_v17, %v1795_v16  ;;  %v15928_v16 = vld [vmem:[%s27429_s0 + $0x17d] sm:$0xff]  ;;  %v15929_v17 = vld [vmem:[%s27429_s0 + $0x185] sm:$0xff] }
 0x18b   :  { %18079 = vmatmul.mubr.msk.bf16.gmra.mrb[8].mxu1 %vm218_vm0, %v22048_v37  ;;  %17686 = vmatprep.mubr.msk.bf16.mxu0 %vm218_vm0, %v22050_v38  ;;  %v5656_v27 = vpack.c.bf16 %v15929_v17, %v15928_v16  ;;  %v60_v16 = vld [vmem:[%s27430_s8 + $0xd8] sm:$0xff] }
 0x18c   :  { %18082 = vmatprep.mubr.msk.bf16.mxu1 %vm218_vm0, %v22052_v39  ;;  %v2493_v17 = vld [vmem:[%s27429_s0 + $0xb5] sm:$0xff] }
 0x192   :  { %17687 = vmatmul.mubr.msk.bf16.gmra.mrb[12].mxu0 %vm218_vm0, %v22088_v56 }
 0x193   :  { %18083 = vmatmul.mubr.msk.bf16.gmra.mrb[12].mxu1 %vm218_vm0, %v22090_v57  ;;  %17690 = vmatprep.mubr.msk.bf16.mxu0 %vm218_vm0, %v22092_v62 }
 0x194   :  { %18086 = vmatprep.mubr.msk.bf16.mxu1 %vm218_vm0, %v22094_v63 }
 0x19a   :  { %17691 = vmatmul.mubr.msk.bf16.gmra.mrb[16].mxu0 %vm218_vm0, %v22128_v30 }
 0x19b   :  { %18087 = vmatmul.mubr.msk.bf16.gmra.mrb[16].mxu1 %vm218_vm0, %v22130_v31  ;;  %17694 = vmatprep.mubr.msk.bf16.mxu0 %vm218_vm0, %v22132_v32 }
 0x19c   :  { %18090 = vmatprep.mubr.msk.bf16.mxu1 %vm218_vm0, %v22134_v33 }
 0x1a2   :  { %17695 = vmatmul.mubr.msk.bf16.gmra.mrb[20].mxu0 %vm218_vm0, %v22168_v6 }
 0x1a3   :  { %18091 = vmatmul.mubr.msk.bf16.gmra.mrb[20].mxu1 %vm218_vm0, %v22170_v7  ;;  %17698 = vmatprep.mubr.msk.bf16.mxu0 %vm218_vm0, %v22172_v52 }
 0x1a4   :  { %18094 = vmatprep.mubr.msk.bf16.mxu1 %vm218_vm0, %v22174_v8 }
 0x1aa   :  { %17699 = vmatmul.mubr.msk.bf16.gmra.mrb[24].mxu0 %vm218_vm0, %v22208_v9 }
 0x1ab   :  { %18095 = vmatmul.mubr.msk.bf16.gmra.mrb[24].mxu1 %vm218_vm0, %v22210_v24  ;;  %17702 = vmatprep.mubr.msk.bf16.mxu0 %vm218_vm0, %v22212_v25 }
 0x1ac   :  { %18098 = vmatprep.mubr.msk.bf16.mxu1 %vm218_vm0, %v22214_v13 }
 0x1b2   :  { %17703 = vmatmul.mubr.msk.bf16.gmra.mrb[28].mxu0 %vm218_vm0, %v22248_v53 }
 0x1b3   :  { %18099 = vmatmul.mubr.msk.bf16.gmra.mrb[28].mxu1 %vm218_vm0, %v22250_v55  ;;  %17706 = vmatprep.mubr.msk.bf16.mxu0 %vm218_vm0, %v22252_v0 }
 0x1b4   :  { %18102 = vmatprep.mubr.msk.bf16.mxu1 %vm218_vm0, %v22254_v3 }
 0x1ba   :  { %17707 = vmatmul.mubr.msk.bf16.gmra.mrb[32].mxu0 %vm218_vm0, %v22276_v20 }
 0x1bb   :  { %18103 = vmatmul.mubr.msk.bf16.gmra.mrb[32].mxu1 %vm218_vm0, %v22278_v21  ;;  %17718 = vmatprep.mubr.msk.bf16.mxu0 %vm218_vm0, %v21930_v46  ;;  %v20246_v46 = vld [vmem:[%s27428_s1 + $0xf0] sm:$0xff]  }
 0x1bc   :  { %18114 = vmatprep.mubr.msk.bf16.mxu1 %vm218_vm0, %v21938_v49  ;;  %v20247_v49 = vld [vmem:[%s27428_s1 + $0xf0] sm:$0xff]  }
 0x1c2   :  { %17719 = vmatmul.mubr.msk.bf16.vlgmr.msra.gmra.mrb[0].mxu0 %vm218_vm0, %v21940_v58  ;;  %v20248_v58 = vld [vmem:[%s27428_s1 + $0xf8] sm:$0xff]  }
 0x1c3   :  { %18115 = vmatmul.mubr.msk.bf16.vlgmr.msra.gmra.mrb[0].mxu1 %vm218_vm0, %v21942_v59  ;;  %17755 = vmatpush3.bf16.msra.mxu0 %v22039_v28  ;;  %v20249_v59 = vld [vmem:[%s27428_s1 + $0xf8] sm:$0xff]   ;;  %v35_v28 = vld [vmem:[%s27430_s8 + $0x10] sm:$0xff] }
 0x1c4   :  { %18151 = vmatpush3.bf16.msra.mxu1 %v22046_v36  ;;  %17722 = vmatprep.mubr.msk.bf16.mxu0 %vm218_vm0, %v21990_v42  ;;  %v22327_v42 = vld [vmem:[%s27428_s1 + $0x100] sm:$0xff]   ;;  %v36_v36 = vld [vmem:[%s27430_s8 + $0x18] sm:$0xff] }
 0x1c5   :  { %18118 = vmatprep.mubr.msk.bf16.mxu1 %vm218_vm0, %v21992_v14  ;;  %17756 = vmatprep.subr.bf16.mxu0 %v20244_v34  ;;  %v22332_v14 = vld [vmem:[%s27428_s1 + $0x100] sm:$0xff]  }
 0x1c6   :  { %18152 = vmatprep.subr.bf16.mxu1 %v20245_v35 }
 0x1c7   :  { %17757 = vmatpush3.bf16.msra.mxu0 %v20244_v34  ;;  %v2514_v34 = vpack.c.bf16 %v2482_v50, %v2481_v43  ;;  %v63_v50 = vld [vmem:[%s27430_s8 + $0xf0] sm:$0xff] }
 0x1c8   :  { %18153 = vmatpush3.bf16.msra.mxu1 %v20245_v35  ;;  %17758 = vmatprep.subr.bf16.mxu0 %v20246_v46 }
 0x1c9   :  { %18154 = vmatprep.subr.bf16.mxu1 %v20247_v49 }
 0x1ca   :  { %17723 = vmatmul.mubr.msk.bf16.gmra.mrb[4].mxu0 %vm218_vm0, %v21994_v15  ;;  %v20470_v15 = vmov 0  }
 0x1cb   :  { %18119 = vmatmul.mubr.msk.bf16.gmra.mrb[4].mxu1 %vm218_vm0, %v21996_v44  ;;  %17726 = vmatprep.mubr.msk.bf16.mxu0 %vm218_vm0, %v22041_v29  ;;  %v33_v44 = vld [vmem:[%s27430_s8] sm:$0xff]  ;;  %v34_v29 = vld [vmem:[%s27430_s8 + $0x8] sm:$0xff] }
 0x1cc   :  { %18122 = vmatprep.mubr.msk.bf16.mxu1 %vm218_vm0, %v22048_v37  ;;  %17759 = vmatpush3.bf16.msra.mxu0 %v20246_v46  ;;  %v37_v37 = vld [vmem:[%s27430_s8 + $0x20] sm:$0xff] }
 0x1cd   :  { %18155 = vmatpush3.bf16.msra.mxu1 %v20247_v49  ;;  %17760 = vmatprep.subr.bf16.mxu0 %v20248_v58  ;;  %v52_v49 = vld [vmem:[%s27430_s8 + $0x98] sm:$0xff] }
 0x1ce   :  { %18156 = vmatprep.subr.bf16.mxu1 %v20249_v59  ;;  %20184 = vset.pattern.permute.xlu0 %v20470_v15 }
 0x1cf   :  { %20185 = vset.pattern.permute.xlu1 %v20470_v15  ;;  %6400 = vperm.xlu0 %20184, %v33_v44   ;;  %v20257_v15 = vld [vmem:[%s27428_s1 + $0x118] sm:$0xff]  }
 0x1d0   :  { %17761 = vmatpush3.bf16.msra.mxu0 %v20248_v58  ;;  %6410 = vperm.xlu1 %20185, %v35_v28   ;;  %v15936_v44 = vld [vmem:[%s27429_s0 + $0x1bd] sm:$0xff]  ;;  %v15937_v28 = vld [vmem:[%s27429_s0 + $0x1c5] sm:$0xff] }
 0x1d1   :  { %18157 = vmatpush3.bf16.msra.mxu1 %v20249_v59  ;;  %17798 = vmatprep.subr.bf16.mxu0 %v22327_v42  ;;  %v20256_v59 = vld [vmem:[%s27428_s1 + $0x118] sm:$0xff]  }
 0x1d2   :  { %17727 = vmatmul.mubr.msk.bf16.gmra.mrb[8].mxu0 %vm218_vm0, %v22050_v38  ;;  %18194 = vmatprep.subr.bf16.mxu1 %v22332_v14  ;;  %v38_v38 = vld [vmem:[%s27430_s8 + $0x28] sm:$0xff] }
 0x1d3   :  { %18123 = vmatmul.mubr.msk.bf16.gmra.mrb[8].mxu1 %vm218_vm0, %v22052_v39  ;;  %17730 = vmatprep.mubr.msk.bf16.mxu0 %vm218_vm0, %v22088_v56  ;;  %v39_v39 = vld [vmem:[%s27430_s8 + $0x30] sm:$0xff]  ;;  %v40_v56 = vld [vmem:[%s27430_s8 + $0x38] sm:$0xff] }
 0x1d4   :  { %18126 = vmatprep.mubr.msk.bf16.mxu1 %vm218_vm0, %v22090_v57  ;;  %6405 = vperm.xlu0 %20184, %v34_v29   ;;  %v41_v57 = vld [vmem:[%s27430_s8 + $0x40] sm:$0xff] }
 0x1d5   :  { %6415 = vperm.xlu1 %20185, %v36_v36   ;;  %v53_v29 = vld [vmem:[%s27430_s8 + $0xa0] sm:$0xff] }
 0x1d6   :  { %v2487_v36 = vld [vmem:[%s27429_s0 + $0x85] sm:$0xff] }
 0x1d8   :  { %6420 = vperm.xlu0 %20184, %v37_v37   ;;  %v2488_v37 = vld [vmem:[%s27429_s0 + $0x8d] sm:$0xff] }
 0x1d9   :  { %6425 = vperm.xlu1 %20185, %v38_v38   ;;  %v54_v38 = vld [vmem:[%s27430_s8 + $0xa8] sm:$0xff] }
 0x1da   :  { %17731 = vmatmul.mubr.msk.bf16.gmra.mrb[12].mxu0 %vm218_vm0, %v22092_v62  ;;  %v2155_v62 = vld [vmem:[%s27429_s0 + $0x134] sm:$0xff] }
 0x1db   :  { %18127 = vmatmul.mubr.msk.bf16.gmra.mrb[12].mxu1 %vm218_vm0, %v22094_v63  ;;  %17734 = vmatprep.mubr.msk.bf16.mxu0 %vm218_vm0, %v22128_v30  ;;  %v2156_v63 = vld [vmem:[%s27429_s0 + $0x13c] sm:$0xff] }
 0x1dc   :  { %18130 = vmatprep.mubr.msk.bf16.mxu1 %vm218_vm0, %v22130_v31  ;;  %6430 = vperm.xlu0 %20184, %v39_v39   ;;  %v15894_v30 = vld [vmem:[%s27429_s0 + $0x27c] sm:$0xff]  ;;  %v42_v31 = vld [vmem:[%s27430_s8 + $0x48] sm:$0xff]  ;;  %v2174_v2 = vpack.c.bf16 %v2156_v63, %v2155_v62  ;;  %v5660_v62 = vpack.c.bf16 %v15937_v28, %v15936_v44  ;;  %v2517_v63 = vpack.c.bf16 %v2488_v37, %v2487_v36 }
 0x1dd   :  { %6435 = vperm.xlu1 %20185, %v40_v56   ;;  %v15938_v39 = vld [vmem:[%s27429_s0 + $0x1cd] sm:$0xff]  ;;  %v15939_v56 = vld [vmem:[%s27429_s0 + $0x1d5] sm:$0xff]  ;;  %v15952_v44 = vld [vmem:[%s27429_s0 + $0x23d] sm:$0xff] }
 0x1de   :  { %v15953_v28 = vld [vmem:[%s27429_s0 + $0x245] sm:$0xff]  ;;  %v2504_v36 = vld [vmem:[%s27429_s0 + $0x10d] sm:$0xff] }
 0x1df   :  { %v15954_v37 = vld [vmem:[%s27429_s0 + $0x24d] sm:$0xff] }
 0x1e0   :  { %6440 = vperm.xlu0 %20184, %v41_v57  }
 0x1e1   :  { %6445 = vperm.xlu1 %20185, %v42_v31   ;;  %v5661_v31 = vpack.c.bf16 %v15939_v56, %v15938_v39  ;;  %v5668_v56 = vpack.c.bf16 %v15953_v28, %v15952_v44  ;;  %v16004_v44 = vld [vmem:[%s27429_s0 + $0x1ce] sm:$0xff]  ;;  %v16005_v28 = vld [vmem:[%s27429_s0 + $0x1d6] sm:$0xff] }
 0x1e2   :  { %17735 = vmatmul.mubr.msk.bf16.gmra.mrb[16].mxu0 %vm218_vm0, %v22132_v32  ;;  %v43_v32 = vld [vmem:[%s27430_s8 + $0x50] sm:$0xff] }
 0x1e3   :  { %18131 = vmatmul.mubr.msk.bf16.gmra.mrb[16].mxu1 %vm218_vm0, %v22134_v33  ;;  %17738 = vmatprep.mubr.msk.bf16.mxu0 %vm218_vm0, %v22168_v6  ;;  %v15895_v33 = vld [vmem:[%s27429_s0 + $0x284] sm:$0xff] }
 0x1e4   :  { %18134 = vmatprep.mubr.msk.bf16.mxu1 %vm218_vm0, %v22170_v7  ;;  %6450 = vperm.xlu0 %20184, %v43_v32   ;;  %v45_v6 = vld [vmem:[%s27430_s8 + $0x60] sm:$0xff]  ;;  %v5319_v7 = vpack.c.bf16 %v15895_v33, %v15894_v30  ;;  %v55_v30 = vld [vmem:[%s27430_s8 + $0xb0] sm:$0xff]  ;;  %v56_v32 = vld [vmem:[%s27430_s8 + $0xb8] sm:$0xff] }
 0x1e5   :  { %6455 = vperm.xlu1 %20185, %v44_v1   ;;  %v2489_v33 = vld [vmem:[%s27429_s0 + $0x95] sm:$0xff]  ;;  %v2491_v1 = vld [vmem:[%s27429_s0 + $0xa5] sm:$0xff] }
 0x1e8   :  { %6460 = vperm.xlu0 %20184, %v45_v6   ;;  %v15942_v6 = vld [vmem:[%s27429_s0 + $0x1ed] sm:$0xff] }
 0x1e9   :  { %6465 = vperm.xlu1 %20185, %v46_v11   ;;  %v59_v11 = vld [vmem:[%s27430_s8 + $0xd0] sm:$0xff] }
 0x1ea   :  { %17739 = vmatmul.mubr.msk.bf16.gmra.mrb[20].mxu0 %vm218_vm0, %v22172_v52  ;;  %v2511_v52 = vpack.c.bf16 %v2476_v48, %v2475_v47  ;;  %v2490_v47 = vld [vmem:[%s27429_s0 + $0x9d] sm:$0xff] }
 0x1eb   :  { %18135 = vmatmul.mubr.msk.bf16.gmra.mrb[20].mxu1 %vm218_vm0, %v22174_v8  ;;  %17742 = vmatprep.mubr.msk.bf16.mxu0 %vm218_vm0, %v22208_v9  ;;  %v5655_v8 = vpack.c.bf16 %v15927_v61, %v15926_v60  ;;  %v48_v9 = vld [vmem:[%s27430_s8 + $0x78] sm:$0xff]  ;;  %v57_v60 = vld [vmem:[%s27430_s8 + $0xc0] sm:$0xff] }
 0x1ec   :  { %18138 = vmatprep.mubr.msk.bf16.mxu1 %vm218_vm0, %v22210_v24  ;;  %6470 = vperm.xlu0 %20184, %v47_v12   ;;  %v2512_v24 = vpack.c.bf16 %v2478_v54, %v2477_v10  ;;  %v15940_v48 = vld [vmem:[%s27429_s0 + $0x1dd] sm:$0xff]  ;;  %v15941_v61 = vld [vmem:[%s27429_s0 + $0x1e5] sm:$0xff] }
 0x1ed   :  { %6475 = vperm.xlu1 %20185, %v48_v9   ;;  %v5662_v10 = vpack.c.bf16 %v15941_v61, %v15940_v48  ;;  %v61_v9 = vld [vmem:[%s27430_s8 + $0xe0] sm:$0xff]  ;;  %v15958_v48 = vld [vmem:[%s27429_s0 + $0x26d] sm:$0xff] }
 0x1f0   :  { %6480 = vperm.xlu0 %20184, %v49_v26   ;;  %v15946_v26 = vld [vmem:[%s27429_s0 + $0x20d] sm:$0xff] }
 0x1f2   :  { %17743 = vmatmul.mubr.msk.bf16.gmra.mrb[24].mxu0 %vm218_vm0, %v22212_v25  ;;  %v15930_v25 = vld [vmem:[%s27429_s0 + $0x18d] sm:$0xff] }
 0x1f3   :  { %18139 = vmatmul.mubr.msk.bf16.gmra.mrb[24].mxu1 %vm218_vm0, %v22214_v13  ;;  %17746 = vmatprep.mubr.msk.bf16.mxu0 %vm218_vm0, %v22248_v53  ;;  %v15931_v13 = vld [vmem:[%s27429_s0 + $0x195] sm:$0xff]  ;;  %v20253_v53 = vld [vmem:[%s27428_s1 + $0x108] sm:$0xff]  }
 0x1f4   :  { %18142 = vmatprep.mubr.msk.bf16.mxu1 %vm218_vm0, %v22250_v55  ;;  %v5657_v41 = vpack.c.bf16 %v15931_v13, %v15930_v25  ;;  %v15933_v55 = vld [vmem:[%s27429_s0 + $0x1a5] sm:$0xff]  ;;  %6490 = vperm.xlu0 %20184, %v51_v18   ;;  %v2496_v13 = vld [vmem:[%s27429_s0 + $0xcd] sm:$0xff] }
 0x1f5   :  { %v5658_v35 = vpack.c.bf16 %v15933_v55, %v15932_v51  ;;  %v2495_v25 = vld [vmem:[%s27429_s0 + $0xc5] sm:$0xff]  ;;  %v2497_v55 = vld [vmem:[%s27429_s0 + $0xd5] sm:$0xff] }
 0x1f6   :  { %v2499_v18 = vld [vmem:[%s27429_s0 + $0xe5] sm:$0xff] }
 0x1f8   :  { %6500 = vperm.xlu0 %20184, %v53_v29   ;;  %v2503_v29 = vld [vmem:[%s27429_s0 + $0x105] sm:$0xff] }
 0x1fa   :  { %17747 = vmatmul.mubr.msk.bf16.gmra.mrb[28].mxu0 %vm218_vm0, %v22252_v0  ;;  %v2483_v0 = vld [vmem:[%s27429_s0 + $0x65] sm:$0xff] }
 0x1fb   :  { %18143 = vmatmul.mubr.msk.bf16.gmra.mrb[28].mxu1 %vm218_vm0, %v22254_v3  ;;  %17750 = vmatprep.mubr.msk.bf16.mxu0 %vm218_vm0, %v22276_v20  ;;  %v50_v3 = vld [vmem:[%s27430_s8 + $0x88] sm:$0xff]  ;;  %v15935_v20 = vld [vmem:[%s27429_s0 + $0x1b5] sm:$0xff]  ;;  %v2515_v46 = vpack.c.bf16 %v2484_v4, %v2483_v0  ;;  %v2498_v0 = vld [vmem:[%s27429_s0 + $0xdd] sm:$0xff] }
 0x1fc   :  { %18146 = vmatprep.mubr.msk.bf16.mxu1 %vm218_vm0, %v22278_v21  ;;  %v20255_v21 = vld [vmem:[%s27428_s1 + $0x110] sm:$0xff]   ;;  %6485 = vperm.xlu1 %20185, %v50_v3   ;;  %v5659_v58 = vpack.c.bf16 %v15935_v20, %v15934_v19  ;;  %v15948_v3 = vld [vmem:[%s27429_s0 + $0x21d] sm:$0xff] }
 0x1fd   :  { %6510 = vperm.xlu0 %20184, %v55_v30   ;;  %v65_v4 = vld [vmem:[%s27430_s8 + $0x100] sm:$0xff]  ;;  %v2500_v19 = vld [vmem:[%s27429_s0 + $0xed] sm:$0xff] }
 0x1fe   :  { %v15950_v20 = vld [vmem:[%s27429_s0 + $0x22d] sm:$0xff]  ;;  %v2506_v30 = vld [vmem:[%s27429_s0 + $0x11d] sm:$0xff] }
 0x200   :  { %6495 = vperm.xlu1 %20185, %v52_v49   ;;  %v2523_v49 = vpack.c.bf16 %v2500_v19, %v2499_v18  ;;  %v2838_v18 = vld [vmem:[%s27429_s0 + $0x6e] sm:$0xff] }
 0x201   :  { %6520 = vperm.xlu0 %20184, %v57_v60   ;;  %v15959_v60 = vld [vmem:[%s27429_s0 + $0x275] sm:$0xff] }
 0x202   :  { %17751 = vmatmul.mubr.msk.bf16.gmra.mrb[32].mxu0 %vm218_vm0, %v2174_v2  ;;  %v2492_v2 = vld [vmem:[%s27429_s0 + $0xad] sm:$0xff] }
 0x203   :  { %18147 = vmatmul.mubr.msk.bf16.gmra.mrb[32].mxu1 %vm218_vm0, %v5319_v7  ;;  %17762 = vmatprep.mubr.msk.bf16.mxu0 %vm218_vm0, %v2511_v52  ;;  %v15943_v7 = vld [vmem:[%s27429_s0 + $0x1f5] sm:$0xff]  ;;  %v58_v52 = vld [vmem:[%s27430_s8 + $0xc8] sm:$0xff]  ;;  %v2519_v54 = vpack.c.bf16 %v2492_v2, %v2491_v1 }
 0x204   :  { %18158 = vmatprep.mubr.msk.bf16.mxu1 %vm218_vm0, %v5655_v8  ;;  %6505 = vperm.xlu1 %20185, %v54_v38   ;;  %v2518_v8 = vpack.c.bf16 %v2490_v47, %v2489_v33  ;;  %v5663_v12 = vpack.c.bf16 %v15943_v7, %v15942_v6  ;;  %v15955_v38 = vld [vmem:[%s27429_s0 + $0x255] sm:$0xff]  ;;  %v2507_v33 = vld [vmem:[%s27429_s0 + $0x125] sm:$0xff]  ;;  %v2508_v47 = vld [vmem:[%s27429_s0 + $0x12d] sm:$0xff]  ;;  %v5671_v6 = vpack.c.bf16 %v15959_v60, %v15958_v48 }
 0x205   :  { %6530 = vperm.xlu0 %20184, %v59_v11   ;;  %v2527_v2 = vpack.c.bf16 %v2508_v47, %v2507_v33  ;;  %v2509_v7 = vld [vmem:[%s27429_s0 + $0x135] sm:$0xff] }
 0x206   :  { %v2830_v11 = vld [vmem:[%s27429_s0 + $0x2e] sm:$0xff] }
 0x207   :  { %v16000_v19 = vld [vmem:[%s27429_s0 + $0x1ae] sm:$0xff] }
 0x208   :  { %6515 = vperm.xlu1 %20185, %v56_v32   ;;  %v15957_v32 = vld [vmem:[%s27429_s0 + $0x265] sm:$0xff] }
 0x209   :  { %6540 = vperm.xlu0 %20184, %v61_v9  }
 0x20a   :  { %17763 = vmatmul.mubr.msk.bf16.vlgmr.msra.gmra.mrb[0].mxu0 %vm218_vm0, %v2512_v24  ;;  %v15945_v24 = vld [vmem:[%s27429_s0 + $0x205] sm:$0xff] }
 0x20b   :  { %18159 = vmatmul.mubr.msk.bf16.vlgmr.msra.gmra.mrb[0].mxu1 %vm218_vm0, %v5656_v27  ;;  %17799 = vmatpush3.bf16.msra.mxu0 %v22327_v42  ;;  %v2485_v42 = vld [vmem:[%s27429_s0 + $0x75] sm:$0xff]  ;;  %v5664_v43 = vpack.c.bf16 %v15945_v24, %v15944_v23 }
 0x20c   :  { %18195 = vmatpush3.bf16.msra.mxu1 %v22332_v14  ;;  %17766 = vmatprep.mubr.msk.bf16.mxu0 %vm218_vm0, %v2513_v40  ;;  %v2486_v14 = vld [vmem:[%s27429_s0 + $0x7d] sm:$0xff]  ;;  %v15947_v27 = vld [vmem:[%s27429_s0 + $0x215] sm:$0xff]  ;;  %v62_v40 = vld [vmem:[%s27430_s8 + $0xe8] sm:$0xff] }
 0x20d   :  { %18162 = vmatprep.mubr.msk.bf16.mxu1 %vm218_vm0, %v5657_v41  ;;  %17800 = vmatprep.subr.bf16.mxu0 %v20252_v45  ;;  %v2516_v57 = vpack.c.bf16 %v2486_v14, %v2485_v42  ;;  %v2520_v41 = vpack.c.bf16 %v2494_v22, %v2493_v17  ;;  %v5665_v51 = vpack.c.bf16 %v15947_v27, %v15946_v26  ;;  %v68_v42 = vld [vmem:[%s27430_s8 + $0x118] sm:$0xff]  ;;  %v15995_v26 = vld [vmem:[%s27429_s0 + $0x186] sm:$0xff] }
 0x20e   :  { %18196 = vmatprep.subr.bf16.mxu1 %v20253_v53  ;;  %6525 = vperm.xlu1 %20185, %v58_v52   ;;  %v2501_v14 = vld [vmem:[%s27429_s0 + $0xf5] sm:$0xff]  ;;  %v2510_v52 = vld [vmem:[%s27429_s0 + $0x13d] sm:$0xff]  ;;  %v2833_v27 = vld [vmem:[%s27429_s0 + $0x46] sm:$0xff] }
 0x20f   :  { %17801 = vmatpush3.bf16.msra.mxu0 %v20252_v45  ;;  %v2521_v45 = vpack.c.bf16 %v2496_v13, %v2495_v25  ;;  %6550 = vperm.xlu0 %20184, %v63_v50   ;;  %v2528_v17 = vpack.c.bf16 %v2510_v52, %v2509_v7  ;;  %v2831_v24 = vld [vmem:[%s27429_s0 + $0x36] sm:$0xff]  ;;  %v2832_v25 = vld [vmem:[%s27429_s0 + $0x3e] sm:$0xff]  ;;  %v2849_v7 = vld [vmem:[%s27429_s0 + $0xc6] sm:$0xff] }
 0x210   :  { %18197 = vmatpush3.bf16.msra.mxu1 %v20253_v53  ;;  %17802 = vmatprep.subr.bf16.mxu0 %v20254_v5  ;;  %v64_v53 = vld [vmem:[%s27430_s8 + $0xf8] sm:$0xff]  ;;  %v2850_v52 = vld [vmem:[%s27429_s0 + $0xce] sm:$0xff] }
 0x211   :  { %18198 = vmatprep.subr.bf16.mxu1 %v20255_v21  ;;  %v15994_v13 = vld [vmem:[%s27429_s0 + $0x17e] sm:$0xff] }
 0x212   :  { %17767 = vmatmul.mubr.msk.bf16.gmra.mrb[4].mxu0 %vm218_vm0, %v2514_v34  ;;  %6535 = vperm.xlu1 %20185, %v60_v16   ;;  %v66_v34 = vld [vmem:[%s27430_s8 + $0x108] sm:$0xff]  ;;  %v15993_v16 = vld [vmem:[%s27429_s0 + $0x176] sm:$0xff]  ;;  %v6009_v50 = vpack.c.bf16 %v15995_v26, %v15994_v13 }
 0x213   :  { %18163 = vmatmul.mubr.msk.bf16.gmra.mrb[4].mxu1 %vm218_vm0, %v5658_v35  ;;  %17770 = vmatprep.mubr.msk.bf16.mxu0 %vm218_vm0, %v2515_v46  ;;  %v2522_v35 = vpack.c.bf16 %v2498_v0, %v2497_v55  ;;  %v2835_v55 = vld [vmem:[%s27429_s0 + $0x56] sm:$0xff]  ;;  %v2836_v0 = vld [vmem:[%s27429_s0 + $0x5e] sm:$0xff]  ;;  %v16016_v13 = vld [vmem:[%s27429_s0 + $0x22e] sm:$0xff] }
 0x214   :  { %18166 = vmatprep.mubr.msk.bf16.mxu1 %vm218_vm0, %v5659_v58  ;;  %17803 = vmatpush3.bf16.msra.mxu0 %v20254_v5  ;;  %v15949_v5 = vld [vmem:[%s27429_s0 + $0x225] sm:$0xff]  ;;  %v67_v58 = vld [vmem:[%s27430_s8 + $0x110] sm:$0xff] }
 0x215   :  { %18199 = vmatpush3.bf16.msra.mxu1 %v20255_v21  ;;  %17804 = vmatprep.subr.bf16.mxu0 %v20256_v59  ;;  %v15951_v21 = vld [vmem:[%s27429_s0 + $0x235] sm:$0xff]  ;;  %v5666_v46 = vpack.c.bf16 %v15949_v5, %v15948_v3  ;;  %v15998_v3 = vld [vmem:[%s27429_s0 + $0x19e] sm:$0xff]  ;;  %v2837_v5 = vld [vmem:[%s27429_s0 + $0x66] sm:$0xff] }
 0x216   :  { %18200 = vmatprep.subr.bf16.mxu1 %v20257_v15  ;;  %6545 = vperm.xlu1 %20185, %v62_v40   ;;  %v2834_v40 = vld [vmem:[%s27429_s0 + $0x4e] sm:$0xff]  ;;  %v16017_v26 = vld [vmem:[%s27429_s0 + $0x236] sm:$0xff] }
 0x217   :  { %6560 = vperm.xlu0 %20184, %v65_v4   ;;  %v15999_v4 = vld [vmem:[%s27429_s0 + $0x1a6] sm:$0xff] }
 0x218   :  { %17805 = vmatpush3.bf16.msra.mxu0 %v20256_v59  ;;  %v5667_v59 = vpack.c.bf16 %v15951_v21, %v15950_v20  ;;  %v16001_v20 = vld [vmem:[%s27429_s0 + $0x1b6] sm:$0xff]  ;;  %v2868_v21 = vpack.c.bf16 %v2836_v0, %v2835_v55  ;;  %v2857_v55 = vld [vmem:[%s27429_s0 + $0x106] sm:$0xff]  ;;  %v2858_v0 = vld [vmem:[%s27429_s0 + $0x10e] sm:$0xff] }
 0x219   :  { %18201 = vmatpush3.bf16.msra.mxu1 %v20257_v15  ;;  %v2502_v15 = vld [vmem:[%s27429_s0 + $0xfd] sm:$0xff] }
 0x21a   :  { %17771 = vmatmul.mubr.msk.bf16.gmra.mrb[8].mxu0 %vm218_vm0, %v2516_v57  ;;  %6555 = vperm.xlu1 %20185, %v64_v53   ;;  %v2524_v39 = vpack.c.bf16 %v2502_v15, %v2501_v14  ;;  %v2525_v57 = vpack.c.bf16 %v2504_v36, %v2503_v29  ;;  %v2841_v14 = vld [vmem:[%s27429_s0 + $0x86] sm:$0xff]  ;;  %v2842_v15 = vld [vmem:[%s27429_s0 + $0x8e] sm:$0xff] }
 0x21b   :  { %18167 = vmatmul.mubr.msk.bf16.gmra.mrb[8].mxu1 %vm218_vm0, %v5660_v62  ;;  %17774 = vmatprep.mubr.msk.bf16.mxu0 %vm218_vm0, %v2517_v63  ;;  %v5669_v62 = vpack.c.bf16 %v15955_v38, %v15954_v37  ;;  %v2505_v63 = vld [vmem:[%s27429_s0 + $0x115] sm:$0xff]  ;;  %v2871_v37 = vpack.c.bf16 %v2842_v15, %v2841_v14  ;;  %v6014_v38 = vpack.c.bf16 %v16005_v28, %v16004_v44 }
 0x21c   :  { %18170 = vmatprep.mubr.msk.bf16.mxu1 %vm218_vm0, %v5661_v31  ;;  %6570 = vperm.xlu0 %20184, %v67_v58   ;;  %v15956_v31 = vld [vmem:[%s27429_s0 + $0x25d] sm:$0xff]  ;;  %v2526_v61 = vpack.c.bf16 %v2506_v30, %v2505_v63  ;;  %v2845_v63 = vld [vmem:[%s27429_s0 + $0xa6] sm:$0xff]  ;;  %v2846_v30 = vld [vmem:[%s27429_s0 + $0xae] sm:$0xff] }
 0x21d   :  { %v5670_v1 = vpack.c.bf16 %v15957_v32, %v15956_v31  ;;  %v2840_v58 = vld [vmem:[%s27429_s0 + $0x7e] sm:$0xff]  ;;  %v16008_v31 = vld [vmem:[%s27429_s0 + $0x1ee] sm:$0xff]  ;;  %v16009_v32 = vld [vmem:[%s27429_s0 + $0x1f6] sm:$0xff]  ;;  %v2873_v48 = vpack.c.bf16 %v2846_v30, %v2845_v63 }
 0x21e   :  { %6565 = vperm.xlu1 %20185, %v66_v34   ;;  %v6011_v34 = vpack.c.bf16 %v15999_v4, %v15998_v3  ;;  %v6016_v60 = vpack.c.bf16 %v16009_v32, %v16008_v31  ;;  %v16020_v3 = vld [vmem:[%s27429_s0 + $0x24e] sm:$0xff]  ;;  %v16021_v4 = vld [vmem:[%s27429_s0 + $0x256] sm:$0xff] }
 0x222   :  { %17775 = vmatmul.mubr.msk.bf16.gmra.mrb[12].mxu0 %vm218_vm0, %v2518_v8  ;;  %6575 = vperm.xlu1 %20185, %v68_v42   ;;  %v15960_v8 = vld [vmem:[%s27429_s0 + $0x27d] sm:$0xff]  ;;  %v16003_v42 = vld [vmem:[%s27429_s0 + $0x1c6] sm:$0xff] }
 0x223   :  { %18171 = vmatmul.mubr.msk.bf16.gmra.mrb[12].mxu1 %vm218_vm0, %v5662_v10  ;;  %17778 = vmatprep.mubr.msk.bf16.mxu0 %vm218_vm0, %v2519_v54  ;;  %v15961_v10 = vld [vmem:[%s27429_s0 + $0x285] sm:$0xff] }
 0x224   :  { %18174 = vmatprep.mubr.msk.bf16.mxu1 %vm218_vm0, %v5663_v12  ;;  %v2829_v54 = vld [vmem:[%s27429_s0 + $0x26] sm:$0xff]  ;;  %v15992_v12 = vld [vmem:[%s27429_s0 + $0x16e] sm:$0xff]  ;;  %v5672_v22 = vpack.c.bf16 %v15961_v10, %v15960_v8  ;;  %v16013_v10 = vld [vmem:[%s27429_s0 + $0x216] sm:$0xff] }
 0x225   :  { %v2865_v23 = vpack.c.bf16 %v2830_v11, %v2829_v54  ;;  %v6008_v9 = vpack.c.bf16 %v15993_v16, %v15992_v12  ;;  %v16012_v8 = vld [vmem:[%s27429_s0 + $0x20e] sm:$0xff]  ;;  %v2875_v12 = vpack.c.bf16 %v2850_v52, %v2849_v7 }
 0x226   :  { %v6018_v16 = vpack.c.bf16 %v16013_v10, %v16012_v8 }
 0x22a   :  { %17779 = vmatmul.mubr.msk.bf16.gmra.mrb[16].mxu0 %vm218_vm0, %v2520_v41  ;;  %v15996_v41 = vld [vmem:[%s27429_s0 + $0x18e] sm:$0xff] }
 0x22b   :  { %18175 = vmatmul.mubr.msk.bf16.gmra.mrb[16].mxu1 %vm218_vm0, %v5664_v43  ;;  %17782 = vmatprep.mubr.msk.bf16.mxu0 %vm218_vm0, %v2521_v45  ;;  %v15997_v43 = vld [vmem:[%s27429_s0 + $0x196] sm:$0xff]  ;;  %v2866_v45 = vpack.c.bf16 %v2832_v25, %v2831_v24  ;;  %v2853_v24 = vld [vmem:[%s27429_s0 + $0xe6] sm:$0xff]  ;;  %v2854_v25 = vld [vmem:[%s27429_s0 + $0xee] sm:$0xff] }
 0x22c   :  { %18178 = vmatprep.mubr.msk.bf16.mxu1 %vm218_vm0, %v5665_v51  ;;  %v2867_v51 = vpack.c.bf16 %v2834_v40, %v2833_v27  ;;  %v6010_v53 = vpack.c.bf16 %v15997_v43, %v15996_v41  ;;  %v2877_v41 = vpack.c.bf16 %v2854_v25, %v2853_v24  ;;  %v6020_v43 = vpack.c.bf16 %v16017_v26, %v16016_v13 }
 0x232   :  { %17783 = vmatmul.mubr.msk.bf16.gmra.mrb[20].mxu0 %vm218_vm0, %v2522_v35  ;;  %v2869_v35 = vpack.c.bf16 %v2838_v18, %v2837_v5 }
 0x233   :  { %18179 = vmatmul.mubr.msk.bf16.gmra.mrb[20].mxu1 %vm218_vm0, %v5666_v46  ;;  %17786 = vmatprep.mubr.msk.bf16.mxu0 %vm218_vm0, %v2523_v49  ;;  %v6012_v46 = vpack.c.bf16 %v16001_v20, %v16000_v19  ;;  %v2839_v49 = vld [vmem:[%s27429_s0 + $0x76] sm:$0xff]  ;;  %v2879_v19 = vpack.c.bf16 %v2858_v0, %v2857_v55  ;;  %v6022_v20 = vpack.c.bf16 %v16021_v4, %v16020_v3 }
 0x234   :  { %18182 = vmatprep.mubr.msk.bf16.mxu1 %vm218_vm0, %v5667_v59  ;;  %v16002_v59 = vld [vmem:[%s27429_s0 + $0x1be] sm:$0xff]  ;;  %v2870_v29 = vpack.c.bf16 %v2840_v58, %v2839_v49  ;;  %v2861_v49 = vld [vmem:[%s27429_s0 + $0x126] sm:$0xff]  ;;  %v2862_v58 = vld [vmem:[%s27429_s0 + $0x12e] sm:$0xff] }
 0x235   :  { %v6013_v36 = vpack.c.bf16 %v16003_v42, %v16002_v59  ;;  %v16024_v59 = vld [vmem:[%s27429_s0 + $0x26e] sm:$0xff]  ;;  %v16025_v42 = vld [vmem:[%s27429_s0 + $0x276] sm:$0xff]  ;;  %v2881_v44 = vpack.c.bf16 %v2862_v58, %v2861_v49 }
 0x236   :  { %v6024_v28 = vpack.c.bf16 %v16025_v42, %v16024_v59 }
 0x23a   :  { %17787 = vmatmul.mubr.msk.bf16.gmra.mrb[24].mxu0 %vm218_vm0, %v2524_v39  ;;  %v2843_v39 = vld [vmem:[%s27429_s0 + $0x96] sm:$0xff] }
 0x23b   :  { %18183 = vmatmul.mubr.msk.bf16.gmra.mrb[24].mxu1 %vm218_vm0, %v5668_v56  ;;  %17790 = vmatprep.mubr.msk.bf16.mxu0 %vm218_vm0, %v2525_v57  ;;  %v2844_v56 = vld [vmem:[%s27429_s0 + $0x9e] sm:$0xff] }
 0x23c   :  { %18186 = vmatprep.mubr.msk.bf16.mxu1 %vm218_vm0, %v5669_v62  ;;  %v16006_v57 = vld [vmem:[%s27429_s0 + $0x1de] sm:$0xff]  ;;  %v16007_v62 = vld [vmem:[%s27429_s0 + $0x1e6] sm:$0xff]  ;;  %v2872_v33 = vpack.c.bf16 %v2844_v56, %v2843_v39 }
 0x23d   :  { %v6015_v47 = vpack.c.bf16 %v16007_v62, %v16006_v57  ;;  %v27438_v57 = vmov 0.0  }
 0x23e   :  { %7227 = vst.msk [vmem:[#allocation3 + $0x18] sm:$0xff] %vm218_vm0, %v27438_v57  ;;  %7228 = vst.msk [vmem:[#allocation3 + $0x20] sm:$0xff] %vm218_vm0, %v27438_v57 }
 0x23f   :  { %7224 = vst.msk [vmem:[#allocation3] sm:$0xff] %vm218_vm0, %v27438_v57  ;;  %7225 = vst.msk [vmem:[#allocation3 + $0x8] sm:$0xff] %vm218_vm0, %v27438_v57 }
 0x240   :  { %7226 = vst.msk [vmem:[#allocation3 + $0x10] sm:$0xff] %vm218_vm0, %v27438_v57  ;;  %7229 = vst.msk [vmem:[#allocation3 + $0x28] sm:$0xff] %vm218_vm0, %v27438_v57 }
 0x241   :  { %7230 = vst.msk [vmem:[#allocation3 + $0x30] sm:$0xff] %vm218_vm0, %v27438_v57  ;;  %7231 = vst.msk [vmem:[#allocation3 + $0x38] sm:$0xff] %vm218_vm0, %v27438_v57 }
 0x242   :  { %17791 = vmatmul.mubr.msk.bf16.gmra.mrb[28].mxu0 %vm218_vm0, %v2526_v61  ;;  %v2847_v61 = vld [vmem:[%s27429_s0 + $0xb6] sm:$0xff]  ;;  %7232 = vst.msk [vmem:[#allocation3 + $0x40] sm:$0xff] %vm218_vm0, %v27438_v57  ;;  %7233 = vst.msk [vmem:[#allocation3 + $0x48] sm:$0xff] %vm218_vm0, %v27438_v57 }
 0x243   :  { %18187 = vmatmul.mubr.msk.bf16.gmra.mrb[28].mxu1 %vm218_vm0, %v5670_v1  ;;  %17794 = vmatprep.mubr.msk.bf16.mxu0 %vm218_vm0, %v2527_v2  ;;  %v2848_v1 = vld [vmem:[%s27429_s0 + $0xbe] sm:$0xff]  ;;  %7234 = vst.msk [vmem:[#allocation3 + $0x50] sm:$0xff] %vm218_vm0, %v27438_v57  ;;  %7235 = vst.msk [vmem:[#allocation3 + $0x58] sm:$0xff] %vm218_vm0, %v27438_v57 }
 0x244   :  { %18190 = vmatprep.mubr.msk.bf16.mxu1 %vm218_vm0, %v5671_v6  ;;  %v16010_v2 = vld [vmem:[%s27429_s0 + $0x1fe] sm:$0xff]  ;;  %v16011_v6 = vld [vmem:[%s27429_s0 + $0x206] sm:$0xff]  ;;  %v2874_v54 = vpack.c.bf16 %v2848_v1, %v2847_v61  ;;  %7236 = vst.msk [vmem:[#allocation3 + $0x60] sm:$0xff] %vm218_vm0, %v27438_v57  ;;  %7237 = vst.msk [vmem:[#allocation3 + $0x68] sm:$0xff] %vm218_vm0, %v27438_v57 }
 0x245   :  { %v6017_v11 = vpack.c.bf16 %v16011_v6, %v16010_v2  ;;  %7238 = vst.msk [vmem:[#allocation3 + $0x70] sm:$0xff] %vm218_vm0, %v27438_v57  ;;  %7239 = vst.msk [vmem:[#allocation3 + $0x78] sm:$0xff] %vm218_vm0, %v27438_v57 }
 0x246   :  { %7240 = vst.msk [vmem:[#allocation3 + $0x80] sm:$0xff] %vm218_vm0, %v27438_v57  ;;  %7241 = vst.msk [vmem:[#allocation3 + $0x88] sm:$0xff] %vm218_vm0, %v27438_v57 }
 0x247   :  { %7242 = vst.msk [vmem:[#allocation3 + $0x90] sm:$0xff] %vm218_vm0, %v27438_v57  ;;  %7243 = vst.msk [vmem:[#allocation3 + $0x98] sm:$0xff] %vm218_vm0, %v27438_v57 }
 0x248   :  { %7244 = vst.msk [vmem:[#allocation3 + $0xa0] sm:$0xff] %vm218_vm0, %v27438_v57  ;;  %7245 = vst.msk [vmem:[#allocation3 + $0xa8] sm:$0xff] %vm218_vm0, %v27438_v57 }
 0x249   :  { %7246 = vst.msk [vmem:[#allocation3 + $0xb0] sm:$0xff] %vm218_vm0, %v27438_v57  ;;  %7247 = vst.msk [vmem:[#allocation3 + $0xb8] sm:$0xff] %vm218_vm0, %v27438_v57 }
 0x24a   :  { %17795 = vmatmul.mubr.msk.bf16.gmra.mrb[32].mxu0 %vm218_vm0, %v2528_v17  ;;  %v2851_v17 = vld [vmem:[%s27429_s0 + $0xd6] sm:$0xff]  ;;  %7248 = vst.msk [vmem:[#allocation3 + $0xc0] sm:$0xff] %vm218_vm0, %v27438_v57  ;;  %7249 = vst.msk [vmem:[#allocation3 + $0xc8] sm:$0xff] %vm218_vm0, %v27438_v57 }
 0x24b   :  { %18191 = vmatmul.mubr.msk.bf16.gmra.mrb[32].mxu1 %vm218_vm0, %v5672_v22  ;;  %17806 = vmatprep.mubr.msk.bf16.mxu0 %vm218_vm0, %v2865_v23  ;;  %v2852_v22 = vld [vmem:[%s27429_s0 + $0xde] sm:$0xff]  ;;  %7250 = vst.msk [vmem:[#allocation3 + $0xd0] sm:$0xff] %vm218_vm0, %v27438_v57  ;;  %7251 = vst.msk [vmem:[#allocation3 + $0xd8] sm:$0xff] %vm218_vm0, %v27438_v57 }
 0x24c   :  { %18202 = vmatprep.mubr.msk.bf16.mxu1 %vm218_vm0, %v6008_v9  ;;  %v16014_v23 = vld [vmem:[%s27429_s0 + $0x21e] sm:$0xff]  ;;  %v16015_v9 = vld [vmem:[%s27429_s0 + $0x226] sm:$0xff]  ;;  %v2876_v27 = vpack.c.bf16 %v2852_v22, %v2851_v17  ;;  %7252 = vst.msk [vmem:[#allocation3 + $0xe0] sm:$0xff] %vm218_vm0, %v27438_v57  ;;  %7253 = vst.msk [vmem:[#allocation3 + $0xe8] sm:$0xff] %vm218_vm0, %v27438_v57 }
 0x24d   :  { %v6019_v40 = vpack.c.bf16 %v16015_v9, %v16014_v23  ;;  %7254 = vst.msk [vmem:[#allocation3 + $0xf0] sm:$0xff] %vm218_vm0, %v27438_v57  ;;  %7255 = vst.msk [vmem:[#allocation3 + $0xf8] sm:$0xff] %vm218_vm0, %v27438_v57 }
 0x24e   :  { %7256 = vst.msk [vmem:[#allocation3 + $0x100] sm:$0xff] %vm218_vm0, %v27438_v57  ;;  %7257 = vst.msk [vmem:[#allocation3 + $0x108] sm:$0xff] %vm218_vm0, %v27438_v57  ;;  %v23190_v62 = vpop.permute.xlu0 %6400 }
 0x24f   :  { %7258 = vst.msk [vmem:[#allocation3 + $0x110] sm:$0xff] %vm218_vm0, %v27438_v57  ;;  %7259 = vst.msk [vmem:[#allocation3 + $0x118] sm:$0xff] %vm218_vm0, %v27438_v57  ;;  %v23192_v63 = vpop.permute.xlu1 %6410 }
 0x250   :  { %7260 = vst.msk [vmem:[#allocation3 + $0x120] sm:$0xff] %vm218_vm0, %v27438_v57  ;;  %7261 = vst.msk [vmem:[#allocation3 + $0x128] sm:$0xff] %vm218_vm0, %v27438_v57 }
 0x251   :  { %7262 = vst.msk [vmem:[#allocation3 + $0x130] sm:$0xff] %vm218_vm0, %v27438_v57  ;;  %7263 = vst.msk [vmem:[#allocation3 + $0x138] sm:$0xff] %vm218_vm0, %v27438_v57 }
 0x252   :  { %17807 = vmatmul.mubr.msk.bf16.vlgmr.msra.gmra.mrb[0].mxu0 %vm218_vm0, %v2866_v45  ;;  %v2855_v45 = vld [vmem:[%s27429_s0 + $0xf6] sm:$0xff]  ;;  %7266 = vst.msk [vmem:[#allocation3 + $0x148] sm:$0xff] %vm218_vm0, %v27438_v57  ;;  %7267 = vst.msk [vmem:[#allocation3 + $0x150] sm:$0xff] %vm218_vm0, %v27438_v57 }
 0x253   :  { %18203 = vmatmul.mubr.msk.bf16.vlgmr.msra.gmra.mrb[0].mxu1 %vm218_vm0, %v6009_v50  ;;  %17810 = vmatprep.mubr.msk.bf16.mxu0 %vm218_vm0, %v2867_v51  ;;  %v2856_v50 = vld [vmem:[%s27429_s0 + $0xfe] sm:$0xff]  ;;  %7268 = vst.msk [vmem:[#allocation3 + $0x158] sm:$0xff] %vm218_vm0, %v27438_v57  ;;  %7269 = vst.msk [vmem:[#allocation3 + $0x160] sm:$0xff] %vm218_vm0, %v27438_v57  ;;  %v23194_v30 = vpop.permute.xlu0 %6405 }
 0x254   :  { %18206 = vmatprep.mubr.msk.bf16.mxu1 %vm218_vm0, %v6010_v53  ;;  %v16018_v51 = vld [vmem:[%s27429_s0 + $0x23e] sm:$0xff]  ;;  %v16019_v53 = vld [vmem:[%s27429_s0 + $0x246] sm:$0xff]  ;;  %v2878_v5 = vpack.c.bf16 %v2856_v50, %v2855_v45  ;;  %7270 = vst.msk [vmem:[#allocation3 + $0x168] sm:$0xff] %vm218_vm0, %v27438_v57  ;;  %7271 = vst.msk [vmem:[#allocation3 + $0x170] sm:$0xff] %vm218_vm0, %v27438_v57  ;;  %v23196_v31 = vpop.permute.xlu1 %6415 }
 0x255   :  { %v6021_v18 = vpack.c.bf16 %v16019_v53, %v16018_v51  ;;  %7272 = vst.msk [vmem:[#allocation3 + $0x178] sm:$0xff] %vm218_vm0, %v27438_v57  ;;  %7273 = vst.msk [vmem:[#allocation3 + $0x180] sm:$0xff] %vm218_vm0, %v27438_v57 }
 0x256   :  { %7274 = vst.msk [vmem:[#allocation3 + $0x188] sm:$0xff] %vm218_vm0, %v27438_v57  ;;  %7275 = vst.msk [vmem:[#allocation3 + $0x190] sm:$0xff] %vm218_vm0, %v27438_v57 }
 0x257   :  { %7276 = vst.msk [vmem:[#allocation3 + $0x198] sm:$0xff] %vm218_vm0, %v27438_v57  ;;  %7277 = vst.msk [vmem:[#allocation3 + $0x1a0] sm:$0xff] %vm218_vm0, %v27438_v57  ;;  %v23198_v32 = vpop.permute.xlu0 %6420 }
 0x258   :  { %7278 = vst.msk [vmem:[#allocation3 + $0x1a8] sm:$0xff] %vm218_vm0, %v27438_v57  ;;  %7279 = vst.msk [vmem:[#allocation3 + $0x1b0] sm:$0xff] %vm218_vm0, %v27438_v57 }
 0x259   :  { %7280 = vst.msk [vmem:[#allocation3 + $0x1b8] sm:$0xff] %vm218_vm0, %v27438_v57  ;;  %7281 = vst.msk [vmem:[#allocation3 + $0x1c0] sm:$0xff] %vm218_vm0, %v27438_v57 }
 0x25a   :  { %17811 = vmatmul.mubr.msk.bf16.gmra.mrb[4].mxu0 %vm218_vm0, %v2868_v21  ;;  %v2859_v21 = vld [vmem:[%s27429_s0 + $0x116] sm:$0xff]  ;;  %7282 = vst.msk [vmem:[#allocation3 + $0x1c8] sm:$0xff] %vm218_vm0, %v27438_v57  ;;  %7283 = vst.msk [vmem:[#allocation3 + $0x1d0] sm:$0xff] %vm218_vm0, %v27438_v57 }
 0x25b   :  { %18207 = vmatmul.mubr.msk.bf16.gmra.mrb[4].mxu1 %vm218_vm0, %v6011_v34  ;;  %17814 = vmatprep.mubr.msk.bf16.mxu0 %vm218_vm0, %v2869_v35  ;;  %v2860_v34 = vld [vmem:[%s27429_s0 + $0x11e] sm:$0xff]  ;;  %7284 = vst.msk [vmem:[#allocation3 + $0x1d8] sm:$0xff] %vm218_vm0, %v27438_v57  ;;  %7285 = vst.msk [vmem:[#allocation3 + $0x1e0] sm:$0xff] %vm218_vm0, %v27438_v57 }
 0x25c   :  { %18210 = vmatprep.mubr.msk.bf16.mxu1 %vm218_vm0, %v6012_v46  ;;  %v16022_v35 = vld [vmem:[%s27429_s0 + $0x25e] sm:$0xff]  ;;  %v16023_v46 = vld [vmem:[%s27429_s0 + $0x266] sm:$0xff]  ;;  %v2880_v14 = vpack.c.bf16 %v2860_v34, %v2859_v21  ;;  %7286 = vst.msk [vmem:[#allocation3 + $0x1e8] sm:$0xff] %vm218_vm0, %v27438_v57  ;;  %7287 = vst.msk [vmem:[#allocation3 + $0x1f0] sm:$0xff] %vm218_vm0, %v27438_v57 }
 0x25d   :  { %v6023_v15 = vpack.c.bf16 %v16023_v46, %v16022_v35  ;;  %7288 = vst.msk [vmem:[#allocation3 + $0x1f8] sm:$0xff] %vm218_vm0, %v27438_v57  ;;  %7289 = vst.msk [vmem:[#allocation3 + $0x200] sm:$0xff] %vm218_vm0, %v27438_v57 }
 0x25e   :  { %7290 = vst.msk [vmem:[#allocation3 + $0x208] sm:$0xff] %vm218_vm0, %v27438_v57  ;;  %7291 = vst.msk [vmem:[#allocation3 + $0x210] sm:$0xff] %vm218_vm0, %v27438_v57 }
 0x25f   :  { %7292 = vst.msk [vmem:[#allocation3 + $0x218] sm:$0xff] %vm218_vm0, %v27438_v57  ;;  %7293 = vst.msk [vmem:[#allocation3 + $0x220] sm:$0xff] %vm218_vm0, %v27438_v57 }
 0x260   :  { %7294 = vst.msk [vmem:[#allocation3 + $0x228] sm:$0xff] %vm218_vm0, %v27438_v57  ;;  %7295 = vst.msk [vmem:[#allocation3 + $0x230] sm:$0xff] %vm218_vm0, %v27438_v57 }
 0x261   :  { %7296 = vst.msk [vmem:[#allocation3 + $0x238] sm:$0xff] %vm218_vm0, %v27438_v57  ;;  %7297 = vst.msk [vmem:[#allocation3 + $0x240] sm:$0xff] %vm218_vm0, %v27438_v57 }
 0x262   :  { %17815 = vmatmul.mubr.msk.bf16.gmra.mrb[8].mxu0 %vm218_vm0, %v2870_v29  ;;  %v2863_v29 = vld [vmem:[%s27429_s0 + $0x136] sm:$0xff]  ;;  %7298 = vst.msk [vmem:[#allocation3 + $0x248] sm:$0xff] %vm218_vm0, %v27438_v57  ;;  %7299 = vst.msk [vmem:[#allocation3 + $0x250] sm:$0xff] %vm218_vm0, %v27438_v57 }
 0x263   :  { %18211 = vmatmul.mubr.msk.bf16.gmra.mrb[8].mxu1 %vm218_vm0, %v6013_v36  ;;  %17818 = vmatprep.mubr.msk.bf16.mxu0 %vm218_vm0, %v2871_v37  ;;  %v2864_v36 = vld [vmem:[%s27429_s0 + $0x13e] sm:$0xff]  ;;  %7300 = vst.msk [vmem:[#allocation3 + $0x258] sm:$0xff] %vm218_vm0, %v27438_v57  ;;  %7301 = vst.msk [vmem:[#allocation3 + $0x260] sm:$0xff] %vm218_vm0, %v27438_v57 }
 0x264   :  { %18214 = vmatprep.mubr.msk.bf16.mxu1 %vm218_vm0, %v6014_v38  ;;  %v16026_v37 = vld [vmem:[%s27429_s0 + $0x27e] sm:$0xff]  ;;  %v16027_v38 = vld [vmem:[%s27429_s0 + $0x286] sm:$0xff]  ;;  %v2882_v39 = vpack.c.bf16 %v2864_v36, %v2863_v29  ;;  %7302 = vst.msk [vmem:[#allocation3 + $0x268] sm:$0xff] %vm218_vm0, %v27438_v57  ;;  %7303 = vst.msk [vmem:[#allocation3 + $0x270] sm:$0xff] %vm218_vm0, %v27438_v57 }
 0x265   :  { %v6025_v56 = vpack.c.bf16 %v16027_v38, %v16026_v37  ;;  %7304 = vst.msk [vmem:[#allocation3 + $0x278] sm:$0xff] %vm218_vm0, %v27438_v57  ;;  %7305 = vst.msk [vmem:[#allocation3 + $0x280] sm:$0xff] %vm218_vm0, %v27438_v57 }
 0x266   :  { %27628 = vst [vmem:[#allocation5_spill] sm:$0xff] %v23190_v62  ;;  %27629 = vst [vmem:[#allocation6_spill] sm:$0xff] %v23192_v63 }
 0x267   :  { %27630 = vst [vmem:[#allocation7_spill] sm:$0xff] %v23194_v30  ;;  %27631 = vst [vmem:[#allocation8_spill] sm:$0xff] %v23196_v31 }
 0x268   :  { %27632 = vst [vmem:[#allocation9_spill] sm:$0xff] %v23198_v32 }
 0x26a   :  { %17819 = vmatmul.mubr.msk.bf16.gmra.mrb[12].mxu0 %vm218_vm0, %v2872_v33  ;;  %v23200_v33 = vpop.permute.xlu1 %6425 }
 0x26b   :  { %18215 = vmatmul.mubr.msk.bf16.gmra.mrb[12].mxu1 %vm218_vm0, %v6015_v47  ;;  %17822 = vmatprep.mubr.msk.bf16.mxu0 %vm218_vm0, %v2873_v48  ;;  %v23202_v47 = vpop.permute.xlu0 %6430 }
 0x26c   :  { %18218 = vmatprep.mubr.msk.bf16.mxu1 %vm218_vm0, %v6016_v60  ;;  %27633 = vst [vmem:[#allocation10_spill] sm:$0xff] %v23202_v47 }
 0x26e   :  { %v23204_v48 = vpop.permute.xlu1 %6435 }
 0x26f   :  { %v23206_v60 = vpop.permute.xlu0 %6440 }
 0x272   :  { %17823 = vmatmul.mubr.msk.bf16.gmra.mrb[16].mxu0 %vm218_vm0, %v2874_v54  ;;  %v23208_v61 = vpop.permute.xlu1 %6445 }
 0x273   :  { %18219 = vmatmul.mubr.msk.bf16.gmra.mrb[16].mxu1 %vm218_vm0, %v6017_v11  ;;  %17826 = vmatprep.mubr.msk.bf16.mxu0 %vm218_vm0, %v2875_v12  ;;  %27634 = vst [vmem:[#allocation11_spill] sm:$0xff] %v23208_v61  ;;  %v23210_v1 = vpop.permute.xlu0 %6450 }
 0x274   :  { %18222 = vmatprep.mubr.msk.bf16.mxu1 %vm218_vm0, %v6018_v16  ;;  %27635 = vst [vmem:[#allocation12_spill] sm:$0xff] %v23210_v1 }
 0x276   :  { %v23212_v2 = vpop.permute.xlu1 %6455 }
 0x277   :  { %27636 = vst [vmem:[#allocation13_spill] sm:$0xff] %v23212_v2  ;;  %v23214_v6 = vpop.permute.xlu0 %6460 }
 0x278   :  { %27637 = vst [vmem:[#allocation14_spill] sm:$0xff] %v23214_v6 }
 0x27a   :  { %17827 = vmatmul.mubr.msk.bf16.gmra.mrb[20].mxu0 %vm218_vm0, %v2876_v27  ;;  %v23216_v7 = vpop.permute.xlu1 %6465 }
 0x27b   :  { %18223 = vmatmul.mubr.msk.bf16.gmra.mrb[20].mxu1 %vm218_vm0, %v6019_v40  ;;  %17830 = vmatprep.mubr.msk.bf16.mxu0 %vm218_vm0, %v2877_v41  ;;  %27638 = vst [vmem:[#allocation15_spill] sm:$0xff] %v23216_v7  ;;  %v23218_v52 = vpop.permute.xlu0 %6470 }
 0x27c   :  { %18226 = vmatprep.mubr.msk.bf16.mxu1 %vm218_vm0, %v6020_v43  ;;  %27639 = vst [vmem:[#allocation16_spill] sm:$0xff] %v23218_v52 }
 0x27e   :  { %v23220_v8 = vpop.permute.xlu1 %6475 }
 0x27f   :  { %27640 = vst [vmem:[#allocation17_spill] sm:$0xff] %v23220_v8  ;;  %v23230_v9 = vpop.permute.xlu0 %6480 }
 0x280   :  { %27641 = vst [vmem:[#allocation18_spill] sm:$0xff] %v23230_v9 }
 0x282   :  { %17831 = vmatmul.mubr.msk.bf16.gmra.mrb[24].mxu0 %vm218_vm0, %v2878_v5  ;;  %v23232_v24 = vpop.permute.xlu1 %6485 }
 0x283   :  { %18227 = vmatmul.mubr.msk.bf16.gmra.mrb[24].mxu1 %vm218_vm0, %v6021_v18  ;;  %17834 = vmatprep.mubr.msk.bf16.mxu0 %vm218_vm0, %v2879_v19  ;;  %27642 = vst [vmem:[#allocation19_spill] sm:$0xff] %v23232_v24  ;;  %v23263_v59 = vpop.permute.xlu0 %6490 }
 0x284   :  { %18230 = vmatprep.mubr.msk.bf16.mxu1 %vm218_vm0, %v6022_v20  ;;  %27643 = vst [vmem:[#allocation20_spill] sm:$0xff] %v23263_v59 }
 0x28a   :  { %17835 = vmatmul.mubr.msk.bf16.gmra.mrb[28].mxu0 %vm218_vm0, %v2880_v14 }
 0x28b   :  { %18231 = vmatmul.mubr.msk.bf16.gmra.mrb[28].mxu1 %vm218_vm0, %v6023_v15  ;;  %17838 = vmatprep.mubr.msk.bf16.mxu0 %vm218_vm0, %v2881_v44 }
 0x28c   :  { %18234 = vmatprep.mubr.msk.bf16.mxu1 %vm218_vm0, %v6024_v28  ;;  %v23268_v28 = vpop.permute.xlu1 %6495 }
 0x28d   :  { %27644 = vst [vmem:[#allocation21_spill] sm:$0xff] %v23268_v28 }
 0x292   :  { %17839 = vmatmul.mubr.msk.bf16.gmra.mrb[32].mxu0 %vm218_vm0, %v2882_v39 }
 0x293   :  { %18235 = vmatmul.mubr.msk.bf16.gmra.mrb[32].mxu1 %vm218_vm0, %v6025_v56 }
 0x325   :  { %v17808_v10 = vpop.f32.mrb[0].mxu0 }
 0x326   :  { %3185 = vst.msk [vmem:[#allocation2 + $0x10] sm:$0xff] %vm218_vm0, %v17808_v10  ;;  %v18204_v54 = vpop.f32.mrb[0].mxu1  ;;  %v3004_v11 = vpop.f32.mrb[1].mxu0 }
 0x327   :  { %6328 = vst.msk [vmem:[#allocation2 + $0x130] sm:$0xff] %vm218_vm0, %v18204_v54  ;;  %3183 = vst.msk [vmem:[#allocation2] sm:$0xff] %vm218_vm0, %v3004_v11  ;;  %v6146_v12 = vpop.f32.mrb[1].mxu1  ;;  %v17809_v16 = vpop.f32.mrb[2].mxu0 }
 0x328   :  { %6326 = vst.msk [vmem:[#allocation2 + $0x120] sm:$0xff] %vm218_vm0, %v6146_v12  ;;  %3186 = vst.msk [vmem:[#allocation2 + $0x18] sm:$0xff] %vm218_vm0, %v17809_v16  ;;  %v18205_v17 = vpop.f32.mrb[2].mxu1  ;;  %v3007_v22 = vpop.f32.mrb[3].mxu0 }
 0x329   :  { %6329 = vst.msk [vmem:[#allocation2 + $0x138] sm:$0xff] %vm218_vm0, %v18205_v17  ;;  %3184 = vst.msk [vmem:[#allocation2 + $0x8] sm:$0xff] %vm218_vm0, %v3007_v22  ;;  %v6149_v23 = vpop.f32.mrb[3].mxu1 }
 0x32a   :  { %6327 = vst.msk [vmem:[#allocation2 + $0x128] sm:$0xff] %vm218_vm0, %v6149_v23 }
 0x32d   :  { %v17812_v25 = vpop.f32.mrb[4].mxu0  ;;  %v23234_v13 = vld [vmem:[#allocation2 + $0x10] sm:$0xff] }
 0x32e   :  { %v23236_v26 = vld [vmem:[#allocation2] sm:$0xff]  ;;  %3189 = vst.msk [vmem:[#allocation2 + $0x30] sm:$0xff] %vm218_vm0, %v17812_v25  ;;  %v18208_v27 = vpop.f32.mrb[4].mxu1  ;;  %v3020_v40 = vpop.f32.mrb[5].mxu0  ;;  %v6694_v41 = vld [vmem:[#allocation2 + $0x130] sm:$0xff]  ;;  %v6580_v5 = vmul.f32 %v23192_v63, %v23234_v13 }
 0x32f   :  { %v6578_v43 = vmul.f32 %v23190_v62, %v23236_v26  ;;  %v6692_v45 = vld [vmem:[#allocation2 + $0x120] sm:$0xff]  ;;  %6332 = vst.msk [vmem:[#allocation2 + $0x150] sm:$0xff] %vm218_vm0, %v18208_v27  ;;  %3187 = vst.msk [vmem:[#allocation2 + $0x20] sm:$0xff] %vm218_vm0, %v3020_v40  ;;  %v6162_v50 = vpop.f32.mrb[5].mxu1  ;;  %v17813_v51 = vpop.f32.mrb[6].mxu0  ;;  %v23244_v55 = vld [vmem:[#allocation2 + $0x18] sm:$0xff]  ;;  %v6730_v34 = vmul.f32 %v6694_v41, %v23192_v63 }
 0x330   :  { %v6728_v53 = vmul.f32 %v6692_v45, %v23190_v62  ;;  %v23246_v0 = vld [vmem:[#allocation2 + $0x8] sm:$0xff]  ;;  %6330 = vst.msk [vmem:[#allocation2 + $0x140] sm:$0xff] %vm218_vm0, %v6162_v50  ;;  %3190 = vst.msk [vmem:[#allocation2 + $0x38] sm:$0xff] %vm218_vm0, %v17813_v51  ;;  %v18209_v3 = vpop.f32.mrb[6].mxu1  ;;  %v3023_v4 = vpop.f32.mrb[7].mxu0  ;;  %v6695_v18 = vld [vmem:[#allocation2 + $0x138] sm:$0xff]  ;;  %v6581_v49 = vmul.f32 %v23196_v31, %v23244_v55 }
 0x331   :  { %v6579_v19 = vmul.f32 %v23194_v30, %v23246_v0  ;;  %v6693_v20 = vld [vmem:[#allocation2 + $0x128] sm:$0xff]  ;;  %6333 = vst.msk [vmem:[#allocation2 + $0x158] sm:$0xff] %vm218_vm0, %v18209_v3  ;;  %3188 = vst.msk [vmem:[#allocation2 + $0x28] sm:$0xff] %vm218_vm0, %v3023_v4  ;;  %v6165_v21 = vpop.f32.mrb[7].mxu1  ;;  %v6614_v46 = vsel %vm218_vm0, %v6578_v43, 0.0  ;;  %v6731_v14 = vmul.f32 %v6695_v18, %v23196_v31  ;;  %v6617_v29 = vsel %vm218_vm0, %v6580_v5, 0.0 }
 0x332   :  { %v6729_v35 = vmul.f32 %v6693_v20, %v23194_v30  ;;  %6331 = vst.msk [vmem:[#allocation2 + $0x148] sm:$0xff] %vm218_vm0, %v6165_v21  ;;  %v6764_v42 = vsel %vm218_vm0, %v6728_v53, 0.0  ;;  %v6767_v38 = vsel %vm218_vm0, %v6730_v34, 0.0  ;;  %v6619_v11 = vsel %vm218_vm0, %v6581_v49, 0.0 }
 0x333   :  { %v6615_v58 = vsel %vm218_vm0, %v6579_v19, 0.0  ;;  %v6769_v27 = vsel %vm218_vm0, %v6731_v14, 0.0 }
 0x334   :  { %v6616_v15 = vadd.f32 %v6615_v58, %v6614_v46  ;;  %v6765_v44 = vsel %vm218_vm0, %v6729_v35, 0.0 }
 0x335   :  { %v6766_v36 = vadd.f32 %v6765_v44, %v6764_v42  ;;  %v17816_v37 = vpop.f32.mrb[8].mxu0  ;;  %v23276_v16 = vld [vmem:[#allocation2 + $0x30] sm:$0xff]  ;;  %v23301_v42 = vpop.permute.xlu0 %6500 }
 0x336   :  { %v6618_v39 = vadd.f32 %v6617_v29, %v6616_v15  ;;  %v23272_v56 = vld [vmem:[#allocation2 + $0x20] sm:$0xff]  ;;  %3193 = vst.msk [vmem:[#allocation2 + $0x50] sm:$0xff] %vm218_vm0, %v17816_v37  ;;  %v18212_v10 = vpop.f32.mrb[8].mxu1  ;;  %v3036_v54 = vpop.f32.mrb[9].mxu0  ;;  %v6698_v40 = vld [vmem:[#allocation2 + $0x150] sm:$0xff]  ;;  %v6584_v19 = vmul.f32 %v23202_v47, %v23276_v16  ;;  %27645 = vst [vmem:[#allocation22_spill] sm:$0xff] %v23301_v42 }
 0x337   :  { %v6768_v12 = vadd.f32 %v6767_v38, %v6766_v36  ;;  %v6582_v17 = vmul.f32 %v23198_v32, %v23272_v56  ;;  %v6696_v22 = vld [vmem:[#allocation2 + $0x140] sm:$0xff]  ;;  %6336 = vst.msk [vmem:[#allocation2 + $0x170] sm:$0xff] %vm218_vm0, %v18212_v10  ;;  %3191 = vst.msk [vmem:[#allocation2 + $0x40] sm:$0xff] %vm218_vm0, %v3036_v54  ;;  %v6178_v23 = vpop.f32.mrb[9].mxu1  ;;  %v17817_v25 = vpop.f32.mrb[10].mxu0  ;;  %v23289_v4 = vld [vmem:[#allocation2 + $0x38] sm:$0xff]  ;;  %v6734_v46 = vmul.f32 %v6698_v40, %v23202_v47 }
 0x338   :  { %v6620_v41 = vadd.f32 %v6619_v11, %v6618_v39  ;;  %v6732_v43 = vmul.f32 %v6696_v22, %v23198_v32  ;;  %v23284_v45 = vld [vmem:[#allocation2 + $0x28] sm:$0xff]  ;;  %6334 = vst.msk [vmem:[#allocation2 + $0x160] sm:$0xff] %vm218_vm0, %v6178_v23  ;;  %3194 = vst.msk [vmem:[#allocation2 + $0x58] sm:$0xff] %vm218_vm0, %v17817_v25  ;;  %v18213_v50 = vpop.f32.mrb[10].mxu1  ;;  %v3039_v51 = vpop.f32.mrb[11].mxu0  ;;  %v6699_v34 = vld [vmem:[#allocation2 + $0x158] sm:$0xff]  ;;  %v6585_v14 = vmul.f32 %v23204_v48, %v23289_v4 }
 0x339   :  { %v6621_v53 = vsel %vm218_vm0, %v6582_v17, 0.0  ;;  %v6770_v3 = vadd.f32 %v6769_v27, %v6768_v12  ;;  %v6697_v5 = vld [vmem:[#allocation2 + $0x148] sm:$0xff]  ;;  %6337 = vst.msk [vmem:[#allocation2 + $0x178] sm:$0xff] %vm218_vm0, %v18213_v50  ;;  %3192 = vst.msk [vmem:[#allocation2 + $0x48] sm:$0xff] %vm218_vm0, %v3039_v51  ;;  %v6181_v18 = vpop.f32.mrb[11].mxu1  ;;  %v6583_v35 = vmul.f32 %v23200_v33, %v23284_v45  ;;  %v23306_v44 = vpop.permute.xlu1 %6505  ;;  %v6735_v29 = vmul.f32 %v6699_v34, %v23204_v48 }
 0x33a   :  { %v6622_v20 = vadd.f32 %v6621_v53, %v6620_v41  ;;  %v6771_v21 = vsel %vm218_vm0, %v6732_v43, 0.0  ;;  %6335 = vst.msk [vmem:[#allocation2 + $0x168] sm:$0xff] %vm218_vm0, %v6181_v18  ;;  %v6733_v58 = vmul.f32 %v6697_v5, %v23200_v33  ;;  %27646 = vst [vmem:[#allocation23_spill] sm:$0xff] %v23306_v44  ;;  %v6625_v39 = vsel %vm218_vm0, %v6584_v19, 0.0 }
 0x33b   :  { %v6772_v49 = vadd.f32 %v6771_v21, %v6770_v3  ;;  %v6623_v15 = vsel %vm218_vm0, %v6583_v35, 0.0  ;;  %v6775_v17 = vsel %vm218_vm0, %v6734_v46, 0.0  ;;  %v6627_v43 = vsel %vm218_vm0, %v6585_v14, 0.0 }
 0x33c   :  { %v6624_v36 = vadd.f32 %v6623_v15, %v6622_v20  ;;  %v6773_v37 = vsel %vm218_vm0, %v6733_v58, 0.0  ;;  %v6777_v19 = vsel %vm218_vm0, %v6735_v29, 0.0 }
 0x33d   :  { %v17820_v38 = vpop.f32.mrb[12].mxu0  ;;  %v6774_v10 = vadd.f32 %v6773_v37, %v6772_v49  ;;  %v23315_v23 = vld [vmem:[#allocation2 + $0x50] sm:$0xff] }
 0x33e   :  { %v23311_v54 = vld [vmem:[#allocation2 + $0x40] sm:$0xff]  ;;  %3197 = vst.msk [vmem:[#allocation2 + $0x70] sm:$0xff] %vm218_vm0, %v17820_v38  ;;  %v18216_v11 = vpop.f32.mrb[12].mxu1  ;;  %v3052_v12 = vpop.f32.mrb[13].mxu0  ;;  %v6626_v22 = vadd.f32 %v6625_v39, %v6624_v36  ;;  %v6702_v51 = vld [vmem:[#allocation2 + $0x170] sm:$0xff]  ;;  %v6588_v49 = vmul.f32 %v23210_v1, %v23315_v23 }
 0x33f   :  { %v6586_v25 = vmul.f32 %v23206_v60, %v23311_v54  ;;  %v6700_v27 = vld [vmem:[#allocation2 + $0x160] sm:$0xff]  ;;  %6340 = vst.msk [vmem:[#allocation2 + $0x190] sm:$0xff] %vm218_vm0, %v18216_v11  ;;  %3195 = vst.msk [vmem:[#allocation2 + $0x60] sm:$0xff] %vm218_vm0, %v3052_v12  ;;  %v6194_v40 = vpop.f32.mrb[13].mxu1  ;;  %v17821_v41 = vpop.f32.mrb[14].mxu0  ;;  %v6776_v50 = vadd.f32 %v6775_v17, %v6774_v10  ;;  %v23329_v34 = vld [vmem:[#allocation2 + $0x58] sm:$0xff]  ;;  %v6738_v36 = vmul.f32 %v6702_v51, %v23210_v1 }
 0x340   :  { %v6736_v53 = vmul.f32 %v6700_v27, %v23206_v60  ;;  %v23323_v3 = vld [vmem:[#allocation2 + $0x48] sm:$0xff]  ;;  %6338 = vst.msk [vmem:[#allocation2 + $0x180] sm:$0xff] %vm218_vm0, %v6194_v40  ;;  %3198 = vst.msk [vmem:[#allocation2 + $0x78] sm:$0xff] %vm218_vm0, %v17821_v41  ;;  %v18217_v5 = vpop.f32.mrb[14].mxu1  ;;  %v3055_v18 = vpop.f32.mrb[15].mxu0  ;;  %v6628_v20 = vadd.f32 %v6627_v43, %v6626_v22  ;;  %v23338_v15 = vld [vmem:[#allocation2 + $0x178] sm:$0xff]  ;;  %v6589_v11 = vmul.f32 %v23212_v2, %v23329_v34 }
 0x341   :  { %v6629_v21 = vsel %vm218_vm0, %v6586_v25, 0.0  ;;  %v23331_v35 = vld [vmem:[#allocation2 + $0x168] sm:$0xff]  ;;  %6341 = vst.msk [vmem:[#allocation2 + $0x198] sm:$0xff] %vm218_vm0, %v18217_v5  ;;  %3196 = vst.msk [vmem:[#allocation2 + $0x68] sm:$0xff] %vm218_vm0, %v3055_v18  ;;  %v6197_v46 = vpop.f32.mrb[15].mxu1  ;;  %v6778_v58 = vadd.f32 %v6777_v19, %v6776_v50  ;;  %v6587_v29 = vmul.f32 %v23208_v61, %v23323_v3  ;;  %v23346_v39 = vpop.permute.xlu0 %6510  ;;  %v6739_v22 = vmul.f32 %v23338_v15, %v23212_v2 }
 0x342   :  { %27647 = vst [vmem:[#allocation24_spill] sm:$0xff] %v23331_v35  ;;  %v6779_v14 = vsel %vm218_vm0, %v6736_v53, 0.0  ;;  %27648 = vst [vmem:[#allocation25_spill] sm:$0xff] %v23338_v15  ;;  %v6630_v37 = vadd.f32 %v6629_v21, %v6628_v20  ;;  %v6737_v38 = vmul.f32 %v23331_v35, %v23208_v61  ;;  %v23351_v17 = vpop.permute.xlu1 %6515  ;;  %v6633_v41 = vsel %vm218_vm0, %v6588_v49, 0.0 }
 0x343   :  { %6339 = vst.msk [vmem:[#allocation2 + $0x188] sm:$0xff] %vm218_vm0, %v6197_v46  ;;  %27649 = vst [vmem:[#allocation26_spill] sm:$0xff] %v23346_v39  ;;  %v6780_v10 = vadd.f32 %v6779_v14, %v6778_v58  ;;  %v6631_v12 = vsel %vm218_vm0, %v6587_v29, 0.0  ;;  %v6783_v5 = vsel %vm218_vm0, %v6738_v36, 0.0  ;;  %v6635_v58 = vsel %vm218_vm0, %v6589_v11, 0.0 }
 0x344   :  { %27650 = vst [vmem:[#allocation27_spill] sm:$0xff] %v23351_v17  ;;  %v6632_v25 = vadd.f32 %v6631_v12, %v6630_v37  ;;  %v6781_v27 = vsel %vm218_vm0, %v6737_v38, 0.0  ;;  %v6785_v12 = vsel %vm218_vm0, %v6739_v22, 0.0 }
 0x345   :  { %v17824_v40 = vpop.f32.mrb[16].mxu0  ;;  %v6782_v43 = vadd.f32 %v6781_v27, %v6780_v10  ;;  %v23361_v19 = vld [vmem:[#allocation2 + $0x70] sm:$0xff] }
 0x346   :  { %v23357_v50 = vld [vmem:[#allocation2 + $0x60] sm:$0xff]  ;;  %3201 = vst.msk [vmem:[#allocation2 + $0x90] sm:$0xff] %vm218_vm0, %v17824_v40  ;;  %v18220_v51 = vpop.f32.mrb[16].mxu1  ;;  %v3068_v53 = vpop.f32.mrb[17].mxu0  ;;  %v6634_v18 = vadd.f32 %v6633_v41, %v6632_v25  ;;  %v23370_v29 = vld [vmem:[#allocation2 + $0x190] sm:$0xff] }
 0x347   :  { %v6590_v20 = vmul.f32 %v23214_v6, %v23357_v50  ;;  %v23365_v21 = vld [vmem:[#allocation2 + $0x180] sm:$0xff]  ;;  %6344 = vst.msk [vmem:[#allocation2 + $0x1b0] sm:$0xff] %vm218_vm0, %v18220_v51  ;;  %3199 = vst.msk [vmem:[#allocation2 + $0x80] sm:$0xff] %vm218_vm0, %v3068_v53  ;;  %v6210_v46 = vpop.f32.mrb[17].mxu1  ;;  %v17825_v49 = vpop.f32.mrb[18].mxu0  ;;  %v6784_v14 = vadd.f32 %v6783_v5, %v6782_v43  ;;  %v23380_v11 = vld [vmem:[#allocation2 + $0x78] sm:$0xff]  ;;  %v6592_v43 = vmul.f32 %v23218_v52, %v23361_v19 }
 0x348   :  { %27651 = vst [vmem:[#allocation28_spill] sm:$0xff] %v23365_v21  ;;  %27652 = vst [vmem:[#allocation29_spill] sm:$0xff] %v23370_v29  ;;  %v6740_v36 = vmul.f32 %v23365_v21, %v23214_v6  ;;  %v23374_v37 = vld [vmem:[#allocation2 + $0x68] sm:$0xff]  ;;  %v18221_v38 = vpop.f32.mrb[18].mxu1  ;;  %v3071_v10 = vpop.f32.mrb[19].mxu0  ;;  %v6636_v25 = vadd.f32 %v6635_v58, %v6634_v18  ;;  %v23389_v5 = vld [vmem:[#allocation2 + $0x198] sm:$0xff]  ;;  %v6742_v18 = vmul.f32 %v23370_v29, %v23218_v52 }
 0x349   :  { %6342 = vst.msk [vmem:[#allocation2 + $0x1a0] sm:$0xff] %vm218_vm0, %v6210_v46  ;;  %3202 = vst.msk [vmem:[#allocation2 + $0x98] sm:$0xff] %vm218_vm0, %v17825_v49  ;;  %v6637_v27 = vsel %vm218_vm0, %v6590_v20, 0.0  ;;  %v6213_v41 = vpop.f32.mrb[19].mxu1  ;;  %v6786_v51 = vadd.f32 %v6785_v12, %v6784_v14  ;;  %v6591_v22 = vmul.f32 %v23216_v7, %v23374_v37  ;;  %v23398_v49 = vpop.permute.xlu0 %6520  ;;  %v6593_v14 = vmul.f32 %v23220_v8, %v23380_v11 }
 0x34a   :  { %v23382_v40 = vld [vmem:[#allocation2 + $0x188] sm:$0xff]  ;;  %6345 = vst.msk [vmem:[#allocation2 + $0x1b8] sm:$0xff] %vm218_vm0, %v18221_v38  ;;  %3200 = vst.msk [vmem:[#allocation2 + $0x88] sm:$0xff] %vm218_vm0, %v3071_v10  ;;  %v6787_v53 = vsel %vm218_vm0, %v6740_v36, 0.0  ;;  %v6638_v20 = vadd.f32 %v6637_v27, %v6636_v25  ;;  %v23403_v38 = vpop.permute.xlu1 %6525  ;;  %v6743_v10 = vmul.f32 %v23389_v5, %v23220_v8  ;;  %v6641_v27 = vsel %vm218_vm0, %v6592_v43, 0.0 }
 0x34b   :  { %27653 = vst [vmem:[#allocation30_spill] sm:$0xff] %v23382_v40  ;;  %27654 = vst [vmem:[#allocation31_spill] sm:$0xff] %v23389_v5  ;;  %v6741_v46 = vmul.f32 %v23382_v40, %v23216_v7  ;;  %v6788_v58 = vadd.f32 %v6787_v53, %v6786_v51  ;;  %v6639_v36 = vsel %vm218_vm0, %v6591_v22, 0.0  ;;  %v6791_v22 = vsel %vm218_vm0, %v6742_v18, 0.0 }
 0x34c   :  { %6343 = vst.msk [vmem:[#allocation2 + $0x1a8] sm:$0xff] %vm218_vm0, %v6213_v41  ;;  %27655 = vst [vmem:[#allocation32_spill] sm:$0xff] %v23398_v49  ;;  %v6640_v12 = vadd.f32 %v6639_v36, %v6638_v20 }
 0x34d   :  { %27656 = vst [vmem:[#allocation33_spill] sm:$0xff] %v23403_v38  ;;  %v6789_v41 = vsel %vm218_vm0, %v6741_v46, 0.0  ;;  %v17828_v25 = vpop.f32.mrb[20].mxu0  ;;  %v23413_v21 = vld [vmem:[#allocation2 + $0x90] sm:$0xff] }
 0x34e   :  { %v6790_v57 = vadd.f32 %v6789_v41, %v6788_v58  ;;  %v23409_v29 = vld [vmem:[#allocation2 + $0x80] sm:$0xff]  ;;  %3205 = vst.msk [vmem:[#allocation2 + $0xb0] sm:$0xff] %vm218_vm0, %v17828_v25  ;;  %v18224_v51 = vpop.f32.mrb[20].mxu1  ;;  %v3084_v53 = vpop.f32.mrb[21].mxu0  ;;  %v6642_v40 = vadd.f32 %v6641_v27, %v6640_v12  ;;  %v6643_v58 = vsel %vm218_vm0, %v6593_v14, 0.0  ;;  %v6710_v25 = vld [vmem:[#allocation2 + $0x1b0] sm:$0xff] }
 0x34f   :  { %v6594_v20 = vmul.f32 %v23230_v9, %v23409_v29  ;;  %6348 = vst.msk [vmem:[#allocation2 + $0x1d0] sm:$0xff] %vm218_vm0, %v18224_v51  ;;  %3203 = vst.msk [vmem:[#allocation2 + $0xa0] sm:$0xff] %vm218_vm0, %v3084_v53  ;;  %v6226_v43 = vpop.f32.mrb[21].mxu1  ;;  %v17829_v46 = vpop.f32.mrb[22].mxu0  ;;  %v6793_v51 = vsel %vm218_vm0, %v6743_v10, 0.0  ;;  %v6746_v10 = vmul.f32 %v6710_v25, %v23263_v59 }
 0x350   :  { %v6708_v36 = vld [vmem:[#allocation2 + $0x1a0] sm:$0xff]  ;;  %v6792_v41 = vadd.f32 %v6791_v22, %v6790_v57  ;;  %6346 = vst.msk [vmem:[#allocation2 + $0x1c0] sm:$0xff] %vm218_vm0, %v6226_v43  ;;  %3206 = vst.msk [vmem:[#allocation2 + $0xb8] sm:$0xff] %vm218_vm0, %v17829_v46  ;;  %v18225_v12 = vpop.f32.mrb[22].mxu1  ;;  %v3087_v27 = vpop.f32.mrb[23].mxu0  ;;  %v6644_v15 = vadd.f32 %v6643_v58, %v6642_v40  ;;  %v23427_v35 = vld [vmem:[#allocation2 + $0x98] sm:$0xff]  ;;  %v6596_v22 = vmul.f32 %v23263_v59, %v23413_v21 }
 0x351   :  { %v6744_v5 = vmul.f32 %v6708_v36, %v23230_v9  ;;  %v23421_v18 = vld [vmem:[#allocation2 + $0x88] sm:$0xff]  ;;  %v6645_v53 = vsel %vm218_vm0, %v6594_v20, 0.0  ;;  %6349 = vst.msk [vmem:[#allocation2 + $0x1d8] sm:$0xff] %vm218_vm0, %v18225_v12  ;;  %3204 = vst.msk [vmem:[#allocation2 + $0xa8] sm:$0xff] %vm218_vm0, %v3087_v27  ;;  %v6229_v57 = vpop.f32.mrb[23].mxu1  ;;  %v6711_v46 = vld [vmem:[#allocation2 + $0x1b8] sm:$0xff]  ;;  %v23442_v12 = vpop.permute.xlu0 %6530 }
 0x352   :  { %v6794_v36 = vadd.f32 %v6793_v51, %v6792_v41  ;;  %v6595_v40 = vmul.f32 %v23232_v24, %v23421_v18  ;;  %6347 = vst.msk [vmem:[#allocation2 + $0x1c8] sm:$0xff] %vm218_vm0, %v6229_v57  ;;  %v6646_v20 = vadd.f32 %v6645_v53, %v6644_v15  ;;  %27658 = vst [vmem:[#allocation35_spill] sm:$0xff] %v23442_v12  ;;  %v23447_v51 = vpop.permute.xlu1 %6535  ;;  %v6649_v15 = vsel %vm218_vm0, %v6596_v22, 0.0 }
 0x353   :  { %v23429_v14 = vld [vmem:[#allocation2 + $0x1a8] sm:$0xff]  ;;  %v6795_v43 = vsel %vm218_vm0, %v6744_v5, 0.0  ;;  %v6597_v41 = vmul.f32 %v23268_v28, %v23427_v35  ;;  %27659 = vst [vmem:[#allocation36_spill] sm:$0xff] %v23447_v51  ;;  %v6747_v9 = vmul.f32 %v6711_v46, %v23268_v28  ;;  %v6799_v59 = vsel %vm218_vm0, %v6746_v10, 0.0 }
 0x354   :  { %27657 = vst [vmem:[#allocation34_spill] sm:$0xff] %v23429_v14  ;;  %v6745_v58 = vmul.f32 %v23429_v14, %v23232_v24  ;;  %v6796_v27 = vadd.f32 %v6795_v43, %v6794_v36  ;;  %v6647_v5 = vsel %vm218_vm0, %v6595_v40, 0.0 }
 0x355   :  { %v6648_v8 = vadd.f32 %v6647_v5, %v6646_v20  ;;  %v17832_v25 = vpop.f32.mrb[24].mxu0  ;;  %v23456_v24 = vld [vmem:[#allocation2 + $0xb0] sm:$0xff] }
 0x356   :  { %v6797_v57 = vsel %vm218_vm0, %v6745_v58, 0.0  ;;  %v23452_v14 = vld [vmem:[#allocation2 + $0xa0] sm:$0xff]  ;;  %3209 = vst.msk [vmem:[#allocation2 + $0xd0] sm:$0xff] %vm218_vm0, %v17832_v25  ;;  %v18228_v36 = vpop.f32.mrb[24].mxu1  ;;  %v3100_v43 = vpop.f32.mrb[25].mxu0 }
 0x357   :  { %v6798_v53 = vadd.f32 %v6797_v57, %v6796_v27  ;;  %v6650_v40 = vadd.f32 %v6649_v15, %v6648_v8  ;;  %v6598_v46 = vmul.f32 %v23301_v42, %v23452_v14  ;;  %v23460_v20 = vld [vmem:[#allocation2 + $0x1c0] sm:$0xff]  ;;  %6352 = vst.msk [vmem:[#allocation2 + $0x1f0] sm:$0xff] %vm218_vm0, %v18228_v36  ;;  %3207 = vst.msk [vmem:[#allocation2 + $0xc0] sm:$0xff] %vm218_vm0, %v3100_v43  ;;  %v6242_v22 = vpop.f32.mrb[25].mxu1  ;;  %v17833_v58 = vpop.f32.mrb[26].mxu0  ;;  %v6651_v27 = vsel %vm218_vm0, %v6597_v41, 0.0 }
 0x358   :  { %27660 = vst [vmem:[#allocation37_spill] sm:$0xff] %v23460_v20  ;;  %v6714_v57 = vld [vmem:[#allocation2 + $0x1d0] sm:$0xff]  ;;  %v6748_v8 = vmul.f32 %v23460_v20, %v23301_v42  ;;  %v23467_v10 = vld [vmem:[#allocation2 + $0xa8] sm:$0xff]  ;;  %6350 = vst.msk [vmem:[#allocation2 + $0x1e0] sm:$0xff] %vm218_vm0, %v6242_v22  ;;  %v18229_v25 = vpop.f32.mrb[26].mxu1  ;;  %v3103_v15 = vpop.f32.mrb[27].mxu0 }
 0x359   :  { %v6800_v5 = vadd.f32 %v6799_v59, %v6798_v53  ;;  %3210 = vst.msk [vmem:[#allocation2 + $0xd8] sm:$0xff] %vm218_vm0, %v17833_v58  ;;  %v6801_v36 = vsel %vm218_vm0, %v6747_v9, 0.0  ;;  %v6652_v43 = vadd.f32 %v6651_v27, %v6650_v40  ;;  %v6653_v28 = vsel %vm218_vm0, %v6598_v46, 0.0  ;;  %v23473_v52 = vld [vmem:[#allocation2 + $0xb8] sm:$0xff]  ;;  %v23475_v59 = vld [vmem:[#allocation2 + $0x1c8] sm:$0xff]  ;;  %6353 = vst.msk [vmem:[#allocation2 + $0x1f8] sm:$0xff] %vm218_vm0, %v18229_v25  ;;  %v23490_v25 = vpop.permute.xlu0 %6540 }
 0x35a   :  { %27661 = vst [vmem:[#allocation38_spill] sm:$0xff] %v23475_v59  ;;  %3208 = vst.msk [vmem:[#allocation2 + $0xc8] sm:$0xff] %vm218_vm0, %v3103_v15  ;;  %v6245_v41 = vpop.f32.mrb[27].mxu1  ;;  %v6600_v53 = vmul.f32 %v23346_v39, %v23456_v24  ;;  %v6803_v58 = vsel %vm218_vm0, %v6748_v8, 0.0  ;;  %v23482_v20 = vld [vmem:[#allocation2 + $0x1d8] sm:$0xff]  ;;  %v6599_v9 = vmul.f32 %v23306_v44, %v23467_v10  ;;  %v6750_v40 = vmul.f32 %v6714_v57, %v23346_v39 }
 0x35b   :  { %v6802_v22 = vadd.f32 %v6801_v36, %v6800_v5  ;;  %27662 = vst [vmem:[#allocation39_spill] sm:$0xff] %v23482_v20  ;;  %6351 = vst.msk [vmem:[#allocation2 + $0x1e8] sm:$0xff] %vm218_vm0, %v6245_v41  ;;  %v6654_v46 = vadd.f32 %v6653_v28, %v6652_v43  ;;  %v6749_v27 = vmul.f32 %v23475_v59, %v23306_v44  ;;  %v23495_v36 = vpop.permute.xlu1 %6545 }
 0x35c   :  { %27663 = vst [vmem:[#allocation40_spill] sm:$0xff] %v23490_v25  ;;  %v6601_v5 = vmul.f32 %v23351_v17, %v23473_v52  ;;  %v6655_v8 = vsel %vm218_vm0, %v6599_v9, 0.0  ;;  %27664 = vst [vmem:[#allocation41_spill] sm:$0xff] %v23495_v36  ;;  %v6751_v42 = vmul.f32 %v23482_v20, %v23351_v17  ;;  %v6657_v43 = vsel %vm218_vm0, %v6600_v53, 0.0 }
 0x35d   :  { %v6804_v15 = vadd.f32 %v6803_v58, %v6802_v22  ;;  %v6656_v41 = vadd.f32 %v6655_v8, %v6654_v46  ;;  %v6805_v57 = vsel %vm218_vm0, %v6749_v27, 0.0  ;;  %v17836_v28 = vpop.f32.mrb[28].mxu0  ;;  %v6807_v9 = vsel %vm218_vm0, %v6750_v40, 0.0  ;;  %v23505_v7 = vld [vmem:[#allocation2 + $0xd0] sm:$0xff] }
 0x35e   :  { %v23501_v39 = vld [vmem:[#allocation2 + $0xc0] sm:$0xff]  ;;  %3213 = vst.msk [vmem:[#allocation2 + $0xf0] sm:$0xff] %vm218_vm0, %v17836_v28  ;;  %v18232_v22 = vpop.f32.mrb[28].mxu1  ;;  %v3116_v58 = vpop.f32.mrb[29].mxu0  ;;  %v6718_v28 = vld [vmem:[#allocation2 + $0x1f0] sm:$0xff] }
 0x35f   :  { %v6806_v59 = vadd.f32 %v6805_v57, %v6804_v15  ;;  %v6658_v44 = vadd.f32 %v6657_v43, %v6656_v41  ;;  %v6602_v46 = vmul.f32 %v23398_v49, %v23501_v39  ;;  %v23509_v8 = vld [vmem:[#allocation2 + $0x1e0] sm:$0xff]  ;;  %6356 = vst.msk [vmem:[#allocation2 + $0x210] sm:$0xff] %vm218_vm0, %v18232_v22  ;;  %3211 = vst.msk [vmem:[#allocation2 + $0xe0] sm:$0xff] %vm218_vm0, %v3116_v58  ;;  %v6258_v53 = vpop.f32.mrb[29].mxu1  ;;  %v17837_v27 = vpop.f32.mrb[30].mxu0  ;;  %v6659_v15 = vsel %vm218_vm0, %v6601_v5, 0.0 }
 0x360   :  { %27665 = vst [vmem:[#allocation42_spill] sm:$0xff] %v23509_v8  ;;  %v6752_v40 = vmul.f32 %v23509_v8, %v23398_v49  ;;  %6354 = vst.msk [vmem:[#allocation2 + $0x200] sm:$0xff] %vm218_vm0, %v6258_v53  ;;  %v18233_v43 = vpop.f32.mrb[30].mxu1  ;;  %v3119_v20 = vpop.f32.mrb[31].mxu0  ;;  %v6809_v22 = vsel %vm218_vm0, %v6751_v42, 0.0  ;;  %v23522_v6 = vld [vmem:[#allocation2 + $0xd8] sm:$0xff] }
 0x361   :  { %v6808_v57 = vadd.f32 %v6807_v9, %v6806_v59  ;;  %v23516_v41 = vld [vmem:[#allocation2 + $0xc8] sm:$0xff]  ;;  %3214 = vst.msk [vmem:[#allocation2 + $0xf8] sm:$0xff] %vm218_vm0, %v17837_v27  ;;  %v6660_v58 = vadd.f32 %v6659_v15, %v6658_v44  ;;  %v6661_v17 = vsel %vm218_vm0, %v6602_v46, 0.0  ;;  %6357 = vst.msk [vmem:[#allocation2 + $0x218] sm:$0xff] %vm218_vm0, %v18233_v43  ;;  %v6261_v5 = vpop.f32.mrb[31].mxu1  ;;  %v6604_v9 = vmul.f32 %v23442_v12, %v23505_v7  ;;  %v6719_v8 = vld [vmem:[#allocation2 + $0x1f8] sm:$0xff] }
 0x362   :  { %v23524_v59 = vld [vmem:[#allocation2 + $0x1e8] sm:$0xff]  ;;  %3212 = vst.msk [vmem:[#allocation2 + $0xe8] sm:$0xff] %vm218_vm0, %v3119_v20  ;;  %v6811_v27 = vsel %vm218_vm0, %v6752_v40, 0.0  ;;  %v6603_v42 = vmul.f32 %v23403_v38, %v23516_v41  ;;  %6355 = vst.msk [vmem:[#allocation2 + $0x208] sm:$0xff] %vm218_vm0, %v6261_v5  ;;  %v6754_v44 = vmul.f32 %v6718_v28, %v23442_v12  ;;  %v23537_v20 = vpop.permute.xlu0 %6550  ;;  %v6755_v49 = vmul.f32 %v6719_v8, %v23447_v51 }
 0x363   :  { %27666 = vst [vmem:[#allocation43_spill] sm:$0xff] %v23524_v59  ;;  %v6810_v53 = vadd.f32 %v6809_v22, %v6808_v57  ;;  %v6662_v46 = vadd.f32 %v6661_v17, %v6660_v58  ;;  %v6753_v15 = vmul.f32 %v23524_v59, %v23403_v38  ;;  %27667 = vst [vmem:[#allocation44_spill] sm:$0xff] %v23537_v20  ;;  %v23542_v22 = vpop.permute.xlu1 %6555  ;;  %v6665_v17 = vsel %vm218_vm0, %v6604_v9, 0.0 }
 0x364   :  { %v6605_v57 = vmul.f32 %v23447_v51, %v23522_v6  ;;  %v6663_v40 = vsel %vm218_vm0, %v6603_v42, 0.0  ;;  %27668 = vst [vmem:[#allocation45_spill] sm:$0xff] %v23542_v22  ;;  %v6815_v12 = vsel %vm218_vm0, %v6754_v44, 0.0 }
 0x365   :  { %v6812_v43 = vadd.f32 %v6811_v27, %v6810_v53  ;;  %v6664_v2 = vadd.f32 %v6663_v40, %v6662_v46  ;;  %v6813_v5 = vsel %vm218_vm0, %v6753_v15, 0.0  ;;  %v17840_v28 = vpop.f32.mrb[32].mxu0  ;;  %v23551_v38 = vld [vmem:[#allocation2 + $0xf0] sm:$0xff] }
 0x366   :  { %v23547_v59 = vld [vmem:[#allocation2 + $0xe0] sm:$0xff]  ;;  %3217 = vst.msk [vmem:[#allocation2 + $0x110] sm:$0xff] %vm218_vm0, %v17840_v28  ;;  %v18236_v53 = vpop.f32.mrb[32].mxu1  ;;  %v3132_v27 = vpop.f32.mrb[33].mxu0  ;;  %27670 = vst [vmem:[#allocation47_spill] sm:$0xff] %v23551_v38 }
 0x367   :  { %v6814_v58 = vadd.f32 %v6813_v5, %v6812_v43  ;;  %27669 = vst [vmem:[#allocation46_spill] sm:$0xff] %v23547_v59  ;;  %v6666_v42 = vadd.f32 %v6665_v17, %v6664_v2  ;;  %v6606_v8 = vmul.f32 %v23490_v25, %v23547_v59  ;;  %v23555_v46 = vld [vmem:[#allocation2 + $0x200] sm:$0xff]  ;;  %6360 = vst.msk [vmem:[#allocation2 + $0x230] sm:$0xff] %vm218_vm0, %v18236_v53  ;;  %v6274_v9 = vpop.f32.mrb[33].mxu1  ;;  %v17841_v15 = vpop.f32.mrb[34].mxu0  ;;  %v6667_v43 = vsel %vm218_vm0, %v6605_v57, 0.0 }
 0x368   :  { %27671 = vst [vmem:[#allocation48_spill] sm:$0xff] %v23555_v46  ;;  %3215 = vst.msk [vmem:[#allocation2 + $0x100] sm:$0xff] %vm218_vm0, %v3132_v27  ;;  %v6722_v5 = vld [vmem:[#allocation2 + $0x210] sm:$0xff]  ;;  %v6756_v2 = vmul.f32 %v23555_v46, %v23490_v25  ;;  %v18237_v28 = vpop.f32.mrb[34].mxu1  ;;  %v3135_v17 = vpop.f32.mrb[35].mxu0  ;;  %v6817_v53 = vsel %vm218_vm0, %v6755_v49, 0.0 }
 0x369   :  { %v6816_v40 = vadd.f32 %v6815_v12, %v6814_v58  ;;  %v23562_v44 = vld [vmem:[#allocation2 + $0xe8] sm:$0xff]  ;;  %6358 = vst.msk [vmem:[#allocation2 + $0x220] sm:$0xff] %vm218_vm0, %v6274_v9  ;;  %3218 = vst.msk [vmem:[#allocation2 + $0x118] sm:$0xff] %vm218_vm0, %v17841_v15  ;;  %v6668_v27 = vadd.f32 %v6667_v43, %v6666_v42  ;;  %v6669_v51 = vsel %vm218_vm0, %v6606_v8, 0.0  ;;  %v23568_v59 = vld [vmem:[#allocation2 + $0xf8] sm:$0xff]  ;;  %v6277_v57 = vpop.f32.mrb[35].mxu1  ;;  %v6608_v58 = vmul.f32 %v23537_v20, %v23551_v38  ;;  %v23580_v42 = vpop.permute.xlu0 %6560 }
 0x36a   :  { %27672 = vst [vmem:[#allocation49_spill] sm:$0xff] %v23562_v44  ;;  %v23570_v12 = vld [vmem:[#allocation2 + $0x208] sm:$0xff]  ;;  %6361 = vst.msk [vmem:[#allocation2 + $0x238] sm:$0xff] %vm218_vm0, %v18237_v28  ;;  %v6819_v15 = vsel %vm218_vm0, %v6756_v2, 0.0  ;;  %v6723_v46 = vld [vmem:[#allocation2 + $0x218] sm:$0xff]  ;;  %v6607_v49 = vmul.f32 %v23495_v36, %v23562_v44  ;;  %v6758_v8 = vmul.f32 %v6722_v5, %v23537_v20 }
 0x36b   :  { %27673 = vst [vmem:[#allocation50_spill] sm:$0xff] %v23570_v12  ;;  %3216 = vst.msk [vmem:[#allocation2 + $0x108] sm:$0xff] %vm218_vm0, %v3135_v17  ;;  %v6818_v9 = vadd.f32 %v6817_v53, %v6816_v40  ;;  %v6670_v43 = vadd.f32 %v6669_v51, %v6668_v27  ;;  %v6757_v28 = vmul.f32 %v23570_v12, %v23495_v36  ;;  %v23588_v53 = vpop.permute.xlu1 %6565  ;;  %v6673_v44 = vsel %vm218_vm0, %v6608_v58, 0.0 }
 0x36c   :  { %6359 = vst.msk [vmem:[#allocation2 + $0x228] sm:$0xff] %vm218_vm0, %v6277_v57  ;;  %27674 = vst [vmem:[#allocation51_spill] sm:$0xff] %v23580_v42  ;;  %v6609_v40 = vmul.f32 %v23542_v22, %v23568_v59  ;;  %v6671_v2 = vsel %vm218_vm0, %v6607_v49, 0.0  ;;  %v6759_v25 = vmul.f32 %v6723_v46, %v23542_v22  ;;  %v6823_v27 = vsel %vm218_vm0, %v6758_v8, 0.0 }
 0x36d   :  { %v6820_v17 = vadd.f32 %v6819_v15, %v6818_v9  ;;  %27675 = vst [vmem:[#allocation52_spill] sm:$0xff] %v23588_v53  ;;  %v6672_v38 = vadd.f32 %v6671_v2, %v6670_v43  ;;  %v6821_v57 = vsel %vm218_vm0, %v6757_v28, 0.0  ;;  %v23596_v15 = vld [vmem:[#allocation2 + $0x110] sm:$0xff] }
 0x36e   :  { %27677 = vst [vmem:[#allocation54_spill] sm:$0xff] %v23596_v15  ;;  %v6675_v46 = vsel %vm218_vm0, %v6609_v40, 0.0  ;;  %v6726_v2 = vld [vmem:[#allocation2 + $0x230] sm:$0xff] }
 0x36f   :  { %v6822_v5 = vadd.f32 %v6821_v57, %v6820_v17  ;;  %v23593_v51 = vld [vmem:[#allocation2 + $0x100] sm:$0xff]  ;;  %v6674_v9 = vadd.f32 %v6673_v44, %v6672_v38  ;;  %v23607_v17 = vpop.permute.xlu0 %6570  ;;  %v6825_v38 = vsel %vm218_vm0, %v6759_v25, 0.0  ;;  %v23620_v20 = vpop.permute.xlu1 %6575 }
 0x370   :  { %27676 = vst [vmem:[#allocation53_spill] sm:$0xff] %v23593_v51  ;;  %v6610_v49 = vmul.f32 %v23580_v42, %v23593_v51  ;;  %v23600_v12 = vld [vmem:[#allocation2 + $0x220] sm:$0xff]  ;;  %27680 = vst [vmem:[#allocation57_spill] sm:$0xff] %v23607_v17  ;;  %v23611_v57 = vld [vmem:[#allocation2 + $0x118] sm:$0xff]  ;;  %v6612_v40 = vmul.f32 %v23607_v17, %v23596_v15  ;;  %v6762_v25 = vmul.f32 %v6726_v2, %v23607_v17 }
 0x371   :  { %27678 = vst [vmem:[#allocation55_spill] sm:$0xff] %v23600_v12  ;;  %v6824_v43 = vadd.f32 %v6823_v27, %v6822_v5  ;;  %v6760_v58 = vmul.f32 %v23600_v12, %v23580_v42  ;;  %v6676_v44 = vadd.f32 %v6675_v46, %v6674_v9  ;;  %27681 = vst [vmem:[#allocation58_spill] sm:$0xff] %v23611_v57  ;;  %v6727_v12 = vld [vmem:[#allocation2 + $0x238] sm:$0xff] }
 0x372   :  { %v23605_v28 = vld [vmem:[#allocation2 + $0x108] sm:$0xff]  ;;  %v6677_v8 = vsel %vm218_vm0, %v6610_v49, 0.0  ;;  %27683 = vst [vmem:[#allocation60_spill] sm:$0xff] %v23620_v20  ;;  %v6613_v36 = vmul.f32 %v23620_v20, %v23611_v57  ;;  %v6831_v2 = vsel %vm218_vm0, %v6762_v25, 0.0 }
 0x373   :  { %27679 = vst [vmem:[#allocation56_spill] sm:$0xff] %v23605_v28  ;;  %v23613_v22 = vld [vmem:[#allocation2 + $0x228] sm:$0xff]  ;;  %v6826_v5 = vadd.f32 %v6825_v38, %v6824_v43  ;;  %v6827_v27 = vsel %vm218_vm0, %v6760_v58, 0.0  ;;  %v6611_v42 = vmul.f32 %v23588_v53, %v23605_v28  ;;  %v6678_v9 = vadd.f32 %v6677_v8, %v6676_v44 }
 0x374   :  { %27682 = vst [vmem:[#allocation59_spill] sm:$0xff] %v23613_v22  ;;  %v6761_v49 = vmul.f32 %v23613_v22, %v23588_v53  ;;  %v6763_v58 = vmul.f32 %v6727_v12, %v23620_v20  ;;  %v6681_v28 = vsel %vm218_vm0, %v6612_v40, 0.0  ;;  %v6683_v8 = vsel %vm218_vm0, %v6613_v36, 0.0 }
 0x375   :  { %v6828_v46 = vadd.f32 %v6827_v27, %v6826_v5  ;;  %v6679_v43 = vsel %vm218_vm0, %v6611_v42, 0.0 }
 0x376   :  { %v6680_v38 = vadd.f32 %v6679_v43, %v6678_v9  ;;  %v6829_v15 = vsel %vm218_vm0, %v6761_v49, 0.0  ;;  %v6833_v5 = vsel %vm218_vm0, %v6763_v58, 0.0 }
 0x377   :  { %v6830_v51 = vadd.f32 %v6829_v15, %v6828_v46 }
 0x378   :  { %v6682_v44 = vadd.f32 %v6681_v28, %v6680_v38 }
 0x379   :  { %v6832_v22 = vadd.f32 %v6831_v2, %v6830_v51 }
 0x37a   :  { %v6684_v27 = vadd.f32 %v6683_v8, %v6682_v44 }
 0x37b   :  { %v6834_v17 = vadd.f32 %v6833_v5, %v6832_v22 }
 0x37c   :  { %v6685_v57 = vrot.slane %v6684_v27, 4 }
 0x37d   :  { %v6835_v42 = vrot.slane %v6834_v17, 4 }
 0x37e   :  { %v6686_v53 = vadd.f32 %v6685_v57, %v6684_v27 }
 0x37f   :  { %v6836_v12 = vadd.f32 %v6835_v42, %v6834_v17 }
 0x380   :  { %v6687_v9 = vrot.slane %v6686_v53, 2 }
 0x381   :  { %v6837_v43 = vrot.slane %v6836_v12, 2 }
 0x382   :  { %v6688_v49 = vadd.f32 %v6687_v9, %v6686_v53 }
 0x383   :  { %v6838_v20 = vadd.f32 %v6837_v43, %v6836_v12 }
 0x384   :  { %v6689_v40 = vrot.slane %v6688_v49, 1 }
 0x385   :  { %v6839_v15 = vrot.slane %v6838_v20, 1 }
 0x386   :  { %v6690_v46 = vadd.f32 %v6689_v40, %v6688_v49 }
 0x387   :  { %v6840_v25 = vadd.f32 %v6839_v15, %v6838_v20 }
 0x389   :  { %v6841_v28 = vadd.f32 %v6840_v25, %v6690_v46 }
 0x38b   :  { %v23634_v38 = vmul.f32 0.001953125, %v6841_v28 }
 0x38d   :  { %v6844_v36 = vsub.f32 %v23236_v26, %v23634_v38  ;;  %v6845_v22 = vsub.f32 %v23246_v0, %v23634_v38  ;;  %v6846_v51 = vsub.f32 %v23234_v13, %v23634_v38  ;;  %v6847_v53 = vsub.f32 %v23244_v55, %v23634_v38 }
 0x38e   :  { %v6848_v20 = vsub.f32 %v23272_v56, %v23634_v38  ;;  %v6849_v26 = vsub.f32 %v23284_v45, %v23634_v38  ;;  %v6850_v13 = vsub.f32 %v23276_v16, %v23634_v38  ;;  %v6851_v5 = vsub.f32 %v23289_v4, %v23634_v38 }
 0x38f   :  { %v6880_v17 = vmul.f32 %v6844_v36, %v23190_v62  ;;  %v6881_v57 = vmul.f32 %v6845_v22, %v23194_v30  ;;  %v6882_v58 = vmul.f32 %v6846_v51, %v23192_v63  ;;  %v6883_v0 = vmul.f32 %v6847_v53, %v23196_v31 }
 0x390   :  { %v6884_v55 = vmul.f32 %v6848_v20, %v23198_v32  ;;  %v6885_v56 = vmul.f32 %v6849_v26, %v23200_v33  ;;  %v6852_v9 = vsub.f32 %v23311_v54, %v23634_v38  ;;  %v6886_v43 = vmul.f32 %v6850_v13, %v23202_v47 }
 0x391   :  { %v6916_v2 = vmul.f32 %v6880_v17, %v6880_v17  ;;  %v6917_v44 = vmul.f32 %v6881_v57, %v6881_v57  ;;  %v6918_v8 = vmul.f32 %v6882_v58, %v6882_v58  ;;  %v6919_v27 = vmul.f32 %v6883_v0, %v6883_v0 }
 0x392   :  { %v6920_v16 = vmul.f32 %v6884_v55, %v6884_v55  ;;  %v6853_v40 = vsub.f32 %v23323_v3, %v23634_v38  ;;  %v6854_v4 = vsub.f32 %v23315_v23, %v23634_v38  ;;  %v6855_v46 = vsub.f32 %v23329_v34, %v23634_v38 }
 0x393   :  { %v6952_v42 = vsel %vm218_vm0, %v6916_v2, 0.0  ;;  %v6953_v45 = vsel %vm218_vm0, %v6917_v44, 0.0  ;;  %v6955_v49 = vsel %vm218_vm0, %v6918_v8, 0.0  ;;  %v6887_v25 = vmul.f32 %v6851_v5, %v23204_v48  ;;  %v27684_v5 = vld [vmem:[#allocation13_spill] sm:$0xff] }
 0x394   :  { %v6954_v12 = vadd.f32 %v6953_v45, %v6952_v42  ;;  %v6921_v28 = vmul.f32 %v6885_v56, %v6885_v56  ;;  %v6957_v54 = vsel %vm218_vm0, %v6919_v27, 0.0  ;;  %v6856_v36 = vsub.f32 %v23357_v50, %v23634_v38  ;;  %v27685_v42 = vld [vmem:[#allocation46_spill] sm:$0xff] }
 0x395   :  { %v6857_v22 = vsub.f32 %v23374_v37, %v23634_v38  ;;  %v6858_v3 = vsub.f32 %v23361_v19, %v23634_v38  ;;  %v6859_v23 = vsub.f32 %v23380_v11, %v23634_v38  ;;  %v6888_v34 = vmul.f32 %v6852_v9, %v23206_v60 }
 0x396   :  { %v6956_v15 = vadd.f32 %v6955_v49, %v6954_v12  ;;  %v6922_v53 = vmul.f32 %v6886_v43, %v6886_v43  ;;  %v6959_v17 = vsel %vm218_vm0, %v6920_v16, 0.0  ;;  %v6860_v57 = vsub.f32 %v23409_v29, %v23634_v38  ;;  %v27688_v16 = vld [vmem:[#allocation14_spill] sm:$0xff] }
 0x397   :  { %v6861_v50 = vsub.f32 %v23421_v18, %v23634_v38  ;;  %v6862_v37 = vsub.f32 %v23413_v21, %v23634_v38  ;;  %v6863_v19 = vsub.f32 %v23427_v35, %v23634_v38  ;;  %v6889_v11 = vmul.f32 %v6853_v40, %v23208_v61 }
 0x398   :  { %v6958_v51 = vadd.f32 %v6957_v54, %v6956_v15  ;;  %v6923_v58 = vmul.f32 %v6887_v25, %v6887_v25  ;;  %v6961_v26 = vsel %vm218_vm0, %v6921_v28, 0.0  ;;  %v6864_v0 = vsub.f32 %v23452_v14, %v23634_v38  ;;  %v27691_v28 = vld [vmem:[#allocation15_spill] sm:$0xff] }
 0x399   :  { %v6865_v29 = vsub.f32 %v23467_v10, %v23634_v38  ;;  %v6866_v18 = vsub.f32 %v23456_v24, %v23634_v38  ;;  %v6867_v21 = vsub.f32 %v23473_v52, %v23634_v38  ;;  %v6890_v35 = vmul.f32 %v6854_v4, %v23210_v1  ;;  %v27689_v4 = vld [vmem:[#allocation53_spill] sm:$0xff] }
 0x39a   :  { %v6960_v20 = vadd.f32 %v6959_v17, %v6958_v51  ;;  %v6924_v44 = vmul.f32 %v6888_v34, %v6888_v34  ;;  %v6963_v13 = vsel %vm218_vm0, %v6922_v53, 0.0  ;;  %v6868_v55 = vsub.f32 %v23501_v39, %v23634_v38  ;;  %v27686_v39 = vld [vmem:[#allocation49_spill] sm:$0xff]  ;;  %v27692_v34 = vld [vmem:[#allocation16_spill] sm:$0xff] }
 0x39b   :  { %v6869_v14 = vsub.f32 %v23516_v41, %v23634_v38  ;;  %v6870_v10 = vsub.f32 %v23505_v7, %v23634_v38  ;;  %v6871_v24 = vsub.f32 %v23522_v6, %v23634_v38  ;;  %v6891_v52 = vmul.f32 %v6855_v46, %v27684_v5  ;;  %v27687_v41 = vld [vmem:[#allocation47_spill] sm:$0xff]  ;;  %v27690_v46 = vld [vmem:[#allocation56_spill] sm:$0xff]  ;;  %v27693_v17 = vld [vmem:[#allocation17_spill] sm:$0xff] }
 0x39c   :  { %v6962_v2 = vadd.f32 %v6961_v26, %v6960_v20  ;;  %v6925_v56 = vmul.f32 %v6889_v11, %v6889_v11  ;;  %v6965_v27 = vsel %vm218_vm0, %v6923_v58, 0.0  ;;  %v6872_v45 = vsub.f32 %v27685_v42, %v23634_v38  ;;  %v27695_v26 = vld [vmem:[#allocation19_spill] sm:$0xff]  ;;  %v27698_v42 = vld [vmem:[#allocation22_spill] sm:$0xff] }
 0x39d   :  { %v6873_v12 = vsub.f32 %v27686_v39, %v23634_v38  ;;  %v6874_v9 = vsub.f32 %v27687_v41, %v23634_v38  ;;  %v6875_v7 = vsub.f32 %v23568_v59, %v23634_v38  ;;  %v6892_v6 = vmul.f32 %v6856_v36, %v27688_v16  ;;  %v27694_v36 = vld [vmem:[#allocation18_spill] sm:$0xff] }
 0x39e   :  { %v6964_v8 = vadd.f32 %v6963_v13, %v6962_v2  ;;  %v6926_v49 = vmul.f32 %v6890_v35, %v6890_v35  ;;  %v6967_v40 = vsel %vm218_vm0, %v6924_v44, 0.0  ;;  %v6876_v15 = vsub.f32 %v27689_v4, %v23634_v38  ;;  %v27696_v35 = vld [vmem:[#allocation20_spill] sm:$0xff] }
 0x39f   :  { %v6877_v25 = vsub.f32 %v27690_v46, %v23634_v38  ;;  %v6893_v54 = vmul.f32 %v6857_v22, %v27691_v28  ;;  %v6894_v53 = vmul.f32 %v6858_v3, %v27692_v34  ;;  %v6895_v20 = vmul.f32 %v6859_v23, %v27693_v17  ;;  %v27699_v3 = vld [vmem:[#allocation23_spill] sm:$0xff]  ;;  %v27700_v23 = vld [vmem:[#allocation26_spill] sm:$0xff] }
 0x3a0   :  { %v6966_v43 = vadd.f32 %v6965_v27, %v6964_v8  ;;  %v6927_v11 = vmul.f32 %v6891_v52, %v6891_v52  ;;  %v6969_v59 = vsel %vm218_vm0, %v6925_v56, 0.0  ;;  %v6896_v58 = vmul.f32 %v6860_v57, %v27694_v36  ;;  %v27697_v8 = vld [vmem:[#allocation21_spill] sm:$0xff]  ;;  %v27702_v57 = vld [vmem:[#allocation32_spill] sm:$0xff] }
 0x3a1   :  { %v6897_v2 = vmul.f32 %v6861_v50, %v27695_v26  ;;  %v6898_v44 = vmul.f32 %v6862_v37, %v27696_v35  ;;  %v6899_v27 = vmul.f32 %v6863_v19, %v27697_v8  ;;  %v6900_v39 = vmul.f32 %v6864_v0, %v27698_v42  ;;  %v27703_v50 = vld [vmem:[#allocation33_spill] sm:$0xff]  ;;  %v27704_v19 = vld [vmem:[#allocation35_spill] sm:$0xff]  ;;  %v27705_v0 = vld [vmem:[#allocation36_spill] sm:$0xff] }
 0x3a2   :  { %v6968_v51 = vadd.f32 %v6967_v40, %v6966_v43  ;;  %v6928_v22 = vmul.f32 %v6892_v6, %v6892_v6  ;;  %v6971_v41 = vsel %vm218_vm0, %v6926_v49, 0.0  ;;  %v6901_v43 = vmul.f32 %v6865_v29, %v27699_v3  ;;  %v27701_v40 = vld [vmem:[#allocation27_spill] sm:$0xff]  ;;  %v27706_v42 = vld [vmem:[#allocation40_spill] sm:$0xff]  ;;  %v27707_v29 = vld [vmem:[#allocation41_spill] sm:$0xff] }
 0x3a3   :  { %v6902_v52 = vmul.f32 %v6866_v18, %v27700_v23  ;;  %v6903_v56 = vmul.f32 %v6867_v21, %v27701_v40  ;;  %v6904_v46 = vmul.f32 %v6868_v55, %v27702_v57  ;;  %v6905_v26 = vmul.f32 %v6869_v14, %v27703_v50  ;;  %v27708_v18 = vld [vmem:[#allocation44_spill] sm:$0xff]  ;;  %v27709_v55 = vld [vmem:[#allocation45_spill] sm:$0xff]  ;;  %v27710_v14 = vld [vmem:[#allocation51_spill] sm:$0xff] }
 0x3a4   :  { %v6970_v13 = vadd.f32 %v6969_v59, %v6968_v51  ;;  %v6929_v37 = vmul.f32 %v6893_v54, %v6893_v54  ;;  %v6973_v51 = vsel %vm218_vm0, %v6927_v11, 0.0  ;;  %v6906_v59 = vmul.f32 %v6870_v10, %v27704_v19  ;;  %v27711_v50 = vld [vmem:[#allocation52_spill] sm:$0xff] }
 0x3a5   :  { %v6907_v6 = vmul.f32 %v6871_v24, %v27705_v0  ;;  %v6908_v49 = vmul.f32 %v6872_v45, %v27706_v42  ;;  %v6909_v3 = vmul.f32 %v6873_v12, %v27707_v29  ;;  %v6910_v23 = vmul.f32 %v6874_v9, %v27708_v18 }
 0x3a6   :  { %v6972_v4 = vadd.f32 %v6971_v41, %v6970_v13  ;;  %v6930_v21 = vmul.f32 %v6894_v53, %v6894_v53  ;;  %v6975_v13 = vsel %vm218_vm0, %v6928_v22, 0.0  ;;  %v6911_v41 = vmul.f32 %v6875_v7, %v27709_v55 }
 0x3a7   :  { %v6912_v54 = vmul.f32 %v6876_v15, %v27710_v14  ;;  %v23751_v11 = vmul.f32 %v6877_v25, %v27711_v50  ;;  %v6931_v19 = vmul.f32 %v6895_v20, %v6895_v20  ;;  %v6932_v24 = vmul.f32 %v6896_v58, %v6896_v58 }
 0x3a8   :  { %v6974_v8 = vadd.f32 %v6973_v51, %v6972_v4  ;;  %v6933_v0 = vmul.f32 %v6897_v2, %v6897_v2  ;;  %v6977_v45 = vsel %vm218_vm0, %v6929_v37, 0.0  ;;  %v6934_v4 = vmul.f32 %v6898_v44, %v6898_v44  ;;  %v23756_v44 = vld [vmem:[#allocation2 + $0x120] sm:$0xff] }
 0x3a9   :  { %v6935_v12 = vmul.f32 %v6899_v27, %v6899_v27  ;;  %v6936_v51 = vmul.f32 %v6900_v39, %v6900_v39  ;;  %v6937_v53 = vmul.f32 %v6901_v43, %v6901_v43  ;;  %v6938_v18 = vmul.f32 %v6902_v52, %v6902_v52  ;;  %v23760_v39 = vld [vmem:[#allocation2 + $0x128] sm:$0xff] }
 0x3aa   :  { %v6976_v10 = vadd.f32 %v6975_v13, %v6974_v8  ;;  %v6939_v22 = vmul.f32 %v6903_v56, %v6903_v56  ;;  %v6979_v7 = vsel %vm218_vm0, %v6930_v21, 0.0  ;;  %v6940_v55 = vmul.f32 %v6904_v46, %v6904_v46 }
 0x3ab   :  { %v6941_v15 = vmul.f32 %v6905_v26, %v6905_v26  ;;  %v6942_v14 = vmul.f32 %v6906_v59, %v6906_v59  ;;  %v6943_v50 = vmul.f32 %v6907_v6, %v6907_v6  ;;  %v6944_v8 = vmul.f32 %v6908_v49, %v6908_v49  ;;  %v23770_v59 = vld [vmem:[#allocation2 + $0x130] sm:$0xff] }
 0x3ac   :  { %v6978_v9 = vadd.f32 %v6977_v45, %v6976_v10  ;;  %v6945_v20 = vmul.f32 %v6909_v3, %v6909_v3  ;;  %v6981_v58 = vsel %vm218_vm0, %v6931_v19, 0.0  ;;  %v6946_v2 = vmul.f32 %v6910_v23, %v6910_v23 }
 0x3ad   :  { %v7030_v27 = vsub.f32 %v23756_v44, %v23634_v38  ;;  %v7031_v43 = vsub.f32 %v23760_v39, %v23634_v38  ;;  %v6947_v26 = vmul.f32 %v6911_v41, %v6911_v41  ;;  %v23764_v52 = vmul.f32 %v6912_v54, %v6912_v54  ;;  %v23780_v54 = vld [vmem:[#allocation2 + $0x138] sm:$0xff] }
 0x3ae   :  { %v6980_v25 = vadd.f32 %v6979_v7, %v6978_v9  ;;  %v6983_v56 = vsel %vm218_vm0, %v6932_v24, 0.0  ;;  %v6985_v3 = vsel %vm218_vm0, %v6933_v0, 0.0  ;;  %v6987_v23 = vsel %vm218_vm0, %v6934_v4, 0.0 }
 0x3af   :  { %v6989_v19 = vsel %vm218_vm0, %v6935_v12, 0.0  ;;  %v7032_v6 = vsub.f32 %v23770_v59, %v23634_v38  ;;  %v6991_v49 = vsel %vm218_vm0, %v6936_v51, 0.0  ;;  %v6993_v21 = vsel %vm218_vm0, %v6937_v53, 0.0 }
 0x3b0   :  { %v6982_v37 = vadd.f32 %v6981_v58, %v6980_v25  ;;  %v6995_v13 = vsel %vm218_vm0, %v6938_v18, 0.0  ;;  %v23778_v41 = vsel %vm218_vm0, %v6939_v22, 0.0  ;;  %v7033_v10 = vsub.f32 %v23780_v54, %v23634_v38  ;;  %v23801_v22 = vld [vmem:[#allocation2 + $0x140] sm:$0xff]  ;;  %v23815_v25 = vld [vmem:[#allocation2 + $0x148] sm:$0xff] }
 0x3b1   :  { %v7066_v24 = vmul.f32 %v7030_v27, %v23190_v62  ;;  %v7067_v45 = vmul.f32 %v7031_v43, %v23194_v30  ;;  %v23787_v4 = vsel %vm218_vm0, %v6940_v55, 0.0  ;;  %v23790_v12 = vsel %vm218_vm0, %v6941_v15, 0.0 }
 0x3b2   :  { %v6984_v46 = vadd.f32 %v6983_v56, %v6982_v37  ;;  %v23793_v18 = vsel %vm218_vm0, %v6942_v14, 0.0  ;;  %v23796_v51 = vsel %vm218_vm0, %v6943_v50, 0.0  ;;  %v23799_v53 = vsel %vm218_vm0, %v6944_v8, 0.0  ;;  %v23822_v56 = vld [vmem:[#allocation2 + $0x150] sm:$0xff] }
 0x3b3   :  { %v7034_v7 = vsub.f32 %v23801_v22, %v23634_v38  ;;  %v7068_v55 = vmul.f32 %v7032_v6, %v23192_v63  ;;  %v23807_v15 = vsel %vm218_vm0, %v6945_v20, 0.0  ;;  %v23810_v14 = vsel %vm218_vm0, %v6946_v2, 0.0  ;;  %27712 = vst [vmem:[#allocation46_spill] sm:$0xff] %v23822_v56  ;;  %v27715_v6 = vld [vmem:[#allocation24_spill] sm:$0xff] }
 0x3b4   :  { %v6986_v0 = vadd.f32 %v6985_v3, %v6984_v46  ;;  %v23813_v50 = vsel %vm218_vm0, %v6947_v26, 0.0  ;;  %v7035_v8 = vsub.f32 %v23815_v25, %v23634_v38  ;;  %v7069_v37 = vmul.f32 %v7033_v10, %v23196_v31  ;;  %v23826_v26 = vld [vmem:[#allocation2 + $0x158] sm:$0xff]  ;;  %v23830_v46 = vld [vmem:[#allocation2 + $0x160] sm:$0xff]  ;;  %v27718_v63 = vld [vmem:[#allocation28_spill] sm:$0xff] }
 0x3b5   :  { %v7102_v27 = vmul.f32 %v7066_v24, %v7066_v24  ;;  %v7103_v43 = vmul.f32 %v7067_v45, %v7067_v45  ;;  %v6949_v20 = vmul.f32 %v23751_v11, %v23751_v11  ;;  %v7036_v2 = vsub.f32 %v23822_v56, %v23634_v38  ;;  %27713 = vst [vmem:[#allocation49_spill] sm:$0xff] %v23826_v26  ;;  %v23837_v24 = vld [vmem:[#allocation2 + $0x170] sm:$0xff] }
 0x3b6   :  { %v6988_v9 = vadd.f32 %v6987_v23, %v6986_v0  ;;  %v7037_v3 = vsub.f32 %v23826_v26, %v23634_v38  ;;  %27714 = vst [vmem:[#allocation47_spill] sm:$0xff] %v23830_v46  ;;  %v7038_v23 = vsub.f32 %v23830_v46, %v23634_v38  ;;  %v7039_v0 = vsub.f32 %v27715_v6, %v23634_v38 }
 0x3b7   :  { %v7070_v11 = vmul.f32 %v7034_v7, %v23198_v32  ;;  %v7104_v10 = vmul.f32 %v7068_v55, %v7068_v55  ;;  %27716 = vst [vmem:[#allocation53_spill] sm:$0xff] %v23837_v24  ;;  %v7040_v45 = vsub.f32 %v23837_v24, %v23634_v38  ;;  %v7042_v30 = vsub.f32 %v27718_v63, %v23634_v38  ;;  %v27719_v55 = vld [vmem:[#allocation30_spill] sm:$0xff] }
 0x3b8   :  { %v6990_v58 = vadd.f32 %v6989_v19, %v6988_v9  ;;  %v27717_v9 = vld [vmem:[#allocation25_spill] sm:$0xff]  ;;  %v7071_v62 = vmul.f32 %v7035_v8, %v23200_v33  ;;  %v7138_v6 = vsel %vm218_vm0, %v7102_v27, 0.0  ;;  %v7139_v7 = vsel %vm218_vm0, %v7103_v43, 0.0 }
 0x3b9   :  { %v7041_v31 = vsub.f32 %v27717_v9, %v23634_v38  ;;  %v7043_v32 = vsub.f32 %v27719_v55, %v23634_v38  ;;  %v7072_v46 = vmul.f32 %v7036_v2, %v23202_v47  ;;  %v7073_v24 = vmul.f32 %v7037_v3, %v23204_v48  ;;  %v27721_v2 = vld [vmem:[#allocation31_spill] sm:$0xff] }
 0x3ba   :  { %v6992_v19 = vadd.f32 %v6991_v49, %v6990_v58  ;;  %v7105_v58 = vmul.f32 %v7069_v37, %v7069_v37  ;;  %v7140_v26 = vadd.f32 %v7139_v7, %v7138_v6  ;;  %v7074_v9 = vmul.f32 %v7038_v23, %v23206_v60 }
 0x3bb   :  { %v7075_v63 = vmul.f32 %v7039_v0, %v23208_v61  ;;  %v7106_v56 = vmul.f32 %v7070_v11, %v7070_v11  ;;  %v7076_v37 = vmul.f32 %v7040_v45, %v23210_v1  ;;  %v7077_v27 = vmul.f32 %v7041_v31, %v27684_v5  ;;  %v20389_v1 = vld [vmem:[#allocation2 + $0x110] sm:$0xff]  ;;  %v20390_v61 = vld [vmem:[#allocation2 + $0x118] sm:$0xff] }
 0x3bc   :  { %v6994_v49 = vadd.f32 %v6993_v21, %v6992_v19  ;;  %v7141_v21 = vsel %vm218_vm0, %v7104_v10, 0.0  ;;  %v27720_v19 = vld [vmem:[#allocation29_spill] sm:$0xff]  ;;  %v7045_v3 = vsub.f32 %v27721_v2, %v23634_v38  ;;  %v7107_v6 = vmul.f32 %v7071_v62, %v7071_v62 }
 0x3bd   :  { %v7142_v43 = vadd.f32 %v7141_v21, %v7140_v26  ;;  %v7044_v55 = vsub.f32 %v27720_v19, %v23634_v38  ;;  %v7143_v23 = vsel %vm218_vm0, %v7105_v58, 0.0  ;;  %v7078_v0 = vmul.f32 %v7042_v30, %v27688_v16 }
 0x3be   :  { %v6996_v8 = vadd.f32 %v6995_v13, %v6994_v49  ;;  %v7079_v11 = vmul.f32 %v7043_v32, %v27691_v28  ;;  %v7108_v10 = vmul.f32 %v7072_v46, %v7072_v46  ;;  %v7109_v49 = vmul.f32 %v7073_v24, %v7073_v24 }
 0x3bf   :  { %v7144_v13 = vadd.f32 %v7143_v23, %v7142_v43  ;;  %v7110_v45 = vmul.f32 %v7074_v9, %v7074_v9  ;;  %v7111_v7 = vmul.f32 %v7075_v63, %v7075_v63  ;;  %v7145_v31 = vsel %vm218_vm0, %v7106_v56, 0.0 }
 0x3c0   :  { %v6998_v26 = vadd.f32 %v23778_v41, %v6996_v8  ;;  %v7112_v21 = vmul.f32 %v7076_v37, %v7076_v37  ;;  %v7113_v19 = vmul.f32 %v7077_v27, %v7077_v27  ;;  %v23868_v62 = vsel %vm218_vm0, %v23764_v52, 0.0 }
 0x3c1   :  { %v7146_v5 = vadd.f32 %v7145_v31, %v7144_v13  ;;  %v7080_v30 = vmul.f32 %v7044_v55, %v27692_v34  ;;  %v7081_v32 = vmul.f32 %v7045_v3, %v27693_v17  ;;  %v7147_v46 = vsel %vm218_vm0, %v7107_v6, 0.0  ;;  %v23888_v13 = vld [vmem:[#allocation2 + $0x1a0] sm:$0xff] }
 0x3c2   :  { %v23874_v24 = vsel %vm218_vm0, %v6949_v20, 0.0  ;;  %v7114_v58 = vmul.f32 %v7078_v0, %v7078_v0  ;;  %v7115_v56 = vmul.f32 %v7079_v11, %v7079_v11  ;;  %v7149_v41 = vsel %vm218_vm0, %v7108_v10, 0.0 }
 0x3c3   :  { %v7148_v9 = vadd.f32 %v7147_v46, %v7146_v5  ;;  %v7151_v63 = vsel %vm218_vm0, %v7109_v49, 0.0  ;;  %v7153_v8 = vsel %vm218_vm0, %v7110_v45, 0.0  ;;  %v7155_v52 = vsel %vm218_vm0, %v7111_v7, 0.0  ;;  %v27722_v45 = vld [vmem:[#allocation34_spill] sm:$0xff] }
 0x3c4   :  { %v7000_v37 = vadd.f32 %v23787_v4, %v6998_v26  ;;  %v7157_v43 = vsel %vm218_vm0, %v7112_v21, 0.0  ;;  %v7159_v55 = vsel %vm218_vm0, %v7113_v19, 0.0  ;;  %v7116_v20 = vmul.f32 %v7080_v30, %v7080_v30  ;;  %v23895_v19 = vld [vmem:[#allocation2 + $0x1b0] sm:$0xff]  ;;  %v23899_v30 = vld [vmem:[#allocation2 + $0x1b8] sm:$0xff] }
 0x3c5   :  { %v7150_v27 = vadd.f32 %v7149_v41, %v7148_v9  ;;  %v7117_v2 = vmul.f32 %v7081_v32, %v7081_v32  ;;  %v7161_v5 = vsel %vm218_vm0, %v7114_v58, 0.0  ;;  %v7163_v6 = vsel %vm218_vm0, %v7115_v56, 0.0  ;;  %v27723_v58 = vld [vmem:[#allocation19_spill] sm:$0xff] }
 0x3c6   :  { %v7002_v23 = vadd.f32 %v23790_v12, %v7000_v37  ;;  %v7165_v11 = vsel %vm218_vm0, %v7116_v20, 0.0  ;;  %v7046_v49 = vsub.f32 %v23888_v13, %v23634_v38  ;;  %v7047_v7 = vsub.f32 %v27722_v45, %v23634_v38 }
 0x3c7   :  { %v7152_v3 = vadd.f32 %v7151_v63, %v7150_v27  ;;  %v7167_v10 = vsel %vm218_vm0, %v7117_v2, 0.0  ;;  %v7048_v12 = vsub.f32 %v23895_v19, %v23634_v38  ;;  %v7049_v32 = vsub.f32 %v23899_v30, %v23634_v38 }
 0x3c8   :  { %v7004_v31 = vadd.f32 %v23793_v18, %v7002_v23  ;;  %v7082_v46 = vmul.f32 %v7046_v49, %v27694_v36  ;;  %v7083_v56 = vmul.f32 %v7047_v7, %v27723_v58  ;;  %v27724_v18 = vld [vmem:[#allocation37_spill] sm:$0xff]  ;;  %v27728_v49 = vld [vmem:[#allocation22_spill] sm:$0xff] }
 0x3c9   :  { %v7154_v0 = vadd.f32 %v7153_v8, %v7152_v3  ;;  %v7050_v63 = vsub.f32 %v27724_v18, %v23634_v38  ;;  %v27725_v8 = vld [vmem:[#allocation38_spill] sm:$0xff]  ;;  %v7084_v27 = vmul.f32 %v7048_v12, %v27696_v35  ;;  %v20381_v35 = vld [vmem:[#allocation2 + $0xd0] sm:$0xff] }
 0x3ca   :  { %v7006_v9 = vadd.f32 %v23796_v51, %v7004_v31  ;;  %v7118_v20 = vmul.f32 %v7082_v46, %v7082_v46  ;;  %v7119_v2 = vmul.f32 %v7083_v56, %v7083_v56  ;;  %v27730_v46 = vld [vmem:[#allocation42_spill] sm:$0xff] }
 0x3cb   :  { %v7156_v4 = vadd.f32 %v7155_v52, %v7154_v0  ;;  %v7051_v52 = vsub.f32 %v27725_v8, %v23634_v38  ;;  %v23913_v0 = vld [vmem:[#allocation2 + $0x1d0] sm:$0xff]  ;;  %v7086_v45 = vmul.f32 %v7050_v63, %v27728_v49  ;;  %v7054_v56 = vsub.f32 %v27730_v46, %v23634_v38  ;;  %v27732_v18 = vld [vmem:[#allocation26_spill] sm:$0xff] }
 0x3cc   :  { %v7008_v3 = vadd.f32 %v23799_v53, %v7006_v9  ;;  %v7052_v51 = vsub.f32 %v23913_v0, %v23634_v38  ;;  %v7169_v12 = vsel %vm218_vm0, %v7118_v20, 0.0  ;;  %v7171_v53 = vsel %vm218_vm0, %v7119_v2, 0.0  ;;  %v27731_v9 = vld [vmem:[#allocation43_spill] sm:$0xff]  ;;  %v27733_v2 = vld [vmem:[#allocation54_spill] sm:$0xff] }
 0x3cd   :  { %v7158_v26 = vadd.f32 %v7157_v43, %v7156_v4  ;;  %v27726_v43 = vld [vmem:[#allocation21_spill] sm:$0xff]  ;;  %v23946_v46 = vld [vmem:[#allocation2 + $0x1f8] sm:$0xff] }
 0x3ce   :  { %v7088_v63 = vmul.f32 %v7052_v51, %v27732_v18  ;;  %v20376_v18 = vld [vmem:[#allocation2 + $0xa8] sm:$0xff]  ;;  %v20378_v49 = vld [vmem:[#allocation2 + $0xb8] sm:$0xff] }
 0x3cf   :  { %v7160_v21 = vadd.f32 %v7159_v55, %v7158_v26  ;;  %v7085_v55 = vmul.f32 %v7049_v32, %v27726_v43  ;;  %v7120_v26 = vmul.f32 %v7084_v27, %v7084_v27  ;;  %v20379_v43 = vld [vmem:[#allocation2 + $0xc0] sm:$0xff] }
 0x3d1   :  { %v7162_v41 = vadd.f32 %v7161_v5, %v7160_v21  ;;  %v27727_v5 = vld [vmem:[#allocation39_spill] sm:$0xff]  ;;  %v7121_v21 = vmul.f32 %v7085_v55, %v7085_v55  ;;  %v7173_v27 = vsel %vm218_vm0, %v7120_v26, 0.0 }
 0x3d2   :  { %v7053_v4 = vsub.f32 %v27727_v5, %v23634_v38  ;;  %v7090_v5 = vmul.f32 %v7054_v56, %v27702_v57  ;;  %v7057_v56 = vsub.f32 %v23946_v46, %v23634_v38 }
 0x3d3   :  { %v7164_v37 = vadd.f32 %v7163_v6, %v7162_v41  ;;  %v27729_v6 = vld [vmem:[#allocation23_spill] sm:$0xff]  ;;  %v7055_v41 = vsub.f32 %v27731_v9, %v23634_v38  ;;  %v7175_v55 = vsel %vm218_vm0, %v7121_v21, 0.0  ;;  %v27736_v9 = vld [vmem:[#allocation48_spill] sm:$0xff] }
 0x3d4   :  { %v7087_v7 = vmul.f32 %v7051_v52, %v27729_v6  ;;  %v7089_v8 = vmul.f32 %v7053_v4, %v27701_v40  ;;  %v7122_v52 = vmul.f32 %v7086_v45, %v7086_v45  ;;  %v27734_v4 = vld [vmem:[#allocation33_spill] sm:$0xff]  ;;  %v20375_v40 = vld [vmem:[#allocation2 + $0xa0] sm:$0xff] }
 0x3d5   :  { %v7166_v23 = vadd.f32 %v7165_v11, %v7164_v37  ;;  %v7010_v11 = vadd.f32 %v23807_v15, %v7008_v3  ;;  %v6878_v3 = vsub.f32 %v27733_v2, %v23634_v38  ;;  %v7091_v45 = vmul.f32 %v7055_v41, %v27734_v4  ;;  %v20377_v6 = vld [vmem:[#allocation2 + $0xb0] sm:$0xff] }
 0x3d6   :  { %v7123_v37 = vmul.f32 %v7087_v7, %v7087_v7  ;;  %v7125_v26 = vmul.f32 %v7089_v8, %v7089_v8  ;;  %v7177_v21 = vsel %vm218_vm0, %v7122_v52, 0.0  ;;  %v7058_v41 = vsub.f32 %v27736_v9, %v23634_v38 }
 0x3d7   :  { %v7168_v31 = vadd.f32 %v7167_v10, %v7166_v23  ;;  %v7012_v15 = vadd.f32 %v23810_v14, %v7010_v11  ;;  %v23935_v23 = vld [vmem:[#allocation2 + $0x1f0] sm:$0xff]  ;;  %v7127_v2 = vmul.f32 %v7091_v45, %v7091_v45 }
 0x3d8   :  { %v7056_v51 = vsub.f32 %v23935_v23, %v23634_v38  ;;  %v7179_v14 = vsel %vm218_vm0, %v7123_v37, 0.0  ;;  %v27739_v37 = vld [vmem:[#allocation35_spill] sm:$0xff]  ;;  %v7094_v45 = vmul.f32 %v7058_v41, %v27706_v42  ;;  %v20261_v41 = vld [vmem:[%s27431_s4 + $0x28] sm:$0xff]  }
 0x3d9   :  { %v7170_v32 = vadd.f32 %v7169_v12, %v7168_v31  ;;  %v7124_v31 = vmul.f32 %v7088_v63, %v7088_v63  ;;  %v27735_v12 = vld [vmem:[#allocation58_spill] sm:$0xff]  ;;  %v7014_v11 = vadd.f32 %v23813_v50, %v7012_v15  ;;  %v27737_v63 = vld [vmem:[#allocation57_spill] sm:$0xff]  ;;  %v7183_v15 = vsel %vm218_vm0, %v7125_v26, 0.0 }
 0x3da   :  { %v6914_v8 = vmul.f32 %v6878_v3, %v27737_v63  ;;  %v20259_v3 = vld [vmem:[%s27431_s4 + $0x20] sm:$0xff]  }
 0x3db   :  { %v7172_v10 = vadd.f32 %v7171_v53, %v7170_v32  ;;  %v6879_v53 = vsub.f32 %v27735_v12, %v23634_v38  ;;  %v7181_v50 = vsel %vm218_vm0, %v7124_v31, 0.0  ;;  %v7016_v9 = vadd.f32 %v23868_v62, %v7014_v11  ;;  %18634 = vmatprep.subr.bf16.mxu1 %v20259_v3 }
 0x3dc   :  { %v6950_v31 = vmul.f32 %v6914_v8, %v6914_v8  ;;  %18635 = vmatpush3.bf16.msra.mxu1 %v20259_v3  ;;  %v7187_v11 = vsel %vm218_vm0, %v7127_v2, 0.0 }
 0x3dd   :  { %v7174_v20 = vadd.f32 %v7173_v27, %v7172_v10  ;;  %v27738_v10 = vld [vmem:[#allocation50_spill] sm:$0xff]  ;;  %v7092_v27 = vmul.f32 %v7056_v51, %v27739_v37  ;;  %18636 = vmatprep.subr.bf16.mxu1 %v20261_v41 }
 0x3de   :  { %v7059_v52 = vsub.f32 %v27738_v10, %v23634_v38  ;;  %v23969_v10 = vld [vmem:[#allocation2 + $0x210] sm:$0xff]  ;;  %v7019_v3 = vsel %vm218_vm0, %v6950_v31, 0.0 }
 0x3df   :  { %v7176_v7 = vadd.f32 %v7175_v55, %v7174_v20  ;;  %v7126_v20 = vmul.f32 %v7090_v5, %v7090_v5  ;;  %v7128_v37 = vmul.f32 %v7092_v27, %v7092_v27 }
 0x3e0   :  { %v7095_v26 = vmul.f32 %v7059_v52, %v27707_v29  ;;  %v7018_v52 = vadd.f32 %v23874_v24, %v7016_v9  ;;  %18637 = vmatpush3.bf16.msra.mxu1 %v20261_v41  ;;  %v27743_v24 = vld [vmem:[#allocation44_spill] sm:$0xff] }
 0x3e1   :  { %v7178_v32 = vadd.f32 %v7177_v21, %v7176_v7  ;;  %v20258_v7 = vld [vmem:[%s27431_s4 + $0x20] sm:$0xff]   ;;  %v27740_v21 = vld [vmem:[#allocation60_spill] sm:$0xff]  ;;  %v7185_v62 = vsel %vm218_vm0, %v7126_v20, 0.0 }
 0x3e2   :  { %v6915_v12 = vmul.f32 %v6879_v53, %v27740_v21  ;;  %18238 = vmatprep.subr.bf16.mxu0 %v20258_v7  ;;  %v7060_v53 = vsub.f32 %v23969_v10, %v23634_v38  ;;  %v7131_v2 = vmul.f32 %v7095_v26, %v7095_v26  ;;  %v20264_v26 = vld [vmem:[%s27431_s4 + $0x38] sm:$0xff]   ;;  %v7020_v31 = vadd.f32 %v7019_v3, %v7018_v52  ;;  %v7814_v41 = vld [vmem:[#allocation3 + $0x1] sm:$0xff] }
 0x3e3   :  { %v7180_v55 = vadd.f32 %v7179_v14, %v7178_v32  ;;  %v27741_v14 = vld [vmem:[#allocation36_spill] sm:$0xff]  ;;  %18239 = vmatpush3.bf16.msra.mxu0 %v20258_v7  ;;  %v10964_v3 = vld [vmem:[#allocation3 + $0x151] sm:$0xff] }
 0x3e4   :  { %v7093_v5 = vmul.f32 %v7057_v56, %v27741_v14  ;;  %v20260_v56 = vld [vmem:[%s27431_s4 + $0x28] sm:$0xff]   ;;  %v6951_v8 = vmul.f32 %v6915_v12, %v6915_v12  ;;  %v27742_v12 = vld [vmem:[#allocation55_spill] sm:$0xff]  ;;  %v7096_v9 = vmul.f32 %v7060_v53, %v27743_v24 }
 0x3e5   :  { %v7182_v51 = vadd.f32 %v7181_v50, %v7180_v55  ;;  %v23982_v50 = vld [vmem:[#allocation2 + $0x218] sm:$0xff]  ;;  %18240 = vmatprep.subr.bf16.mxu0 %v20260_v56 }
 0x3e6   :  { %v7061_v27 = vsub.f32 %v23982_v50, %v23634_v38  ;;  %v7129_v20 = vmul.f32 %v7093_v5, %v7093_v5  ;;  %v20262_v5 = vld [vmem:[%s27431_s4 + $0x30] sm:$0xff]   ;;  %v7132_v14 = vmul.f32 %v7096_v9, %v7096_v9 }
 0x3e7   :  { %v7184_v32 = vadd.f32 %v7183_v15, %v7182_v51  ;;  %v7130_v15 = vmul.f32 %v7094_v45, %v7094_v45  ;;  %18241 = vmatpush3.bf16.msra.mxu0 %v20260_v56  ;;  %v7062_v51 = vsub.f32 %v27742_v12, %v23634_v38  ;;  %v20263_v45 = vld [vmem:[%s27431_s4 + $0x30] sm:$0xff]  }
 0x3e8   :  { %v27745_v12 = vld [vmem:[#allocation45_spill] sm:$0xff]  ;;  %v7191_v29 = vsel %vm218_vm0, %v7129_v20, 0.0  ;;  %18242 = vmatprep.subr.bf16.mxu0 %v20262_v5  ;;  %18638 = vmatprep.subr.bf16.mxu1 %v20263_v45  ;;  %v24018_v20 = vld [vmem:[%s27431_s4] sm:$0xff]  }
 0x3e9   :  { %v7186_v55 = vadd.f32 %v7185_v62, %v7184_v32  ;;  %v7189_v32 = vsel %vm218_vm0, %v7128_v37, 0.0  ;;  %v7021_v62 = vsel %vm218_vm0, %v6951_v8, 0.0  ;;  %v20265_v37 = vld [vmem:[%s27431_s4 + $0x38] sm:$0xff]   ;;  %v7097_v24 = vmul.f32 %v7061_v27, %v27745_v12  ;;  %v10963_v8 = vld [vmem:[#allocation3 + $0x149] sm:$0xff]  ;;  %18639 = vmatpush3.bf16.msra.mxu1 %v20263_v45  ;;  %27747 = vst [vmem:[#allocation24_spill] sm:$0xff] %v24018_v20 }
 0x3ea   :  { %v7193_v42 = vsel %vm218_vm0, %v7130_v15, 0.0  ;;  %v10999_v27 = vpack.c.bf16 %v10964_v3, %v10963_v8  ;;  %v24020_v15 = vld [vmem:[#allocation2 + $0x230] sm:$0xff]  ;;  %18640 = vmatprep.subr.bf16.mxu1 %v20265_v37 }
 0x3eb   :  { %v7188_v7 = vadd.f32 %v7187_v11, %v7186_v55  ;;  %v27744_v11 = vld [vmem:[#allocation59_spill] sm:$0xff]  ;;  %v7815_v55 = vld [vmem:[#allocation3 + $0x9] sm:$0xff]  ;;  %18243 = vmatpush3.bf16.msra.mxu0 %v20262_v5  ;;  %v24027_v5 = vld [vmem:[#allocation2 + $0x238] sm:$0xff]  ;;  %v7133_v3 = vmul.f32 %v7097_v24, %v7097_v24 }
 0x3ec   :  { %v7063_v53 = vsub.f32 %v27744_v11, %v23634_v38  ;;  %v7850_v52 = vpack.c.bf16 %v7815_v55, %v7814_v41  ;;  %v7195_v11 = vsel %vm218_vm0, %v7131_v2, 0.0  ;;  %v7064_v41 = vsub.f32 %v24020_v15, %v23634_v38  ;;  %v27748_v55 = vld [vmem:[#allocation51_spill] sm:$0xff]  ;;  %18244 = vmatprep.subr.bf16.mxu0 %v20264_v26  ;;  %18642 = vmatprep.mubr.msk.bf16.mxu1 %vm218_vm0, %v10999_v27 }
 0x3ed   :  { %v7190_v56 = vadd.f32 %v7189_v32, %v7188_v7  ;;  %v24012_v7 = vld [vmem:[%s27431_s4] sm:$0xff]   ;;  %v7098_v12 = vmul.f32 %v7062_v51, %v27748_v55  ;;  %v7065_v45 = vsub.f32 %v24027_v5, %v23634_v38  ;;  %18641 = vmatpush3.bf16.msra.mxu1 %v20265_v37  ;;  %v20374_v55 = vld [vmem:[#allocation2 + $0x98] sm:$0xff] }
 0x3ee   :  { %27746 = vst [vmem:[#allocation56_spill] sm:$0xff] %v24012_v7  ;;  %18246 = vmatprep.mubr.msk.bf16.mxu0 %vm218_vm0, %v7850_v52  ;;  %v7100_v51 = vmul.f32 %v7064_v41, %v27737_v63  ;;  %18678 = vmatprep.subr.bf16.mxu1 %v24018_v20 }
 0x3ef   :  { %v7192_v32 = vadd.f32 %v7191_v29, %v7190_v56  ;;  %v7022_v29 = vadd.f32 %v7021_v62, %v7020_v31  ;;  %v27749_v56 = vld [vmem:[#allocation52_spill] sm:$0xff]  ;;  %18245 = vmatpush3.bf16.msra.mxu0 %v20264_v26  ;;  %v7134_v9 = vmul.f32 %v7098_v12, %v7098_v12  ;;  %v7101_v52 = vmul.f32 %v7065_v45, %v27740_v21 }
 0x3f0   :  { %v7099_v8 = vmul.f32 %v7063_v53, %v27749_v56  ;;  %18282 = vmatprep.subr.bf16.mxu0 %v24012_v7  ;;  %v7199_v53 = vsel %vm218_vm0, %v7133_v3, 0.0 }
 0x3f1   :  { %v7194_v2 = vadd.f32 %v7193_v42, %v7192_v32  ;;  %v7197_v42 = vsel %vm218_vm0, %v7132_v14, 0.0  ;;  %v7023_v31 = vrot.slane %v7022_v29, 4  ;;  %v7201_v26 = vsel %vm218_vm0, %v7134_v9, 0.0 }
 0x3f2   :  { %v7135_v32 = vmul.f32 %v7099_v8, %v7099_v8  ;;  %v7137_v12 = vmul.f32 %v7101_v52, %v7101_v52 }
 0x3f3   :  { %v7196_v4 = vadd.f32 %v7195_v11, %v7194_v2  ;;  %v7136_v11 = vmul.f32 %v7100_v51, %v7100_v51  ;;  %v7024_v37 = vadd.f32 %v7023_v31, %v7022_v29 }
 0x3f4   :  { %v7203_v14 = vsel %vm218_vm0, %v7135_v32, 0.0 }
 0x3f5   :  { %v7198_v62 = vadd.f32 %v7197_v42, %v7196_v4  ;;  %v7205_v2 = vsel %vm218_vm0, %v7136_v11, 0.0  ;;  %v7025_v20 = vrot.slane %v7024_v37, 2  ;;  %v7207_v4 = vsel %vm218_vm0, %v7137_v12, 0.0  ;;  %v7221_v12 = vld [vmem:[%s27433_s3] sm:$0x1] }
 0x3f7   :  { %v7200_v24 = vadd.f32 %v7199_v53, %v7198_v62  ;;  %v7026_v8 = vadd.f32 %v7025_v20, %v7024_v37 }
 0x3f9   :  { %v7202_v27 = vadd.f32 %v7201_v26, %v7200_v24  ;;  %v7027_v62 = vrot.slane %v7026_v8, 1  ;;  %v7344_v26 = vlaneseq }
 0x3fb   :  { %v7204_v41 = vadd.f32 %v7203_v14, %v7202_v27  ;;  %v7028_v9 = vadd.f32 %v7027_v62, %v7026_v8  ;;  %v7345_v11 = vshrl.u32 %v7344_v26, 7  ;;  %v7217_v27 = vld [vmem:[%s27432_s2] sm:$0x1]  ;;  %v20361_v26 = vld [vmem:[#allocation2 + $0x30] sm:$0xff] }
 0x3fc   :  { %v20355_v8 = vld [vmem:[#allocation2] sm:$0xff] }
 0x3fd   :  { %v7206_v7 = vadd.f32 %v7205_v2, %v7204_v41 }
 0x3ff   :  { %v7208_v45 = vadd.f32 %v7207_v4, %v7206_v7  ;;  %v24045_v7 = vsub.s32 0, %v7345_v11  ;;  %v20354_v4 = vld [vmem:[#allocation2 + $0x228] sm:$0xff] }
 0x401   :  { %v7209_v42 = vrot.slane %v7208_v45, 4  ;;  %27750 = vst [vmem:[#allocation25_spill] sm:$0xff] %v24045_v7 }
 0x403   :  { %v7210_v3 = vadd.f32 %v7209_v42, %v7208_v45 }
 0x405   :  { %v7211_v51 = vrot.slane %v7210_v3, 2 }
 0x407   :  { %v7212_v53 = vadd.f32 %v7211_v51, %v7210_v3  ;;  %v20356_v3 = vld [vmem:[#allocation2 + $0x8] sm:$0xff]  ;;  %v20357_v51 = vld [vmem:[#allocation2 + $0x10] sm:$0xff] }
 0x409   :  { %v7213_v29 = vrot.slane %v7212_v53, 1 }
 0x40b   :  { %v7214_v31 = vadd.f32 %v7213_v29, %v7212_v53  ;;  %v20359_v29 = vld [vmem:[#allocation2 + $0x20] sm:$0xff] }
 0x40d   :  { %v7215_v52 = vadd.f32 %v7214_v31, %v7028_v9 }
 0x40f   :  { %v7216_v24 = vmul.f32 0.001953125, %v7215_v52  ;;  %v20360_v52 = vld [vmem:[#allocation2 + $0x28] sm:$0xff] }
 0x411   :  { %v7218_v32 = vadd.f32 1e-05, %v7216_v24 }
 0x413   :  { %20330 = vrsqrt.f32 %v7218_v32 }
 0x41d   :  { %v20331_v20 = vpop.eup %20330 }
 0x41e   :  { %v7220_v37 = vmul.f32 %v20331_v20, %v7217_v27  ;;  %v20362_v27 = vld [vmem:[#allocation2 + $0x38] sm:$0xff] }
 0x420   :  { %v7222_v14 = vmul.f32 %v7220_v37, %v23634_v38  ;;  %v24052_v41 = vrot.slane %v7220_v37, %v24045_v7  ;;  %v20358_v38 = vld [vmem:[#allocation2 + $0x18] sm:$0xff]  ;;  %v20363_v37 = vld [vmem:[#allocation2 + $0x40] sm:$0xff] }
 0x422   :  { %v7223_v2 = vsub.f32 %v7221_v12, %v7222_v14  ;;  %v7604_v45 = vmul.f32 %v20354_v4, %v24052_v41  ;;  %v24056_v42 = vmul.f32 %v20355_v8, %v24052_v41  ;;  %v24059_v62 = vmul.f32 %v20356_v3, %v24052_v41  ;;  %v20364_v14 = vld [vmem:[#allocation2 + $0x48] sm:$0xff]  ;;  %v20365_v8 = vld [vmem:[#allocation2 + $0x50] sm:$0xff]  ;;  %v20366_v3 = vld [vmem:[#allocation2 + $0x58] sm:$0xff] }
 0x423   :  { %v24062_v53 = vmul.f32 %v20357_v51, %v24052_v41  ;;  %v24065_v9 = vmul.f32 %v20358_v38, %v24052_v41  ;;  %v24068_v31 = vmul.f32 %v20359_v29, %v24052_v41  ;;  %v24071_v24 = vmul.f32 %v20360_v52, %v24052_v41  ;;  %v20367_v38 = vld [vmem:[#allocation2 + $0x60] sm:$0xff] }
 0x424   :  { %v24074_v32 = vrot.slane %v7223_v2, %v24045_v7  ;;  %v24077_v11 = vmul.f32 %v20361_v26, %v24052_v41  ;;  %v24080_v20 = vmul.f32 %v20362_v27, %v24052_v41  ;;  %v24083_v12 = vmul.f32 %v20363_v37, %v24052_v41  ;;  %v20368_v26 = vld [vmem:[#allocation2 + $0x68] sm:$0xff]  ;;  %v20369_v37 = vld [vmem:[#allocation2 + $0x70] sm:$0xff] }
 0x425   :  { %v24086_v4 = vmul.f32 %v20364_v14, %v24052_v41  ;;  %v24089_v2 = vmul.f32 %v20365_v8, %v24052_v41  ;;  %v24092_v51 = vmul.f32 %v20366_v3, %v24052_v41  ;;  %v24095_v29 = vmul.f32 %v20367_v38, %v24052_v41  ;;  %v20370_v8 = vld [vmem:[#allocation2 + $0x78] sm:$0xff]  ;;  %v20371_v3 = vld [vmem:[#allocation2 + $0x80] sm:$0xff]  ;;  %v20372_v38 = vld [vmem:[#allocation2 + $0x88] sm:$0xff] }
 0x426   :  { %v7640_v52 = vadd.f32 %v7604_v45, %v24074_v32  ;;  %v24099_v27 = vmul.f32 %v20368_v26, %v24052_v41  ;;  %v24102_v14 = vmul.f32 %v20369_v37, %v24052_v41  ;;  %v24105_v7 = vmul.f32 %v20370_v8, %v24052_v41  ;;  %v20373_v45 = vld [vmem:[#allocation2 + $0x90] sm:$0xff] }
 0x427   :  { %v24108_v21 = vmul.f32 %v20371_v3, %v24052_v41  ;;  %v24111_v63 = vmul.f32 %v20372_v38, %v24052_v41  ;;  %v24114_v26 = vmul.f32 %v20373_v45, %v24052_v41  ;;  %v24117_v37 = vmul.f32 %v20374_v55, %v24052_v41 }
 0x428   :  { %v7676_v57 = vmax.f32 %v7640_v52, 0.0  ;;  %v24120_v8 = vmul.f32 %v20375_v40, %v24052_v41  ;;  %v24123_v3 = vmul.f32 %v20376_v18, %v24052_v41  ;;  %v24126_v38 = vmul.f32 %v20377_v6, %v24052_v41  ;;  %v20380_v52 = vld [vmem:[#allocation2 + $0xc8] sm:$0xff]  ;;  %v20382_v6 = vld [vmem:[#allocation2 + $0xd8] sm:$0xff] }
 0x429   :  { %v24129_v45 = vmul.f32 %v20378_v49, %v24052_v41  ;;  %v24132_v55 = vmul.f32 %v20379_v43, %v24052_v41  ;;  %v24135_v40 = vmul.f32 %v20380_v52, %v24052_v41  ;;  %v24138_v18 = vmul.f32 %v20381_v35, %v24052_v41  ;;  %v20383_v49 = vld [vmem:[#allocation2 + $0xe0] sm:$0xff]  ;;  %v20384_v43 = vld [vmem:[#allocation2 + $0xe8] sm:$0xff]  ;;  %v20385_v52 = vld [vmem:[#allocation2 + $0xf0] sm:$0xff] }
 0x42a   :  { %v7712_v58 = vmul.f32 %v7676_v57, %v27749_v56  ;;  %v24142_v36 = vmul.f32 %v20382_v6, %v24052_v41  ;;  %v24145_v17 = vmul.f32 %v20383_v49, %v24052_v41  ;;  %v24148_v34 = vmul.f32 %v20384_v43, %v24052_v41  ;;  %v20386_v35 = vld [vmem:[#allocation2 + $0xf8] sm:$0xff]  ;;  %v20387_v57 = vld [vmem:[#allocation2 + $0x100] sm:$0xff]  ;;  %v20388_v56 = vld [vmem:[#allocation2 + $0x108] sm:$0xff] }
 0x42b   :  { %v24151_v28 = vmul.f32 %v20385_v52, %v24052_v41  ;;  %v24154_v16 = vmul.f32 %v20386_v35, %v24052_v41  ;;  %v24157_v6 = vmul.f32 %v20387_v57, %v24052_v41  ;;  %v24160_v49 = vmul.f32 %v20388_v56, %v24052_v41 }
 0x42c   :  { %v24163_v43 = vmul.f32 %v20389_v1, %v24052_v41  ;;  %v24166_v52 = vmul.f32 %v20390_v61, %v24052_v41  ;;  %v24170_v35 = vmul.f32 %v23756_v44, %v24052_v41  ;;  %v24174_v57 = vmul.f32 %v23760_v39, %v24052_v41  ;;  %7749 = vst.msk [vmem:[#allocation3 + $0x263] sm:$0xff] %vm218_vm0, %v7712_v58  ;;  %v27756_v39 = vld [vmem:[#allocation46_spill] sm:$0xff]  ;;  %v27758_v58 = vld [vmem:[#allocation49_spill] sm:$0xff] }
 0x42d   :  { %v24179_v56 = vmul.f32 %v23770_v59, %v24052_v41  ;;  %v24183_v1 = vmul.f32 %v23780_v54, %v24052_v41  ;;  %v24187_v61 = vmul.f32 %v23801_v22, %v24052_v41  ;;  %v24191_v44 = vmul.f32 %v23815_v25, %v24052_v41 }
 0x42e   :  { %27751 = vst [vmem:[#allocation28_spill] sm:$0xff] %v24174_v57  ;;  %v24195_v57 = vmul.f32 %v27756_v39, %v24052_v41  ;;  %v24199_v59 = vmul.f32 %v27758_v58, %v24052_v41 }
 0x42f   :  { %27752 = vst [vmem:[#allocation30_spill] sm:$0xff] %v24179_v56  ;;  %27753 = vst [vmem:[#allocation29_spill] sm:$0xff] %v24183_v1  ;;  %v27760_v56 = vld [vmem:[#allocation47_spill] sm:$0xff]  ;;  %v20391_v1 = vld [vmem:[#allocation2 + $0x168] sm:$0xff] }
 0x430   :  { %27754 = vst [vmem:[#allocation31_spill] sm:$0xff] %v24187_v61  ;;  %27755 = vst [vmem:[#allocation34_spill] sm:$0xff] %v24191_v44  ;;  %v24203_v54 = vmul.f32 %v27760_v56, %v24052_v41  ;;  %v24206_v22 = vmul.f32 %v20391_v1, %v24052_v41  ;;  %v27763_v61 = vld [vmem:[#allocation53_spill] sm:$0xff]  ;;  %v20392_v44 = vld [vmem:[#allocation2 + $0x178] sm:$0xff] }
 0x431   :  { %27757 = vst [vmem:[#allocation37_spill] sm:$0xff] %v24195_v57  ;;  %27759 = vst [vmem:[#allocation38_spill] sm:$0xff] %v24199_v59  ;;  %v24210_v25 = vmul.f32 %v27763_v61, %v24052_v41  ;;  %v24213_v39 = vmul.f32 %v20392_v44, %v24052_v41  ;;  %v20393_v57 = vld [vmem:[#allocation2 + $0x180] sm:$0xff]  ;;  %v20394_v59 = vld [vmem:[#allocation2 + $0x188] sm:$0xff]  ;;  %v24229_v44 = vmul.f32 %v23888_v13, %v24052_v41 }
 0x432   :  { %27761 = vst [vmem:[#allocation39_spill] sm:$0xff] %v24203_v54  ;;  %27762 = vst [vmem:[#allocation42_spill] sm:$0xff] %v24206_v22  ;;  %v24216_v58 = vmul.f32 %v20393_v57, %v24052_v41  ;;  %v24219_v56 = vmul.f32 %v20394_v59, %v24052_v41  ;;  %v20395_v54 = vld [vmem:[#allocation2 + $0x190] sm:$0xff]  ;;  %v20396_v22 = vld [vmem:[#allocation2 + $0x198] sm:$0xff]  ;;  %v24236_v59 = vmul.f32 %v23895_v19, %v24052_v41 }
 0x433   :  { %27764 = vst [vmem:[#allocation43_spill] sm:$0xff] %v24213_v39  ;;  %v24222_v1 = vmul.f32 %v20395_v54, %v24052_v41  ;;  %v24225_v61 = vmul.f32 %v20396_v22, %v24052_v41  ;;  %v20397_v39 = vld [vmem:[#allocation2 + $0x1a8] sm:$0xff]  ;;  %v24240_v54 = vmul.f32 %v23899_v30, %v24052_v41 }
 0x434   :  { %v24232_v57 = vmul.f32 %v20397_v39, %v24052_v41  ;;  %27768 = vst [vmem:[#allocation50_spill] sm:$0xff] %v24236_v59  ;;  %v24250_v39 = vmul.f32 %v23913_v0, %v24052_v41  ;;  %v20401_v59 = vld [vmem:[#allocation2 + $0x1e0] sm:$0xff]  ;;  %v24267_v0 = vmul.f32 %v23946_v46, %v24052_v41 }
 0x435   :  { %27765 = vst [vmem:[#allocation54_spill] sm:$0xff] %v24222_v1  ;;  %27766 = vst [vmem:[#allocation58_spill] sm:$0xff] %v24225_v61  ;;  %v20398_v1 = vld [vmem:[#allocation2 + $0x1c0] sm:$0xff]  ;;  %v20399_v61 = vld [vmem:[#allocation2 + $0x1c8] sm:$0xff]  ;;  %v24256_v30 = vmul.f32 %v20401_v59, %v24052_v41 }
 0x436   :  { %27767 = vst [vmem:[#allocation48_spill] sm:$0xff] %v24232_v57  ;;  %27769 = vst [vmem:[#allocation55_spill] sm:$0xff] %v24240_v54  ;;  %v24243_v22 = vmul.f32 %v20398_v1, %v24052_v41  ;;  %v24246_v13 = vmul.f32 %v20399_v61, %v24052_v41  ;;  %v20400_v57 = vld [vmem:[#allocation2 + $0x1d8] sm:$0xff]  ;;  %v20402_v54 = vld [vmem:[#allocation2 + $0x1e8] sm:$0xff]  ;;  %v24263_v61 = vmul.f32 %v23935_v23, %v24052_v41 }
 0x437   :  { %27771 = vst [vmem:[#allocation46_spill] sm:$0xff] %v24250_v39  ;;  %v24253_v19 = vmul.f32 %v20400_v57, %v24052_v41  ;;  %27773 = vst [vmem:[#allocation47_spill] sm:$0xff] %v24256_v30  ;;  %v24259_v1 = vmul.f32 %v20402_v54, %v24052_v41  ;;  %v20403_v39 = vld [vmem:[#allocation2 + $0x200] sm:$0xff]  ;;  %v24277_v54 = vmul.f32 %v23969_v10, %v24052_v41 }
 0x438   :  { %27770 = vst [vmem:[#allocation59_spill] sm:$0xff] %v24246_v13  ;;  %27775 = vst [vmem:[#allocation61_spill] sm:$0xff] %v24263_v61  ;;  %v24270_v57 = vmul.f32 %v20403_v39, %v24052_v41  ;;  %v24281_v23 = vmul.f32 %v23982_v50, %v24052_v41  ;;  %v20405_v61 = vld [vmem:[#allocation2 + $0x220] sm:$0xff]  ;;  %v24288_v39 = vmul.f32 %v24020_v15, %v24052_v41  ;;  %v27790_v13 = vld [vmem:[#allocation12_spill] sm:$0xff] }
 0x439   :  { %27772 = vst [vmem:[#allocation49_spill] sm:$0xff] %v24253_v19  ;;  %27774 = vst [vmem:[#allocation53_spill] sm:$0xff] %v24259_v1  ;;  %v20404_v19 = vld [vmem:[#allocation2 + $0x208] sm:$0xff]  ;;  %v24284_v46 = vmul.f32 %v20405_v61, %v24052_v41  ;;  %v24296_v10 = vadd.f32 %v24074_v32, %v24056_v42  ;;  %v24300_v50 = vadd.f32 %v24074_v32, %v24059_v62  ;;  %v27788_v1 = vld [vmem:[#allocation9_spill] sm:$0xff] }
 0x43a   :  { %27776 = vst [vmem:[#allocation62_spill] sm:$0xff] %v24267_v0  ;;  %27777 = vst [vmem:[#allocation63_spill] sm:$0xff] %v24270_v57  ;;  %v24273_v59 = vmul.f32 %v20404_v19, %v24052_v41  ;;  %v24292_v19 = vmul.f32 %v24027_v5, %v24052_v41  ;;  %v24304_v61 = vadd.f32 %v24074_v32, %v24062_v53  ;;  %v27786_v57 = vld [vmem:[#allocation6_spill] sm:$0xff]  ;;  %v27787_v0 = vld [vmem:[#allocation8_spill] sm:$0xff] }
 0x43b   :  { %27779 = vst [vmem:[#allocation65_spill] sm:$0xff] %v24277_v54  ;;  %27780 = vst [vmem:[#allocation66_spill] sm:$0xff] %v24281_v23  ;;  %v24308_v15 = vadd.f32 %v24074_v32, %v24065_v9  ;;  %v24312_v5 = vadd.f32 %v24074_v32, %v24068_v31  ;;  %v24316_v41 = vadd.f32 %v24074_v32, %v24071_v24  ;;  %v27784_v54 = vld [vmem:[#allocation5_spill] sm:$0xff]  ;;  %v27789_v30 = vld [vmem:[#allocation11_spill] sm:$0xff] }
 0x43c   :  { %27778 = vst [vmem:[#allocation64_spill] sm:$0xff] %v24273_v59  ;;  %27781 = vst [vmem:[#allocation67_spill] sm:$0xff] %v24284_v46  ;;  %v24320_v42 = vadd.f32 %v24074_v32, %v24077_v11  ;;  %v24324_v62 = vadd.f32 %v24074_v32, %v24080_v20  ;;  %v24328_v53 = vadd.f32 %v24074_v32, %v24083_v12  ;;  %v27785_v59 = vld [vmem:[#allocation7_spill] sm:$0xff] }
 0x43d   :  { %27782 = vst [vmem:[#allocation68_spill] sm:$0xff] %v24288_v39  ;;  %27783 = vst [vmem:[#allocation69_spill] sm:$0xff] %v24292_v19  ;;  %v24332_v9 = vadd.f32 %v24074_v32, %v24086_v4  ;;  %v24336_v31 = vadd.f32 %v24074_v32, %v24089_v2  ;;  %v24340_v24 = vadd.f32 %v24074_v32, %v24092_v51  ;;  %v7429_v19 = vmax.f32 %v24304_v61, 0.0 }
 0x43e   :  { %v24344_v11 = vadd.f32 %v24074_v32, %v24095_v29  ;;  %v24348_v20 = vadd.f32 %v24074_v32, %v24099_v27  ;;  %v24352_v12 = vadd.f32 %v24074_v32, %v24102_v14  ;;  %v24356_v4 = vadd.f32 %v24074_v32, %v24105_v7 }
 0x43f   :  { %v24360_v2 = vadd.f32 %v24074_v32, %v24108_v21  ;;  %v24364_v51 = vadd.f32 %v24074_v32, %v24111_v63  ;;  %v24368_v29 = vadd.f32 %v24074_v32, %v24114_v26  ;;  %v24372_v27 = vadd.f32 %v24074_v32, %v24117_v37 }
 0x440   :  { %v24376_v7 = vadd.f32 %v24074_v32, %v24120_v8  ;;  %v24380_v21 = vadd.f32 %v24074_v32, %v24123_v3  ;;  %v24384_v63 = vadd.f32 %v24074_v32, %v24126_v38  ;;  %v24388_v14 = vadd.f32 %v24074_v32, %v24129_v45 }
 0x441   :  { %v24392_v26 = vadd.f32 %v24074_v32, %v24132_v55  ;;  %v24396_v37 = vadd.f32 %v24074_v32, %v24135_v40  ;;  %v24400_v8 = vadd.f32 %v24074_v32, %v24138_v18  ;;  %v24404_v3 = vadd.f32 %v24074_v32, %v24142_v36 }
 0x442   :  { %v24408_v38 = vadd.f32 %v24074_v32, %v24145_v17  ;;  %v24412_v45 = vadd.f32 %v24074_v32, %v24148_v34  ;;  %v24416_v55 = vadd.f32 %v24074_v32, %v24151_v28  ;;  %v24420_v40 = vadd.f32 %v24074_v32, %v24154_v16 }
 0x443   :  { %v24424_v36 = vadd.f32 %v24074_v32, %v24157_v6  ;;  %v24428_v17 = vadd.f32 %v24074_v32, %v24160_v49  ;;  %v24432_v34 = vadd.f32 %v24074_v32, %v24163_v43  ;;  %v24436_v28 = vadd.f32 %v24074_v32, %v24166_v52 }
 0x444   :  { %v7427_v18 = vmax.f32 %v24296_v10, 0.0  ;;  %v7428_v16 = vmax.f32 %v24300_v50, 0.0  ;;  %v7430_v6 = vmax.f32 %v24308_v15, 0.0  ;;  %v7431_v39 = vmax.f32 %v24312_v5, 0.0 }
 0x445   :  { %v7432_v49 = vmax.f32 %v24316_v41, 0.0  ;;  %v7433_v46 = vmax.f32 %v24320_v42, 0.0  ;;  %v7434_v43 = vmax.f32 %v24324_v62, 0.0  ;;  %v7435_v23 = vmax.f32 %v24328_v53, 0.0 }
 0x446   :  { %v7436_v52 = vmax.f32 %v24332_v9, 0.0  ;;  %v7437_v10 = vmax.f32 %v24336_v31, 0.0  ;;  %v7438_v50 = vmax.f32 %v24340_v24, 0.0  ;;  %v7439_v61 = vmax.f32 %v24344_v11, 0.0 }
 0x447   :  { %v7440_v15 = vmax.f32 %v24348_v20, 0.0  ;;  %v7441_v5 = vmax.f32 %v24352_v12, 0.0  ;;  %v7442_v41 = vmax.f32 %v24356_v4, 0.0  ;;  %v7443_v42 = vmax.f32 %v24360_v2, 0.0 }
 0x448   :  { %v7444_v62 = vmax.f32 %v24364_v51, 0.0  ;;  %v7445_v53 = vmax.f32 %v24368_v29, 0.0  ;;  %v7446_v9 = vmax.f32 %v24372_v27, 0.0  ;;  %v7447_v31 = vmax.f32 %v24376_v7, 0.0 }
 0x449   :  { %v7448_v24 = vmax.f32 %v24380_v21, 0.0  ;;  %v7449_v11 = vmax.f32 %v24384_v63, 0.0  ;;  %v7450_v20 = vmax.f32 %v24388_v14, 0.0  ;;  %v7451_v12 = vmax.f32 %v24392_v26, 0.0 }
 0x44a   :  { %v7452_v4 = vmax.f32 %v24396_v37, 0.0  ;;  %v7453_v2 = vmax.f32 %v24400_v8, 0.0  ;;  %v7454_v51 = vmax.f32 %v24404_v3, 0.0  ;;  %v7455_v29 = vmax.f32 %v24408_v38, 0.0 }
 0x44b   :  { %v7456_v27 = vmax.f32 %v24412_v45, 0.0  ;;  %v7457_v7 = vmax.f32 %v24416_v55, 0.0  ;;  %v7458_v21 = vmax.f32 %v24420_v40, 0.0  ;;  %v7459_v63 = vmax.f32 %v24424_v36, 0.0 }
 0x44c   :  { %v7460_v14 = vmax.f32 %v24428_v17, 0.0  ;;  %v7461_v26 = vmax.f32 %v24432_v34, 0.0  ;;  %v7463_v8 = vmul.f32 %v7427_v18, %v27784_v54  ;;  %v7464_v3 = vmul.f32 %v7428_v16, %v27785_v59  ;;  %v27792_v16 = vld [vmem:[#allocation14_spill] sm:$0xff] }
 0x44d   :  { %v7465_v38 = vmul.f32 %v7429_v19, %v27786_v57  ;;  %v7466_v45 = vmul.f32 %v7430_v6, %v27787_v0  ;;  %v7467_v55 = vmul.f32 %v7431_v39, %v27788_v1  ;;  %v7468_v40 = vmul.f32 %v7432_v49, %v23200_v33  ;;  %v27791_v19 = vld [vmem:[#allocation13_spill] sm:$0xff]  ;;  %v27793_v49 = vld [vmem:[#allocation15_spill] sm:$0xff] }
 0x44e   :  { %v7469_v36 = vmul.f32 %v7433_v46, %v23202_v47  ;;  %v7470_v17 = vmul.f32 %v7434_v43, %v23204_v48  ;;  %v7471_v34 = vmul.f32 %v7435_v23, %v23206_v60  ;;  %v7472_v37 = vmul.f32 %v7436_v52, %v27789_v30  ;;  %7500 = vst.msk [vmem:[#allocation3 + $0x1b] sm:$0xff] %vm218_vm0, %v7464_v3  ;;  %v27794_v47 = vld [vmem:[#allocation16_spill] sm:$0xff]  ;;  %v27795_v23 = vld [vmem:[#allocation17_spill] sm:$0xff]  ;;  %v27797_v3 = vld [vmem:[#allocation19_spill] sm:$0xff] }
 0x44f   :  { %v7473_v18 = vmul.f32 %v7437_v10, %v27790_v13  ;;  %7499 = vst.msk [vmem:[#allocation3 + $0x13] sm:$0xff] %vm218_vm0, %v7463_v8  ;;  %7501 = vst.msk [vmem:[#allocation3 + $0x23] sm:$0xff] %vm218_vm0, %v7465_v38  ;;  %v7474_v39 = vmul.f32 %v7438_v50, %v27791_v19  ;;  %v7475_v6 = vmul.f32 %v7439_v61, %v27792_v16  ;;  %v27796_v10 = vld [vmem:[#allocation18_spill] sm:$0xff]  ;;  %v27798_v38 = vld [vmem:[#allocation20_spill] sm:$0xff] }
 0x450   :  { %v7476_v46 = vmul.f32 %v7440_v15, %v27793_v49  ;;  %v7477_v43 = vmul.f32 %v7441_v5, %v27794_v47  ;;  %7502 = vst.msk [vmem:[#allocation3 + $0x2b] sm:$0xff] %vm218_vm0, %v7466_v45  ;;  %7503 = vst.msk [vmem:[#allocation3 + $0x33] sm:$0xff] %vm218_vm0, %v7467_v55  ;;  %v7478_v52 = vmul.f32 %v7442_v41, %v27795_v23  ;;  %v27799_v15 = vld [vmem:[#allocation21_spill] sm:$0xff]  ;;  %v27800_v45 = vld [vmem:[#allocation22_spill] sm:$0xff] }
 0x451   :  { %7504 = vst.msk [vmem:[#allocation3 + $0x3b] sm:$0xff] %vm218_vm0, %v7468_v40  ;;  %7505 = vst.msk [vmem:[#allocation3 + $0x43] sm:$0xff] %vm218_vm0, %v7469_v36  ;;  %v7479_v8 = vmul.f32 %v7443_v42, %v27796_v10  ;;  %v7480_v50 = vmul.f32 %v7444_v62, %v27797_v3  ;;  %v7481_v61 = vmul.f32 %v7445_v53, %v27798_v38  ;;  %v27801_v40 = vld [vmem:[#allocation23_spill] sm:$0xff]  ;;  %v27802_v36 = vld [vmem:[#allocation26_spill] sm:$0xff] }
 0x452   :  { %7506 = vst.msk [vmem:[#allocation3 + $0x4b] sm:$0xff] %vm218_vm0, %v7470_v17  ;;  %7507 = vst.msk [vmem:[#allocation3 + $0x53] sm:$0xff] %vm218_vm0, %v7471_v34  ;;  %v7482_v5 = vmul.f32 %v7446_v9, %v27799_v15  ;;  %v7483_v55 = vmul.f32 %v7447_v31, %v27800_v45  ;;  %v7484_v41 = vmul.f32 %v7448_v24, %v27801_v40  ;;  %v27803_v62 = vld [vmem:[#allocation27_spill] sm:$0xff]  ;;  %v27805_v34 = vld [vmem:[#allocation33_spill] sm:$0xff] }
 0x453   :  { %7508 = vst.msk [vmem:[#allocation3 + $0x5b] sm:$0xff] %vm218_vm0, %v7472_v37  ;;  %7509 = vst.msk [vmem:[#allocation3 + $0x63] sm:$0xff] %vm218_vm0, %v7473_v18  ;;  %v7485_v42 = vmul.f32 %v7449_v11, %v27802_v36  ;;  %v7486_v53 = vmul.f32 %v7450_v20, %v27803_v62  ;;  %v27804_v37 = vld [vmem:[#allocation32_spill] sm:$0xff]  ;;  %v7488_v9 = vmul.f32 %v7452_v4, %v27805_v34  ;;  %v27806_v18 = vld [vmem:[#allocation35_spill] sm:$0xff] }
 0x454   :  { %7510 = vst.msk [vmem:[#allocation3 + $0x6b] sm:$0xff] %vm218_vm0, %v7474_v39  ;;  %7511 = vst.msk [vmem:[#allocation3 + $0x73] sm:$0xff] %vm218_vm0, %v7475_v6  ;;  %v7487_v17 = vmul.f32 %v7451_v12, %v27804_v37  ;;  %v7489_v31 = vmul.f32 %v7453_v2, %v27806_v18  ;;  %v27807_v24 = vld [vmem:[#allocation36_spill] sm:$0xff]  ;;  %v27811_v4 = vld [vmem:[#allocation45_spill] sm:$0xff] }
 0x455   :  { %7512 = vst.msk [vmem:[#allocation3 + $0x7b] sm:$0xff] %vm218_vm0, %v7476_v46  ;;  %7513 = vst.msk [vmem:[#allocation3 + $0x83] sm:$0xff] %vm218_vm0, %v7477_v43  ;;  %v7490_v11 = vmul.f32 %v7454_v51, %v27807_v24  ;;  %v27808_v39 = vld [vmem:[#allocation40_spill] sm:$0xff]  ;;  %v27809_v46 = vld [vmem:[#allocation41_spill] sm:$0xff]  ;;  %v7494_v2 = vmul.f32 %v7458_v21, %v27811_v4  ;;  %v24541_v21 = vadd.f32 %v24170_v35, %v24074_v32 }
 0x456   :  { %7514 = vst.msk [vmem:[#allocation3 + $0x8b] sm:$0xff] %vm218_vm0, %v7478_v52  ;;  %7515 = vst.msk [vmem:[#allocation3 + $0x93] sm:$0xff] %vm218_vm0, %v7479_v8  ;;  %v7491_v6 = vmul.f32 %v7455_v29, %v27808_v39  ;;  %v7492_v20 = vmul.f32 %v7456_v27, %v27809_v46  ;;  %v27810_v43 = vld [vmem:[#allocation44_spill] sm:$0xff]  ;;  %v27812_v52 = vld [vmem:[#allocation51_spill] sm:$0xff] }
 0x457   :  { %7516 = vst.msk [vmem:[#allocation3 + $0x9b] sm:$0xff] %vm218_vm0, %v7480_v50  ;;  %7517 = vst.msk [vmem:[#allocation3 + $0xa3] sm:$0xff] %vm218_vm0, %v7481_v61  ;;  %v7493_v12 = vmul.f32 %v7457_v7, %v27810_v43  ;;  %v7495_v8 = vmul.f32 %v7459_v63, %v27812_v52  ;;  %v27813_v50 = vld [vmem:[#allocation52_spill] sm:$0xff]  ;;  %v27814_v61 = vld [vmem:[#allocation57_spill] sm:$0xff]  ;;  %v27816_v7 = vmax.f32 %v24436_v28, 0.0  ;;  %v7643_v62 = vmax.f32 %v24541_v21, 0.0 }
 0x458   :  { %7518 = vst.msk [vmem:[#allocation3 + $0xab] sm:$0xff] %vm218_vm0, %v7482_v5  ;;  %7519 = vst.msk [vmem:[#allocation3 + $0xb3] sm:$0xff] %vm218_vm0, %v7483_v55  ;;  %v7496_v51 = vmul.f32 %v7460_v14, %v27813_v50  ;;  %v7497_v29 = vmul.f32 %v7461_v26, %v27814_v61  ;;  %v27815_v27 = vld [vmem:[#allocation60_spill] sm:$0xff]  ;;  %v27818_v26 = vld [vmem:[#allocation30_spill] sm:$0xff] }
 0x459   :  { %7520 = vst.msk [vmem:[#allocation3 + $0xbb] sm:$0xff] %vm218_vm0, %v7484_v41  ;;  %7521 = vst.msk [vmem:[#allocation3 + $0xc3] sm:$0xff] %vm218_vm0, %v7485_v42  ;;  %v7498_v5 = vmul.f32 %v27816_v7, %v27815_v27  ;;  %v27817_v63 = vld [vmem:[#allocation28_spill] sm:$0xff]  ;;  %v24549_v55 = vadd.f32 %v27818_v26, %v24074_v32  ;;  %v27819_v28 = vld [vmem:[#allocation29_spill] sm:$0xff]  ;;  %v24602_v26 = vadd.f32 %v24219_v56, %v24074_v32 }
 0x45a   :  { %7522 = vst.msk [vmem:[#allocation3 + $0xcb] sm:$0xff] %vm218_vm0, %v7486_v53  ;;  %7523 = vst.msk [vmem:[#allocation3 + $0xd3] sm:$0xff] %vm218_vm0, %v7487_v17  ;;  %v24545_v14 = vadd.f32 %v27817_v63, %v24074_v32  ;;  %v24557_v35 = vadd.f32 %v27819_v28, %v24074_v32  ;;  %v27820_v41 = vld [vmem:[#allocation31_spill] sm:$0xff]  ;;  %v27821_v53 = vld [vmem:[#allocation34_spill] sm:$0xff] }
 0x45b   :  { %7524 = vst.msk [vmem:[#allocation3 + $0xdb] sm:$0xff] %vm218_vm0, %v7488_v9  ;;  %7525 = vst.msk [vmem:[#allocation3 + $0xe3] sm:$0xff] %vm218_vm0, %v7489_v31  ;;  %v24561_v42 = vadd.f32 %v27820_v41, %v24074_v32  ;;  %v24565_v17 = vadd.f32 %v27821_v53, %v24074_v32  ;;  %v27822_v9 = vld [vmem:[#allocation37_spill] sm:$0xff]  ;;  %v27825_v7 = vld [vmem:[#allocation42_spill] sm:$0xff]  ;;  %v7645_v36 = vmax.f32 %v24549_v55, 0.0  ;;  %v7656_v55 = vmax.f32 %v24602_v26, 0.0 }
 0x45c   :  { %7526 = vst.msk [vmem:[#allocation3 + $0xeb] sm:$0xff] %vm218_vm0, %v7490_v11  ;;  %7527 = vst.msk [vmem:[#allocation3 + $0xf3] sm:$0xff] %vm218_vm0, %v7491_v6  ;;  %v24569_v31 = vadd.f32 %v27822_v9, %v24074_v32  ;;  %v27823_v11 = vld [vmem:[#allocation38_spill] sm:$0xff]  ;;  %v24585_v63 = vadd.f32 %v27825_v7, %v24074_v32  ;;  %v27829_v9 = vld [vmem:[#allocation48_spill] sm:$0xff] }
 0x45d   :  { %7528 = vst.msk [vmem:[#allocation3 + $0xfb] sm:$0xff] %vm218_vm0, %v7492_v20  ;;  %7529 = vst.msk [vmem:[#allocation3 + $0x103] sm:$0xff] %vm218_vm0, %v7493_v12  ;;  %v24577_v6 = vadd.f32 %v27823_v11, %v24074_v32  ;;  %v27824_v20 = vld [vmem:[#allocation39_spill] sm:$0xff]  ;;  %v27827_v28 = vld [vmem:[#allocation54_spill] sm:$0xff]  ;;  %v7647_v40 = vmax.f32 %v24561_v42, 0.0 }
 0x45e   :  { %7530 = vst.msk [vmem:[#allocation3 + $0x10b] sm:$0xff] %vm218_vm0, %v7494_v2  ;;  %7531 = vst.msk [vmem:[#allocation3 + $0x113] sm:$0xff] %vm218_vm0, %v7495_v8  ;;  %v24581_v12 = vadd.f32 %v27824_v20, %v24074_v32  ;;  %v24589_v2 = vadd.f32 %v24210_v25, %v24074_v32  ;;  %v27826_v8 = vld [vmem:[#allocation43_spill] sm:$0xff]  ;;  %v24606_v41 = vadd.f32 %v27827_v28, %v24074_v32  ;;  %v27828_v25 = vld [vmem:[#allocation58_spill] sm:$0xff]  ;;  %v7649_v45 = vmax.f32 %v24569_v31, 0.0 }
 0x45f   :  { %7532 = vst.msk [vmem:[#allocation3 + $0x11b] sm:$0xff] %vm218_vm0, %v7496_v51  ;;  %7533 = vst.msk [vmem:[#allocation3 + $0x123] sm:$0xff] %vm218_vm0, %v7497_v29  ;;  %v24594_v51 = vadd.f32 %v27826_v8, %v24074_v32  ;;  %v24598_v29 = vadd.f32 %v24216_v58, %v24074_v32  ;;  %v24610_v53 = vadd.f32 %v27828_v25, %v24074_v32  ;;  %v27830_v11 = vld [vmem:[#allocation50_spill] sm:$0xff]  ;;  %v27831_v20 = vld [vmem:[#allocation55_spill] sm:$0xff] }
 0x460   :  { %7534 = vst.msk [vmem:[#allocation3 + $0x12b] sm:$0xff] %vm218_vm0, %v7498_v5  ;;  %v24614_v5 = vadd.f32 %v24229_v44, %v24074_v32  ;;  %v24618_v58 = vadd.f32 %v27829_v9, %v24074_v32  ;;  %v24622_v56 = vadd.f32 %v27830_v11, %v24074_v32  ;;  %v24626_v7 = vadd.f32 %v27831_v20, %v24074_v32  ;;  %v27832_v28 = vld [vmem:[#allocation59_spill] sm:$0xff]  ;;  %v27833_v25 = vld [vmem:[#allocation46_spill] sm:$0xff]  ;;  %v27834_v50 = vld [vmem:[#allocation49_spill] sm:$0xff] }
 0x461   :  { %v24630_v8 = vadd.f32 %v24243_v22, %v24074_v32  ;;  %v24634_v44 = vadd.f32 %v27832_v28, %v24074_v32  ;;  %v24638_v9 = vadd.f32 %v27833_v25, %v24074_v32  ;;  %v24642_v11 = vadd.f32 %v27834_v50, %v24074_v32  ;;  %v27835_v27 = vld [vmem:[#allocation47_spill] sm:$0xff]  ;;  %v27836_v61 = vld [vmem:[#allocation53_spill] sm:$0xff]  ;;  %v27838_v4 = vld [vmem:[#allocation62_spill] sm:$0xff] }
 0x462   :  { %v24646_v20 = vadd.f32 %v27835_v27, %v24074_v32  ;;  %v24650_v22 = vadd.f32 %v27836_v61, %v24074_v32  ;;  %v27837_v52 = vld [vmem:[#allocation61_spill] sm:$0xff]  ;;  %v24658_v25 = vadd.f32 %v27838_v4, %v24074_v32  ;;  %v27839_v43 = vld [vmem:[#allocation63_spill] sm:$0xff]  ;;  %v27840_v46 = vld [vmem:[#allocation64_spill] sm:$0xff]  ;;  %v7651_v15 = vmax.f32 %v24581_v12, 0.0 }
 0x463   :  { %v24654_v28 = vadd.f32 %v27837_v52, %v24074_v32  ;;  %v24662_v50 = vadd.f32 %v27839_v43, %v24074_v32  ;;  %v24666_v27 = vadd.f32 %v27840_v46, %v24074_v32  ;;  %v27841_v39 = vld [vmem:[#allocation65_spill] sm:$0xff]  ;;  %v27842_v24 = vld [vmem:[#allocation66_spill] sm:$0xff]  ;;  %v27843_v18 = vld [vmem:[#allocation67_spill] sm:$0xff]  ;;  %v7654_v21 = vmax.f32 %v24594_v51, 0.0 }
 0x464   :  { %v24670_v61 = vadd.f32 %v27841_v39, %v24074_v32  ;;  %v24674_v52 = vadd.f32 %v27842_v24, %v24074_v32  ;;  %v24678_v4 = vadd.f32 %v27843_v18, %v24074_v32  ;;  %v27844_v34 = vld [vmem:[#allocation68_spill] sm:$0xff]  ;;  %v27845_v37 = vld [vmem:[#allocation69_spill] sm:$0xff]  ;;  %v7644_v39 = vmax.f32 %v24545_v14, 0.0 }
 0x465   :  { %v24682_v43 = vadd.f32 %v27844_v34, %v24074_v32  ;;  %v24686_v46 = vadd.f32 %v27845_v37, %v24074_v32  ;;  %v7646_v24 = vmax.f32 %v24557_v35, 0.0  ;;  %v7648_v18 = vmax.f32 %v24565_v17, 0.0 }
 0x466   :  { %v7650_v34 = vmax.f32 %v24577_v6, 0.0  ;;  %v7652_v32 = vmax.f32 %v24585_v63, 0.0  ;;  %v7653_v37 = vmax.f32 %v24589_v2, 0.0  ;;  %v7655_v14 = vmax.f32 %v24598_v29, 0.0 }
 0x467   :  { %v7657_v35 = vmax.f32 %v24606_v41, 0.0  ;;  %v7658_v42 = vmax.f32 %v24610_v53, 0.0  ;;  %v7659_v17 = vmax.f32 %v24614_v5, 0.0  ;;  %v7660_v31 = vmax.f32 %v24618_v58, 0.0 }
 0x468   :  { %v7661_v6 = vmax.f32 %v24622_v56, 0.0  ;;  %v7662_v12 = vmax.f32 %v24626_v7, 0.0  ;;  %v7663_v63 = vmax.f32 %v24630_v8, 0.0  ;;  %v7664_v2 = vmax.f32 %v24634_v44, 0.0 }
 0x469   :  { %v7665_v51 = vmax.f32 %v24638_v9, 0.0  ;;  %v7666_v29 = vmax.f32 %v24642_v11, 0.0  ;;  %v7667_v26 = vmax.f32 %v24646_v20, 0.0  ;;  %v7668_v41 = vmax.f32 %v24650_v22, 0.0 }
 0x46a   :  { %v7669_v53 = vmax.f32 %v24654_v28, 0.0  ;;  %v7670_v5 = vmax.f32 %v24658_v25, 0.0  ;;  %v7671_v58 = vmax.f32 %v24662_v50, 0.0  ;;  %v7672_v56 = vmax.f32 %v24666_v27, 0.0 }
 0x46b   :  { %v7673_v7 = vmax.f32 %v24670_v61, 0.0  ;;  %v7674_v8 = vmax.f32 %v24674_v52, 0.0  ;;  %v7675_v44 = vmax.f32 %v24678_v4, 0.0  ;;  %v7678_v11 = vmax.f32 %v24686_v46, 0.0  ;;  %v27846_v61 = vld [vmem:[#allocation10_spill] sm:$0xff] }
 0x46c   :  { %v7679_v20 = vmul.f32 %v7643_v62, %v27784_v54  ;;  %v7680_v22 = vmul.f32 %v7644_v39, %v27785_v59  ;;  %v7681_v28 = vmul.f32 %v7645_v36, %v27786_v57  ;;  %v7682_v25 = vmul.f32 %v7646_v24, %v27787_v0 }
 0x46d   :  { %v7683_v50 = vmul.f32 %v7647_v40, %v27788_v1  ;;  %v7684_v27 = vmul.f32 %v7648_v18, %v23200_v33  ;;  %v7685_v52 = vmul.f32 %v7649_v45, %v27846_v61  ;;  %v7686_v4 = vmul.f32 %v7650_v34, %v23204_v48 }
 0x46e   :  { %v7687_v9 = vmul.f32 %v7651_v15, %v23206_v60  ;;  %7716 = vst.msk [vmem:[#allocation3 + $0x15b] sm:$0xff] %vm218_vm0, %v7679_v20  ;;  %v7688_v62 = vmul.f32 %v7652_v32, %v27789_v30  ;;  %v7689_v39 = vmul.f32 %v7653_v37, %v27790_v13  ;;  %v7690_v36 = vmul.f32 %v7654_v21, %v27791_v19  ;;  %v27847_v37 = vld [vmem:[#allocation21_spill] sm:$0xff] }
 0x46f   :  { %v7691_v24 = vmul.f32 %v7655_v14, %v27792_v16  ;;  %7717 = vst.msk [vmem:[#allocation3 + $0x163] sm:$0xff] %vm218_vm0, %v7680_v22  ;;  %7718 = vst.msk [vmem:[#allocation3 + $0x16b] sm:$0xff] %vm218_vm0, %v7681_v28  ;;  %v7692_v15 = vmul.f32 %v7656_v55, %v27793_v49  ;;  %v7693_v45 = vmul.f32 %v7657_v35, %v27794_v47  ;;  %v27848_v14 = vld [vmem:[#allocation22_spill] sm:$0xff] }
 0x470   :  { %7719 = vst.msk [vmem:[#allocation3 + $0x173] sm:$0xff] %vm218_vm0, %v7682_v25  ;;  %7720 = vst.msk [vmem:[#allocation3 + $0x17b] sm:$0xff] %vm218_vm0, %v7683_v50  ;;  %v7694_v40 = vmul.f32 %v7658_v42, %v27795_v23  ;;  %v7695_v18 = vmul.f32 %v7659_v17, %v27796_v10  ;;  %v7696_v34 = vmul.f32 %v7660_v31, %v27797_v3  ;;  %v7816_v35 = vld [vmem:[#allocation3 + $0x11] sm:$0xff]  ;;  %v27849_v42 = vld [vmem:[#allocation23_spill] sm:$0xff] }
 0x471   :  { %7721 = vst.msk [vmem:[#allocation3 + $0x183] sm:$0xff] %vm218_vm0, %v7684_v27  ;;  %7722 = vst.msk [vmem:[#allocation3 + $0x18b] sm:$0xff] %vm218_vm0, %v7685_v52  ;;  %v7697_v32 = vmul.f32 %v7661_v6, %v27798_v38  ;;  %v7698_v21 = vmul.f32 %v7662_v12, %v27847_v37  ;;  %v7699_v55 = vmul.f32 %v7663_v63, %v27848_v14  ;;  %v27851_v31 = vld [vmem:[#allocation27_spill] sm:$0xff]  ;;  %v27852_v6 = vld [vmem:[#allocation32_spill] sm:$0xff] }
 0x472   :  { %7723 = vst.msk [vmem:[#allocation3 + $0x193] sm:$0xff] %vm218_vm0, %v7686_v4  ;;  %7724 = vst.msk [vmem:[#allocation3 + $0x19b] sm:$0xff] %vm218_vm0, %v7687_v9  ;;  %v7700_v17 = vmul.f32 %v7664_v2, %v27849_v42  ;;  %v27850_v9 = vld [vmem:[#allocation26_spill] sm:$0xff]  ;;  %v7702_v22 = vmul.f32 %v7666_v29, %v27851_v31  ;;  %v7703_v28 = vmul.f32 %v7667_v26, %v27852_v6  ;;  %v7818_v63 = vld [vmem:[#allocation3 + $0x21] sm:$0xff] }
 0x473   :  { %7725 = vst.msk [vmem:[#allocation3 + $0x1a3] sm:$0xff] %vm218_vm0, %v7688_v62  ;;  %7726 = vst.msk [vmem:[#allocation3 + $0x1ab] sm:$0xff] %vm218_vm0, %v7689_v39  ;;  %v7701_v20 = vmul.f32 %v7665_v51, %v27850_v9  ;;  %v7817_v12 = vld [vmem:[#allocation3 + $0x19] sm:$0xff]  ;;  %v7819_v25 = vld [vmem:[#allocation3 + $0x29] sm:$0xff] }
 0x474   :  { %7727 = vst.msk [vmem:[#allocation3 + $0x1b3] sm:$0xff] %vm218_vm0, %v7690_v36  ;;  %7728 = vst.msk [vmem:[#allocation3 + $0x1bb] sm:$0xff] %vm218_vm0, %v7691_v24  ;;  %v27853_v50 = vld [vmem:[#allocation33_spill] sm:$0xff]  ;;  %v27854_v2 = vld [vmem:[#allocation35_spill] sm:$0xff] }
 0x475   :  { %7729 = vst.msk [vmem:[#allocation3 + $0x1c3] sm:$0xff] %vm218_vm0, %v7692_v15  ;;  %7730 = vst.msk [vmem:[#allocation3 + $0x1cb] sm:$0xff] %vm218_vm0, %v7693_v45  ;;  %v7704_v27 = vmul.f32 %v7668_v41, %v27853_v50  ;;  %v7705_v52 = vmul.f32 %v7669_v53, %v27854_v2  ;;  %v27855_v51 = vld [vmem:[#allocation36_spill] sm:$0xff]  ;;  %v27857_v26 = vld [vmem:[#allocation41_spill] sm:$0xff] }
 0x476   :  { %7731 = vst.msk [vmem:[#allocation3 + $0x1d3] sm:$0xff] %vm218_vm0, %v7694_v40  ;;  %7732 = vst.msk [vmem:[#allocation3 + $0x1db] sm:$0xff] %vm218_vm0, %v7695_v18  ;;  %v7706_v4 = vmul.f32 %v7670_v5, %v27855_v51  ;;  %v27856_v29 = vld [vmem:[#allocation40_spill] sm:$0xff]  ;;  %v7708_v39 = vmul.f32 %v7672_v56, %v27857_v26  ;;  %v27859_v15 = vld [vmem:[#allocation45_spill] sm:$0xff] }
 0x477   :  { %v7707_v62 = vmul.f32 %v7671_v58, %v27856_v29  ;;  %7733 = vst.msk [vmem:[#allocation3 + $0x1e3] sm:$0xff] %vm218_vm0, %v7696_v34  ;;  %7734 = vst.msk [vmem:[#allocation3 + $0x1eb] sm:$0xff] %vm218_vm0, %v7697_v32  ;;  %v27858_v36 = vld [vmem:[#allocation44_spill] sm:$0xff]  ;;  %v7710_v41 = vmul.f32 %v7674_v8, %v27859_v15  ;;  %v27860_v45 = vld [vmem:[#allocation51_spill] sm:$0xff]  ;;  %v27862_v58 = vmax.f32 %v24682_v43, 0.0 }
 0x478   :  { %7735 = vst.msk [vmem:[#allocation3 + $0x1f3] sm:$0xff] %vm218_vm0, %v7698_v21  ;;  %7736 = vst.msk [vmem:[#allocation3 + $0x1fb] sm:$0xff] %vm218_vm0, %v7699_v55  ;;  %v7709_v24 = vmul.f32 %v7673_v7, %v27858_v36  ;;  %v7711_v53 = vmul.f32 %v7675_v44, %v27860_v45  ;;  %v27861_v5 = vld [vmem:[#allocation57_spill] sm:$0xff]  ;;  %v27863_v18 = vld [vmem:[#allocation60_spill] sm:$0xff]  ;;  %v7851_v7 = vpack.c.bf16 %v7817_v12, %v7816_v35 }
 0x479   :  { %7737 = vst.msk [vmem:[#allocation3 + $0x203] sm:$0xff] %vm218_vm0, %v7700_v17  ;;  %7738 = vst.msk [vmem:[#allocation3 + $0x20b] sm:$0xff] %vm218_vm0, %v7701_v20  ;;  %v7713_v40 = vmul.f32 %v27862_v58, %v27861_v5  ;;  %v7714_v56 = vmul.f32 %v7678_v11, %v27863_v18  ;;  %v10965_v8 = vld [vmem:[#allocation3 + $0x159] sm:$0xff]  ;;  %v7852_v44 = vpack.c.bf16 %v7819_v25, %v7818_v63  ;;  %v20268_v43 = vld [vmem:[%s27431_s4 + $0x8] sm:$0xff]  }
 0x47a   :  { %7739 = vst.msk [vmem:[#allocation3 + $0x213] sm:$0xff] %vm218_vm0, %v7702_v22  ;;  %7740 = vst.msk [vmem:[#allocation3 + $0x21b] sm:$0xff] %vm218_vm0, %v7703_v28  ;;  %v10966_v46 = vld [vmem:[#allocation3 + $0x161] sm:$0xff]  ;;  %v10967_v11 = vld [vmem:[#allocation3 + $0x169] sm:$0xff]  ;;  %18247 = vmatmul.mubr.msk.bf16.vlgmr.msra.gmra.mrb[36].mxu0 %vm218_vm0, %v7851_v7 }
 0x47b   :  { %7741 = vst.msk [vmem:[#allocation3 + $0x223] sm:$0xff] %vm218_vm0, %v7704_v27  ;;  %7742 = vst.msk [vmem:[#allocation3 + $0x22b] sm:$0xff] %vm218_vm0, %v7705_v52  ;;  %v10968_v34 = vld [vmem:[#allocation3 + $0x171] sm:$0xff]  ;;  %v11000_v32 = vpack.c.bf16 %v10966_v46, %v10965_v8  ;;  %v20269_v55 = vld [vmem:[%s27431_s4 + $0x8] sm:$0xff]   ;;  %18250 = vmatprep.mubr.msk.bf16.mxu0 %vm218_vm0, %v7852_v44 }
 0x47c   :  { %7743 = vst.msk [vmem:[#allocation3 + $0x233] sm:$0xff] %vm218_vm0, %v7706_v4  ;;  %7744 = vst.msk [vmem:[#allocation3 + $0x23b] sm:$0xff] %vm218_vm0, %v7707_v62  ;;  %v11001_v21 = vpack.c.bf16 %v10968_v34, %v10967_v11  ;;  %v27864_v35 = vld [vmem:[#allocation56_spill] sm:$0xff]  ;;  %v20270_v17 = vld [vmem:[%s27431_s4 + $0x10] sm:$0xff]  }
 0x47d   :  { %7745 = vst.msk [vmem:[#allocation3 + $0x243] sm:$0xff] %vm218_vm0, %v7708_v39  ;;  %7746 = vst.msk [vmem:[#allocation3 + $0x24b] sm:$0xff] %vm218_vm0, %v7709_v24  ;;  %18283 = vmatpush3.bf16.msra.mxu0 %v27864_v35  ;;  %18643 = vmatmul.mubr.msk.bf16.vlgmr.msra.gmra.mrb[36].mxu1 %vm218_vm0, %v11000_v32  ;;  %v27865_v20 = vld [vmem:[#allocation24_spill] sm:$0xff]  ;;  %v7820_v22 = vld [vmem:[#allocation3 + $0x31] sm:$0xff] }
 0x47e   :  { %7747 = vst.msk [vmem:[#allocation3 + $0x253] sm:$0xff] %vm218_vm0, %v7710_v41  ;;  %7748 = vst.msk [vmem:[#allocation3 + $0x25b] sm:$0xff] %vm218_vm0, %v7711_v53  ;;  %18284 = vmatprep.subr.bf16.mxu0 %v20268_v43  ;;  %18646 = vmatprep.mubr.msk.bf16.mxu1 %vm218_vm0, %v11001_v21  ;;  %v7821_v28 = vld [vmem:[#allocation3 + $0x39] sm:$0xff]  ;;  %v7822_v12 = vld [vmem:[#allocation3 + $0x41] sm:$0xff] }
 0x47f   :  { %7750 = vst.msk [vmem:[#allocation3 + $0x26b] sm:$0xff] %vm218_vm0, %v7713_v40  ;;  %7751 = vst.msk [vmem:[#allocation3 + $0x273] sm:$0xff] %vm218_vm0, %v7714_v56  ;;  %18679 = vmatpush3.bf16.msra.mxu1 %v27865_v20  ;;  %v7823_v63 = vld [vmem:[#allocation3 + $0x49] sm:$0xff]  ;;  %v10969_v27 = vld [vmem:[#allocation3 + $0x179] sm:$0xff]  ;;  %v7853_v4 = vpack.c.bf16 %v7821_v28, %v7820_v22 }
 0x480   :  { %18680 = vmatprep.subr.bf16.mxu1 %v20269_v55  ;;  %v20271_v25 = vld [vmem:[%s27431_s4 + $0x10] sm:$0xff]   ;;  %v10970_v52 = vld [vmem:[#allocation3 + $0x181] sm:$0xff]  ;;  %v20272_v24 = vld [vmem:[%s27431_s4 + $0x18] sm:$0xff]   ;;  %v7854_v41 = vpack.c.bf16 %v7823_v63, %v7822_v12 }
 0x481   :  { %18285 = vmatpush3.bf16.msra.mxu0 %v20268_v43  ;;  %v10971_v62 = vld [vmem:[#allocation3 + $0x189] sm:$0xff]  ;;  %v10972_v39 = vld [vmem:[#allocation3 + $0x191] sm:$0xff]  ;;  %v11002_v53 = vpack.c.bf16 %v10970_v52, %v10969_v27  ;;  %v24827_v56 = vld [vmem:[%s27431_s4 + $0x40] sm:$0xff]  }
 0x482   :  { %18286 = vmatprep.subr.bf16.mxu0 %v20270_v17  ;;  %18251 = vmatmul.mubr.msk.bf16.gmra.mrb[40].mxu0 %vm218_vm0, %v7853_v4  ;;  %v20273_v58 = vld [vmem:[%s27431_s4 + $0x18] sm:$0xff]   ;;  %v11003_v40 = vpack.c.bf16 %v10972_v39, %v10971_v62  ;;  %v7826_v44 = vld [vmem:[#allocation3 + $0x61] sm:$0xff]  ;;  %v7827_v43 = vld [vmem:[#allocation3 + $0x69] sm:$0xff] }
 0x483   :  { %18681 = vmatpush3.bf16.msra.mxu1 %v20269_v55  ;;  %18254 = vmatprep.mubr.msk.bf16.mxu0 %vm218_vm0, %v7854_v41  ;;  %v7824_v7 = vld [vmem:[#allocation3 + $0x51] sm:$0xff]  ;;  %v7825_v8 = vld [vmem:[#allocation3 + $0x59] sm:$0xff]  ;;  %v10974_v34 = vld [vmem:[#allocation3 + $0x1a1] sm:$0xff]  ;;  %v7856_v35 = vpack.c.bf16 %v7827_v43, %v7826_v44 }
 0x484   :  { %18682 = vmatprep.subr.bf16.mxu1 %v20271_v25  ;;  %v24833_v46 = vld [vmem:[%s27431_s4 + $0x40] sm:$0xff]   ;;  %v7855_v32 = vpack.c.bf16 %v7825_v8, %v7824_v7  ;;  %v10975_v21 = vld [vmem:[#allocation3 + $0x1a9] sm:$0xff]  ;;  %v10976_v55 = vld [vmem:[#allocation3 + $0x1b1] sm:$0xff] }
 0x485   :  { %18287 = vmatpush3.bf16.msra.mxu0 %v20270_v17  ;;  %18647 = vmatmul.mubr.msk.bf16.gmra.mrb[40].mxu1 %vm218_vm0, %v11002_v53  ;;  %v10973_v11 = vld [vmem:[#allocation3 + $0x199] sm:$0xff]  ;;  %v11005_v20 = vpack.c.bf16 %v10976_v55, %v10975_v21  ;;  %v7828_v22 = vld [vmem:[#allocation3 + $0x71] sm:$0xff]  ;;  %v7830_v12 = vld [vmem:[#allocation3 + $0x81] sm:$0xff] }
 0x486   :  { %18288 = vmatprep.subr.bf16.mxu0 %v20272_v24  ;;  %18650 = vmatprep.mubr.msk.bf16.mxu1 %vm218_vm0, %v11003_v40  ;;  %v11004_v17 = vpack.c.bf16 %v10974_v34, %v10973_v11  ;;  %v7829_v28 = vld [vmem:[#allocation3 + $0x79] sm:$0xff]  ;;  %v7831_v63 = vld [vmem:[#allocation3 + $0x89] sm:$0xff]  ;;  %v10978_v27 = vld [vmem:[#allocation3 + $0x1c1] sm:$0xff] }
 0x487   :  { %18683 = vmatpush3.bf16.msra.mxu1 %v20271_v25  ;;  %v10977_v25 = vld [vmem:[#allocation3 + $0x1b9] sm:$0xff]  ;;  %v7857_v52 = vpack.c.bf16 %v7829_v28, %v7828_v22  ;;  %v10979_v4 = vld [vmem:[#allocation3 + $0x1c9] sm:$0xff]  ;;  %v10980_v62 = vld [vmem:[#allocation3 + $0x1d1] sm:$0xff]  ;;  %v7858_v39 = vpack.c.bf16 %v7831_v63, %v7830_v12 }
 0x488   :  { %18684 = vmatprep.subr.bf16.mxu1 %v20273_v58  ;;  %v11007_v41 = vpack.c.bf16 %v10980_v62, %v10979_v4  ;;  %v7832_v53 = vld [vmem:[#allocation3 + $0x91] sm:$0xff]  ;;  %v7834_v40 = vld [vmem:[#allocation3 + $0xa1] sm:$0xff]  ;;  %v7835_v7 = vld [vmem:[#allocation3 + $0xa9] sm:$0xff] }
 0x489   :  { %18289 = vmatpush3.bf16.msra.mxu0 %v20272_v24  ;;  %v11006_v24 = vpack.c.bf16 %v10978_v27, %v10977_v25  ;;  %v10981_v8 = vld [vmem:[#allocation3 + $0x1d9] sm:$0xff]  ;;  %v10982_v44 = vld [vmem:[#allocation3 + $0x1e1] sm:$0xff]  ;;  %v10983_v11 = vld [vmem:[#allocation3 + $0x1e9] sm:$0xff] }
 0x48a   :  { %18326 = vmatprep.subr.bf16.mxu0 %v24827_v56  ;;  %18255 = vmatmul.mubr.msk.bf16.gmra.mrb[44].mxu0 %vm218_vm0, %v7855_v32  ;;  %v10984_v34 = vld [vmem:[#allocation3 + $0x1f1] sm:$0xff]  ;;  %v7860_v32 = vpack.c.bf16 %v7835_v7, %v7834_v40  ;;  %v11008_v21 = vpack.c.bf16 %v10982_v44, %v10981_v8  ;;  %v7839_v22 = vld [vmem:[#allocation3 + $0xc9] sm:$0xff]  ;;  %v10985_v28 = vld [vmem:[#allocation3 + $0x1f9] sm:$0xff] }
 0x48b   :  { %18685 = vmatpush3.bf16.msra.mxu1 %v20273_v58  ;;  %18258 = vmatprep.mubr.msk.bf16.mxu0 %vm218_vm0, %v7856_v35  ;;  %v7833_v58 = vld [vmem:[#allocation3 + $0x99] sm:$0xff]  ;;  %v11009_v55 = vpack.c.bf16 %v10984_v34, %v10983_v11  ;;  %v7836_v35 = vld [vmem:[#allocation3 + $0xb1] sm:$0xff]  ;;  %v10986_v12 = vld [vmem:[#allocation3 + $0x201] sm:$0xff] }
 0x48c   :  { %18722 = vmatprep.subr.bf16.mxu1 %v24833_v46  ;;  %v7859_v43 = vpack.c.bf16 %v7833_v58, %v7832_v53  ;;  %v10987_v25 = vld [vmem:[#allocation3 + $0x209] sm:$0xff]  ;;  %v10988_v27 = vld [vmem:[#allocation3 + $0x211] sm:$0xff]  ;;  %v11010_v4 = vpack.c.bf16 %v10986_v12, %v10985_v28  ;;  %v10989_v58 = vld [vmem:[#allocation3 + $0x219] sm:$0xff] }
 0x48d   :  { %18651 = vmatmul.mubr.msk.bf16.gmra.mrb[44].mxu1 %vm218_vm0, %v11004_v17  ;;  %v7837_v17 = vld [vmem:[#allocation3 + $0xb9] sm:$0xff]  ;;  %v11011_v62 = vpack.c.bf16 %v10988_v27, %v10987_v25  ;;  %v7843_v53 = vld [vmem:[#allocation3 + $0xe9] sm:$0xff]  ;;  %v10990_v40 = vld [vmem:[#allocation3 + $0x221] sm:$0xff] }
 0x48e   :  { %18654 = vmatprep.mubr.msk.bf16.mxu1 %vm218_vm0, %v11005_v20  ;;  %v7838_v20 = vld [vmem:[#allocation3 + $0xc1] sm:$0xff]  ;;  %v7861_v63 = vpack.c.bf16 %v7837_v17, %v7836_v35  ;;  %v10991_v8 = vld [vmem:[#allocation3 + $0x229] sm:$0xff]  ;;  %v10992_v44 = vld [vmem:[#allocation3 + $0x231] sm:$0xff]  ;;  %v11012_v11 = vpack.c.bf16 %v10990_v40, %v10989_v58 }
 0x48f   :  { %v11013_v34 = vpack.c.bf16 %v10992_v44, %v10991_v8  ;;  %v7847_v35 = vld [vmem:[#allocation3 + $0x109] sm:$0xff]  ;;  %v10993_v17 = vld [vmem:[#allocation3 + $0x239] sm:$0xff]  ;;  %v10996_v12 = vld [vmem:[#allocation3 + $0x251] sm:$0xff] }
 0x490   :  { %v10995_v28 = vld [vmem:[#allocation3 + $0x249] sm:$0xff]  ;;  %v10998_v58 = vld [vmem:[#allocation3 + $0x261] sm:$0xff] }
 0x491   :  { %v11015_v27 = vpack.c.bf16 %v10996_v12, %v10995_v28  ;;  %v11557_v5 = vld [vmem:[#allocation3 + $0x1fa] sm:$0xff]  ;;  %v11558_v45 = vld [vmem:[#allocation3 + $0x202] sm:$0xff] }
 0x492   :  { %18259 = vmatmul.mubr.msk.bf16.gmra.mrb[48].mxu0 %vm218_vm0, %v7857_v52  ;;  %v7862_v52 = vpack.c.bf16 %v7839_v22, %v7838_v20  ;;  %v10994_v20 = vld [vmem:[#allocation3 + $0x241] sm:$0xff] }
 0x493   :  { %18262 = vmatprep.mubr.msk.bf16.mxu0 %vm218_vm0, %v7858_v39  ;;  %v7840_v39 = vld [vmem:[#allocation3 + $0xd1] sm:$0xff]  ;;  %v11014_v25 = vpack.c.bf16 %v10994_v20, %v10993_v17  ;;  %v10905_v17 = vld [vmem:[#allocation3 + $0x168] sm:$0xff]  ;;  %v11561_v36 = vld [vmem:[#allocation3 + $0x21a] sm:$0xff] }
 0x494   :  { %v10906_v20 = vld [vmem:[#allocation3 + $0x170] sm:$0xff]  ;;  %v11562_v29 = vld [vmem:[#allocation3 + $0x222] sm:$0xff]  ;;  %v11565_v2 = vld [vmem:[#allocation3 + $0x23a] sm:$0xff] }
 0x495   :  { %18655 = vmatmul.mubr.msk.bf16.gmra.mrb[48].mxu1 %vm218_vm0, %v11006_v24  ;;  %v7841_v24 = vld [vmem:[#allocation3 + $0xd9] sm:$0xff]  ;;  %v11566_v6 = vld [vmem:[#allocation3 + $0x242] sm:$0xff] }
 0x496   :  { %18658 = vmatprep.mubr.msk.bf16.mxu1 %vm218_vm0, %v11007_v41  ;;  %v7842_v41 = vld [vmem:[#allocation3 + $0xe1] sm:$0xff]  ;;  %v7863_v7 = vpack.c.bf16 %v7841_v24, %v7840_v39  ;;  %v7849_v39 = vld [vmem:[#allocation3 + $0x119] sm:$0xff] }
 0x497   :  { %v10901_v24 = vld [vmem:[#allocation3 + $0x148] sm:$0xff] }
 0x49a   :  { %18263 = vmatmul.mubr.msk.bf16.gmra.mrb[52].mxu0 %vm218_vm0, %v7859_v43  ;;  %v7864_v43 = vpack.c.bf16 %v7843_v53, %v7842_v41  ;;  %v10902_v41 = vld [vmem:[#allocation3 + $0x150] sm:$0xff]  ;;  %v10997_v53 = vld [vmem:[#allocation3 + $0x259] sm:$0xff] }
 0x49b   :  { %18266 = vmatprep.mubr.msk.bf16.mxu0 %vm218_vm0, %v7860_v32  ;;  %v7844_v32 = vld [vmem:[#allocation3 + $0xf1] sm:$0xff]  ;;  %v10937_v8 = vpack.c.bf16 %v10902_v41, %v10901_v24  ;;  %v11016_v44 = vpack.c.bf16 %v10998_v58, %v10997_v53  ;;  %v10908_v41 = vld [vmem:[#allocation3 + $0x180] sm:$0xff]  ;;  %v10909_v58 = vld [vmem:[#allocation3 + $0x188] sm:$0xff] }
 0x49c   :  { %v10907_v24 = vld [vmem:[#allocation3 + $0x178] sm:$0xff] }
 0x49d   :  { %18659 = vmatmul.mubr.msk.bf16.gmra.mrb[52].mxu1 %vm218_vm0, %v11008_v21  ;;  %v7845_v21 = vld [vmem:[#allocation3 + $0xf9] sm:$0xff] }
 0x49e   :  { %18662 = vmatprep.mubr.msk.bf16.mxu1 %vm218_vm0, %v11009_v55  ;;  %v7846_v55 = vld [vmem:[#allocation3 + $0x101] sm:$0xff]  ;;  %v7865_v22 = vpack.c.bf16 %v7845_v21, %v7844_v32  ;;  %v10903_v21 = vld [vmem:[#allocation3 + $0x158] sm:$0xff] }
 0x49f   :  { %v7757_v32 = vld [vmem:[#allocation3 + $0x28] sm:$0xff] }
 0x4a2   :  { %18267 = vmatmul.mubr.msk.bf16.gmra.mrb[56].mxu0 %vm218_vm0, %v7861_v63  ;;  %v7866_v63 = vpack.c.bf16 %v7847_v35, %v7846_v55  ;;  %v10904_v55 = vld [vmem:[#allocation3 + $0x160] sm:$0xff] }
 0x4a3   :  { %18270 = vmatprep.mubr.msk.bf16.mxu0 %vm218_vm0, %v7862_v52  ;;  %v7752_v52 = vld [vmem:[#allocation3] sm:$0xff]  ;;  %v10938_v12 = vpack.c.bf16 %v10904_v55, %v10903_v21  ;;  %v7765_v55 = vld [vmem:[#allocation3 + $0x68] sm:$0xff] }
 0x4a4   :  { %v7764_v21 = vld [vmem:[#allocation3 + $0x60] sm:$0xff] }
 0x4a5   :  { %18663 = vmatmul.mubr.msk.bf16.gmra.mrb[56].mxu1 %vm218_vm0, %v11010_v4  ;;  %v7753_v4 = vld [vmem:[#allocation3 + $0x8] sm:$0xff] }
 0x4a6   :  { %18666 = vmatprep.mubr.msk.bf16.mxu1 %vm218_vm0, %v11011_v62  ;;  %v7848_v62 = vld [vmem:[#allocation3 + $0x111] sm:$0xff]  ;;  %v7788_v40 = vpack.c.bf16 %v7753_v4, %v7752_v52 }
 0x4a7   :  { %v7758_v52 = vld [vmem:[#allocation3 + $0x30] sm:$0xff]  ;;  %v7759_v4 = vld [vmem:[#allocation3 + $0x38] sm:$0xff] }
 0x4a8   :  { %v7791_v53 = vpack.c.bf16 %v7759_v4, %v7758_v52  ;;  %v7766_v52 = vld [vmem:[#allocation3 + $0x70] sm:$0xff]  ;;  %v7767_v4 = vld [vmem:[#allocation3 + $0x78] sm:$0xff] }
 0x4aa   :  { %18271 = vmatmul.mubr.msk.bf16.gmra.mrb[60].mxu0 %vm218_vm0, %v7863_v7  ;;  %v7867_v7 = vpack.c.bf16 %v7849_v39, %v7848_v62  ;;  %v7760_v62 = vld [vmem:[#allocation3 + $0x40] sm:$0xff]  ;;  %v7761_v39 = vld [vmem:[#allocation3 + $0x48] sm:$0xff] }
 0x4ab   :  { %18274 = vmatprep.mubr.msk.bf16.mxu0 %vm218_vm0, %v7864_v43  ;;  %v7754_v43 = vld [vmem:[#allocation3 + $0x10] sm:$0xff] }
 0x4ad   :  { %18667 = vmatmul.mubr.msk.bf16.gmra.mrb[60].mxu1 %vm218_vm0, %v11012_v11  ;;  %v7755_v11 = vld [vmem:[#allocation3 + $0x18] sm:$0xff] }
 0x4ae   :  { %18670 = vmatprep.mubr.msk.bf16.mxu1 %vm218_vm0, %v11013_v34  ;;  %v7756_v34 = vld [vmem:[#allocation3 + $0x20] sm:$0xff]  ;;  %v7789_v35 = vpack.c.bf16 %v7755_v11, %v7754_v43 }
 0x4af   :  { %v7790_v28 = vpack.c.bf16 %v7757_v32, %v7756_v34  ;;  %v24895_v11 = vld [vmem:[%s27431_s4 + $0x60] sm:$0xff]   ;;  %v7762_v34 = vld [vmem:[#allocation3 + $0x50] sm:$0xff]  ;;  %v7763_v32 = vld [vmem:[#allocation3 + $0x58] sm:$0xff] }
 0x4b2   :  { %18275 = vmatmul.mubr.msk.bf16.gmra.mrb[64].mxu0 %vm218_vm0, %v7865_v22  ;;  %v20276_v22 = vld [vmem:[%s27431_s4 + $0x48] sm:$0xff]  }
 0x4b3   :  { %18278 = vmatprep.mubr.msk.bf16.mxu0 %vm218_vm0, %v7866_v63  ;;  %v20277_v63 = vld [vmem:[%s27431_s4 + $0x48] sm:$0xff]  }
 0x4b5   :  { %18671 = vmatmul.mubr.msk.bf16.gmra.mrb[64].mxu1 %vm218_vm0, %v11014_v25  ;;  %v10939_v25 = vpack.c.bf16 %v10906_v20, %v10905_v17  ;;  %v10911_v17 = vld [vmem:[#allocation3 + $0x198] sm:$0xff]  ;;  %v10912_v20 = vld [vmem:[#allocation3 + $0x1a0] sm:$0xff] }
 0x4b6   :  { %18674 = vmatprep.mubr.msk.bf16.mxu1 %vm218_vm0, %v11015_v27  ;;  %v20278_v27 = vld [vmem:[%s27431_s4 + $0x50] sm:$0xff]  }
 0x4ba   :  { %18279 = vmatmul.mubr.msk.bf16.gmra.mrb[68].mxu0 %vm218_vm0, %v7867_v7  ;;  %v7792_v7 = vpack.c.bf16 %v7761_v39, %v7760_v62  ;;  %v7768_v62 = vld [vmem:[#allocation3 + $0x80] sm:$0xff]  ;;  %v7769_v39 = vld [vmem:[#allocation3 + $0x88] sm:$0xff] }
 0x4bb   :  { %18290 = vmatprep.mubr.msk.bf16.mxu0 %vm218_vm0, %v7788_v40  ;;  %v10910_v40 = vld [vmem:[#allocation3 + $0x190] sm:$0xff] }
 0x4bc   :  { %v10941_v43 = vpack.c.bf16 %v10910_v40, %v10909_v58  ;;  %v10918_v58 = vld [vmem:[#allocation3 + $0x1d0] sm:$0xff]  ;;  %v7796_v40 = vpack.c.bf16 %v7769_v39, %v7768_v62  ;;  %v10924_v62 = vld [vmem:[#allocation3 + $0x200] sm:$0xff] }
 0x4bd   :  { %18675 = vmatmul.mubr.msk.bf16.gmra.mrb[68].mxu1 %vm218_vm0, %v11016_v44  ;;  %v20281_v44 = vld [vmem:[%s27431_s4 + $0x58] sm:$0xff]  }
 0x4be   :  { %18686 = vmatprep.mubr.msk.bf16.mxu1 %vm218_vm0, %v10937_v8  ;;  %v10940_v8 = vpack.c.bf16 %v10908_v41, %v10907_v24  ;;  %v10916_v24 = vld [vmem:[#allocation3 + $0x1c0] sm:$0xff]  ;;  %v7795_v41 = vpack.c.bf16 %v7767_v4, %v7766_v52  ;;  %v7777_v52 = vld [vmem:[#allocation3 + $0xc8] sm:$0xff]  ;;  %v10923_v4 = vld [vmem:[#allocation3 + $0x1f8] sm:$0xff] }
 0x4c2   :  { %18291 = vmatmul.mubr.msk.bf16.vlgmr.msra.gmra.mrb[36].mxu0 %vm218_vm0, %v7789_v35  ;;  %v24901_v35 = vld [vmem:[%s27431_s4 + $0x60] sm:$0xff]  }
 0x4c3   :  { %18294 = vmatprep.mubr.msk.bf16.mxu0 %vm218_vm0, %v7790_v28  ;;  %18327 = vmatpush3.bf16.msra.mxu0 %v24827_v56  ;;  %v20279_v56 = vld [vmem:[%s27431_s4 + $0x50] sm:$0xff]   ;;  %v10913_v28 = vld [vmem:[#allocation3 + $0x1a8] sm:$0xff] }
 0x4c4   :  { %18328 = vmatprep.subr.bf16.mxu0 %v20276_v22 }
 0x4c5   :  { %18687 = vmatmul.mubr.msk.bf16.vlgmr.msra.gmra.mrb[36].mxu1 %vm218_vm0, %v10938_v12  ;;  %v10914_v12 = vld [vmem:[#allocation3 + $0x1b0] sm:$0xff] }
 0x4c6   :  { %18690 = vmatprep.mubr.msk.bf16.mxu1 %vm218_vm0, %v10939_v25  ;;  %18723 = vmatpush3.bf16.msra.mxu1 %v24833_v46  ;;  %v20280_v46 = vld [vmem:[%s27431_s4 + $0x58] sm:$0xff]   ;;  %v10942_v25 = vpack.c.bf16 %v10912_v20, %v10911_v17  ;;  %v10921_v17 = vld [vmem:[#allocation3 + $0x1e8] sm:$0xff]  ;;  %v10922_v20 = vld [vmem:[#allocation3 + $0x1f0] sm:$0xff] }
 0x4c7   :  { %18724 = vmatprep.subr.bf16.mxu1 %v20277_v63  ;;  %18329 = vmatpush3.bf16.msra.mxu0 %v20276_v22  ;;  %v7793_v22 = vpack.c.bf16 %v7763_v32, %v7762_v34  ;;  %v7773_v34 = vld [vmem:[#allocation3 + $0xa8] sm:$0xff]  ;;  %v10919_v32 = vld [vmem:[#allocation3 + $0x1d8] sm:$0xff] }
 0x4c8   :  { %18330 = vmatprep.subr.bf16.mxu0 %v20278_v27 }
 0x4ca   :  { %18725 = vmatpush3.bf16.msra.mxu1 %v20277_v63  ;;  %18295 = vmatmul.mubr.msk.bf16.gmra.mrb[40].mxu0 %vm218_vm0, %v7791_v53  ;;  %v7794_v63 = vpack.c.bf16 %v7765_v55, %v7764_v21  ;;  %v10917_v53 = vld [vmem:[#allocation3 + $0x1c8] sm:$0xff]  ;;  %v10920_v21 = vld [vmem:[#allocation3 + $0x1e0] sm:$0xff] }
 0x4cb   :  { %18726 = vmatprep.subr.bf16.mxu1 %v20279_v56  ;;  %18298 = vmatprep.mubr.msk.bf16.mxu0 %vm218_vm0, %v7792_v7  ;;  %v10945_v7 = vpack.c.bf16 %v10918_v58, %v10917_v53  ;;  %v10948_v53 = vpack.c.bf16 %v10924_v62, %v10923_v4  ;;  %v10933_v4 = vld [vmem:[#allocation3 + $0x248] sm:$0xff]  ;;  %v10934_v62 = vld [vmem:[#allocation3 + $0x250] sm:$0xff] }
 0x4cc   :  { %18331 = vmatpush3.bf16.msra.mxu0 %v20278_v27  ;;  %v10943_v27 = vpack.c.bf16 %v10914_v12, %v10913_v28  ;;  %v10946_v28 = vpack.c.bf16 %v10920_v21, %v10919_v32  ;;  %v10947_v12 = vpack.c.bf16 %v10922_v20, %v10921_v17  ;;  %v10929_v32 = vld [vmem:[#allocation3 + $0x228] sm:$0xff]  ;;  %v10930_v21 = vld [vmem:[#allocation3 + $0x230] sm:$0xff] }
 0x4cd   :  { %18691 = vmatmul.mubr.msk.bf16.gmra.mrb[40].mxu1 %vm218_vm0, %v10940_v8  ;;  %18332 = vmatprep.subr.bf16.mxu0 %v20280_v46  ;;  %v7770_v8 = vld [vmem:[#allocation3 + $0x90] sm:$0xff]  ;;  %v10951_v20 = vpack.c.bf16 %v10930_v21, %v10929_v32 }
 0x4ce   :  { %18694 = vmatprep.mubr.msk.bf16.mxu1 %vm218_vm0, %v10941_v43  ;;  %18727 = vmatpush3.bf16.msra.mxu1 %v20279_v56  ;;  %v10915_v56 = vld [vmem:[#allocation3 + $0x1b8] sm:$0xff]  ;;  %v7772_v43 = vld [vmem:[#allocation3 + $0xa0] sm:$0xff] }
 0x4cf   :  { %18728 = vmatprep.subr.bf16.mxu1 %v20281_v44 }
 0x4d0   :  { %18333 = vmatpush3.bf16.msra.mxu0 %v20280_v46  ;;  %v10944_v46 = vpack.c.bf16 %v10916_v24, %v10915_v56  ;;  %v10925_v56 = vld [vmem:[#allocation3 + $0x208] sm:$0xff]  ;;  %v10926_v24 = vld [vmem:[#allocation3 + $0x210] sm:$0xff] }
 0x4d1   :  { %18370 = vmatprep.subr.bf16.mxu0 %v24895_v11  ;;  %v10949_v58 = vpack.c.bf16 %v10926_v24, %v10925_v56  ;;  %v10953_v24 = vpack.c.bf16 %v10934_v62, %v10933_v4 }
 0x4d2   :  { %18729 = vmatpush3.bf16.msra.mxu1 %v20281_v44  ;;  %18299 = vmatmul.mubr.msk.bf16.gmra.mrb[44].mxu0 %vm218_vm0, %v7793_v22  ;;  %v7771_v44 = vld [vmem:[#allocation3 + $0x98] sm:$0xff]  ;;  %v7798_v22 = vpack.c.bf16 %v7773_v34, %v7772_v43  ;;  %v10928_v43 = vld [vmem:[#allocation3 + $0x220] sm:$0xff] }
 0x4d3   :  { %18766 = vmatprep.subr.bf16.mxu1 %v24901_v35  ;;  %18302 = vmatprep.mubr.msk.bf16.mxu0 %vm218_vm0, %v7794_v63  ;;  %v7797_v55 = vpack.c.bf16 %v7771_v44, %v7770_v8  ;;  %v7774_v63 = vld [vmem:[#allocation3 + $0xb0] sm:$0xff]  ;;  %v7781_v8 = vld [vmem:[#allocation3 + $0xe8] sm:$0xff]  ;;  %v10927_v44 = vld [vmem:[#allocation3 + $0x218] sm:$0xff] }
 0x4d4   :  { %v10950_v17 = vpack.c.bf16 %v10928_v43, %v10927_v44  ;;  %v10936_v44 = vld [vmem:[#allocation3 + $0x260] sm:$0xff] }
 0x4d5   :  { %18695 = vmatmul.mubr.msk.bf16.gmra.mrb[44].mxu1 %vm218_vm0, %v10942_v25  ;;  %v7775_v25 = vld [vmem:[#allocation3 + $0xb8] sm:$0xff] }
 0x4d6   :  { %18698 = vmatprep.mubr.msk.bf16.mxu1 %vm218_vm0, %v10943_v27  ;;  %v7776_v27 = vld [vmem:[#allocation3 + $0xc0] sm:$0xff]  ;;  %v7799_v39 = vpack.c.bf16 %v7775_v25, %v7774_v63  ;;  %v7785_v63 = vld [vmem:[#allocation3 + $0x108] sm:$0xff]  ;;  %v10931_v25 = vld [vmem:[#allocation3 + $0x238] sm:$0xff] }
 0x4da   :  { %18303 = vmatmul.mubr.msk.bf16.gmra.mrb[48].mxu0 %vm218_vm0, %v7795_v41  ;;  %v7800_v41 = vpack.c.bf16 %v7777_v52, %v7776_v27  ;;  %v10932_v27 = vld [vmem:[#allocation3 + $0x240] sm:$0xff] }
 0x4db   :  { %18306 = vmatprep.mubr.msk.bf16.mxu0 %vm218_vm0, %v7796_v40  ;;  %v7778_v40 = vld [vmem:[#allocation3 + $0xd0] sm:$0xff]  ;;  %v10952_v56 = vpack.c.bf16 %v10932_v27, %v10931_v25 }
 0x4dc   :  { %v11539_v25 = vld [vmem:[#allocation3 + $0x16a] sm:$0xff]  ;;  %v11540_v27 = vld [vmem:[#allocation3 + $0x172] sm:$0xff] }
 0x4dd   :  { %18699 = vmatmul.mubr.msk.bf16.gmra.mrb[48].mxu1 %vm218_vm0, %v10944_v46  ;;  %v7779_v46 = vld [vmem:[#allocation3 + $0xd8] sm:$0xff] }
 0x4de   :  { %18702 = vmatprep.mubr.msk.bf16.mxu1 %vm218_vm0, %v10945_v7  ;;  %v7780_v7 = vld [vmem:[#allocation3 + $0xe0] sm:$0xff]  ;;  %v7801_v34 = vpack.c.bf16 %v7779_v46, %v7778_v40  ;;  %v7787_v40 = vld [vmem:[#allocation3 + $0x118] sm:$0xff]  ;;  %v11535_v46 = vld [vmem:[#allocation3 + $0x14a] sm:$0xff] }
 0x4e2   :  { %18307 = vmatmul.mubr.msk.bf16.gmra.mrb[52].mxu0 %vm218_vm0, %v7797_v55  ;;  %v7802_v55 = vpack.c.bf16 %v7781_v8, %v7780_v7  ;;  %v11536_v7 = vld [vmem:[#allocation3 + $0x152] sm:$0xff] }
 0x4e3   :  { %18310 = vmatprep.mubr.msk.bf16.mxu0 %vm218_vm0, %v7798_v22  ;;  %v7782_v22 = vld [vmem:[#allocation3 + $0xf0] sm:$0xff]  ;;  %v10935_v8 = vld [vmem:[#allocation3 + $0x258] sm:$0xff]  ;;  %v11571_v32 = vpack.c.bf16 %v11536_v7, %v11535_v46  ;;  %v11542_v7 = vld [vmem:[#allocation3 + $0x182] sm:$0xff] }
 0x4e4   :  { %v10954_v21 = vpack.c.bf16 %v10936_v44, %v10935_v8  ;;  %v11541_v46 = vld [vmem:[#allocation3 + $0x17a] sm:$0xff]  ;;  %v11543_v44 = vld [vmem:[#allocation3 + $0x18a] sm:$0xff] }
 0x4e5   :  { %18703 = vmatmul.mubr.msk.bf16.gmra.mrb[52].mxu1 %vm218_vm0, %v10946_v28  ;;  %v7783_v28 = vld [vmem:[#allocation3 + $0xf8] sm:$0xff] }
 0x4e6   :  { %18706 = vmatprep.mubr.msk.bf16.mxu1 %vm218_vm0, %v10947_v12  ;;  %v7784_v12 = vld [vmem:[#allocation3 + $0x100] sm:$0xff]  ;;  %v7803_v52 = vpack.c.bf16 %v7783_v28, %v7782_v22  ;;  %v8392_v22 = vld [vmem:[#allocation3 + $0x2a] sm:$0xff] }
 0x4e7   :  { %v11537_v28 = vld [vmem:[#allocation3 + $0x15a] sm:$0xff] }
 0x4ea   :  { %18311 = vmatmul.mubr.msk.bf16.gmra.mrb[56].mxu0 %vm218_vm0, %v7799_v39  ;;  %v7804_v39 = vpack.c.bf16 %v7785_v63, %v7784_v12  ;;  %v11538_v12 = vld [vmem:[#allocation3 + $0x162] sm:$0xff] }
 0x4eb   :  { %18314 = vmatprep.mubr.msk.bf16.mxu0 %vm218_vm0, %v7800_v41  ;;  %v8387_v41 = vld [vmem:[#allocation3 + $0x2] sm:$0xff]  ;;  %v24942_v62 = vpack.c.bf16 %v11538_v12, %v11537_v28  ;;  %v8400_v12 = vld [vmem:[#allocation3 + $0x6a] sm:$0xff] }
 0x4ec   :  { %v8399_v28 = vld [vmem:[#allocation3 + $0x62] sm:$0xff] }
 0x4ed   :  { %18707 = vmatmul.mubr.msk.bf16.gmra.mrb[56].mxu1 %vm218_vm0, %v10948_v53  ;;  %v8388_v53 = vld [vmem:[#allocation3 + $0xa] sm:$0xff] }
 0x4ee   :  { %18710 = vmatprep.mubr.msk.bf16.mxu1 %vm218_vm0, %v10949_v58  ;;  %v7786_v58 = vld [vmem:[#allocation3 + $0x110] sm:$0xff]  ;;  %v8423_v43 = vpack.c.bf16 %v8388_v53, %v8387_v41  ;;  %v8394_v53 = vld [vmem:[#allocation3 + $0x3a] sm:$0xff] }
 0x4ef   :  { %v8393_v41 = vld [vmem:[#allocation3 + $0x32] sm:$0xff] }
 0x4f0   :  { %v24963_v8 = vpack.c.bf16 %v8394_v53, %v8393_v41  ;;  %v11548_v41 = vld [vmem:[#allocation3 + $0x1b2] sm:$0xff]  ;;  %v24998_v53 = vpack.c.bf16 %v8400_v12, %v8399_v28 }
 0x4f2   :  { %18315 = vmatmul.mubr.msk.bf16.gmra.mrb[60].mxu0 %vm218_vm0, %v7801_v34  ;;  %v7805_v34 = vpack.c.bf16 %v7787_v40, %v7786_v58  ;;  %v8395_v58 = vld [vmem:[#allocation3 + $0x42] sm:$0xff]  ;;  %v8396_v40 = vld [vmem:[#allocation3 + $0x4a] sm:$0xff] }
 0x4f3   :  { %18318 = vmatprep.mubr.msk.bf16.mxu0 %vm218_vm0, %v7802_v55  ;;  %v8389_v55 = vld [vmem:[#allocation3 + $0x12] sm:$0xff] }
 0x4f5   :  { %18711 = vmatmul.mubr.msk.bf16.gmra.mrb[60].mxu1 %vm218_vm0, %v10950_v17  ;;  %v8390_v17 = vld [vmem:[#allocation3 + $0x1a] sm:$0xff] }
 0x4f6   :  { %18714 = vmatprep.mubr.msk.bf16.mxu1 %vm218_vm0, %v10951_v20  ;;  %v8391_v20 = vld [vmem:[#allocation3 + $0x22] sm:$0xff]  ;;  %v24933_v63 = vpack.c.bf16 %v8390_v17, %v8389_v55 }
 0x4f7   :  { %v24938_v4 = vpack.c.bf16 %v8392_v22, %v8391_v20  ;;  %v24986_v17 = vld [vmem:[%s27431_s4 + $0x80] sm:$0xff]   ;;  %v8397_v20 = vld [vmem:[#allocation3 + $0x52] sm:$0xff] }
 0x4f8   :  { %v8398_v22 = vld [vmem:[#allocation3 + $0x5a] sm:$0xff] }
 0x4fa   :  { %18319 = vmatmul.mubr.msk.bf16.gmra.mrb[64].mxu0 %vm218_vm0, %v7803_v52  ;;  %v20284_v52 = vld [vmem:[%s27431_s4 + $0x68] sm:$0xff]  }
 0x4fb   :  { %18322 = vmatprep.mubr.msk.bf16.mxu0 %vm218_vm0, %v7804_v39  ;;  %v20285_v39 = vld [vmem:[%s27431_s4 + $0x68] sm:$0xff]  }
 0x4fd   :  { %18715 = vmatmul.mubr.msk.bf16.gmra.mrb[64].mxu1 %vm218_vm0, %v10952_v56  ;;  %v24950_v56 = vpack.c.bf16 %v11540_v27, %v11539_v25  ;;  %v24993_v25 = vld [vmem:[%s27431_s4 + $0x80] sm:$0xff]  }
 0x4fe   :  { %18718 = vmatprep.mubr.msk.bf16.mxu1 %vm218_vm0, %v10953_v24  ;;  %v20286_v24 = vld [vmem:[%s27431_s4 + $0x70] sm:$0xff]   ;;  %v11545_v27 = vld [vmem:[#allocation3 + $0x19a] sm:$0xff] }
 0x502   :  { %18323 = vmatmul.mubr.msk.bf16.gmra.mrb[68].mxu0 %vm218_vm0, %v7805_v34  ;;  %v24968_v34 = vpack.c.bf16 %v8396_v40, %v8395_v58 }
 0x503   :  { %18334 = vmatprep.mubr.msk.bf16.mxu0 %vm218_vm0, %v8423_v43  ;;  %v11544_v43 = vld [vmem:[#allocation3 + $0x192] sm:$0xff] }
 0x504   :  { %v24979_v55 = vpack.c.bf16 %v11544_v43, %v11543_v44  ;;  %v8404_v44 = vld [vmem:[#allocation3 + $0x8a] sm:$0xff]  ;;  %v11549_v43 = vld [vmem:[#allocation3 + $0x1ba] sm:$0xff] }
 0x505   :  { %18719 = vmatmul.mubr.msk.bf16.gmra.mrb[68].mxu1 %vm218_vm0, %v10954_v21  ;;  %v20289_v21 = vld [vmem:[%s27431_s4 + $0x78] sm:$0xff]  }
 0x506   :  { %18730 = vmatprep.mubr.msk.bf16.mxu1 %vm218_vm0, %v11571_v32  ;;  %v24972_v32 = vpack.c.bf16 %v11542_v7, %v11541_v46  ;;  %v8402_v46 = vld [vmem:[#allocation3 + $0x7a] sm:$0xff]  ;;  %v8403_v7 = vld [vmem:[#allocation3 + $0x82] sm:$0xff] }
 0x507   :  { %v25015_v28 = vpack.c.bf16 %v8404_v44, %v8403_v7  ;;  %v11554_v7 = vld [vmem:[#allocation3 + $0x1e2] sm:$0xff] }
 0x50a   :  { %18335 = vmatmul.mubr.msk.bf16.vlgmr.msra.gmra.mrb[36].mxu0 %vm218_vm0, %v24933_v63 }
 0x50b   :  { %18338 = vmatprep.mubr.msk.bf16.mxu0 %vm218_vm0, %v24938_v4  ;;  %18371 = vmatpush3.bf16.msra.mxu0 %v24895_v11  ;;  %v20287_v11 = vld [vmem:[%s27431_s4 + $0x70] sm:$0xff]  }
 0x50c   :  { %18372 = vmatprep.subr.bf16.mxu0 %v20284_v52 }
 0x50d   :  { %18731 = vmatmul.mubr.msk.bf16.vlgmr.msra.gmra.mrb[36].mxu1 %vm218_vm0, %v24942_v62 }
 0x50e   :  { %18734 = vmatprep.mubr.msk.bf16.mxu1 %vm218_vm0, %v24950_v56  ;;  %18767 = vmatpush3.bf16.msra.mxu1 %v24901_v35  ;;  %v20288_v35 = vld [vmem:[%s27431_s4 + $0x78] sm:$0xff]  }
 0x50f   :  { %18768 = vmatprep.subr.bf16.mxu1 %v20285_v39  ;;  %18373 = vmatpush3.bf16.msra.mxu0 %v20284_v52  ;;  %v11546_v52 = vld [vmem:[#allocation3 + $0x1a2] sm:$0xff] }
 0x510   :  { %18374 = vmatprep.subr.bf16.mxu0 %v20286_v24  ;;  %v25002_v58 = vpack.c.bf16 %v11546_v52, %v11545_v27  ;;  %v8405_v52 = vld [vmem:[#allocation3 + $0x92] sm:$0xff] }
 0x512   :  { %18769 = vmatpush3.bf16.msra.mxu1 %v20285_v39  ;;  %18339 = vmatmul.mubr.msk.bf16.gmra.mrb[40].mxu0 %vm218_vm0, %v24963_v8  ;;  %v24995_v39 = vpack.c.bf16 %v8398_v22, %v8397_v20  ;;  %v11551_v20 = vld [vmem:[#allocation3 + $0x1ca] sm:$0xff]  ;;  %v11552_v22 = vld [vmem:[#allocation3 + $0x1d2] sm:$0xff] }
 0x513   :  { %18770 = vmatprep.subr.bf16.mxu1 %v20287_v11  ;;  %18342 = vmatprep.mubr.msk.bf16.mxu0 %vm218_vm0, %v24968_v34  ;;  %v25023_v27 = vpack.c.bf16 %v11552_v22, %v11551_v20 }
 0x514   :  { %18375 = vmatpush3.bf16.msra.mxu0 %v20286_v24  ;;  %v11547_v24 = vld [vmem:[#allocation3 + $0x1aa] sm:$0xff] }
 0x515   :  { %18735 = vmatmul.mubr.msk.bf16.gmra.mrb[40].mxu1 %vm218_vm0, %v24972_v32  ;;  %18376 = vmatprep.subr.bf16.mxu0 %v20288_v35  ;;  %v25007_v40 = vpack.c.bf16 %v11548_v41, %v11547_v24  ;;  %v8406_v24 = vld [vmem:[#allocation3 + $0x9a] sm:$0xff]  ;;  %v8407_v41 = vld [vmem:[#allocation3 + $0xa2] sm:$0xff] }
 0x516   :  { %18738 = vmatprep.mubr.msk.bf16.mxu1 %vm218_vm0, %v24979_v55  ;;  %18771 = vmatpush3.bf16.msra.mxu1 %v20287_v11  ;;  %v8401_v11 = vld [vmem:[#allocation3 + $0x72] sm:$0xff]  ;;  %v25029_v44 = vpack.c.bf16 %v8406_v24, %v8405_v52  ;;  %v8410_v24 = vld [vmem:[#allocation3 + $0xba] sm:$0xff] }
 0x517   :  { %18772 = vmatprep.subr.bf16.mxu1 %v20289_v21  ;;  %v8409_v52 = vld [vmem:[#allocation3 + $0xb2] sm:$0xff] }
 0x518   :  { %18377 = vmatpush3.bf16.msra.mxu0 %v20288_v35  ;;  %v11550_v35 = vld [vmem:[#allocation3 + $0x1c2] sm:$0xff]  ;;  %v25045_v15 = vpack.c.bf16 %v8410_v24, %v8409_v52  ;;  %v8413_v52 = vld [vmem:[#allocation3 + $0xd2] sm:$0xff]  ;;  %v8414_v24 = vld [vmem:[#allocation3 + $0xda] sm:$0xff] }
 0x519   :  { %18414 = vmatprep.subr.bf16.mxu0 %v24986_v17  ;;  %v25019_v12 = vpack.c.bf16 %v11550_v35, %v11549_v43  ;;  %v11555_v43 = vld [vmem:[#allocation3 + $0x1ea] sm:$0xff]  ;;  %v11556_v35 = vld [vmem:[#allocation3 + $0x1f2] sm:$0xff]  ;;  %v25061_v51 = vpack.c.bf16 %v8414_v24, %v8413_v52  ;;  %v8418_v24 = vld [vmem:[#allocation3 + $0xfa] sm:$0xff] }
 0x51a   :  { %18773 = vmatpush3.bf16.msra.mxu1 %v20289_v21  ;;  %18343 = vmatmul.mubr.msk.bf16.gmra.mrb[44].mxu0 %vm218_vm0, %v24995_v39  ;;  %v25013_v21 = vpack.c.bf16 %v8402_v46, %v8401_v11  ;;  %v8408_v11 = vld [vmem:[#allocation3 + $0xaa] sm:$0xff]  ;;  %v11553_v46 = vld [vmem:[#allocation3 + $0x1da] sm:$0xff]  ;;  %v25039_v22 = vpack.c.bf16 %v11556_v35, %v11555_v43  ;;  %v25051_v43 = vpack.c.bf16 %v11558_v45, %v11557_v5  ;;  %v11564_v5 = vld [vmem:[#allocation3 + $0x232] sm:$0xff] }
 0x51b   :  { %18810 = vmatprep.subr.bf16.mxu1 %v24993_v25  ;;  %18346 = vmatprep.mubr.msk.bf16.mxu0 %vm218_vm0, %v24998_v53  ;;  %v25031_v18 = vpack.c.bf16 %v8408_v11, %v8407_v41  ;;  %v25035_v20 = vpack.c.bf16 %v11554_v7, %v11553_v46  ;;  %v8411_v41 = vld [vmem:[#allocation3 + $0xc2] sm:$0xff]  ;;  %v8412_v11 = vld [vmem:[#allocation3 + $0xca] sm:$0xff]  ;;  %v11560_v7 = vld [vmem:[#allocation3 + $0x212] sm:$0xff] }
 0x51c   :  { %v11559_v46 = vld [vmem:[#allocation3 + $0x20a] sm:$0xff]  ;;  %v25047_v26 = vpack.c.bf16 %v8412_v11, %v8411_v41  ;;  %v8415_v41 = vld [vmem:[#allocation3 + $0xe2] sm:$0xff]  ;;  %v8417_v52 = vld [vmem:[#allocation3 + $0xf2] sm:$0xff] }
 0x51d   :  { %18739 = vmatmul.mubr.msk.bf16.gmra.mrb[44].mxu1 %vm218_vm0, %v25002_v58  ;;  %v25055_v35 = vpack.c.bf16 %v11560_v7, %v11559_v46  ;;  %v8416_v11 = vld [vmem:[#allocation3 + $0xea] sm:$0xff]  ;;  %v25067_v46 = vpack.c.bf16 %v11562_v29, %v11561_v36  ;;  %v25077_v31 = vpack.c.bf16 %v8418_v24, %v8417_v52  ;;  %v11568_v36 = vld [vmem:[#allocation3 + $0x252] sm:$0xff]  ;;  %v8422_v24 = vld [vmem:[#allocation3 + $0x11a] sm:$0xff] }
 0x51e   :  { %18742 = vmatprep.mubr.msk.bf16.mxu1 %vm218_vm0, %v25007_v40  ;;  %v11563_v45 = vld [vmem:[#allocation3 + $0x22a] sm:$0xff]  ;;  %v25063_v50 = vpack.c.bf16 %v8416_v11, %v8415_v41  ;;  %v8419_v41 = vld [vmem:[#allocation3 + $0x102] sm:$0xff]  ;;  %v8421_v52 = vld [vmem:[#allocation3 + $0x112] sm:$0xff] }
 0x51f   :  { %v25071_v7 = vpack.c.bf16 %v11564_v5, %v11563_v45  ;;  %v8420_v11 = vld [vmem:[#allocation3 + $0x10a] sm:$0xff]  ;;  %v25083_v45 = vpack.c.bf16 %v11566_v6, %v11565_v2  ;;  %v8440_v9 = vpack.c.bf16 %v8422_v24, %v8421_v52  ;;  %v9104_v52 = vld [vmem:[#allocation3 + $0x5b] sm:$0xff] }
 0x520   :  { %v11567_v29 = vld [vmem:[#allocation3 + $0x24a] sm:$0xff]  ;;  %v25079_v42 = vpack.c.bf16 %v8420_v11, %v8419_v41  ;;  %v11569_v41 = vld [vmem:[#allocation3 + $0x25a] sm:$0xff]  ;;  %v11570_v11 = vld [vmem:[#allocation3 + $0x262] sm:$0xff] }
 0x521   :  { %v25087_v5 = vpack.c.bf16 %v11568_v36, %v11567_v29  ;;  %v11588_v6 = vpack.c.bf16 %v11570_v11, %v11569_v41  ;;  %v20292_v2 = vld [vmem:[%s27431_s4 + $0x88] sm:$0xff]   ;;  %v20303_v24 = vld [vmem:[%s27431_s4 + $0xb0] sm:$0xff]  }
 0x522   :  { %18347 = vmatmul.mubr.msk.bf16.gmra.mrb[48].mxu0 %vm218_vm0, %v25013_v21  ;;  %v20293_v29 = vld [vmem:[%s27431_s4 + $0x88] sm:$0xff]   ;;  %v12248_v11 = vld [vmem:[#allocation3 + $0x193] sm:$0xff] }
 0x523   :  { %18350 = vmatprep.mubr.msk.bf16.mxu0 %vm218_vm0, %v25015_v28  ;;  %v9101_v36 = vld [vmem:[#allocation3 + $0x43] sm:$0xff]  ;;  %v12247_v41 = vld [vmem:[#allocation3 + $0x18b] sm:$0xff] }
 0x525   :  { %18743 = vmatmul.mubr.msk.bf16.gmra.mrb[48].mxu1 %vm218_vm0, %v25019_v12 }
 0x526   :  { %18746 = vmatprep.mubr.msk.bf16.mxu1 %vm218_vm0, %v25023_v27 }
 0x52a   :  { %18351 = vmatmul.mubr.msk.bf16.gmra.mrb[52].mxu0 %vm218_vm0, %v25029_v44 }
 0x52b   :  { %18354 = vmatprep.mubr.msk.bf16.mxu0 %vm218_vm0, %v25031_v18 }
 0x52d   :  { %18747 = vmatmul.mubr.msk.bf16.gmra.mrb[52].mxu1 %vm218_vm0, %v25035_v20 }
 0x52e   :  { %18750 = vmatprep.mubr.msk.bf16.mxu1 %vm218_vm0, %v25039_v22 }
 0x532   :  { %18355 = vmatmul.mubr.msk.bf16.gmra.mrb[56].mxu0 %vm218_vm0, %v25045_v15 }
 0x533   :  { %18358 = vmatprep.mubr.msk.bf16.mxu0 %vm218_vm0, %v25047_v26 }
 0x535   :  { %18751 = vmatmul.mubr.msk.bf16.gmra.mrb[56].mxu1 %vm218_vm0, %v25051_v43 }
 0x536   :  { %18754 = vmatprep.mubr.msk.bf16.mxu1 %vm218_vm0, %v25055_v35 }
 0x53a   :  { %18359 = vmatmul.mubr.msk.bf16.gmra.mrb[60].mxu0 %vm218_vm0, %v25061_v51 }
 0x53b   :  { %18362 = vmatprep.mubr.msk.bf16.mxu0 %vm218_vm0, %v25063_v50 }
 0x53d   :  { %18755 = vmatmul.mubr.msk.bf16.gmra.mrb[60].mxu1 %vm218_vm0, %v25067_v46 }
 0x53e   :  { %18758 = vmatprep.mubr.msk.bf16.mxu1 %vm218_vm0, %v25071_v7 }
 0x542   :  { %18363 = vmatmul.mubr.msk.bf16.gmra.mrb[64].mxu0 %vm218_vm0, %v25077_v31 }
 0x543   :  { %18366 = vmatprep.mubr.msk.bf16.mxu0 %vm218_vm0, %v25079_v42 }
 0x545   :  { %18759 = vmatmul.mubr.msk.bf16.gmra.mrb[64].mxu1 %vm218_vm0, %v25083_v45 }
 0x546   :  { %18762 = vmatprep.mubr.msk.bf16.mxu1 %vm218_vm0, %v25087_v5 }
 0x54a   :  { %18367 = vmatmul.mubr.msk.bf16.gmra.mrb[68].mxu0 %vm218_vm0, %v8440_v9 }
 0x54b   :  { %18378 = vmatprep.mubr.msk.bf16.mxu0 %vm218_vm0, %v24933_v63  ;;  %v20294_v63 = vld [vmem:[%s27431_s4 + $0x90] sm:$0xff]  }
 0x54d   :  { %18763 = vmatmul.mubr.msk.bf16.gmra.mrb[68].mxu1 %vm218_vm0, %v11588_v6 }
 0x54e   :  { %18774 = vmatprep.mubr.msk.bf16.mxu1 %vm218_vm0, %v24942_v62  ;;  %v20296_v62 = vld [vmem:[%s27431_s4 + $0x98] sm:$0xff]  }
 0x552   :  { %18379 = vmatmul.mubr.msk.bf16.vlgmr.msra.gmra.mrb[36].mxu0 %vm218_vm0, %v24938_v4  ;;  %v20295_v4 = vld [vmem:[%s27431_s4 + $0x90] sm:$0xff]  }
 0x553   :  { %18382 = vmatprep.mubr.msk.bf16.mxu0 %vm218_vm0, %v24963_v8  ;;  %18415 = vmatpush3.bf16.msra.mxu0 %v24986_v17  ;;  %v25136_v8 = vld [vmem:[%s27431_s4 + $0xa0] sm:$0xff]  }
 0x554   :  { %18416 = vmatprep.subr.bf16.mxu0 %v20292_v2  ;;  %v12242_v17 = vld [vmem:[#allocation3 + $0x163] sm:$0xff] }
 0x555   :  { %18775 = vmatmul.mubr.msk.bf16.vlgmr.msra.gmra.mrb[36].mxu1 %vm218_vm0, %v24950_v56  ;;  %v20297_v56 = vld [vmem:[%s27431_s4 + $0x98] sm:$0xff]  }
 0x556   :  { %18778 = vmatprep.mubr.msk.bf16.mxu1 %vm218_vm0, %v24972_v32  ;;  %18811 = vmatpush3.bf16.msra.mxu1 %v24993_v25 }
 0x557   :  { %18812 = vmatprep.subr.bf16.mxu1 %v20293_v29  ;;  %18417 = vmatpush3.bf16.msra.mxu0 %v20292_v2  ;;  %v12249_v2 = vld [vmem:[#allocation3 + $0x19b] sm:$0xff] }
 0x558   :  { %18418 = vmatprep.subr.bf16.mxu0 %v20294_v63 }
 0x55a   :  { %18813 = vmatpush3.bf16.msra.mxu1 %v20293_v29  ;;  %18383 = vmatmul.mubr.msk.bf16.gmra.mrb[40].mxu0 %vm218_vm0, %v24968_v34  ;;  %v25143_v34 = vld [vmem:[%s27431_s4 + $0xa0] sm:$0xff]  }
 0x55b   :  { %18814 = vmatprep.subr.bf16.mxu1 %v20295_v4  ;;  %18386 = vmatprep.mubr.msk.bf16.mxu0 %vm218_vm0, %v24995_v39  ;;  %v9097_v39 = vld [vmem:[#allocation3 + $0x23] sm:$0xff] }
 0x55c   :  { %18419 = vmatpush3.bf16.msra.mxu0 %v20294_v63  ;;  %v12250_v29 = vld [vmem:[#allocation3 + $0x1a3] sm:$0xff]  ;;  %v20304_v63 = vld [vmem:[%s27431_s4 + $0xb8] sm:$0xff]  }
 0x55d   :  { %18779 = vmatmul.mubr.msk.bf16.gmra.mrb[40].mxu1 %vm218_vm0, %v24979_v55  ;;  %18420 = vmatprep.subr.bf16.mxu0 %v20296_v62  ;;  %v12241_v55 = vld [vmem:[#allocation3 + $0x15b] sm:$0xff] }
 0x55e   :  { %18782 = vmatprep.mubr.msk.bf16.mxu1 %vm218_vm0, %v25002_v58  ;;  %18815 = vmatpush3.bf16.msra.mxu1 %v20295_v4  ;;  %v9099_v58 = vld [vmem:[#allocation3 + $0x33] sm:$0xff] }
 0x55f   :  { %18816 = vmatprep.subr.bf16.mxu1 %v20297_v56 }
 0x560   :  { %18421 = vmatpush3.bf16.msra.mxu0 %v20296_v62  ;;  %v12280_v62 = vpack.c.bf16 %v12248_v11, %v12247_v41  ;;  %v12261_v41 = vld [vmem:[#allocation3 + $0x1fb] sm:$0xff]  ;;  %v12262_v11 = vld [vmem:[#allocation3 + $0x203] sm:$0xff] }
 0x561   :  { %18458 = vmatprep.subr.bf16.mxu0 %v25136_v8 }
 0x562   :  { %18817 = vmatpush3.bf16.msra.mxu1 %v20297_v56  ;;  %18387 = vmatmul.mubr.msk.bf16.gmra.mrb[44].mxu0 %vm218_vm0, %v24998_v53  ;;  %v9098_v53 = vld [vmem:[#allocation3 + $0x2b] sm:$0xff]  ;;  %v20305_v56 = vld [vmem:[%s27431_s4 + $0xb8] sm:$0xff]  }
 0x563   :  { %18854 = vmatprep.subr.bf16.mxu1 %v25143_v34  ;;  %18390 = vmatprep.mubr.msk.bf16.mxu0 %vm218_vm0, %v25013_v21  ;;  %v12243_v21 = vld [vmem:[#allocation3 + $0x16b] sm:$0xff] }
 0x565   :  { %18783 = vmatmul.mubr.msk.bf16.gmra.mrb[44].mxu1 %vm218_vm0, %v25007_v40  ;;  %v9100_v40 = vld [vmem:[#allocation3 + $0x3b] sm:$0xff] }
 0x566   :  { %18786 = vmatprep.mubr.msk.bf16.mxu1 %vm218_vm0, %v25019_v12  ;;  %v9132_v12 = vpack.c.bf16 %v9098_v53, %v9097_v39  ;;  %v9109_v53 = vld [vmem:[#allocation3 + $0x83] sm:$0xff] }
 0x56a   :  { %18391 = vmatmul.mubr.msk.bf16.gmra.mrb[48].mxu0 %vm218_vm0, %v25015_v28  ;;  %v12244_v28 = vld [vmem:[#allocation3 + $0x173] sm:$0xff] }
 0x56b   :  { %18394 = vmatprep.mubr.msk.bf16.mxu0 %vm218_vm0, %v25029_v44  ;;  %v12246_v44 = vld [vmem:[#allocation3 + $0x183] sm:$0xff] }
 0x56d   :  { %18787 = vmatmul.mubr.msk.bf16.gmra.mrb[48].mxu1 %vm218_vm0, %v25023_v27  ;;  %v12245_v27 = vld [vmem:[#allocation3 + $0x17b] sm:$0xff] }
 0x56e   :  { %18790 = vmatprep.mubr.msk.bf16.mxu1 %vm218_vm0, %v25035_v20  ;;  %v20300_v20 = vld [vmem:[%s27431_s4 + $0xa8] sm:$0xff]  }
 0x572   :  { %18395 = vmatmul.mubr.msk.bf16.gmra.mrb[52].mxu0 %vm218_vm0, %v25031_v18  ;;  %v11923_v18 = vld [vmem:[#allocation3 + $0x272] sm:$0xff] }
 0x573   :  { %18398 = vmatprep.mubr.msk.bf16.mxu0 %vm218_vm0, %v25045_v15  ;;  %v11922_v15 = vld [vmem:[#allocation3 + $0x26a] sm:$0xff] }
 0x575   :  { %18791 = vmatmul.mubr.msk.bf16.gmra.mrb[52].mxu1 %vm218_vm0, %v25039_v22  ;;  %v9133_v22 = vpack.c.bf16 %v9100_v40, %v9099_v58  ;;  %v9110_v58 = vld [vmem:[#allocation3 + $0x8b] sm:$0xff]  ;;  %v9111_v40 = vld [vmem:[#allocation3 + $0x93] sm:$0xff] }
 0x576   :  { %18794 = vmatprep.mubr.msk.bf16.mxu1 %vm218_vm0, %v25051_v43  ;;  %v12278_v43 = vpack.c.bf16 %v12244_v28, %v12243_v21  ;;  %v9112_v21 = vld [vmem:[#allocation3 + $0x9b] sm:$0xff]  ;;  %v12255_v28 = vld [vmem:[#allocation3 + $0x1cb] sm:$0xff] }
 0x57a   :  { %18399 = vmatmul.mubr.msk.bf16.gmra.mrb[56].mxu0 %vm218_vm0, %v25047_v26  ;;  %v9095_v26 = vld [vmem:[#allocation3 + $0x13] sm:$0xff] }
 0x57b   :  { %18402 = vmatprep.mubr.msk.bf16.mxu0 %vm218_vm0, %v25061_v51  ;;  %v8776_v51 = vld [vmem:[#allocation3 + $0x12a] sm:$0xff] }
 0x57d   :  { %18795 = vmatmul.mubr.msk.bf16.gmra.mrb[56].mxu1 %vm218_vm0, %v25055_v35  ;;  %v20301_v35 = vld [vmem:[%s27431_s4 + $0xa8] sm:$0xff]  }
 0x57e   :  { %18798 = vmatprep.mubr.msk.bf16.mxu1 %vm218_vm0, %v25067_v46  ;;  %v12279_v46 = vpack.c.bf16 %v12246_v44, %v12245_v27  ;;  %v9138_v27 = vpack.c.bf16 %v9110_v58, %v9109_v53  ;;  %v12257_v44 = vld [vmem:[#allocation3 + $0x1db] sm:$0xff]  ;;  %v12268_v53 = vld [vmem:[#allocation3 + $0x233] sm:$0xff] }
 0x582   :  { %18403 = vmatmul.mubr.msk.bf16.gmra.mrb[60].mxu0 %vm218_vm0, %v25063_v50  ;;  %v8775_v50 = vld [vmem:[#allocation3 + $0x122] sm:$0xff] }
 0x583   :  { %18406 = vmatprep.mubr.msk.bf16.mxu0 %vm218_vm0, %v25077_v31  ;;  %v9096_v31 = vld [vmem:[#allocation3 + $0x1b] sm:$0xff]  ;;  %v8794_v32 = vpack.c.bf16 %v8776_v51, %v8775_v50  ;;  %v9105_v50 = vld [vmem:[#allocation3 + $0x63] sm:$0xff]  ;;  %v9106_v51 = vld [vmem:[#allocation3 + $0x6b] sm:$0xff] }
 0x584   :  { %v9131_v25 = vpack.c.bf16 %v9096_v31, %v9095_v26  ;;  %v9107_v26 = vld [vmem:[#allocation3 + $0x73] sm:$0xff]  ;;  %v9108_v31 = vld [vmem:[#allocation3 + $0x7b] sm:$0xff] }
 0x585   :  { %18799 = vmatmul.mubr.msk.bf16.gmra.mrb[60].mxu1 %vm218_vm0, %v25071_v7  ;;  %v20302_v7 = vld [vmem:[%s27431_s4 + $0xb0] sm:$0xff]  }
 0x586   :  { %18802 = vmatprep.mubr.msk.bf16.mxu1 %vm218_vm0, %v25083_v45  ;;  %v9102_v45 = vld [vmem:[#allocation3 + $0x4b] sm:$0xff] }
 0x58a   :  { %18407 = vmatmul.mubr.msk.bf16.gmra.mrb[64].mxu0 %vm218_vm0, %v25079_v42  ;;  %v11941_v42 = vpack.c.bf16 %v11923_v18, %v11922_v15  ;;  %v25233_v15 = vld [vmem:[%s27431_s4 + $0xc0] sm:$0xff]   ;;  %v12251_v18 = vld [vmem:[#allocation3 + $0x1ab] sm:$0xff] }
 0x58b   :  { %18410 = vmatprep.mubr.msk.bf16.mxu0 %vm218_vm0, %v8440_v9  ;;  %v12277_v9 = vpack.c.bf16 %v12242_v17, %v12241_v55  ;;  %v9136_v55 = vpack.c.bf16 %v9106_v51, %v9105_v50  ;;  %v12253_v17 = vld [vmem:[#allocation3 + $0x1bb] sm:$0xff]  ;;  %v12264_v50 = vld [vmem:[#allocation3 + $0x213] sm:$0xff] }
 0x58d   :  { %18803 = vmatmul.mubr.msk.bf16.gmra.mrb[64].mxu1 %vm218_vm0, %v25087_v5  ;;  %v9103_v5 = vld [vmem:[#allocation3 + $0x53] sm:$0xff] }
 0x58e   :  { %18806 = vmatprep.mubr.msk.bf16.mxu1 %vm218_vm0, %v11588_v6  ;;  %v9134_v6 = vpack.c.bf16 %v9102_v45, %v9101_v36  ;;  %v9135_v4 = vpack.c.bf16 %v9104_v52, %v9103_v5  ;;  %v9115_v36 = vld [vmem:[#allocation3 + $0xb3] sm:$0xff]  ;;  %v9116_v45 = vld [vmem:[#allocation3 + $0xbb] sm:$0xff]  ;;  %v12259_v5 = vld [vmem:[#allocation3 + $0x1eb] sm:$0xff] }
 0x58f   :  { %v12260_v52 = vld [vmem:[#allocation3 + $0x1f3] sm:$0xff] }
 0x592   :  { %18411 = vmatmul.mubr.msk.bf16.gmra.mrb[68].mxu0 %vm218_vm0, %v8794_v32  ;;  %v12252_v32 = vld [vmem:[#allocation3 + $0x1b3] sm:$0xff] }
 0x593   :  { %18422 = vmatprep.mubr.msk.bf16.mxu0 %vm218_vm0, %v9131_v25  ;;  %v12254_v25 = vld [vmem:[#allocation3 + $0x1c3] sm:$0xff] }
 0x594   :  { %v12283_v39 = vpack.c.bf16 %v12254_v25, %v12253_v17  ;;  %v9121_v17 = vld [vmem:[#allocation3 + $0xe3] sm:$0xff]  ;;  %v9122_v25 = vld [vmem:[#allocation3 + $0xeb] sm:$0xff] }
 0x595   :  { %18807 = vmatmul.mubr.msk.bf16.gmra.mrb[68].mxu1 %vm218_vm0, %v11941_v42  ;;  %v9137_v42 = vpack.c.bf16 %v9108_v31, %v9107_v26  ;;  %v12265_v26 = vld [vmem:[#allocation3 + $0x21b] sm:$0xff]  ;;  %v12266_v31 = vld [vmem:[#allocation3 + $0x223] sm:$0xff]  ;;  %v9144_v58 = vpack.c.bf16 %v9122_v25, %v9121_v17 }
 0x596   :  { %18818 = vmatprep.mubr.msk.bf16.mxu1 %vm218_vm0, %v12277_v9  ;;  %v12282_v9 = vpack.c.bf16 %v12252_v32, %v12251_v18  ;;  %v12597_v17 = vld [vmem:[#allocation3 + $0x174] sm:$0xff] }
 0x59a   :  { %18423 = vmatmul.mubr.msk.bf16.vlgmr.msra.gmra.mrb[36].mxu0 %vm218_vm0, %v9132_v12  ;;  %v12256_v12 = vld [vmem:[#allocation3 + $0x1d3] sm:$0xff] }
 0x59b   :  { %18426 = vmatprep.mubr.msk.bf16.mxu0 %vm218_vm0, %v9133_v22  ;;  %18459 = vmatpush3.bf16.msra.mxu0 %v25136_v8  ;;  %v12281_v8 = vpack.c.bf16 %v12250_v29, %v12249_v2  ;;  %v9139_v22 = vpack.c.bf16 %v9112_v21, %v9111_v40  ;;  %v12286_v2 = vpack.c.bf16 %v12260_v52, %v12259_v5  ;;  %v12269_v40 = vld [vmem:[#allocation3 + $0x23b] sm:$0xff]  ;;  %v12270_v21 = vld [vmem:[#allocation3 + $0x243] sm:$0xff] }
 0x59c   :  { %18460 = vmatprep.subr.bf16.mxu0 %v20300_v20  ;;  %v12287_v29 = vpack.c.bf16 %v12262_v11, %v12261_v41  ;;  %v9129_v41 = vld [vmem:[#allocation3 + $0x123] sm:$0xff]  ;;  %v9130_v11 = vld [vmem:[#allocation3 + $0x12b] sm:$0xff] }
 0x59d   :  { %18819 = vmatmul.mubr.msk.bf16.vlgmr.msra.gmra.mrb[36].mxu1 %vm218_vm0, %v12278_v43  ;;  %v12284_v43 = vpack.c.bf16 %v12256_v12, %v12255_v28 }
 0x59e   :  { %18822 = vmatprep.mubr.msk.bf16.mxu1 %vm218_vm0, %v12279_v46  ;;  %18855 = vmatpush3.bf16.msra.mxu1 %v25143_v34  ;;  %v25227_v34 = vld [vmem:[%s27431_s4 + $0xc0] sm:$0xff]  }
 0x59f   :  { %18856 = vmatprep.subr.bf16.mxu1 %v20301_v35  ;;  %18461 = vmatpush3.bf16.msra.mxu0 %v20300_v20  ;;  %v12258_v20 = vld [vmem:[#allocation3 + $0x1e3] sm:$0xff] }
 0x5a0   :  { %18462 = vmatprep.subr.bf16.mxu0 %v20302_v7  ;;  %v9113_v46 = vld [vmem:[#allocation3 + $0xa3] sm:$0xff] }
 0x5a2   :  { %18857 = vmatpush3.bf16.msra.mxu1 %v20301_v35  ;;  %18427 = vmatmul.mubr.msk.bf16.gmra.mrb[40].mxu0 %vm218_vm0, %v9134_v6  ;;  %v12285_v35 = vpack.c.bf16 %v12258_v20, %v12257_v44  ;;  %v9141_v6 = vpack.c.bf16 %v9116_v45, %v9115_v36  ;;  %v9125_v44 = vld [vmem:[#allocation3 + $0x103] sm:$0xff]  ;;  %v9126_v20 = vld [vmem:[#allocation3 + $0x10b] sm:$0xff]  ;;  %v12273_v36 = vld [vmem:[#allocation3 + $0x25b] sm:$0xff] }
 0x5a3   :  { %18858 = vmatprep.subr.bf16.mxu1 %v20303_v24  ;;  %18430 = vmatprep.mubr.msk.bf16.mxu0 %vm218_vm0, %v9135_v4  ;;  %v9118_v4 = vld [vmem:[#allocation3 + $0xcb] sm:$0xff]  ;;  %v12274_v45 = vld [vmem:[#allocation3 + $0x263] sm:$0xff] }
 0x5a4   :  { %18463 = vmatpush3.bf16.msra.mxu0 %v20302_v7  ;;  %v9114_v7 = vld [vmem:[#allocation3 + $0xab] sm:$0xff] }
 0x5a5   :  { %18823 = vmatmul.mubr.msk.bf16.gmra.mrb[40].mxu1 %vm218_vm0, %v12280_v62  ;;  %18464 = vmatprep.subr.bf16.mxu0 %v20304_v63  ;;  %v9119_v62 = vld [vmem:[#allocation3 + $0xd3] sm:$0xff] }
 0x5a6   :  { %18826 = vmatprep.mubr.msk.bf16.mxu1 %vm218_vm0, %v12281_v8  ;;  %18859 = vmatpush3.bf16.msra.mxu1 %v20303_v24  ;;  %v9140_v24 = vpack.c.bf16 %v9114_v7, %v9113_v46  ;;  %v12263_v8 = vld [vmem:[#allocation3 + $0x20b] sm:$0xff]  ;;  %v12272_v46 = vld [vmem:[#allocation3 + $0x253] sm:$0xff]  ;;  %v9146_v7 = vpack.c.bf16 %v9126_v20, %v9125_v44 }
 0x5a7   :  { %18860 = vmatprep.subr.bf16.mxu1 %v20305_v56  ;;  %v12288_v32 = vpack.c.bf16 %v12264_v50, %v12263_v8  ;;  %v9457_v44 = vld [vmem:[#allocation3 + $0x54] sm:$0xff] }
 0x5a8   :  { %18465 = vmatpush3.bf16.msra.mxu0 %v20304_v63  ;;  %v9117_v63 = vld [vmem:[#allocation3 + $0xc3] sm:$0xff]  ;;  %v20311_v20 = vld [vmem:[%s27431_s4 + $0xd0] sm:$0xff]  }
 0x5a9   :  { %18502 = vmatprep.subr.bf16.mxu0 %v25227_v34  ;;  %v9142_v51 = vpack.c.bf16 %v9118_v4, %v9117_v63  ;;  %v12276_v63 = vld [vmem:[#allocation3 + $0x273] sm:$0xff]  ;;  %v9148_v4 = vpack.c.bf16 %v9130_v11, %v9129_v41  ;;  %v25320_v41 = vld [vmem:[%s27431_s4 + $0xe0] sm:$0xff]  }
 0x5aa   :  { %18861 = vmatpush3.bf16.msra.mxu1 %v20305_v56  ;;  %18431 = vmatmul.mubr.msk.bf16.gmra.mrb[44].mxu0 %vm218_vm0, %v9136_v55  ;;  %v9120_v56 = vld [vmem:[#allocation3 + $0xdb] sm:$0xff]  ;;  %v12289_v55 = vpack.c.bf16 %v12266_v31, %v12265_v26  ;;  %v9451_v26 = vld [vmem:[#allocation3 + $0x24] sm:$0xff]  ;;  %v9452_v31 = vld [vmem:[#allocation3 + $0x2c] sm:$0xff] }
 0x5ab   :  { %18898 = vmatprep.subr.bf16.mxu1 %v25233_v15  ;;  %18434 = vmatprep.mubr.msk.bf16.mxu0 %vm218_vm0, %v9137_v42  ;;  %v9143_v18 = vpack.c.bf16 %v9120_v56, %v9119_v62  ;;  %v9123_v42 = vld [vmem:[#allocation3 + $0xf3] sm:$0xff]  ;;  %v12594_v62 = vld [vmem:[#allocation3 + $0x15c] sm:$0xff]  ;;  %v12595_v56 = vld [vmem:[#allocation3 + $0x164] sm:$0xff]  ;;  %v25265_v25 = vpack.c.bf16 %v9452_v31, %v9451_v26 }
 0x5ac   :  { %v9459_v11 = vld [vmem:[#allocation3 + $0x64] sm:$0xff] }
 0x5ad   :  { %18827 = vmatmul.mubr.msk.bf16.gmra.mrb[44].mxu1 %vm218_vm0, %v12282_v9  ;;  %v9124_v9 = vld [vmem:[#allocation3 + $0xfb] sm:$0xff] }
 0x5ae   :  { %18830 = vmatprep.mubr.msk.bf16.mxu1 %vm218_vm0, %v12283_v39  ;;  %v12267_v39 = vld [vmem:[#allocation3 + $0x22b] sm:$0xff]  ;;  %v9145_v28 = vpack.c.bf16 %v9124_v9, %v9123_v42  ;;  %v12598_v42 = vld [vmem:[#allocation3 + $0x17c] sm:$0xff] }
 0x5af   :  { %v12290_v12 = vpack.c.bf16 %v12268_v53, %v12267_v39  ;;  %v12599_v9 = vld [vmem:[#allocation3 + $0x184] sm:$0xff] }
 0x5b0   :  { %v20308_v39 = vld [vmem:[%s27431_s4 + $0xc8] sm:$0xff]  }
 0x5b2   :  { %18435 = vmatmul.mubr.msk.bf16.gmra.mrb[48].mxu0 %vm218_vm0, %v9138_v27  ;;  %v12291_v27 = vpack.c.bf16 %v12270_v21, %v12269_v40  ;;  %v20309_v40 = vld [vmem:[%s27431_s4 + $0xc8] sm:$0xff]   ;;  %v25282_v21 = vpack.c.bf16 %v12599_v9, %v12598_v42  ;;  %v12609_v9 = vld [vmem:[#allocation3 + $0x1d4] sm:$0xff] }
 0x5b3   :  { %18438 = vmatprep.mubr.msk.bf16.mxu0 %vm218_vm0, %v9139_v22  ;;  %v9127_v22 = vld [vmem:[#allocation3 + $0x113] sm:$0xff] }
 0x5b4   :  { %v12608_v42 = vld [vmem:[#allocation3 + $0x1cc] sm:$0xff] }
 0x5b5   :  { %18831 = vmatmul.mubr.msk.bf16.gmra.mrb[48].mxu1 %vm218_vm0, %v12284_v43  ;;  %v9128_v43 = vld [vmem:[#allocation3 + $0x11b] sm:$0xff] }
 0x5b6   :  { %18834 = vmatprep.mubr.msk.bf16.mxu1 %vm218_vm0, %v12285_v35  ;;  %v12271_v35 = vld [vmem:[#allocation3 + $0x24b] sm:$0xff]  ;;  %v9147_v5 = vpack.c.bf16 %v9128_v43, %v9127_v22  ;;  %v27866_v22 = vmov 0.0  }
 0x5b7   :  { %v12292_v52 = vpack.c.bf16 %v12272_v46, %v12271_v35  ;;  %7265 = vst.msk [vmem:[#allocation3 + $0x140] sm:$0x3f] %vm7264_vm1, %v27866_v22  ;;  %7306 = vst.msk [vmem:[#allocation3 + $0x288] sm:$0x3f] %vm7264_vm1, %v27866_v22  ;;  %v12600_v43 = vld [vmem:[#allocation3 + $0x18c] sm:$0xff]  ;;  %v12601_v35 = vld [vmem:[#allocation3 + $0x194] sm:$0xff] }
 0x5b8   :  { %v9469_v22 = vld [vmem:[#allocation3 + $0xb4] sm:$0xff] }
 0x5ba   :  { %18439 = vmatmul.mubr.msk.bf16.gmra.mrb[52].mxu0 %vm218_vm0, %v9140_v24  ;;  %v12293_v24 = vpack.c.bf16 %v12274_v45, %v12273_v36  ;;  %v20312_v36 = vld [vmem:[%s27431_s4 + $0xd8] sm:$0xff]  }
 0x5bb   :  { %18442 = vmatprep.mubr.msk.bf16.mxu0 %vm218_vm0, %v9141_v6  ;;  %v9449_v6 = vld [vmem:[#allocation3 + $0x14] sm:$0xff] }
 0x5bd   :  { %18835 = vmatmul.mubr.msk.bf16.gmra.mrb[52].mxu1 %vm218_vm0, %v12286_v2  ;;  %v9450_v2 = vld [vmem:[#allocation3 + $0x1c] sm:$0xff] }
 0x5be   :  { %18838 = vmatprep.mubr.msk.bf16.mxu1 %vm218_vm0, %v12287_v29  ;;  %v12275_v29 = vld [vmem:[#allocation3 + $0x26b] sm:$0xff]  ;;  %v9485_v8 = vpack.c.bf16 %v9450_v2, %v9449_v6  ;;  %v9461_v2 = vld [vmem:[#allocation3 + $0x74] sm:$0xff] }
 0x5bf   :  { %v12294_v50 = vpack.c.bf16 %v12276_v63, %v12275_v29  ;;  %v9460_v6 = vld [vmem:[#allocation3 + $0x6c] sm:$0xff]  ;;  %v9462_v29 = vld [vmem:[#allocation3 + $0x7c] sm:$0xff] }
 0x5c0   :  { %v25327_v63 = vld [vmem:[%s27431_s4 + $0xe0] sm:$0xff]  }
 0x5c2   :  { %18443 = vmatmul.mubr.msk.bf16.gmra.mrb[56].mxu0 %vm218_vm0, %v9142_v51  ;;  %v12630_v51 = vpack.c.bf16 %v12595_v56, %v12594_v62  ;;  %v12605_v62 = vld [vmem:[#allocation3 + $0x1b4] sm:$0xff]  ;;  %v25329_v56 = vpack.c.bf16 %v9460_v6, %v9459_v11 }
 0x5c3   :  { %18446 = vmatprep.mubr.msk.bf16.mxu0 %vm218_vm0, %v9143_v18  ;;  %v9453_v18 = vld [vmem:[#allocation3 + $0x34] sm:$0xff] }
 0x5c5   :  { %18839 = vmatmul.mubr.msk.bf16.gmra.mrb[56].mxu1 %vm218_vm0, %v12288_v32  ;;  %v9454_v32 = vld [vmem:[#allocation3 + $0x3c] sm:$0xff] }
 0x5c6   :  { %18842 = vmatprep.mubr.msk.bf16.mxu1 %vm218_vm0, %v12289_v55  ;;  %v12596_v55 = vld [vmem:[#allocation3 + $0x16c] sm:$0xff]  ;;  %v25270_v53 = vpack.c.bf16 %v9454_v32, %v9453_v18  ;;  %v9463_v18 = vld [vmem:[#allocation3 + $0x84] sm:$0xff] }
 0x5c7   :  { %v9464_v32 = vld [vmem:[#allocation3 + $0x8c] sm:$0xff] }
 0x5ca   :  { %18447 = vmatmul.mubr.msk.bf16.gmra.mrb[60].mxu0 %vm218_vm0, %v9144_v58  ;;  %v25274_v58 = vpack.c.bf16 %v12597_v17, %v12596_v55  ;;  %v9465_v55 = vld [vmem:[#allocation3 + $0x94] sm:$0xff]  ;;  %v9466_v17 = vld [vmem:[#allocation3 + $0x9c] sm:$0xff] }
 0x5cb   :  { %18450 = vmatprep.mubr.msk.bf16.mxu0 %vm218_vm0, %v9145_v28  ;;  %v20310_v28 = vld [vmem:[%s27431_s4 + $0xd0] sm:$0xff]  }
 0x5cd   :  { %18843 = vmatmul.mubr.msk.bf16.gmra.mrb[60].mxu1 %vm218_vm0, %v12290_v12  ;;  %v9455_v12 = vld [vmem:[#allocation3 + $0x44] sm:$0xff] }
 0x5ce   :  { %18846 = vmatprep.mubr.msk.bf16.mxu1 %vm218_vm0, %v12291_v27  ;;  %v9456_v27 = vld [vmem:[#allocation3 + $0x4c] sm:$0xff] }
 0x5cf   :  { %v25297_v46 = vpack.c.bf16 %v9456_v27, %v9455_v12  ;;  %v25349_v12 = vpack.c.bf16 %v9466_v17, %v9465_v55  ;;  %v25353_v27 = vpack.c.bf16 %v12609_v9, %v12608_v42  ;;  %v12618_v55 = vld [vmem:[#allocation3 + $0x21c] sm:$0xff]  ;;  %v12619_v17 = vld [vmem:[#allocation3 + $0x224] sm:$0xff] }
 0x5d2   :  { %18451 = vmatmul.mubr.msk.bf16.gmra.mrb[64].mxu0 %vm218_vm0, %v9146_v7  ;;  %v12603_v7 = vld [vmem:[#allocation3 + $0x1a4] sm:$0xff] }
 0x5d3   :  { %18454 = vmatprep.mubr.msk.bf16.mxu0 %vm218_vm0, %v9147_v5  ;;  %v25306_v5 = vpack.c.bf16 %v12601_v35, %v12600_v43  ;;  %v9470_v43 = vld [vmem:[#allocation3 + $0xbc] sm:$0xff]  ;;  %v12612_v35 = vld [vmem:[#allocation3 + $0x1ec] sm:$0xff] }
 0x5d4   :  { %v25365_v11 = vpack.c.bf16 %v9470_v43, %v9469_v22  ;;  %v9478_v22 = vld [vmem:[#allocation3 + $0xfc] sm:$0xff]  ;;  %v12620_v43 = vld [vmem:[#allocation3 + $0x22c] sm:$0xff] }
 0x5d5   :  { %18847 = vmatmul.mubr.msk.bf16.gmra.mrb[64].mxu1 %vm218_vm0, %v12292_v52  ;;  %v20313_v52 = vld [vmem:[%s27431_s4 + $0xd8] sm:$0xff]  }
 0x5d6   :  { %18850 = vmatprep.mubr.msk.bf16.mxu1 %vm218_vm0, %v12293_v24 }
 0x5da   :  { %18455 = vmatmul.mubr.msk.bf16.gmra.mrb[68].mxu0 %vm218_vm0, %v9148_v4  ;;  %v12604_v4 = vld [vmem:[#allocation3 + $0x1ac] sm:$0xff] }
 0x5db   :  { %18466 = vmatprep.mubr.msk.bf16.mxu0 %vm218_vm0, %v9485_v8  ;;  %v12606_v8 = vld [vmem:[#allocation3 + $0x1bc] sm:$0xff]  ;;  %v25336_v26 = vpack.c.bf16 %v12605_v62, %v12604_v4  ;;  %v9472_v4 = vld [vmem:[#allocation3 + $0xcc] sm:$0xff]  ;;  %v9473_v62 = vld [vmem:[#allocation3 + $0xd4] sm:$0xff] }
 0x5dd   :  { %18851 = vmatmul.mubr.msk.bf16.gmra.mrb[68].mxu1 %vm218_vm0, %v12294_v50  ;;  %v12607_v50 = vld [vmem:[#allocation3 + $0x1c4] sm:$0xff] }
 0x5de   :  { %18862 = vmatprep.mubr.msk.bf16.mxu1 %vm218_vm0, %v12630_v51  ;;  %v25332_v51 = vpack.c.bf16 %v9462_v29, %v9461_v2  ;;  %v25341_v31 = vpack.c.bf16 %v12607_v50, %v12606_v8  ;;  %v9471_v29 = vld [vmem:[#allocation3 + $0xc4] sm:$0xff]  ;;  %v9474_v8 = vld [vmem:[#allocation3 + $0xdc] sm:$0xff]  ;;  %v12616_v50 = vld [vmem:[#allocation3 + $0x20c] sm:$0xff] }
 0x5df   :  { %v25381_v42 = vpack.c.bf16 %v9474_v8, %v9473_v62  ;;  %v9479_v8 = vld [vmem:[#allocation3 + $0x104] sm:$0xff] }
 0x5e2   :  { %18467 = vmatmul.mubr.msk.bf16.vlgmr.msra.gmra.mrb[36].mxu0 %vm218_vm0, %v25265_v25 }
 0x5e3   :  { %18470 = vmatprep.mubr.msk.bf16.mxu0 %vm218_vm0, %v25270_v53  ;;  %18503 = vmatpush3.bf16.msra.mxu0 %v25227_v34  ;;  %v9458_v34 = vld [vmem:[#allocation3 + $0x5c] sm:$0xff] }
 0x5e4   :  { %18504 = vmatprep.subr.bf16.mxu0 %v20308_v39  ;;  %v25302_v45 = vpack.c.bf16 %v9458_v34, %v9457_v44  ;;  %v9467_v34 = vld [vmem:[#allocation3 + $0xa4] sm:$0xff] }
 0x5e5   :  { %18863 = vmatmul.mubr.msk.bf16.vlgmr.msra.gmra.mrb[36].mxu1 %vm218_vm0, %v25274_v58 }
 0x5e6   :  { %18866 = vmatprep.mubr.msk.bf16.mxu1 %vm218_vm0, %v25282_v21  ;;  %18899 = vmatpush3.bf16.msra.mxu1 %v25233_v15  ;;  %v12602_v15 = vld [vmem:[#allocation3 + $0x19c] sm:$0xff] }
 0x5e7   :  { %18900 = vmatprep.subr.bf16.mxu1 %v20309_v40  ;;  %18505 = vmatpush3.bf16.msra.mxu0 %v20308_v39  ;;  %v25313_v24 = vpack.c.bf16 %v12603_v7, %v12602_v15  ;;  %v25347_v39 = vpack.c.bf16 %v9464_v32, %v9463_v18  ;;  %v12613_v15 = vld [vmem:[#allocation3 + $0x1f4] sm:$0xff]  ;;  %v25379_v32 = vpack.c.bf16 %v9472_v4, %v9471_v29 }
 0x5e8   :  { %18506 = vmatprep.subr.bf16.mxu0 %v20310_v28  ;;  %v25369_v6 = vpack.c.bf16 %v12613_v15, %v12612_v35  ;;  %v12617_v18 = vld [vmem:[#allocation3 + $0x214] sm:$0xff] }
 0x5e9   :  { %v25385_v9 = vpack.c.bf16 %v12617_v18, %v12616_v50  ;;  %v12621_v35 = vld [vmem:[#allocation3 + $0x234] sm:$0xff]  ;;  %v9480_v50 = vld [vmem:[#allocation3 + $0x10c] sm:$0xff] }
 0x5ea   :  { %18901 = vmatpush3.bf16.msra.mxu1 %v20309_v40  ;;  %18471 = vmatmul.mubr.msk.bf16.gmra.mrb[40].mxu0 %vm218_vm0, %v25297_v46  ;;  %v12610_v40 = vld [vmem:[#allocation3 + $0x1dc] sm:$0xff]  ;;  %v25401_v4 = vpack.c.bf16 %v12621_v35, %v12620_v43  ;;  %v9481_v18 = vld [vmem:[#allocation3 + $0x114] sm:$0xff] }
 0x5eb   :  { %18902 = vmatprep.subr.bf16.mxu1 %v20311_v20  ;;  %18474 = vmatprep.mubr.msk.bf16.mxu0 %vm218_vm0, %v25302_v45 }
 0x5ec   :  { %18507 = vmatpush3.bf16.msra.mxu0 %v20310_v28  ;;  %v12611_v28 = vld [vmem:[#allocation3 + $0x1e4] sm:$0xff] }
 0x5ed   :  { %18867 = vmatmul.mubr.msk.bf16.gmra.mrb[40].mxu1 %vm218_vm0, %v25306_v5  ;;  %18508 = vmatprep.subr.bf16.mxu0 %v20312_v36  ;;  %v25357_v44 = vpack.c.bf16 %v12611_v28, %v12610_v40  ;;  %v25389_v40 = vpack.c.bf16 %v12619_v17, %v12618_v55  ;;  %v9475_v28 = vld [vmem:[#allocation3 + $0xe4] sm:$0xff]  ;;  %v9482_v55 = vld [vmem:[#allocation3 + $0x11c] sm:$0xff]  ;;  %v12624_v17 = vld [vmem:[#allocation3 + $0x24c] sm:$0xff] }
 0x5ee   :  { %18870 = vmatprep.mubr.msk.bf16.mxu1 %vm218_vm0, %v25313_v24  ;;  %18903 = vmatpush3.bf16.msra.mxu1 %v20311_v20  ;;  %v9468_v20 = vld [vmem:[#allocation3 + $0xac] sm:$0xff]  ;;  %v25413_v43 = vpack.c.bf16 %v9482_v55, %v9481_v18  ;;  %v12629_v18 = vld [vmem:[#allocation3 + $0x274] sm:$0xff] }
 0x5ef   :  { %18904 = vmatprep.subr.bf16.mxu1 %v20313_v52  ;;  %v25363_v7 = vpack.c.bf16 %v9468_v20, %v9467_v34  ;;  %v9476_v34 = vld [vmem:[#allocation3 + $0xec] sm:$0xff]  ;;  %v9477_v20 = vld [vmem:[#allocation3 + $0xf4] sm:$0xff] }
 0x5f0   :  { %18509 = vmatpush3.bf16.msra.mxu0 %v20312_v36  ;;  %v12614_v36 = vld [vmem:[#allocation3 + $0x1fc] sm:$0xff]  ;;  %v25395_v15 = vpack.c.bf16 %v9476_v34, %v9475_v28  ;;  %v25397_v29 = vpack.c.bf16 %v9478_v22, %v9477_v20  ;;  %v12625_v28 = vld [vmem:[#allocation3 + $0x254] sm:$0xff]  ;;  %v25411_v34 = vpack.c.bf16 %v9480_v50, %v9479_v8  ;;  %v12627_v22 = vld [vmem:[#allocation3 + $0x264] sm:$0xff] }
 0x5f1   :  { %18546 = vmatprep.subr.bf16.mxu0 %v25320_v41  ;;  %v12626_v20 = vld [vmem:[#allocation3 + $0x25c] sm:$0xff]  ;;  %v25417_v35 = vpack.c.bf16 %v12625_v28, %v12624_v17  ;;  %v9484_v8 = vld [vmem:[#allocation3 + $0x12c] sm:$0xff] }
 0x5f2   :  { %18905 = vmatpush3.bf16.msra.mxu1 %v20313_v52  ;;  %18475 = vmatmul.mubr.msk.bf16.gmra.mrb[44].mxu0 %vm218_vm0, %v25329_v56  ;;  %v12615_v52 = vld [vmem:[#allocation3 + $0x204] sm:$0xff]  ;;  %v12628_v50 = vld [vmem:[#allocation3 + $0x26c] sm:$0xff] }
 0x5f3   :  { %18942 = vmatprep.subr.bf16.mxu1 %v25327_v63  ;;  %18478 = vmatprep.mubr.msk.bf16.mxu0 %vm218_vm0, %v25332_v51  ;;  %v25373_v2 = vpack.c.bf16 %v12615_v52, %v12614_v36  ;;  %v12622_v36 = vld [vmem:[#allocation3 + $0x23c] sm:$0xff]  ;;  %v12623_v52 = vld [vmem:[#allocation3 + $0x244] sm:$0xff]  ;;  %v12647_v17 = vpack.c.bf16 %v12629_v18, %v12628_v50  ;;  %v20327_v50 = vld [vmem:[%s27431_s4 + $0x110] sm:$0xff]  }
 0x5f4   :  { %v25405_v62 = vpack.c.bf16 %v12623_v52, %v12622_v36  ;;  %v25421_v36 = vpack.c.bf16 %v12627_v22, %v12626_v20  ;;  %v9483_v52 = vld [vmem:[#allocation3 + $0x124] sm:$0xff] }
 0x5f5   :  { %18871 = vmatmul.mubr.msk.bf16.gmra.mrb[44].mxu1 %vm218_vm0, %v25336_v26  ;;  %v9502_v55 = vpack.c.bf16 %v9484_v8, %v9483_v52  ;;  %v20316_v28 = vld [vmem:[%s27431_s4 + $0xe8] sm:$0xff]   ;;  %v13306_v18 = vld [vmem:[#allocation3 + $0x19d] sm:$0xff] }
 0x5f6   :  { %18874 = vmatprep.mubr.msk.bf16.mxu1 %vm218_vm0, %v25341_v31  ;;  %v20317_v20 = vld [vmem:[%s27431_s4 + $0xe8] sm:$0xff]  }
 0x5f7   :  { %v10165_v52 = vld [vmem:[#allocation3 + $0x65] sm:$0xff]  ;;  %v10166_v8 = vld [vmem:[#allocation3 + $0x6d] sm:$0xff] }
 0x5fa   :  { %18479 = vmatmul.mubr.msk.bf16.gmra.mrb[48].mxu0 %vm218_vm0, %v25347_v39 }
 0x5fb   :  { %18482 = vmatprep.mubr.msk.bf16.mxu0 %vm218_vm0, %v25349_v12 }
 0x5fd   :  { %18875 = vmatmul.mubr.msk.bf16.gmra.mrb[48].mxu1 %vm218_vm0, %v25353_v27 }
 0x5fe   :  { %18878 = vmatprep.mubr.msk.bf16.mxu1 %vm218_vm0, %v25357_v44 }
 0x602   :  { %18483 = vmatmul.mubr.msk.bf16.gmra.mrb[52].mxu0 %vm218_vm0, %v25363_v7 }
 0x603   :  { %18486 = vmatprep.mubr.msk.bf16.mxu0 %vm218_vm0, %v25365_v11 }
 0x605   :  { %18879 = vmatmul.mubr.msk.bf16.gmra.mrb[52].mxu1 %vm218_vm0, %v25369_v6 }
 0x606   :  { %18882 = vmatprep.mubr.msk.bf16.mxu1 %vm218_vm0, %v25373_v2 }
 0x60a   :  { %18487 = vmatmul.mubr.msk.bf16.gmra.mrb[56].mxu0 %vm218_vm0, %v25379_v32 }
 0x60b   :  { %18490 = vmatprep.mubr.msk.bf16.mxu0 %vm218_vm0, %v25381_v42 }
 0x60d   :  { %18883 = vmatmul.mubr.msk.bf16.gmra.mrb[56].mxu1 %vm218_vm0, %v25385_v9 }
 0x60e   :  { %18886 = vmatprep.mubr.msk.bf16.mxu1 %vm218_vm0, %v25389_v40 }
 0x612   :  { %18491 = vmatmul.mubr.msk.bf16.gmra.mrb[60].mxu0 %vm218_vm0, %v25395_v15 }
 0x613   :  { %18494 = vmatprep.mubr.msk.bf16.mxu0 %vm218_vm0, %v25397_v29 }
 0x615   :  { %18887 = vmatmul.mubr.msk.bf16.gmra.mrb[60].mxu1 %vm218_vm0, %v25401_v4 }
 0x616   :  { %18890 = vmatprep.mubr.msk.bf16.mxu1 %vm218_vm0, %v25405_v62 }
 0x61a   :  { %18495 = vmatmul.mubr.msk.bf16.gmra.mrb[64].mxu0 %vm218_vm0, %v25411_v34 }
 0x61b   :  { %18498 = vmatprep.mubr.msk.bf16.mxu0 %vm218_vm0, %v25413_v43 }
 0x61d   :  { %18891 = vmatmul.mubr.msk.bf16.gmra.mrb[64].mxu1 %vm218_vm0, %v25417_v35 }
 0x61e   :  { %18894 = vmatprep.mubr.msk.bf16.mxu1 %vm218_vm0, %v25421_v36 }
 0x622   :  { %18499 = vmatmul.mubr.msk.bf16.gmra.mrb[68].mxu0 %vm218_vm0, %v9502_v55 }
 0x623   :  { %18510 = vmatprep.mubr.msk.bf16.mxu0 %vm218_vm0, %v25265_v25  ;;  %v20318_v25 = vld [vmem:[%s27431_s4 + $0xf0] sm:$0xff]  }
 0x625   :  { %18895 = vmatmul.mubr.msk.bf16.gmra.mrb[68].mxu1 %vm218_vm0, %v12647_v17 }
 0x626   :  { %18906 = vmatprep.mubr.msk.bf16.mxu1 %vm218_vm0, %v25274_v58  ;;  %v20320_v58 = vld [vmem:[%s27431_s4 + $0xf8] sm:$0xff]  }
 0x62a   :  { %18511 = vmatmul.mubr.msk.bf16.vlgmr.msra.gmra.mrb[36].mxu0 %vm218_vm0, %v25270_v53  ;;  %v20319_v53 = vld [vmem:[%s27431_s4 + $0xf0] sm:$0xff]  }
 0x62b   :  { %18514 = vmatprep.mubr.msk.bf16.mxu0 %vm218_vm0, %v25297_v46  ;;  %18547 = vmatpush3.bf16.msra.mxu0 %v25320_v41  ;;  %v25470_v46 = vld [vmem:[%s27431_s4 + $0x100] sm:$0xff]  }
 0x62c   :  { %18548 = vmatprep.subr.bf16.mxu0 %v20316_v28  ;;  %v12981_v41 = vld [vmem:[#allocation3 + $0x27c] sm:$0xff] }
 0x62d   :  { %18907 = vmatmul.mubr.msk.bf16.vlgmr.msra.gmra.mrb[36].mxu1 %vm218_vm0, %v25282_v21  ;;  %v20321_v21 = vld [vmem:[%s27431_s4 + $0xf8] sm:$0xff]  }
 0x62e   :  { %18910 = vmatprep.mubr.msk.bf16.mxu1 %vm218_vm0, %v25306_v5  ;;  %18943 = vmatpush3.bf16.msra.mxu1 %v25327_v63  ;;  %v9837_v5 = vld [vmem:[#allocation3 + $0x134] sm:$0xff]  ;;  %v12982_v63 = vld [vmem:[#allocation3 + $0x284] sm:$0xff] }
 0x62f   :  { %18944 = vmatprep.subr.bf16.mxu1 %v20317_v20  ;;  %18549 = vmatpush3.bf16.msra.mxu0 %v20316_v28  ;;  %v13308_v28 = vld [vmem:[#allocation3 + $0x1ad] sm:$0xff] }
 0x630   :  { %18550 = vmatprep.subr.bf16.mxu0 %v20318_v25 }
 0x632   :  { %18945 = vmatpush3.bf16.msra.mxu1 %v20317_v20  ;;  %18515 = vmatmul.mubr.msk.bf16.gmra.mrb[40].mxu0 %vm218_vm0, %v25302_v45  ;;  %v25477_v45 = vld [vmem:[%s27431_s4 + $0x100] sm:$0xff]   ;;  %v13309_v20 = vld [vmem:[#allocation3 + $0x1b5] sm:$0xff] }
 0x633   :  { %18946 = vmatprep.subr.bf16.mxu1 %v20319_v53  ;;  %18518 = vmatprep.mubr.msk.bf16.mxu0 %vm218_vm0, %v25329_v56 }
 0x634   :  { %18551 = vmatpush3.bf16.msra.mxu0 %v20318_v25  ;;  %v20328_v25 = vld [vmem:[%s27431_s4 + $0x118] sm:$0xff]  }
 0x635   :  { %18911 = vmatmul.mubr.msk.bf16.gmra.mrb[40].mxu1 %vm218_vm0, %v25313_v24  ;;  %18552 = vmatprep.subr.bf16.mxu0 %v20320_v58  ;;  %v9838_v24 = vld [vmem:[#allocation3 + $0x13c] sm:$0xff] }
 0x636   :  { %18914 = vmatprep.mubr.msk.bf16.mxu1 %vm218_vm0, %v25336_v26  ;;  %18947 = vmatpush3.bf16.msra.mxu1 %v20319_v53  ;;  %v9856_v56 = vpack.c.bf16 %v9838_v24, %v9837_v5  ;;  %v10158_v26 = vld [vmem:[#allocation3 + $0x2d] sm:$0xff]  ;;  %v10197_v53 = vpack.c.bf16 %v10166_v8, %v10165_v52  ;;  %v10168_v5 = vld [vmem:[#allocation3 + $0x7d] sm:$0xff]  ;;  %v10169_v24 = vld [vmem:[#allocation3 + $0x85] sm:$0xff] }
 0x637   :  { %18948 = vmatprep.subr.bf16.mxu1 %v20321_v21  ;;  %v13320_v8 = vld [vmem:[#allocation3 + $0x20d] sm:$0xff] }
 0x638   :  { %18553 = vmatpush3.bf16.msra.mxu0 %v20320_v58 }
 0x639   :  { %18590 = vmatprep.subr.bf16.mxu0 %v25470_v46 }
 0x63a   :  { %18949 = vmatpush3.bf16.msra.mxu1 %v20321_v21  ;;  %18519 = vmatmul.mubr.msk.bf16.gmra.mrb[44].mxu0 %vm218_vm0, %v25332_v51  ;;  %v10157_v51 = vld [vmem:[#allocation3 + $0x25] sm:$0xff]  ;;  %v20329_v21 = vld [vmem:[%s27431_s4 + $0x118] sm:$0xff]  }
 0x63b   :  { %18986 = vmatprep.subr.bf16.mxu1 %v25477_v45  ;;  %18522 = vmatprep.mubr.msk.bf16.mxu0 %vm218_vm0, %v25347_v39  ;;  %v13300_v39 = vld [vmem:[#allocation3 + $0x16d] sm:$0xff] }
 0x63d   :  { %18915 = vmatmul.mubr.msk.bf16.gmra.mrb[44].mxu1 %vm218_vm0, %v25341_v31  ;;  %v13000_v31 = vpack.c.bf16 %v12982_v63, %v12981_v41  ;;  %v10170_v41 = vld [vmem:[#allocation3 + $0x8d] sm:$0xff]  ;;  %v13310_v63 = vld [vmem:[#allocation3 + $0x1bd] sm:$0xff] }
 0x63e   :  { %18918 = vmatprep.mubr.msk.bf16.mxu1 %vm218_vm0, %v25353_v27  ;;  %v10193_v27 = vpack.c.bf16 %v10158_v26, %v10157_v51  ;;  %v13312_v26 = vld [vmem:[#allocation3 + $0x1cd] sm:$0xff] }
 0x642   :  { %18523 = vmatmul.mubr.msk.bf16.gmra.mrb[48].mxu0 %vm218_vm0, %v25349_v12  ;;  %v13301_v12 = vld [vmem:[#allocation3 + $0x175] sm:$0xff] }
 0x643   :  { %18526 = vmatprep.mubr.msk.bf16.mxu0 %vm218_vm0, %v25363_v7  ;;  %v10159_v7 = vld [vmem:[#allocation3 + $0x35] sm:$0xff] }
 0x645   :  { %18919 = vmatmul.mubr.msk.bf16.gmra.mrb[48].mxu1 %vm218_vm0, %v25357_v44  ;;  %v13336_v44 = vpack.c.bf16 %v13301_v12, %v13300_v39  ;;  %v10199_v39 = vpack.c.bf16 %v10170_v41, %v10169_v24 }
 0x646   :  { %18922 = vmatprep.mubr.msk.bf16.mxu1 %vm218_vm0, %v25369_v6  ;;  %v10161_v6 = vld [vmem:[#allocation3 + $0x45] sm:$0xff] }
 0x64a   :  { %18527 = vmatmul.mubr.msk.bf16.gmra.mrb[52].mxu0 %vm218_vm0, %v25365_v11  ;;  %v10160_v11 = vld [vmem:[#allocation3 + $0x3d] sm:$0xff] }
 0x64b   :  { %18530 = vmatprep.mubr.msk.bf16.mxu0 %vm218_vm0, %v25379_v32  ;;  %v13302_v32 = vld [vmem:[#allocation3 + $0x17d] sm:$0xff] }
 0x64d   :  { %18923 = vmatmul.mubr.msk.bf16.gmra.mrb[52].mxu1 %vm218_vm0, %v25373_v2  ;;  %v10162_v2 = vld [vmem:[#allocation3 + $0x4d] sm:$0xff] }
 0x64e   :  { %18926 = vmatprep.mubr.msk.bf16.mxu1 %vm218_vm0, %v25385_v9  ;;  %v10194_v9 = vpack.c.bf16 %v10160_v11, %v10159_v7  ;;  %v10172_v7 = vld [vmem:[#allocation3 + $0x9d] sm:$0xff]  ;;  %v10173_v11 = vld [vmem:[#allocation3 + $0xa5] sm:$0xff] }
 0x652   :  { %18531 = vmatmul.mubr.msk.bf16.gmra.mrb[56].mxu0 %vm218_vm0, %v25381_v42  ;;  %v13303_v42 = vld [vmem:[#allocation3 + $0x185] sm:$0xff] }
 0x653   :  { %18534 = vmatprep.mubr.msk.bf16.mxu0 %vm218_vm0, %v25395_v15  ;;  %v13305_v15 = vld [vmem:[#allocation3 + $0x195] sm:$0xff] }
 0x655   :  { %18927 = vmatmul.mubr.msk.bf16.gmra.mrb[56].mxu1 %vm218_vm0, %v25389_v40  ;;  %v13304_v40 = vld [vmem:[#allocation3 + $0x18d] sm:$0xff] }
 0x656   :  { %18930 = vmatprep.mubr.msk.bf16.mxu1 %vm218_vm0, %v25401_v4  ;;  %v10195_v4 = vpack.c.bf16 %v10162_v2, %v10161_v6  ;;  %v13338_v22 = vpack.c.bf16 %v13305_v15, %v13304_v40  ;;  %v10174_v6 = vld [vmem:[#allocation3 + $0xad] sm:$0xff]  ;;  %v13314_v2 = vld [vmem:[#allocation3 + $0x1dd] sm:$0xff]  ;;  %v13317_v40 = vld [vmem:[#allocation3 + $0x1f5] sm:$0xff] }
 0x657   :  { %v10201_v15 = vpack.c.bf16 %v10174_v6, %v10173_v11 }
 0x65a   :  { %18535 = vmatmul.mubr.msk.bf16.gmra.mrb[60].mxu0 %vm218_vm0, %v25397_v29  ;;  %v20324_v29 = vld [vmem:[%s27431_s4 + $0x108] sm:$0xff]  }
 0x65b   :  { %18538 = vmatprep.mubr.msk.bf16.mxu0 %vm218_vm0, %v25411_v34  ;;  %v20325_v34 = vld [vmem:[%s27431_s4 + $0x108] sm:$0xff]  }
 0x65d   :  { %18931 = vmatmul.mubr.msk.bf16.gmra.mrb[60].mxu1 %vm218_vm0, %v25405_v62  ;;  %v13337_v62 = vpack.c.bf16 %v13303_v42, %v13302_v32  ;;  %v13315_v32 = vld [vmem:[#allocation3 + $0x1e5] sm:$0xff] }
 0x65e   :  { %18934 = vmatprep.mubr.msk.bf16.mxu1 %vm218_vm0, %v25417_v35  ;;  %v10163_v35 = vld [vmem:[#allocation3 + $0x55] sm:$0xff] }
 0x662   :  { %18539 = vmatmul.mubr.msk.bf16.gmra.mrb[64].mxu0 %vm218_vm0, %v25413_v43  ;;  %v20326_v43 = vld [vmem:[%s27431_s4 + $0x110] sm:$0xff]  }
 0x663   :  { %18542 = vmatprep.mubr.msk.bf16.mxu0 %vm218_vm0, %v9502_v55  ;;  %v13307_v55 = vld [vmem:[#allocation3 + $0x1a5] sm:$0xff] }
 0x664   :  { %v13339_v58 = vpack.c.bf16 %v13307_v55, %v13306_v18 }
 0x665   :  { %18935 = vmatmul.mubr.msk.bf16.gmra.mrb[64].mxu1 %vm218_vm0, %v25421_v36  ;;  %v10164_v36 = vld [vmem:[#allocation3 + $0x5d] sm:$0xff] }
 0x666   :  { %18938 = vmatprep.mubr.msk.bf16.mxu1 %vm218_vm0, %v12647_v17  ;;  %v10196_v17 = vpack.c.bf16 %v10164_v36, %v10163_v35  ;;  %v13318_v35 = vld [vmem:[#allocation3 + $0x1fd] sm:$0xff]  ;;  %v13319_v36 = vld [vmem:[#allocation3 + $0x205] sm:$0xff] }
 0x667   :  { %v13345_v55 = vpack.c.bf16 %v13319_v36, %v13318_v35  ;;  %v10191_v36 = vld [vmem:[#allocation3 + $0x135] sm:$0xff] }
 0x66a   :  { %18543 = vmatmul.mubr.msk.bf16.gmra.mrb[68].mxu0 %vm218_vm0, %v9856_v56  ;;  %v13311_v56 = vld [vmem:[#allocation3 + $0x1c5] sm:$0xff] }
 0x66b   :  { %18554 = vmatprep.mubr.msk.bf16.mxu0 %vm218_vm0, %v10193_v27  ;;  %v13341_v12 = vpack.c.bf16 %v13311_v56, %v13310_v63  ;;  %v10183_v56 = vld [vmem:[#allocation3 + $0xf5] sm:$0xff] }
 0x66d   :  { %18939 = vmatmul.mubr.msk.bf16.gmra.mrb[68].mxu1 %vm218_vm0, %v13000_v31  ;;  %v13313_v31 = vld [vmem:[#allocation3 + $0x1d5] sm:$0xff] }
 0x66e   :  { %18950 = vmatprep.mubr.msk.bf16.mxu1 %vm218_vm0, %v13336_v44  ;;  %v13342_v27 = vpack.c.bf16 %v13313_v31, %v13312_v26  ;;  %v10171_v44 = vld [vmem:[#allocation3 + $0x95] sm:$0xff]  ;;  %v10185_v26 = vld [vmem:[#allocation3 + $0x105] sm:$0xff]  ;;  %v10186_v31 = vld [vmem:[#allocation3 + $0x10d] sm:$0xff] }
 0x66f   :  { %v10200_v42 = vpack.c.bf16 %v10172_v7, %v10171_v44  ;;  %v13328_v44 = vld [vmem:[#allocation3 + $0x24d] sm:$0xff]  ;;  %v13329_v7 = vld [vmem:[#allocation3 + $0x255] sm:$0xff]  ;;  %v10207_v11 = vpack.c.bf16 %v10186_v31, %v10185_v26 }
 0x672   :  { %18555 = vmatmul.mubr.msk.bf16.vlgmr.msra.gmra.mrb[36].mxu0 %vm218_vm0, %v10194_v9  ;;  %v13316_v9 = vld [vmem:[#allocation3 + $0x1ed] sm:$0xff] }
 0x673   :  { %18558 = vmatprep.mubr.msk.bf16.mxu0 %vm218_vm0, %v10195_v4  ;;  %18591 = vmatpush3.bf16.msra.mxu0 %v25470_v46  ;;  %v13340_v46 = vpack.c.bf16 %v13309_v20, %v13308_v28  ;;  %v13344_v4 = vpack.c.bf16 %v13317_v40, %v13316_v9  ;;  %v10179_v28 = vld [vmem:[#allocation3 + $0xd5] sm:$0xff]  ;;  %v10180_v20 = vld [vmem:[#allocation3 + $0xdd] sm:$0xff]  ;;  %v10189_v9 = vld [vmem:[#allocation3 + $0x125] sm:$0xff] }
 0x674   :  { %18592 = vmatprep.subr.bf16.mxu0 %v20324_v29  ;;  %v10190_v40 = vld [vmem:[#allocation3 + $0x12d] sm:$0xff] }
 0x675   :  { %18951 = vmatmul.mubr.msk.bf16.vlgmr.msra.gmra.mrb[36].mxu1 %vm218_vm0, %v13337_v62  ;;  %v10175_v62 = vld [vmem:[#allocation3 + $0xb5] sm:$0xff] }
 0x676   :  { %18954 = vmatprep.mubr.msk.bf16.mxu1 %vm218_vm0, %v13338_v22  ;;  %18987 = vmatpush3.bf16.msra.mxu1 %v25477_v45  ;;  %v10167_v45 = vld [vmem:[#allocation3 + $0x75] sm:$0xff]  ;;  %v10177_v22 = vld [vmem:[#allocation3 + $0xc5] sm:$0xff] }
 0x677   :  { %18988 = vmatprep.subr.bf16.mxu1 %v20325_v34  ;;  %18593 = vmatpush3.bf16.msra.mxu0 %v20324_v29  ;;  %v10198_v51 = vpack.c.bf16 %v10168_v5, %v10167_v45  ;;  %v13343_v29 = vpack.c.bf16 %v13315_v32, %v13314_v2  ;;  %v13324_v45 = vld [vmem:[#allocation3 + $0x22d] sm:$0xff]  ;;  %v13325_v5 = vld [vmem:[#allocation3 + $0x235] sm:$0xff]  ;;  %v13350_v2 = vpack.c.bf16 %v13329_v7, %v13328_v44 }
 0x678   :  { %18594 = vmatprep.subr.bf16.mxu0 %v20326_v43  ;;  %v13348_v63 = vpack.c.bf16 %v13325_v5, %v13324_v45  ;;  %v10187_v32 = vld [vmem:[#allocation3 + $0x115] sm:$0xff]  ;;  %v10515_v45 = vld [vmem:[#allocation3 + $0x46] sm:$0xff] }
 0x679   :  { %v10516_v5 = vld [vmem:[#allocation3 + $0x4e] sm:$0xff]  ;;  %v10519_v44 = vld [vmem:[#allocation3 + $0x66] sm:$0xff] }
 0x67a   :  { %18989 = vmatpush3.bf16.msra.mxu1 %v20325_v34  ;;  %18559 = vmatmul.mubr.msk.bf16.gmra.mrb[40].mxu0 %vm218_vm0, %v10196_v17  ;;  %v10176_v34 = vld [vmem:[#allocation3 + $0xbd] sm:$0xff]  ;;  %v10549_v26 = vpack.c.bf16 %v10516_v5, %v10515_v45  ;;  %v10520_v7 = vld [vmem:[#allocation3 + $0x6e] sm:$0xff] }
 0x67b   :  { %18990 = vmatprep.subr.bf16.mxu1 %v20327_v50  ;;  %18562 = vmatprep.mubr.msk.bf16.mxu0 %vm218_vm0, %v10197_v53  ;;  %v10202_v52 = vpack.c.bf16 %v10176_v34, %v10175_v62  ;;  %v10182_v53 = vld [vmem:[#allocation3 + $0xed] sm:$0xff]  ;;  %v13333_v34 = vld [vmem:[#allocation3 + $0x275] sm:$0xff] }
 0x67c   :  { %18595 = vmatpush3.bf16.msra.mxu0 %v20326_v43  ;;  %v10178_v43 = vld [vmem:[#allocation3 + $0xcd] sm:$0xff] }
 0x67d   :  { %18955 = vmatmul.mubr.msk.bf16.gmra.mrb[40].mxu1 %vm218_vm0, %v13339_v58  ;;  %18596 = vmatprep.subr.bf16.mxu0 %v20328_v25  ;;  %v10203_v18 = vpack.c.bf16 %v10178_v43, %v10177_v22  ;;  %v13322_v58 = vld [vmem:[#allocation3 + $0x21d] sm:$0xff]  ;;  %v13332_v62 = vld [vmem:[#allocation3 + $0x26d] sm:$0xff]  ;;  %v10209_v22 = vpack.c.bf16 %v10190_v40, %v10189_v9  ;;  %v10551_v9 = vpack.c.bf16 %v10520_v7, %v10519_v44 }
 0x67e   :  { %18958 = vmatprep.mubr.msk.bf16.mxu1 %vm218_vm0, %v13340_v46  ;;  %18991 = vmatpush3.bf16.msra.mxu1 %v20327_v50  ;;  %v13321_v50 = vld [vmem:[#allocation3 + $0x215] sm:$0xff]  ;;  %v10204_v46 = vpack.c.bf16 %v10180_v20, %v10179_v28  ;;  %v13352_v35 = vpack.c.bf16 %v13333_v34, %v13332_v62  ;;  %v10523_v62 = vld [vmem:[#allocation3 + $0x86] sm:$0xff] }
 0x67f   :  { %18992 = vmatprep.subr.bf16.mxu1 %v20329_v21  ;;  %v13346_v17 = vpack.c.bf16 %v13321_v50, %v13320_v8  ;;  %v13334_v8 = vld [vmem:[#allocation3 + $0x27d] sm:$0xff]  ;;  %v13335_v50 = vld [vmem:[#allocation3 + $0x285] sm:$0xff]  ;;  %v13653_v20 = vld [vmem:[#allocation3 + $0x16e] sm:$0xff] }
 0x680   :  { %18597 = vmatpush3.bf16.msra.mxu0 %v20328_v25  ;;  %v10181_v25 = vld [vmem:[#allocation3 + $0xe5] sm:$0xff]  ;;  %v13353_v28 = vpack.c.bf16 %v13335_v50, %v13334_v8  ;;  %v10524_v34 = vld [vmem:[#allocation3 + $0x8e] sm:$0xff] }
 0x681   :  { %v10205_v24 = vpack.c.bf16 %v10182_v53, %v10181_v25  ;;  %v13654_v25 = vld [vmem:[#allocation3 + $0x176] sm:$0xff]  ;;  %v10553_v8 = vpack.c.bf16 %v10524_v34, %v10523_v62 }
 0x682   :  { %18993 = vmatpush3.bf16.msra.mxu1 %v20329_v21  ;;  %18563 = vmatmul.mubr.msk.bf16.gmra.mrb[44].mxu0 %vm218_vm0, %v10198_v51  ;;  %v13323_v21 = vld [vmem:[#allocation3 + $0x225] sm:$0xff]  ;;  %v10184_v51 = vld [vmem:[#allocation3 + $0xfd] sm:$0xff] }
 0x683   :  { %18566 = vmatprep.mubr.msk.bf16.mxu0 %vm218_vm0, %v10199_v39  ;;  %v13347_v41 = vpack.c.bf16 %v13323_v21, %v13322_v58  ;;  %v13326_v39 = vld [vmem:[#allocation3 + $0x23d] sm:$0xff]  ;;  %v13689_v58 = vpack.c.bf16 %v13654_v25, %v13653_v20  ;;  %v10528_v20 = vld [vmem:[#allocation3 + $0xae] sm:$0xff] }
 0x684   :  { %v10513_v21 = vld [vmem:[#allocation3 + $0x36] sm:$0xff]  ;;  %v13667_v25 = vld [vmem:[#allocation3 + $0x1de] sm:$0xff] }
 0x685   :  { %18959 = vmatmul.mubr.msk.bf16.gmra.mrb[44].mxu1 %vm218_vm0, %v13341_v12  ;;  %v13327_v12 = vld [vmem:[#allocation3 + $0x245] sm:$0xff] }
 0x686   :  { %18962 = vmatprep.mubr.msk.bf16.mxu1 %vm218_vm0, %v13342_v27  ;;  %v10206_v27 = vpack.c.bf16 %v10184_v51, %v10183_v56  ;;  %v13349_v6 = vpack.c.bf16 %v13327_v12, %v13326_v39  ;;  %v13657_v56 = vld [vmem:[#allocation3 + $0x18e] sm:$0xff]  ;;  %v13658_v51 = vld [vmem:[#allocation3 + $0x196] sm:$0xff] }
 0x687   :  { %v13691_v39 = vpack.c.bf16 %v13658_v51, %v13657_v56  ;;  %v10517_v12 = vld [vmem:[#allocation3 + $0x56] sm:$0xff]  ;;  %v10531_v56 = vld [vmem:[#allocation3 + $0xc6] sm:$0xff]  ;;  %v10532_v51 = vld [vmem:[#allocation3 + $0xce] sm:$0xff] }
 0x688   :  { %v10557_v44 = vpack.c.bf16 %v10532_v51, %v10531_v56 }
 0x68a   :  { %18567 = vmatmul.mubr.msk.bf16.gmra.mrb[48].mxu0 %vm218_vm0, %v10200_v42  ;;  %v10188_v42 = vld [vmem:[#allocation3 + $0x11d] sm:$0xff] }
 0x68b   :  { %18570 = vmatprep.mubr.msk.bf16.mxu0 %vm218_vm0, %v10201_v15  ;;  %v13330_v15 = vld [vmem:[#allocation3 + $0x25d] sm:$0xff] }
 0x68d   :  { %18963 = vmatmul.mubr.msk.bf16.gmra.mrb[48].mxu1 %vm218_vm0, %v13343_v29  ;;  %v13331_v29 = vld [vmem:[#allocation3 + $0x265] sm:$0xff] }
 0x68e   :  { %18966 = vmatprep.mubr.msk.bf16.mxu1 %vm218_vm0, %v13344_v4  ;;  %v10208_v4 = vpack.c.bf16 %v10188_v42, %v10187_v32  ;;  %v13351_v43 = vpack.c.bf16 %v13331_v29, %v13330_v15  ;;  %v13661_v32 = vld [vmem:[#allocation3 + $0x1ae] sm:$0xff]  ;;  %v13662_v42 = vld [vmem:[#allocation3 + $0x1b6] sm:$0xff] }
 0x68f   :  { %v13693_v15 = vpack.c.bf16 %v13662_v42, %v13661_v32  ;;  %v10521_v29 = vld [vmem:[#allocation3 + $0x76] sm:$0xff]  ;;  %v10535_v32 = vld [vmem:[#allocation3 + $0xe6] sm:$0xff]  ;;  %v10536_v42 = vld [vmem:[#allocation3 + $0xee] sm:$0xff] }
 0x690   :  { %v10559_v62 = vpack.c.bf16 %v10536_v42, %v10535_v32 }
 0x692   :  { %18571 = vmatmul.mubr.msk.bf16.gmra.mrb[52].mxu0 %vm218_vm0, %v10202_v52  ;;  %v10192_v52 = vld [vmem:[#allocation3 + $0x13d] sm:$0xff] }
 0x693   :  { %18574 = vmatprep.mubr.msk.bf16.mxu0 %vm218_vm0, %v10203_v18  ;;  %v10210_v18 = vpack.c.bf16 %v10192_v52, %v10191_v36  ;;  %v13665_v36 = vld [vmem:[#allocation3 + $0x1ce] sm:$0xff]  ;;  %v13666_v52 = vld [vmem:[#allocation3 + $0x1d6] sm:$0xff] }
 0x695   :  { %18967 = vmatmul.mubr.msk.bf16.gmra.mrb[52].mxu1 %vm218_vm0, %v13345_v55  ;;  %v10511_v55 = vld [vmem:[#allocation3 + $0x26] sm:$0xff] }
 0x696   :  { %18970 = vmatprep.mubr.msk.bf16.mxu1 %vm218_vm0, %v13346_v17  ;;  %v10512_v17 = vld [vmem:[#allocation3 + $0x2e] sm:$0xff] }
 0x697   :  { %v10547_v53 = vpack.c.bf16 %v10512_v17, %v10511_v55  ;;  %v10525_v55 = vld [vmem:[#allocation3 + $0x96] sm:$0xff]  ;;  %v10526_v17 = vld [vmem:[#allocation3 + $0x9e] sm:$0xff] }
 0x69a   :  { %18575 = vmatmul.mubr.msk.bf16.gmra.mrb[56].mxu0 %vm218_vm0, %v10204_v46  ;;  %v10514_v46 = vld [vmem:[#allocation3 + $0x3e] sm:$0xff] }
 0x69b   :  { %18578 = vmatprep.mubr.msk.bf16.mxu0 %vm218_vm0, %v10205_v24  ;;  %v13655_v24 = vld [vmem:[#allocation3 + $0x17e] sm:$0xff] }
 0x69d   :  { %18971 = vmatmul.mubr.msk.bf16.gmra.mrb[56].mxu1 %vm218_vm0, %v13347_v41  ;;  %v13656_v41 = vld [vmem:[#allocation3 + $0x186] sm:$0xff] }
 0x69e   :  { %18974 = vmatprep.mubr.msk.bf16.mxu1 %vm218_vm0, %v13348_v63  ;;  %v10548_v63 = vpack.c.bf16 %v10514_v46, %v10513_v21  ;;  %v13690_v31 = vpack.c.bf16 %v13656_v41, %v13655_v24  ;;  %v13669_v21 = vld [vmem:[#allocation3 + $0x1ee] sm:$0xff]  ;;  %v13670_v46 = vld [vmem:[#allocation3 + $0x1f6] sm:$0xff] }
 0x69f   :  { %v13697_v24 = vpack.c.bf16 %v13670_v46, %v13669_v21  ;;  %v10529_v41 = vld [vmem:[#allocation3 + $0xb6] sm:$0xff]  ;;  %v10543_v21 = vld [vmem:[#allocation3 + $0x126] sm:$0xff]  ;;  %v10544_v46 = vld [vmem:[#allocation3 + $0x12e] sm:$0xff] }
 0x6a0   :  { %v10563_v56 = vpack.c.bf16 %v10544_v46, %v10543_v21 }
 0x6a2   :  { %18579 = vmatmul.mubr.msk.bf16.gmra.mrb[60].mxu0 %vm218_vm0, %v10206_v27  ;;  %v10518_v27 = vld [vmem:[#allocation3 + $0x5e] sm:$0xff] }
 0x6a3   :  { %18582 = vmatprep.mubr.msk.bf16.mxu0 %vm218_vm0, %v10207_v11  ;;  %v13659_v11 = vld [vmem:[#allocation3 + $0x19e] sm:$0xff] }
 0x6a5   :  { %18975 = vmatmul.mubr.msk.bf16.gmra.mrb[60].mxu1 %vm218_vm0, %v13349_v6  ;;  %v13660_v6 = vld [vmem:[#allocation3 + $0x1a6] sm:$0xff] }
 0x6a6   :  { %18978 = vmatprep.mubr.msk.bf16.mxu1 %vm218_vm0, %v13350_v2  ;;  %v10550_v2 = vpack.c.bf16 %v10518_v27, %v10517_v12  ;;  %v13692_v40 = vpack.c.bf16 %v13660_v6, %v13659_v11  ;;  %v13673_v12 = vld [vmem:[#allocation3 + $0x20e] sm:$0xff]  ;;  %v13674_v27 = vld [vmem:[#allocation3 + $0x216] sm:$0xff] }
 0x6a7   :  { %v13699_v11 = vpack.c.bf16 %v13674_v27, %v13673_v12  ;;  %v10533_v6 = vld [vmem:[#allocation3 + $0xd6] sm:$0xff]  ;;  %v13687_v12 = vld [vmem:[#allocation3 + $0x27e] sm:$0xff]  ;;  %v13688_v27 = vld [vmem:[#allocation3 + $0x286] sm:$0xff] }
 0x6aa   :  { %18583 = vmatmul.mubr.msk.bf16.gmra.mrb[64].mxu0 %vm218_vm0, %v10208_v4  ;;  %v10522_v4 = vld [vmem:[#allocation3 + $0x7e] sm:$0xff] }
 0x6ab   :  { %18586 = vmatprep.mubr.msk.bf16.mxu0 %vm218_vm0, %v10209_v22  ;;  %v13663_v22 = vld [vmem:[#allocation3 + $0x1be] sm:$0xff] }
 0x6ad   :  { %18979 = vmatmul.mubr.msk.bf16.gmra.mrb[64].mxu1 %vm218_vm0, %v13351_v43  ;;  %v13664_v43 = vld [vmem:[#allocation3 + $0x1c6] sm:$0xff] }
 0x6ae   :  { %18982 = vmatprep.mubr.msk.bf16.mxu1 %vm218_vm0, %v13352_v35  ;;  %v10552_v35 = vpack.c.bf16 %v10522_v4, %v10521_v29  ;;  %v13694_v50 = vpack.c.bf16 %v13664_v43, %v13663_v22  ;;  %v13677_v29 = vld [vmem:[#allocation3 + $0x22e] sm:$0xff]  ;;  %v13678_v4 = vld [vmem:[#allocation3 + $0x236] sm:$0xff] }
 0x6af   :  { %v13701_v22 = vpack.c.bf16 %v13678_v4, %v13677_v29  ;;  %v10537_v43 = vld [vmem:[#allocation3 + $0xf6] sm:$0xff] }
 0x6b2   :  { %18587 = vmatmul.mubr.msk.bf16.gmra.mrb[68].mxu0 %vm218_vm0, %v10210_v18  ;;  %v13695_v18 = vpack.c.bf16 %v13666_v52, %v13665_v36  ;;  %v10539_v36 = vld [vmem:[#allocation3 + $0x106] sm:$0xff]  ;;  %v10540_v52 = vld [vmem:[#allocation3 + $0x10e] sm:$0xff] }
 0x6b3   :  { %18598 = vmatprep.mubr.msk.bf16.mxu0 %vm218_vm0, %v10547_v53  ;;  %v13668_v53 = vld [vmem:[#allocation3 + $0x1e6] sm:$0xff] }
 0x6b4   :  { %v13696_v5 = vpack.c.bf16 %v13668_v53, %v13667_v25  ;;  %v10541_v53 = vld [vmem:[#allocation3 + $0x116] sm:$0xff] }
 0x6b5   :  { %18983 = vmatmul.mubr.msk.bf16.gmra.mrb[68].mxu1 %vm218_vm0, %v13353_v28  ;;  %v10527_v28 = vld [vmem:[#allocation3 + $0xa6] sm:$0xff] }
 0x6b6   :  { %18994 = vmatprep.mubr.msk.bf16.mxu1 %vm218_vm0, %v13689_v58  ;;  %v10554_v58 = vpack.c.bf16 %v10526_v17, %v10525_v55  ;;  %v10555_v45 = vpack.c.bf16 %v10528_v20, %v10527_v28  ;;  %v13681_v55 = vld [vmem:[#allocation3 + $0x24e] sm:$0xff]  ;;  %v13682_v17 = vld [vmem:[#allocation3 + $0x256] sm:$0xff]  ;;  %v10561_v28 = vpack.c.bf16 %v10540_v52, %v10539_v36 }
 0x6b7   :  { %v13703_v25 = vpack.c.bf16 %v13682_v17, %v13681_v55 }
 0x6ba   :  { %18599 = vmatmul.mubr.msk.bf16.vlgmr.msra.gmra.mrb[36].mxu0 %vm218_vm0, %v10548_v63  ;;  %v10530_v63 = vld [vmem:[#allocation3 + $0xbe] sm:$0xff] }
 0x6bb   :  { %18602 = vmatprep.mubr.msk.bf16.mxu0 %vm218_vm0, %v10549_v26  ;;  %v13671_v26 = vld [vmem:[#allocation3 + $0x1fe] sm:$0xff] }
 0x6bd   :  { %18995 = vmatmul.mubr.msk.bf16.vlgmr.msra.gmra.mrb[36].mxu1 %vm218_vm0, %v13690_v31  ;;  %v13672_v31 = vld [vmem:[#allocation3 + $0x206] sm:$0xff] }
 0x6be   :  { %18998 = vmatprep.mubr.msk.bf16.mxu1 %vm218_vm0, %v13691_v39  ;;  %v10556_v39 = vpack.c.bf16 %v10530_v63, %v10529_v41  ;;  %v13698_v7 = vpack.c.bf16 %v13672_v31, %v13671_v26  ;;  %v13685_v41 = vld [vmem:[#allocation3 + $0x26e] sm:$0xff]  ;;  %v13686_v63 = vld [vmem:[#allocation3 + $0x276] sm:$0xff] }
 0x6bf   :  { %v13705_v26 = vpack.c.bf16 %v13686_v63, %v13685_v41  ;;  %v10545_v31 = vld [vmem:[#allocation3 + $0x136] sm:$0xff] }
 0x6c2   :  { %18603 = vmatmul.mubr.msk.bf16.gmra.mrb[40].mxu0 %vm218_vm0, %v10550_v2  ;;  %v10534_v2 = vld [vmem:[#allocation3 + $0xde] sm:$0xff] }
 0x6c3   :  { %18606 = vmatprep.mubr.msk.bf16.mxu0 %vm218_vm0, %v10551_v9  ;;  %v13675_v9 = vld [vmem:[#allocation3 + $0x21e] sm:$0xff] }
 0x6c5   :  { %18999 = vmatmul.mubr.msk.bf16.gmra.mrb[40].mxu1 %vm218_vm0, %v13692_v40  ;;  %v13676_v40 = vld [vmem:[#allocation3 + $0x226] sm:$0xff] }
 0x6c6   :  { %19002 = vmatprep.mubr.msk.bf16.mxu1 %vm218_vm0, %v13693_v15  ;;  %v10558_v15 = vpack.c.bf16 %v10534_v2, %v10533_v6  ;;  %v13700_v34 = vpack.c.bf16 %v13676_v40, %v13675_v9 }
 0x6ca   :  { %18607 = vmatmul.mubr.msk.bf16.gmra.mrb[44].mxu0 %vm218_vm0, %v10552_v35  ;;  %v10538_v35 = vld [vmem:[#allocation3 + $0xfe] sm:$0xff] }
 0x6cb   :  { %18610 = vmatprep.mubr.msk.bf16.mxu0 %vm218_vm0, %v10553_v8  ;;  %v13679_v8 = vld [vmem:[#allocation3 + $0x23e] sm:$0xff] }
 0x6cd   :  { %19003 = vmatmul.mubr.msk.bf16.gmra.mrb[44].mxu1 %vm218_vm0, %v13694_v50  ;;  %v13680_v50 = vld [vmem:[#allocation3 + $0x246] sm:$0xff] }
 0x6ce   :  { %19006 = vmatprep.mubr.msk.bf16.mxu1 %vm218_vm0, %v13695_v18  ;;  %v10560_v18 = vpack.c.bf16 %v10538_v35, %v10537_v43  ;;  %v13702_v20 = vpack.c.bf16 %v13680_v50, %v13679_v8 }
 0x6d2   :  { %18611 = vmatmul.mubr.msk.bf16.gmra.mrb[48].mxu0 %vm218_vm0, %v10554_v58  ;;  %v10542_v58 = vld [vmem:[#allocation3 + $0x11e] sm:$0xff] }
 0x6d3   :  { %18614 = vmatprep.mubr.msk.bf16.mxu0 %vm218_vm0, %v10555_v45  ;;  %v13683_v45 = vld [vmem:[#allocation3 + $0x25e] sm:$0xff] }
 0x6d5   :  { %19007 = vmatmul.mubr.msk.bf16.gmra.mrb[48].mxu1 %vm218_vm0, %v13696_v5  ;;  %v13684_v5 = vld [vmem:[#allocation3 + $0x266] sm:$0xff] }
 0x6d6   :  { %19010 = vmatprep.mubr.msk.bf16.mxu1 %vm218_vm0, %v13697_v24  ;;  %v10562_v24 = vpack.c.bf16 %v10542_v58, %v10541_v53  ;;  %v13704_v51 = vpack.c.bf16 %v13684_v5, %v13683_v45 }
 0x6da   :  { %18615 = vmatmul.mubr.msk.bf16.gmra.mrb[52].mxu0 %vm218_vm0, %v10556_v39  ;;  %v10546_v39 = vld [vmem:[#allocation3 + $0x13e] sm:$0xff] }
 0x6db   :  { %18618 = vmatprep.mubr.msk.bf16.mxu0 %vm218_vm0, %v10557_v44  ;;  %v10564_v44 = vpack.c.bf16 %v10546_v39, %v10545_v31 }
 0x6dd   :  { %19011 = vmatmul.mubr.msk.bf16.gmra.mrb[52].mxu1 %vm218_vm0, %v13698_v7  ;;  %v13706_v7 = vpack.c.bf16 %v13688_v27, %v13687_v12 }
 0x6de   :  { %19014 = vmatprep.mubr.msk.bf16.mxu1 %vm218_vm0, %v13699_v11 }
 0x6e2   :  { %18619 = vmatmul.mubr.msk.bf16.gmra.mrb[56].mxu0 %vm218_vm0, %v10558_v15 }
 0x6e3   :  { %18622 = vmatprep.mubr.msk.bf16.mxu0 %vm218_vm0, %v10559_v62 }
 0x6e5   :  { %19015 = vmatmul.mubr.msk.bf16.gmra.mrb[56].mxu1 %vm218_vm0, %v13700_v34 }
 0x6e6   :  { %19018 = vmatprep.mubr.msk.bf16.mxu1 %vm218_vm0, %v13701_v22 }
 0x6ea   :  { %18623 = vmatmul.mubr.msk.bf16.gmra.mrb[60].mxu0 %vm218_vm0, %v10560_v18 }
 0x6eb   :  { %18626 = vmatprep.mubr.msk.bf16.mxu0 %vm218_vm0, %v10561_v28 }
 0x6ed   :  { %19019 = vmatmul.mubr.msk.bf16.gmra.mrb[60].mxu1 %vm218_vm0, %v13702_v20 }
 0x6ee   :  { %19022 = vmatprep.mubr.msk.bf16.mxu1 %vm218_vm0, %v13703_v25 }
 0x6f2   :  { %18627 = vmatmul.mubr.msk.bf16.gmra.mrb[64].mxu0 %vm218_vm0, %v10562_v24 }
 0x6f3   :  { %18630 = vmatprep.mubr.msk.bf16.mxu0 %vm218_vm0, %v10563_v56 }
 0x6f5   :  { %19023 = vmatmul.mubr.msk.bf16.gmra.mrb[64].mxu1 %vm218_vm0, %v13704_v51 }
 0x6f6   :  { %19026 = vmatprep.mubr.msk.bf16.mxu1 %vm218_vm0, %v13705_v26 }
 0x6fa   :  { %18631 = vmatmul.mubr.msk.bf16.gmra.mrb[68].mxu0 %vm218_vm0, %v10564_v44 }
 0x6fd   :  { %19027 = vmatmul.mubr.msk.bf16.gmra.mrb[68].mxu1 %vm218_vm0, %v13706_v7 }
 0x78d   :  { %v18600_v11 = vpop.f32.mrb[36].mxu0 }
 0x78e   :  { %10867 = vst.msk [vmem:[#allocation4 + $0x10] sm:$0xff] %vm218_vm0, %v18600_v11  ;;  %v10686_v6 = vpop.f32.mrb[37].mxu0 }
 0x78f   :  { %10865 = vst.msk [vmem:[#allocation4] sm:$0xff] %vm218_vm0, %v10686_v6  ;;  %v18601_v32 = vpop.f32.mrb[38].mxu0 }
 0x790   :  { %v18996_v2 = vpop.f32.mrb[36].mxu1  ;;  %10868 = vst.msk [vmem:[#allocation4 + $0x18] sm:$0xff] %vm218_vm0, %v18601_v32  ;;  %v10689_v9 = vpop.f32.mrb[39].mxu0 }
 0x791   :  { %14009 = vst.msk [vmem:[#allocation4 + $0x130] sm:$0xff] %vm218_vm0, %v18996_v2  ;;  %v13827_v42 = vpop.f32.mrb[37].mxu1  ;;  %10866 = vst.msk [vmem:[#allocation4 + $0x8] sm:$0xff] %vm218_vm0, %v10689_v9 }
 0x792   :  { %14007 = vst.msk [vmem:[#allocation4 + $0x120] sm:$0xff] %vm218_vm0, %v13827_v42  ;;  %v18997_v40 = vpop.f32.mrb[38].mxu1 }
 0x793   :  { %14010 = vst.msk [vmem:[#allocation4 + $0x138] sm:$0xff] %vm218_vm0, %v18997_v40  ;;  %v13830_v15 = vpop.f32.mrb[39].mxu1 }
 0x794   :  { %14008 = vst.msk [vmem:[#allocation4 + $0x128] sm:$0xff] %vm218_vm0, %v13830_v15 }
 0x795   :  { %v18604_v29 = vpop.f32.mrb[40].mxu0  ;;  %v25629_v4 = vld [vmem:[#allocation4 + $0x10] sm:$0xff] }
 0x796   :  { %v25631_v62 = vld [vmem:[#allocation4] sm:$0xff]  ;;  %10871 = vst.msk [vmem:[#allocation4 + $0x30] sm:$0xff] %vm218_vm0, %v18604_v29  ;;  %v10702_v34 = vpop.f32.mrb[41].mxu0  ;;  %v14081_v17 = vmul.f32 %v25629_v4, %v27786_v57 }
 0x797   :  { %v14079_v43 = vmul.f32 %v25631_v62, %v27784_v54  ;;  %10869 = vst.msk [vmem:[#allocation4 + $0x20] sm:$0xff] %vm218_vm0, %v10702_v34  ;;  %v18605_v36 = vpop.f32.mrb[42].mxu0  ;;  %v25639_v8 = vld [vmem:[#allocation4 + $0x18] sm:$0xff] }
 0x798   :  { %v14195_v22 = vld [vmem:[#allocation4 + $0x130] sm:$0xff]  ;;  %v19000_v35 = vpop.f32.mrb[40].mxu1  ;;  %v25641_v50 = vld [vmem:[#allocation4 + $0x8] sm:$0xff]  ;;  %10872 = vst.msk [vmem:[#allocation4 + $0x38] sm:$0xff] %vm218_vm0, %v18605_v36  ;;  %v10705_v55 = vpop.f32.mrb[43].mxu0  ;;  %v14082_v5 = vmul.f32 %v25639_v8, %v27787_v0  ;;  %v14118_v51 = vsel %vm218_vm0, %v14081_v17, 0.0 }
 0x799   :  { %v25637_v52 = vld [vmem:[#allocation4 + $0x120] sm:$0xff]  ;;  %14013 = vst.msk [vmem:[#allocation4 + $0x150] sm:$0xff] %vm218_vm0, %v19000_v35  ;;  %v13843_v18 = vpop.f32.mrb[41].mxu1  ;;  %v14080_v25 = vmul.f32 %v25641_v50, %v27785_v59  ;;  %10870 = vst.msk [vmem:[#allocation4 + $0x28] sm:$0xff] %vm218_vm0, %v10705_v55  ;;  %v14231_v58 = vmul.f32 %v14195_v22, %v27786_v57  ;;  %v14115_v45 = vsel %vm218_vm0, %v14079_v43, 0.0 }
 0x79a   :  { %27867 = vst [vmem:[#allocation5_spill] sm:$0xff] %v25637_v52  ;;  %v14229_v28 = vmul.f32 %v25637_v52, %v27784_v54  ;;  %v14196_v20 = vld [vmem:[#allocation4 + $0x138] sm:$0xff]  ;;  %14011 = vst.msk [vmem:[#allocation4 + $0x140] sm:$0xff] %vm218_vm0, %v13843_v18  ;;  %v19001_v53 = vpop.f32.mrb[42].mxu1  ;;  %v14120_v2 = vsel %vm218_vm0, %v14082_v5, 0.0 }
 0x79b   :  { %v25654_v21 = vld [vmem:[#allocation4 + $0x128] sm:$0xff]  ;;  %14014 = vst.msk [vmem:[#allocation4 + $0x158] sm:$0xff] %vm218_vm0, %v19001_v53  ;;  %v13846_v46 = vpop.f32.mrb[43].mxu1  ;;  %v14116_v24 = vsel %vm218_vm0, %v14080_v25, 0.0  ;;  %v14232_v63 = vmul.f32 %v14196_v20, %v27787_v0  ;;  %v14268_v6 = vsel %vm218_vm0, %v14231_v58, 0.0 }
 0x79c   :  { %27868 = vst [vmem:[#allocation7_spill] sm:$0xff] %v25654_v21  ;;  %v14230_v41 = vmul.f32 %v25654_v21, %v27785_v59  ;;  %14012 = vst.msk [vmem:[#allocation4 + $0x148] sm:$0xff] %vm218_vm0, %v13846_v46  ;;  %v14117_v56 = vadd.f32 %v14116_v24, %v14115_v45  ;;  %v14265_v26 = vsel %vm218_vm0, %v14229_v28, 0.0 }
 0x79d   :  { %v18608_v39 = vpop.f32.mrb[44].mxu0  ;;  %v25668_v44 = vld [vmem:[#allocation4 + $0x30] sm:$0xff]  ;;  %v14270_v15 = vsel %vm218_vm0, %v14232_v63, 0.0 }
 0x79e   :  { %v14266_v31 = vsel %vm218_vm0, %v14230_v41, 0.0  ;;  %v14119_v12 = vadd.f32 %v14118_v51, %v14117_v56  ;;  %v25670_v7 = vld [vmem:[#allocation4 + $0x20] sm:$0xff]  ;;  %10875 = vst.msk [vmem:[#allocation4 + $0x50] sm:$0xff] %vm218_vm0, %v18608_v39  ;;  %v10718_v11 = vpop.f32.mrb[45].mxu0  ;;  %v14085_v55 = vmul.f32 %v25668_v44, %v27846_v61 }
 0x79f   :  { %v14267_v27 = vadd.f32 %v14266_v31, %v14265_v26  ;;  %v14083_v42 = vmul.f32 %v25670_v7, %v27788_v1  ;;  %10873 = vst.msk [vmem:[#allocation4 + $0x40] sm:$0xff] %vm218_vm0, %v10718_v11  ;;  %v18609_v40 = vpop.f32.mrb[46].mxu0  ;;  %v25683_v43 = vld [vmem:[#allocation4 + $0x38] sm:$0xff] }
 0x7a0   :  { %v25675_v32 = vld [vmem:[#allocation4 + $0x150] sm:$0xff]  ;;  %v19004_v9 = vpop.f32.mrb[44].mxu1  ;;  %v14121_v34 = vadd.f32 %v14120_v2, %v14119_v12  ;;  %v25685_v35 = vld [vmem:[#allocation4 + $0x28] sm:$0xff]  ;;  %10876 = vst.msk [vmem:[#allocation4 + $0x58] sm:$0xff] %vm218_vm0, %v18609_v40  ;;  %v10721_v18 = vpop.f32.mrb[47].mxu0  ;;  %v14086_v63 = vmul.f32 %v25683_v43, %v23204_v48  ;;  %v14126_v12 = vsel %vm218_vm0, %v14085_v55, 0.0 }
 0x7a1   :  { %27869 = vst [vmem:[#allocation6_spill] sm:$0xff] %v25675_v32  ;;  %v14269_v29 = vadd.f32 %v14268_v6, %v14267_v27  ;;  %v25681_v22 = vld [vmem:[#allocation4 + $0x140] sm:$0xff]  ;;  %14017 = vst.msk [vmem:[#allocation4 + $0x170] sm:$0xff] %vm218_vm0, %v19004_v9  ;;  %v13859_v36 = vpop.f32.mrb[45].mxu1  ;;  %v14122_v17 = vsel %vm218_vm0, %v14083_v42, 0.0  ;;  %v14084_v25 = vmul.f32 %v25685_v35, %v23200_v33  ;;  %v14235_v58 = vmul.f32 %v25675_v32, %v27846_v61 }
 0x7a2   :  { %27870 = vst [vmem:[#allocation8_spill] sm:$0xff] %v25681_v22  ;;  %v14233_v28 = vmul.f32 %v25681_v22, %v27788_v1  ;;  %v25694_v20 = vld [vmem:[#allocation4 + $0x158] sm:$0xff]  ;;  %14015 = vst.msk [vmem:[#allocation4 + $0x160] sm:$0xff] %vm218_vm0, %v13859_v36  ;;  %v19005_v53 = vpop.f32.mrb[46].mxu1  ;;  %v14123_v46 = vadd.f32 %v14122_v17, %v14121_v34 }
 0x7a3   :  { %27871 = vst [vmem:[#allocation9_spill] sm:$0xff] %v25694_v20  ;;  %10874 = vst.msk [vmem:[#allocation4 + $0x48] sm:$0xff] %vm218_vm0, %v10721_v18  ;;  %v14271_v45 = vadd.f32 %v14270_v15, %v14269_v29  ;;  %v25702_v5 = vld [vmem:[#allocation4 + $0x148] sm:$0xff]  ;;  %v13862_v24 = vpop.f32.mrb[47].mxu1  ;;  %v14124_v56 = vsel %vm218_vm0, %v14084_v25, 0.0  ;;  %v14236_v31 = vmul.f32 %v25694_v20, %v23204_v48  ;;  %v14276_v15 = vsel %vm218_vm0, %v14235_v58, 0.0 }
 0x7a4   :  { %27872 = vst [vmem:[#allocation11_spill] sm:$0xff] %v25702_v5  ;;  %14018 = vst.msk [vmem:[#allocation4 + $0x178] sm:$0xff] %vm218_vm0, %v19005_v53  ;;  %v14272_v41 = vsel %vm218_vm0, %v14233_v28, 0.0  ;;  %v14234_v51 = vmul.f32 %v25702_v5, %v23200_v33  ;;  %v14125_v39 = vadd.f32 %v14124_v56, %v14123_v46  ;;  %v14128_v29 = vsel %vm218_vm0, %v14086_v63, 0.0 }
 0x7a5   :  { %14016 = vst.msk [vmem:[#allocation4 + $0x168] sm:$0xff] %vm218_vm0, %v13862_v24  ;;  %v14273_v26 = vadd.f32 %v14272_v41, %v14271_v45  ;;  %v18612_v11 = vpop.f32.mrb[48].mxu0  ;;  %v25716_v42 = vld [vmem:[#allocation4 + $0x50] sm:$0xff]  ;;  %v14278_v17 = vsel %vm218_vm0, %v14236_v31, 0.0 }
 0x7a6   :  { %v14274_v27 = vsel %vm218_vm0, %v14234_v51, 0.0  ;;  %v14127_v6 = vadd.f32 %v14126_v12, %v14125_v39  ;;  %v25718_v9 = vld [vmem:[#allocation4 + $0x40] sm:$0xff]  ;;  %10879 = vst.msk [vmem:[#allocation4 + $0x70] sm:$0xff] %vm218_vm0, %v18612_v11  ;;  %v10734_v40 = vpop.f32.mrb[49].mxu0  ;;  %v14089_v41 = vmul.f32 %v25716_v42, %v27790_v13 }
 0x7a7   :  { %v14275_v2 = vadd.f32 %v14274_v27, %v14273_v26  ;;  %v14087_v36 = vmul.f32 %v25718_v9, %v23206_v60  ;;  %10877 = vst.msk [vmem:[#allocation4 + $0x60] sm:$0xff] %vm218_vm0, %v10734_v40  ;;  %v18613_v55 = vpop.f32.mrb[50].mxu0  ;;  %v25731_v46 = vld [vmem:[#allocation4 + $0x58] sm:$0xff] }
 0x7a8   :  { %v25723_v34 = vld [vmem:[#allocation4 + $0x170] sm:$0xff]  ;;  %v19008_v18 = vpop.f32.mrb[48].mxu1  ;;  %v14129_v25 = vadd.f32 %v14128_v29, %v14127_v6  ;;  %10880 = vst.msk [vmem:[#allocation4 + $0x78] sm:$0xff] %vm218_vm0, %v18613_v55  ;;  %v10737_v24 = vpop.f32.mrb[51].mxu0  ;;  %v14090_v40 = vmul.f32 %v25731_v46, %v27791_v19 }
 0x7a9   :  { %27873 = vst [vmem:[#allocation12_spill] sm:$0xff] %v25723_v34  ;;  %v14277_v28 = vadd.f32 %v14276_v15, %v14275_v2  ;;  %v25729_v53 = vld [vmem:[#allocation4 + $0x160] sm:$0xff]  ;;  %14021 = vst.msk [vmem:[#allocation4 + $0x190] sm:$0xff] %vm218_vm0, %v19008_v18  ;;  %v13875_v45 = vpop.f32.mrb[49].mxu1  ;;  %v14130_v63 = vsel %vm218_vm0, %v14087_v36, 0.0  ;;  %v14239_v39 = vmul.f32 %v25723_v34, %v27790_v13 }
 0x7aa   :  { %27874 = vst [vmem:[#allocation13_spill] sm:$0xff] %v25729_v53  ;;  %v25733_v58 = vld [vmem:[#allocation4 + $0x48] sm:$0xff]  ;;  %v14237_v56 = vmul.f32 %v25729_v53, %v23206_v60  ;;  %14019 = vst.msk [vmem:[#allocation4 + $0x180] sm:$0xff] %vm218_vm0, %v13875_v45  ;;  %v19009_v31 = vpop.f32.mrb[50].mxu1  ;;  %v14131_v12 = vadd.f32 %v14130_v63, %v14129_v25 }
 0x7ab   :  { %v25742_v51 = vld [vmem:[#allocation4 + $0x178] sm:$0xff]  ;;  %v14088_v26 = vmul.f32 %v25733_v58, %v27789_v30  ;;  %10878 = vst.msk [vmem:[#allocation4 + $0x68] sm:$0xff] %vm218_vm0, %v10737_v24  ;;  %v14279_v27 = vadd.f32 %v14278_v17, %v14277_v28  ;;  %14022 = vst.msk [vmem:[#allocation4 + $0x198] sm:$0xff] %vm218_vm0, %v19009_v31  ;;  %v13878_v6 = vpop.f32.mrb[51].mxu1  ;;  %v14134_v17 = vsel %vm218_vm0, %v14089_v41, 0.0  ;;  %v14284_v31 = vsel %vm218_vm0, %v14239_v39, 0.0 }
 0x7ac   :  { %27875 = vst [vmem:[#allocation14_spill] sm:$0xff] %v25742_v51  ;;  %v25750_v11 = vld [vmem:[#allocation4 + $0x168] sm:$0xff]  ;;  %v14280_v2 = vsel %vm218_vm0, %v14237_v56, 0.0  ;;  %14020 = vst.msk [vmem:[#allocation4 + $0x188] sm:$0xff] %vm218_vm0, %v13878_v6  ;;  %v14240_v18 = vmul.f32 %v25742_v51, %v27791_v19 }
 0x7ad   :  { %27876 = vst [vmem:[#allocation15_spill] sm:$0xff] %v25750_v11  ;;  %v14132_v15 = vsel %vm218_vm0, %v14088_v26, 0.0  ;;  %v14238_v29 = vmul.f32 %v25750_v11, %v27789_v30  ;;  %v14281_v36 = vadd.f32 %v14280_v2, %v14279_v27  ;;  %v18616_v25 = vpop.f32.mrb[52].mxu0  ;;  %v25764_v63 = vld [vmem:[#allocation4 + $0x70] sm:$0xff]  ;;  %v14136_v27 = vsel %vm218_vm0, %v14090_v40, 0.0 }
 0x7ae   :  { %v14133_v55 = vadd.f32 %v14132_v15, %v14131_v12  ;;  %v25766_v56 = vld [vmem:[#allocation4 + $0x60] sm:$0xff]  ;;  %10883 = vst.msk [vmem:[#allocation4 + $0x90] sm:$0xff] %vm218_vm0, %v18616_v25  ;;  %v10750_v26 = vpop.f32.mrb[53].mxu0  ;;  %v14286_v15 = vsel %vm218_vm0, %v14240_v18, 0.0  ;;  %v14093_v25 = vmul.f32 %v25764_v63, %v27794_v47 }
 0x7af   :  { %v14282_v28 = vsel %vm218_vm0, %v14238_v29, 0.0  ;;  %v14091_v41 = vmul.f32 %v25766_v56, %v27792_v16  ;;  %10881 = vst.msk [vmem:[#allocation4 + $0x80] sm:$0xff] %vm218_vm0, %v10750_v26  ;;  %v18617_v2 = vpop.f32.mrb[54].mxu0 }
 0x7b0   :  { %v14135_v45 = vadd.f32 %v14134_v17, %v14133_v55  ;;  %v14283_v24 = vadd.f32 %v14282_v28, %v14281_v36  ;;  %v25771_v6 = vld [vmem:[#allocation4 + $0x190] sm:$0xff]  ;;  %v19012_v12 = vpop.f32.mrb[52].mxu1  ;;  %v25779_v17 = vld [vmem:[#allocation4 + $0x78] sm:$0xff]  ;;  %10884 = vst.msk [vmem:[#allocation4 + $0x98] sm:$0xff] %vm218_vm0, %v18617_v2  ;;  %v10753_v28 = vpop.f32.mrb[55].mxu0 }
 0x7b1   :  { %27877 = vst [vmem:[#allocation16_spill] sm:$0xff] %v25771_v6  ;;  %v25777_v55 = vld [vmem:[#allocation4 + $0x180] sm:$0xff]  ;;  %14025 = vst.msk [vmem:[#allocation4 + $0x1b0] sm:$0xff] %vm218_vm0, %v19012_v12  ;;  %v13891_v40 = vpop.f32.mrb[53].mxu1  ;;  %v14138_v26 = vsel %vm218_vm0, %v14091_v41, 0.0  ;;  %v14094_v34 = vmul.f32 %v25779_v17, %v27795_v23 }
 0x7b2   :  { %v14285_v29 = vadd.f32 %v14284_v31, %v14283_v24  ;;  %v14137_v36 = vadd.f32 %v14136_v27, %v14135_v45  ;;  %27878 = vst [vmem:[#allocation17_spill] sm:$0xff] %v25777_v55  ;;  %v25781_v39 = vld [vmem:[#allocation4 + $0x68] sm:$0xff]  ;;  %v14241_v18 = vmul.f32 %v25777_v55, %v27792_v16  ;;  %v25790_v45 = vld [vmem:[#allocation4 + $0x198] sm:$0xff]  ;;  %14023 = vst.msk [vmem:[#allocation4 + $0x1a0] sm:$0xff] %vm218_vm0, %v13891_v40  ;;  %v19013_v31 = vpop.f32.mrb[54].mxu1 }
 0x7b3   :  { %27879 = vst [vmem:[#allocation18_spill] sm:$0xff] %v25790_v45  ;;  %v14092_v24 = vmul.f32 %v25781_v39, %v27793_v49  ;;  %10882 = vst.msk [vmem:[#allocation4 + $0x88] sm:$0xff] %vm218_vm0, %v10753_v28  ;;  %v14243_v27 = vmul.f32 %v25771_v6, %v27794_v47  ;;  %v25798_v51 = vld [vmem:[#allocation4 + $0x188] sm:$0xff]  ;;  %v13894_v41 = vpop.f32.mrb[55].mxu1 }
 0x7b4   :  { %v14139_v12 = vadd.f32 %v14138_v26, %v14137_v36  ;;  %v14287_v2 = vadd.f32 %v14286_v15, %v14285_v29  ;;  %27880 = vst [vmem:[#allocation19_spill] sm:$0xff] %v25798_v51  ;;  %14026 = vst.msk [vmem:[#allocation4 + $0x1b8] sm:$0xff] %vm218_vm0, %v19013_v31  ;;  %v14288_v55 = vsel %vm218_vm0, %v14241_v18, 0.0  ;;  %v14242_v28 = vmul.f32 %v25798_v51, %v27793_v49 }
 0x7b5   :  { %v14140_v40 = vsel %vm218_vm0, %v14092_v24, 0.0  ;;  %14024 = vst.msk [vmem:[#allocation4 + $0x1a8] sm:$0xff] %vm218_vm0, %v13894_v41  ;;  %v14244_v15 = vmul.f32 %v25790_v45, %v27795_v23  ;;  %v14142_v36 = vsel %vm218_vm0, %v14093_v25, 0.0  ;;  %v18620_v18 = vpop.f32.mrb[56].mxu0  ;;  %v25812_v53 = vld [vmem:[#allocation4 + $0x90] sm:$0xff] }
 0x7b6   :  { %v14289_v6 = vadd.f32 %v14288_v55, %v14287_v2  ;;  %v14141_v29 = vadd.f32 %v14140_v40, %v14139_v12  ;;  %v14290_v26 = vsel %vm218_vm0, %v14242_v28, 0.0  ;;  %v25814_v24 = vld [vmem:[#allocation4 + $0x80] sm:$0xff]  ;;  %10887 = vst.msk [vmem:[#allocation4 + $0xb0] sm:$0xff] %vm218_vm0, %v18620_v18  ;;  %v10766_v51 = vpop.f32.mrb[57].mxu0  ;;  %v14292_v55 = vsel %vm218_vm0, %v14243_v27, 0.0 }
 0x7b7   :  { %v14144_v2 = vsel %vm218_vm0, %v14094_v34, 0.0  ;;  %v14095_v25 = vmul.f32 %v25814_v24, %v27796_v10  ;;  %10885 = vst.msk [vmem:[#allocation4 + $0xa0] sm:$0xff] %vm218_vm0, %v10766_v51  ;;  %v14294_v40 = vsel %vm218_vm0, %v14244_v15, 0.0  ;;  %v14097_v51 = vmul.f32 %v25812_v53, %v27798_v38 }
 0x7b8   :  { %v14143_v31 = vadd.f32 %v14142_v36, %v14141_v29  ;;  %v14291_v11 = vadd.f32 %v14290_v26, %v14289_v6  ;;  %v25819_v41 = vld [vmem:[#allocation4 + $0x1b0] sm:$0xff]  ;;  %v19016_v12 = vpop.f32.mrb[56].mxu1  ;;  %v18621_v6 = vpop.f32.mrb[58].mxu0  ;;  %v25827_v26 = vld [vmem:[#allocation4 + $0x98] sm:$0xff] }
 0x7b9   :  { %27881 = vst [vmem:[#allocation20_spill] sm:$0xff] %v25819_v41  ;;  %v25825_v36 = vld [vmem:[#allocation4 + $0x1a0] sm:$0xff]  ;;  %14029 = vst.msk [vmem:[#allocation4 + $0x1d0] sm:$0xff] %vm218_vm0, %v19016_v12  ;;  %v13907_v34 = vpop.f32.mrb[57].mxu1  ;;  %v10769_v18 = vpop.f32.mrb[59].mxu0  ;;  %v14146_v45 = vsel %vm218_vm0, %v14095_v25, 0.0  ;;  %v14098_v32 = vmul.f32 %v25827_v26, %v27847_v37 }
 0x7ba   :  { %v14293_v28 = vadd.f32 %v14292_v55, %v14291_v11  ;;  %v14145_v29 = vadd.f32 %v14144_v2, %v14143_v31  ;;  %27882 = vst [vmem:[#allocation28_spill] sm:$0xff] %v25825_v36  ;;  %v25829_v27 = vld [vmem:[#allocation4 + $0x88] sm:$0xff]  ;;  %10888 = vst.msk [vmem:[#allocation4 + $0xb8] sm:$0xff] %vm218_vm0, %v18621_v6  ;;  %v14245_v11 = vmul.f32 %v25825_v36, %v27796_v10  ;;  %v19017_v55 = vpop.f32.mrb[58].mxu1 }
 0x7bb   :  { %v25838_v15 = vld [vmem:[#allocation4 + $0x1b8] sm:$0xff]  ;;  %v14096_v31 = vmul.f32 %v25829_v27, %v27797_v3  ;;  %14027 = vst.msk [vmem:[#allocation4 + $0x1c0] sm:$0xff] %vm218_vm0, %v13907_v34  ;;  %10886 = vst.msk [vmem:[#allocation4 + $0xa8] sm:$0xff] %vm218_vm0, %v10769_v18  ;;  %v14247_v2 = vmul.f32 %v25819_v41, %v27798_v38  ;;  %v13910_v25 = vpop.f32.mrb[59].mxu1 }
 0x7bc   :  { %27883 = vst [vmem:[#allocation30_spill] sm:$0xff] %v25838_v15  ;;  %v14147_v12 = vadd.f32 %v14146_v45, %v14145_v29  ;;  %v14295_v6 = vadd.f32 %v14294_v40, %v14293_v28  ;;  %v25846_v20 = vld [vmem:[#allocation4 + $0x1a8] sm:$0xff]  ;;  %14030 = vst.msk [vmem:[#allocation4 + $0x1d8] sm:$0xff] %vm218_vm0, %v19017_v55  ;;  %v14296_v36 = vsel %vm218_vm0, %v14245_v11, 0.0  ;;  %v14248_v45 = vmul.f32 %v25838_v15, %v27847_v37 }
 0x7bd   :  { %27884 = vst [vmem:[#allocation29_spill] sm:$0xff] %v25846_v20  ;;  %v14148_v34 = vsel %vm218_vm0, %v14096_v31, 0.0  ;;  %v14246_v18 = vmul.f32 %v25846_v20, %v27797_v3  ;;  %14028 = vst.msk [vmem:[#allocation4 + $0x1c8] sm:$0xff] %vm218_vm0, %v13910_v25  ;;  %v14150_v28 = vsel %vm218_vm0, %v14097_v51, 0.0  ;;  %v18624_v11 = vpop.f32.mrb[60].mxu0  ;;  %v25860_v22 = vld [vmem:[#allocation4 + $0xb0] sm:$0xff] }
 0x7be   :  { %v14297_v41 = vadd.f32 %v14296_v36, %v14295_v6  ;;  %v14149_v40 = vadd.f32 %v14148_v34, %v14147_v12  ;;  %27885 = vst [vmem:[#allocation31_spill] sm:$0xff] %v25860_v22  ;;  %v25862_v31 = vld [vmem:[#allocation4 + $0xa0] sm:$0xff]  ;;  %10891 = vst.msk [vmem:[#allocation4 + $0xd0] sm:$0xff] %vm218_vm0, %v18624_v11  ;;  %v10782_v20 = vpop.f32.mrb[61].mxu0  ;;  %v14300_v36 = vsel %vm218_vm0, %v14247_v2, 0.0  ;;  %v14152_v6 = vsel %vm218_vm0, %v14098_v32, 0.0 }
 0x7bf   :  { %v14298_v29 = vsel %vm218_vm0, %v14246_v18, 0.0  ;;  %v14099_v51 = vmul.f32 %v25862_v31, %v27848_v14  ;;  %10889 = vst.msk [vmem:[#allocation4 + $0xc0] sm:$0xff] %vm218_vm0, %v10782_v20  ;;  %v14302_v34 = vsel %vm218_vm0, %v14248_v45, 0.0  ;;  %v27890_v15 = vld [vmem:[#allocation26_spill] sm:$0xff] }
 0x7c0   :  { %v14151_v55 = vadd.f32 %v14150_v28, %v14149_v40  ;;  %v14299_v5 = vadd.f32 %v14298_v29, %v14297_v41  ;;  %v25867_v25 = vld [vmem:[#allocation4 + $0x1d0] sm:$0xff]  ;;  %v19020_v12 = vpop.f32.mrb[60].mxu1  ;;  %v18625_v41 = vpop.f32.mrb[62].mxu0  ;;  %v14101_v20 = vmul.f32 %v25860_v22, %v27890_v15 }
 0x7c1   :  { %27886 = vst [vmem:[#allocation34_spill] sm:$0xff] %v25867_v25  ;;  %v25875_v29 = vld [vmem:[#allocation4 + $0xb8] sm:$0xff]  ;;  %14033 = vst.msk [vmem:[#allocation4 + $0x1f0] sm:$0xff] %vm218_vm0, %v19020_v12  ;;  %v13923_v32 = vpop.f32.mrb[61].mxu1  ;;  %v10785_v11 = vpop.f32.mrb[63].mxu0  ;;  %v14154_v21 = vsel %vm218_vm0, %v14099_v51, 0.0  ;;  %v14251_v12 = vmul.f32 %v25867_v25, %v27890_v15 }
 0x7c2   :  { %v14301_v18 = vadd.f32 %v14300_v36, %v14299_v5  ;;  %v14153_v40 = vadd.f32 %v14152_v6, %v14151_v55  ;;  %v25873_v28 = vld [vmem:[#allocation4 + $0x1c0] sm:$0xff]  ;;  %27888 = vst [vmem:[#allocation38_spill] sm:$0xff] %v25875_v29  ;;  %v25877_v2 = vld [vmem:[#allocation4 + $0xa8] sm:$0xff]  ;;  %10892 = vst.msk [vmem:[#allocation4 + $0xd8] sm:$0xff] %vm218_vm0, %v18625_v41  ;;  %v19021_v6 = vpop.f32.mrb[62].mxu1 }
 0x7c3   :  { %27887 = vst [vmem:[#allocation37_spill] sm:$0xff] %v25873_v28  ;;  %27889 = vst [vmem:[#allocation39_spill] sm:$0xff] %v25877_v2  ;;  %v14249_v5 = vmul.f32 %v25873_v28, %v27848_v14  ;;  %v25886_v45 = vld [vmem:[#allocation4 + $0x1d8] sm:$0xff]  ;;  %v27892_v55 = vld [vmem:[#allocation23_spill] sm:$0xff]  ;;  %v13926_v51 = vpop.f32.mrb[63].mxu1 }
 0x7c4   :  { %27891 = vst [vmem:[#allocation42_spill] sm:$0xff] %v25886_v45  ;;  %v14100_v36 = vmul.f32 %v25877_v2, %v27892_v55  ;;  %14031 = vst.msk [vmem:[#allocation4 + $0x1e0] sm:$0xff] %vm218_vm0, %v13923_v32  ;;  %v14155_v41 = vadd.f32 %v14154_v21, %v14153_v40  ;;  %v14303_v22 = vadd.f32 %v14302_v34, %v14301_v18  ;;  %v25894_v52 = vld [vmem:[#allocation4 + $0x1c8] sm:$0xff]  ;;  %v27894_v14 = vld [vmem:[#allocation27_spill] sm:$0xff]  ;;  %v14158_v18 = vsel %vm218_vm0, %v14101_v20, 0.0 }
 0x7c5   :  { %10890 = vst.msk [vmem:[#allocation4 + $0xc8] sm:$0xff] %vm218_vm0, %v10785_v11  ;;  %27893 = vst [vmem:[#allocation43_spill] sm:$0xff] %v25894_v52  ;;  %v14304_v28 = vsel %vm218_vm0, %v14249_v5, 0.0  ;;  %v14102_v37 = vmul.f32 %v25875_v29, %v27894_v14  ;;  %v14250_v11 = vmul.f32 %v25894_v52, %v27892_v55  ;;  %v14252_v21 = vmul.f32 %v25886_v45, %v27894_v14  ;;  %v18628_v5 = vpop.f32.mrb[64].mxu0  ;;  %v25908_v29 = vld [vmem:[#allocation4 + $0xd0] sm:$0xff] }
 0x7c6   :  { %14034 = vst.msk [vmem:[#allocation4 + $0x1f8] sm:$0xff] %vm218_vm0, %v19021_v6  ;;  %v14156_v32 = vsel %vm218_vm0, %v14100_v36, 0.0  ;;  %14032 = vst.msk [vmem:[#allocation4 + $0x1e8] sm:$0xff] %vm218_vm0, %v13926_v51  ;;  %v14305_v25 = vadd.f32 %v14304_v28, %v14303_v22  ;;  %v25910_v36 = vld [vmem:[#allocation4 + $0xc0] sm:$0xff]  ;;  %v10798_v52 = vpop.f32.mrb[65].mxu0  ;;  %v14308_v22 = vsel %vm218_vm0, %v14251_v12, 0.0 }
 0x7c7   :  { %v14157_v34 = vadd.f32 %v14156_v32, %v14155_v41  ;;  %v14306_v40 = vsel %vm218_vm0, %v14250_v11, 0.0  ;;  %27895 = vst [vmem:[#allocation54_spill] sm:$0xff] %v25908_v29  ;;  %27896 = vst [vmem:[#allocation58_spill] sm:$0xff] %v25910_v36  ;;  %v14160_v28 = vsel %vm218_vm0, %v14102_v37, 0.0  ;;  %v27898_v41 = vld [vmem:[#allocation32_spill] sm:$0xff]  ;;  %v14310_v11 = vsel %vm218_vm0, %v14252_v21, 0.0 }
 0x7c8   :  { %v14307_v15 = vadd.f32 %v14306_v40, %v14305_v25  ;;  %10895 = vst.msk [vmem:[#allocation4 + $0xf0] sm:$0xff] %vm218_vm0, %v18628_v5  ;;  %v25915_v51 = vld [vmem:[#allocation4 + $0x1f0] sm:$0xff]  ;;  %v14103_v20 = vmul.f32 %v25910_v36, %v27898_v41  ;;  %v19024_v32 = vpop.f32.mrb[64].mxu1  ;;  %10893 = vst.msk [vmem:[#allocation4 + $0xe0] sm:$0xff] %vm218_vm0, %v10798_v52  ;;  %v18629_v25 = vpop.f32.mrb[66].mxu0 }
 0x7c9   :  { %v14159_v6 = vadd.f32 %v14158_v18, %v14157_v34  ;;  %27897 = vst [vmem:[#allocation48_spill] sm:$0xff] %v25915_v51  ;;  %v25923_v5 = vld [vmem:[#allocation4 + $0xd8] sm:$0xff]  ;;  %14037 = vst.msk [vmem:[#allocation4 + $0x210] sm:$0xff] %vm218_vm0, %v19024_v32  ;;  %v13939_v37 = vpop.f32.mrb[65].mxu1  ;;  %v10801_v45 = vpop.f32.mrb[67].mxu0  ;;  %v27902_v14 = vld [vmem:[#allocation35_spill] sm:$0xff] }
 0x7ca   :  { %v14309_v34 = vadd.f32 %v14308_v22, %v14307_v15  ;;  %27900 = vst [vmem:[#allocation55_spill] sm:$0xff] %v25923_v5  ;;  %10896 = vst.msk [vmem:[#allocation4 + $0xf8] sm:$0xff] %vm218_vm0, %v18629_v25  ;;  %v14105_v52 = vmul.f32 %v25908_v29, %v27902_v14  ;;  %v14162_v36 = vsel %vm218_vm0, %v14103_v20, 0.0  ;;  %v14255_v32 = vmul.f32 %v25915_v51, %v27902_v14 }
 0x7cb   :  { %v14161_v18 = vadd.f32 %v14160_v28, %v14159_v6  ;;  %v25921_v40 = vld [vmem:[#allocation4 + $0x1e0] sm:$0xff]  ;;  %14035 = vst.msk [vmem:[#allocation4 + $0x200] sm:$0xff] %vm218_vm0, %v13939_v37  ;;  %v19025_v28 = vpop.f32.mrb[66].mxu1  ;;  %10894 = vst.msk [vmem:[#allocation4 + $0xe8] sm:$0xff] %vm218_vm0, %v10801_v45 }
 0x7cc   :  { %27899 = vst [vmem:[#allocation50_spill] sm:$0xff] %v25921_v40  ;;  %v25925_v12 = vld [vmem:[#allocation4 + $0xc8] sm:$0xff]  ;;  %v14253_v15 = vmul.f32 %v25921_v40, %v27898_v41  ;;  %v27904_v6 = vld [vmem:[#allocation33_spill] sm:$0xff]  ;;  %v14311_v29 = vadd.f32 %v14310_v11, %v14309_v34  ;;  %14038 = vst.msk [vmem:[#allocation4 + $0x218] sm:$0xff] %vm218_vm0, %v19025_v28  ;;  %v13942_v20 = vpop.f32.mrb[67].mxu1  ;;  %v14166_v34 = vsel %vm218_vm0, %v14105_v52, 0.0 }
 0x7cd   :  { %27901 = vst [vmem:[#allocation59_spill] sm:$0xff] %v25925_v12  ;;  %v25934_v21 = vld [vmem:[#allocation4 + $0x1f8] sm:$0xff]  ;;  %v14104_v22 = vmul.f32 %v25925_v12, %v27904_v6  ;;  %v14163_v25 = vadd.f32 %v14162_v36, %v14161_v18  ;;  %v25942_v55 = vld [vmem:[#allocation4 + $0x1e8] sm:$0xff]  ;;  %14036 = vst.msk [vmem:[#allocation4 + $0x208] sm:$0xff] %vm218_vm0, %v13942_v20 }
 0x7ce   :  { %27903 = vst [vmem:[#allocation46_spill] sm:$0xff] %v25934_v21  ;;  %27905 = vst [vmem:[#allocation49_spill] sm:$0xff] %v25942_v55  ;;  %v14312_v40 = vsel %vm218_vm0, %v14253_v15, 0.0  ;;  %v27906_v41 = vld [vmem:[#allocation36_spill] sm:$0xff]  ;;  %v14254_v45 = vmul.f32 %v25942_v55, %v27904_v6  ;;  %v18632_v15 = vpop.f32.mrb[68].mxu0 }
 0x7cf   :  { %v14106_v12 = vmul.f32 %v25923_v5, %v27906_v41  ;;  %v14164_v37 = vsel %vm218_vm0, %v14104_v22, 0.0  ;;  %v14313_v51 = vadd.f32 %v14312_v40, %v14311_v29  ;;  %v14256_v36 = vmul.f32 %v25934_v21, %v27906_v41  ;;  %v25956_v5 = vld [vmem:[#allocation4 + $0xf0] sm:$0xff]  ;;  %v25958_v22 = vld [vmem:[#allocation4 + $0xe0] sm:$0xff]  ;;  %10899 = vst.msk [vmem:[#allocation4 + $0x110] sm:$0xff] %vm218_vm0, %v18632_v15  ;;  %v10814_v55 = vpop.f32.mrb[69].mxu0  ;;  %v27914_v41 = vld [vmem:[#allocation44_spill] sm:$0xff] }
 0x7d0   :  { %v14165_v11 = vadd.f32 %v14164_v37, %v14163_v25  ;;  %v14314_v18 = vsel %vm218_vm0, %v14254_v45, 0.0  ;;  %27907 = vst [vmem:[#allocation47_spill] sm:$0xff] %v25956_v5  ;;  %27908 = vst [vmem:[#allocation53_spill] sm:$0xff] %v25958_v22  ;;  %v14316_v29 = vsel %vm218_vm0, %v14255_v32, 0.0  ;;  %v25963_v20 = vld [vmem:[#allocation4 + $0x210] sm:$0xff]  ;;  %v27910_v25 = vld [vmem:[#allocation40_spill] sm:$0xff] }
 0x7d1   :  { %v14315_v14 = vadd.f32 %v14314_v18, %v14313_v51  ;;  %v14168_v40 = vsel %vm218_vm0, %v14106_v12, 0.0  ;;  %27909 = vst [vmem:[#allocation61_spill] sm:$0xff] %v25963_v20  ;;  %v14107_v52 = vmul.f32 %v25958_v22, %v27910_v25  ;;  %v19028_v37 = vpop.f32.mrb[68].mxu1  ;;  %10897 = vst.msk [vmem:[#allocation4 + $0x100] sm:$0xff] %vm218_vm0, %v10814_v55  ;;  %v18633_v51 = vpop.f32.mrb[70].mxu0  ;;  %v14318_v45 = vsel %vm218_vm0, %v14256_v36, 0.0 }
 0x7d2   :  { %v14167_v28 = vadd.f32 %v14166_v34, %v14165_v11  ;;  %v25969_v18 = vld [vmem:[#allocation4 + $0x200] sm:$0xff]  ;;  %v25971_v15 = vld [vmem:[#allocation4 + $0xf8] sm:$0xff]  ;;  %v25973_v32 = vld [vmem:[#allocation4 + $0xe8] sm:$0xff]  ;;  %14041 = vst.msk [vmem:[#allocation4 + $0x230] sm:$0xff] %vm218_vm0, %v19028_v37  ;;  %v13955_v12 = vpop.f32.mrb[69].mxu1  ;;  %v10817_v21 = vpop.f32.mrb[71].mxu0  ;;  %v14109_v55 = vmul.f32 %v25956_v5, %v27914_v41  ;;  %v14259_v37 = vmul.f32 %v25963_v20, %v27914_v41 }
 0x7d3   :  { %v14317_v11 = vadd.f32 %v14316_v29, %v14315_v14  ;;  %27911 = vst [vmem:[#allocation62_spill] sm:$0xff] %v25969_v18  ;;  %27912 = vst [vmem:[#allocation63_spill] sm:$0xff] %v25971_v15  ;;  %v14170_v22 = vsel %vm218_vm0, %v14107_v52, 0.0  ;;  %v14257_v14 = vmul.f32 %v25969_v18, %v27910_v25  ;;  %v25982_v36 = vld [vmem:[#allocation4 + $0x218] sm:$0xff]  ;;  %v27918_v25 = vld [vmem:[#allocation45_spill] sm:$0xff] }
 0x7d4   :  { %v14169_v34 = vadd.f32 %v14168_v40, %v14167_v28  ;;  %27913 = vst [vmem:[#allocation64_spill] sm:$0xff] %v25973_v32  ;;  %10900 = vst.msk [vmem:[#allocation4 + $0x118] sm:$0xff] %vm218_vm0, %v18633_v51  ;;  %v27916_v28 = vld [vmem:[#allocation41_spill] sm:$0xff]  ;;  %v19029_v40 = vpop.f32.mrb[70].mxu1  ;;  %v25990_v6 = vld [vmem:[#allocation4 + $0x208] sm:$0xff] }
 0x7d5   :  { %27915 = vst [vmem:[#allocation65_spill] sm:$0xff] %v25982_v36  ;;  %v14108_v29 = vmul.f32 %v25973_v32, %v27916_v28  ;;  %14039 = vst.msk [vmem:[#allocation4 + $0x220] sm:$0xff] %vm218_vm0, %v13955_v12  ;;  %v14319_v5 = vadd.f32 %v14318_v45, %v14317_v11  ;;  %v13958_v52 = vpop.f32.mrb[71].mxu1  ;;  %v14320_v18 = vsel %vm218_vm0, %v14257_v14, 0.0  ;;  %v14110_v32 = vmul.f32 %v25971_v15, %v27918_v25 }
 0x7d6   :  { %10898 = vst.msk [vmem:[#allocation4 + $0x108] sm:$0xff] %vm218_vm0, %v10817_v21  ;;  %v14171_v51 = vadd.f32 %v14170_v22, %v14169_v34  ;;  %27917 = vst [vmem:[#allocation66_spill] sm:$0xff] %v25990_v6  ;;  %v14258_v21 = vmul.f32 %v25990_v6, %v27916_v28  ;;  %v14260_v22 = vmul.f32 %v25982_v36, %v27918_v25  ;;  %v14174_v11 = vsel %vm218_vm0, %v14109_v55, 0.0  ;;  %v26004_v41 = vld [vmem:[#allocation4 + $0x110] sm:$0xff]  ;;  %v27927_v36 = vld [vmem:[#allocation52_spill] sm:$0xff] }
 0x7d7   :  { %14042 = vst.msk [vmem:[#allocation4 + $0x238] sm:$0xff] %vm218_vm0, %v19029_v40  ;;  %v14172_v12 = vsel %vm218_vm0, %v14108_v29, 0.0  ;;  %14040 = vst.msk [vmem:[#allocation4 + $0x228] sm:$0xff] %vm218_vm0, %v13958_v52  ;;  %v14321_v20 = vadd.f32 %v14320_v18, %v14319_v5  ;;  %v14324_v29 = vsel %vm218_vm0, %v14259_v37, 0.0  ;;  %v14176_v6 = vsel %vm218_vm0, %v14110_v32, 0.0  ;;  %v27922_v5 = vld [vmem:[#allocation51_spill] sm:$0xff] }
 0x7d8   :  { %v14173_v45 = vadd.f32 %v14172_v12, %v14171_v51  ;;  %v14322_v34 = vsel %vm218_vm0, %v14258_v21, 0.0  ;;  %27919 = vst [vmem:[#allocation67_spill] sm:$0xff] %v26004_v41  ;;  %v26006_v15 = vld [vmem:[#allocation4 + $0x100] sm:$0xff]  ;;  %v14326_v51 = vsel %vm218_vm0, %v14260_v22, 0.0 }
 0x7d9   :  { %v14323_v40 = vadd.f32 %v14322_v34, %v14321_v20  ;;  %27920 = vst [vmem:[#allocation68_spill] sm:$0xff] %v26006_v15  ;;  %v26010_v52 = vld [vmem:[#allocation4 + $0x230] sm:$0xff]  ;;  %v14111_v18 = vmul.f32 %v26006_v15, %v27922_v5 }
 0x7da   :  { %v14175_v14 = vadd.f32 %v14174_v11, %v14173_v45  ;;  %27921 = vst [vmem:[#allocation69_spill] sm:$0xff] %v26010_v52  ;;  %v27926_v11 = vld [vmem:[#allocation57_spill] sm:$0xff] }
 0x7db   :  { %v14325_v55 = vadd.f32 %v14324_v29, %v14323_v40  ;;  %v26017_v20 = vld [vmem:[#allocation4 + $0x118] sm:$0xff]  ;;  %v14113_v37 = vmul.f32 %v26004_v41, %v27926_v11  ;;  %v14178_v32 = vsel %vm218_vm0, %v14111_v18, 0.0 }
 0x7dc   :  { %v14177_v12 = vadd.f32 %v14176_v6, %v14175_v14  ;;  %v26015_v21 = vld [vmem:[#allocation4 + $0x220] sm:$0xff]  ;;  %27924 = vst [vmem:[#allocation56_spill] sm:$0xff] %v26017_v20  ;;  %v14263_v6 = vmul.f32 %v26010_v52, %v27926_v11  ;;  %v27930_v41 = vld [vmem:[#allocation60_spill] sm:$0xff] }
 0x7dd   :  { %27923 = vst [vmem:[#allocation10_spill] sm:$0xff] %v26015_v21  ;;  %v26019_v45 = vld [vmem:[#allocation4 + $0x108] sm:$0xff]  ;;  %v14261_v34 = vmul.f32 %v26015_v21, %v27922_v5  ;;  %v14327_v14 = vadd.f32 %v14326_v51, %v14325_v55  ;;  %v14114_v18 = vmul.f32 %v26017_v20, %v27930_v41  ;;  %v14182_v52 = vsel %vm218_vm0, %v14113_v37, 0.0 }
 0x7de   :  { %27925 = vst [vmem:[#allocation24_spill] sm:$0xff] %v26019_v45  ;;  %v14112_v25 = vmul.f32 %v26019_v45, %v27927_v36  ;;  %v14179_v22 = vadd.f32 %v14178_v32, %v14177_v12  ;;  %v26030_v40 = vld [vmem:[#allocation4 + $0x238] sm:$0xff]  ;;  %v26032_v29 = vld [vmem:[#allocation4 + $0x228] sm:$0xff] }
 0x7df   :  { %27928 = vst [vmem:[#allocation70_spill] sm:$0xff] %v26030_v40  ;;  %27929 = vst [vmem:[#allocation71_spill] sm:$0xff] %v26032_v29  ;;  %v14328_v15 = vsel %vm218_vm0, %v14261_v34, 0.0  ;;  %v14262_v21 = vmul.f32 %v26032_v29, %v27927_v36  ;;  %v14264_v51 = vmul.f32 %v26030_v40, %v27930_v41  ;;  %v14332_v34 = vsel %vm218_vm0, %v14263_v6, 0.0 }
 0x7e0   :  { %v14180_v28 = vsel %vm218_vm0, %v14112_v25, 0.0  ;;  %v14329_v5 = vadd.f32 %v14328_v15, %v14327_v14  ;;  %v14184_v11 = vsel %vm218_vm0, %v14114_v18, 0.0 }
 0x7e1   :  { %v14181_v45 = vadd.f32 %v14180_v28, %v14179_v22  ;;  %v14330_v55 = vsel %vm218_vm0, %v14262_v21, 0.0  ;;  %v14334_v2 = vsel %vm218_vm0, %v14264_v51, 0.0 }
 0x7e2   :  { %v14331_v32 = vadd.f32 %v14330_v55, %v14329_v5 }
 0x7e3   :  { %v14183_v12 = vadd.f32 %v14182_v52, %v14181_v45 }
 0x7e4   :  { %v14333_v25 = vadd.f32 %v14332_v34, %v14331_v32 }
 0x7e5   :  { %v14185_v20 = vadd.f32 %v14184_v11, %v14183_v12 }
 0x7e6   :  { %v14335_v29 = vadd.f32 %v14334_v2, %v14333_v25 }
 0x7e7   :  { %v14186_v15 = vrot.slane %v14185_v20, 4 }
 0x7e8   :  { %v14336_v28 = vrot.slane %v14335_v29, 4 }
 0x7e9   :  { %v14187_v22 = vadd.f32 %v14186_v15, %v14185_v20 }
 0x7ea   :  { %v14337_v37 = vadd.f32 %v14336_v28, %v14335_v29 }
 0x7eb   :  { %v14188_v14 = vrot.slane %v14187_v22, 2 }
 0x7ec   :  { %v14338_v36 = vrot.slane %v14337_v37, 2 }
 0x7ed   :  { %v14189_v40 = vadd.f32 %v14188_v14, %v14187_v22 }
 0x7ee   :  { %v14339_v41 = vadd.f32 %v14338_v36, %v14337_v37 }
 0x7ef   :  { %v14190_v21 = vrot.slane %v14189_v40, 1 }
 0x7f0   :  { %v14340_v52 = vrot.slane %v14339_v41, 1 }
 0x7f1   :  { %v14191_v5 = vadd.f32 %v14190_v21, %v14189_v40 }
 0x7f2   :  { %v14341_v45 = vadd.f32 %v14340_v52, %v14339_v41 }
 0x7f4   :  { %v14342_v6 = vadd.f32 %v14341_v45, %v14191_v5 }
 0x7f6   :  { %v26047_v55 = vmul.f32 0.001953125, %v14342_v6 }
 0x7f8   :  { %v14344_v11 = vsub.f32 %v25631_v62, %v26047_v55  ;;  %v14345_v2 = vsub.f32 %v25641_v50, %v26047_v55  ;;  %v14346_v20 = vsub.f32 %v25629_v4, %v26047_v55  ;;  %v14347_v29 = vsub.f32 %v25639_v8, %v26047_v55 }
 0x7f9   :  { %v14348_v41 = vsub.f32 %v25670_v7, %v26047_v55  ;;  %v14349_v62 = vsub.f32 %v25685_v35, %v26047_v55  ;;  %v14350_v4 = vsub.f32 %v25668_v44, %v26047_v55  ;;  %v14351_v34 = vsub.f32 %v25683_v43, %v26047_v55 }
 0x7fa   :  { %v14380_v36 = vmul.f32 %v14344_v11, %v27784_v54  ;;  %v14381_v40 = vmul.f32 %v14345_v2, %v27785_v59  ;;  %v14382_v18 = vmul.f32 %v14346_v20, %v27786_v57  ;;  %v14383_v50 = vmul.f32 %v14347_v29, %v27787_v0 }
 0x7fb   :  { %v14384_v8 = vmul.f32 %v14348_v41, %v27788_v1  ;;  %v14385_v7 = vmul.f32 %v14349_v62, %v23200_v33  ;;  %v14352_v22 = vsub.f32 %v25718_v9, %v26047_v55  ;;  %v14386_v37 = vmul.f32 %v14350_v4, %v27846_v61 }
 0x7fc   :  { %v14416_v51 = vmul.f32 %v14380_v36, %v14380_v36  ;;  %v14417_v12 = vmul.f32 %v14381_v40, %v14381_v40  ;;  %v14418_v32 = vmul.f32 %v14382_v18, %v14382_v18  ;;  %v14419_v25 = vmul.f32 %v14383_v50, %v14383_v50 }
 0x7fd   :  { %v14420_v44 = vmul.f32 %v14384_v8, %v14384_v8  ;;  %v14353_v43 = vsub.f32 %v25733_v58, %v26047_v55  ;;  %v14387_v52 = vmul.f32 %v14351_v34, %v23204_v48  ;;  %v14421_v5 = vmul.f32 %v14385_v7, %v14385_v7 }
 0x7fe   :  { %v14452_v15 = vsel %vm218_vm0, %v14416_v51, 0.0  ;;  %v14453_v35 = vsel %vm218_vm0, %v14417_v12, 0.0  ;;  %v14455_v14 = vsel %vm218_vm0, %v14418_v32, 0.0  ;;  %v14457_v45 = vsel %vm218_vm0, %v14419_v25, 0.0 }
 0x7ff   :  { %v14454_v28 = vadd.f32 %v14453_v35, %v14452_v15  ;;  %v14354_v11 = vsub.f32 %v25716_v42, %v26047_v55  ;;  %v14388_v9 = vmul.f32 %v14352_v22, %v23206_v60  ;;  %v14422_v2 = vmul.f32 %v14386_v37, %v14386_v37 }
 0x800   :  { %v14459_v20 = vsel %vm218_vm0, %v14420_v44, 0.0  ;;  %v14355_v36 = vsub.f32 %v25731_v46, %v26047_v55  ;;  %v14389_v58 = vmul.f32 %v14353_v43, %v27789_v30  ;;  %v14423_v40 = vmul.f32 %v14387_v52, %v14387_v52 }
 0x801   :  { %v14456_v21 = vadd.f32 %v14455_v14, %v14454_v28  ;;  %v14461_v41 = vsel %vm218_vm0, %v14421_v5, 0.0  ;;  %v14356_v62 = vsub.f32 %v25766_v56, %v26047_v55  ;;  %v14390_v42 = vmul.f32 %v14354_v11, %v27790_v13 }
 0x802   :  { %v14424_v50 = vmul.f32 %v14388_v9, %v14388_v9  ;;  %v14463_v51 = vsel %vm218_vm0, %v14422_v2, 0.0  ;;  %v14357_v4 = vsub.f32 %v25781_v39, %v26047_v55  ;;  %v14391_v46 = vmul.f32 %v14355_v36, %v27791_v19 }
 0x803   :  { %v14458_v6 = vadd.f32 %v14457_v45, %v14456_v21  ;;  %v14425_v8 = vmul.f32 %v14389_v58, %v14389_v58  ;;  %v14465_v32 = vsel %vm218_vm0, %v14423_v40, 0.0  ;;  %v14358_v7 = vsub.f32 %v25764_v63, %v26047_v55 }
 0x804   :  { %v14392_v56 = vmul.f32 %v14356_v62, %v27792_v16  ;;  %v14426_v25 = vmul.f32 %v14390_v42, %v14390_v42  ;;  %v14467_v15 = vsel %vm218_vm0, %v14424_v50, 0.0  ;;  %v14359_v28 = vsub.f32 %v25779_v17, %v26047_v55 }
 0x805   :  { %v14460_v29 = vadd.f32 %v14459_v20, %v14458_v6  ;;  %v14393_v39 = vmul.f32 %v14357_v4, %v27793_v49  ;;  %v14427_v22 = vmul.f32 %v14391_v46, %v14391_v46  ;;  %v14469_v37 = vsel %vm218_vm0, %v14425_v8, 0.0  ;;  %v27932_v4 = vld [vmem:[#allocation21_spill] sm:$0xff] }
 0x806   :  { %v14360_v14 = vsub.f32 %v25814_v24, %v26047_v55  ;;  %v14394_v63 = vmul.f32 %v14358_v7, %v27794_v47  ;;  %v14428_v21 = vmul.f32 %v14392_v56, %v14392_v56  ;;  %v14471_v43 = vsel %vm218_vm0, %v14426_v25, 0.0  ;;  %v27935_v25 = vld [vmem:[#allocation31_spill] sm:$0xff] }
 0x807   :  { %v14462_v18 = vadd.f32 %v14461_v41, %v14460_v29  ;;  %v14361_v5 = vsub.f32 %v25829_v27, %v26047_v55  ;;  %v14395_v17 = vmul.f32 %v14359_v28, %v27795_v23  ;;  %v14429_v45 = vmul.f32 %v14393_v39, %v14393_v39 }
 0x808   :  { %v14473_v6 = vsel %vm218_vm0, %v14427_v22, 0.0  ;;  %v14362_v9 = vsub.f32 %v25812_v53, %v26047_v55  ;;  %v14396_v24 = vmul.f32 %v14360_v14, %v27796_v10  ;;  %v14430_v2 = vmul.f32 %v14394_v63, %v14394_v63  ;;  %v27937_v63 = vld [vmem:[#allocation23_spill] sm:$0xff] }
 0x809   :  { %v14464_v12 = vadd.f32 %v14463_v51, %v14462_v18  ;;  %v14475_v20 = vsel %vm218_vm0, %v14428_v21, 0.0  ;;  %v14363_v36 = vsub.f32 %v25827_v26, %v26047_v55  ;;  %v14397_v27 = vmul.f32 %v14361_v5, %v27797_v3  ;;  %v27931_v51 = vld [vmem:[#allocation39_spill] sm:$0xff] }
 0x80a   :  { %v14431_v58 = vmul.f32 %v14395_v17, %v14395_v17  ;;  %v14477_v40 = vsel %vm218_vm0, %v14429_v45, 0.0  ;;  %v14364_v18 = vsub.f32 %v25862_v31, %v26047_v55  ;;  %v14398_v53 = vmul.f32 %v14362_v9, %v27798_v38  ;;  %v27934_v31 = vld [vmem:[#allocation7_spill] sm:$0xff]  ;;  %v26143_v17 = vld [vmem:[#allocation4 + $0x138] sm:$0xff]  ;;  %v27938_v9 = vld [vmem:[#allocation38_spill] sm:$0xff] }
 0x80b   :  { %v14466_v34 = vadd.f32 %v14465_v32, %v14464_v12  ;;  %v14432_v62 = vmul.f32 %v14396_v24, %v14396_v24  ;;  %v14479_v42 = vsel %vm218_vm0, %v14430_v2, 0.0  ;;  %v14365_v12 = vsub.f32 %v27931_v51, %v26047_v55  ;;  %v27939_v2 = vld [vmem:[#allocation26_spill] sm:$0xff] }
 0x80c   :  { %v14399_v26 = vmul.f32 %v14363_v36, %v27932_v4  ;;  %v14433_v46 = vmul.f32 %v14397_v27, %v14397_v27  ;;  %v14481_v8 = vsel %vm218_vm0, %v14431_v58, 0.0  ;;  %v14531_v56 = vsub.f32 %v27934_v31, %v26047_v55  ;;  %v27940_v58 = vld [vmem:[#allocation8_spill] sm:$0xff] }
 0x80d   :  { %v14468_v35 = vadd.f32 %v14467_v15, %v14466_v34  ;;  %v27933_v34 = vld [vmem:[#allocation5_spill] sm:$0xff]  ;;  %v14366_v15 = vsub.f32 %v27935_v25, %v26047_v55  ;;  %v14434_v39 = vmul.f32 %v14398_v53, %v14398_v53  ;;  %v14483_v22 = vsel %vm218_vm0, %v14432_v62, 0.0 }
 0x80e   :  { %v14530_v7 = vsub.f32 %v27933_v34, %v26047_v55  ;;  %v14401_v21 = vmul.f32 %v14365_v12, %v27937_v63  ;;  %v14533_v45 = vsub.f32 %v26143_v17, %v26047_v55  ;;  %v14367_v24 = vsub.f32 %v27938_v9, %v26047_v55  ;;  %v27942_v12 = vld [vmem:[#allocation58_spill] sm:$0xff]  ;;  %v27948_v9 = vld [vmem:[#allocation13_spill] sm:$0xff] }
 0x80f   :  { %v14470_v44 = vadd.f32 %v14469_v37, %v14468_v35  ;;  %v27936_v35 = vld [vmem:[#allocation22_spill] sm:$0xff]  ;;  %v14487_v36 = vsel %vm218_vm0, %v14434_v39, 0.0  ;;  %v27946_v39 = vld [vmem:[#allocation9_spill] sm:$0xff] }
 0x810   :  { %v14400_v28 = vmul.f32 %v14364_v18, %v27936_v35  ;;  %v14437_v18 = vmul.f32 %v14401_v21, %v14401_v21 }
 0x811   :  { %v14472_v52 = vadd.f32 %v14471_v43, %v14470_v44  ;;  %v26137_v44 = vld [vmem:[#allocation4 + $0x130] sm:$0xff]  ;;  %v14435_v43 = vmul.f32 %v14399_v26, %v14399_v26  ;;  %v14368_v26 = vsub.f32 %v27942_v12, %v26047_v55  ;;  %v27952_v12 = vld [vmem:[#allocation12_spill] sm:$0xff] }
 0x812   :  { %v14532_v14 = vsub.f32 %v26137_v44, %v26047_v55 }
 0x813   :  { %v14474_v11 = vadd.f32 %v14473_v6, %v14472_v52  ;;  %v14485_v52 = vsel %vm218_vm0, %v14433_v46, 0.0  ;;  %v14566_v6 = vmul.f32 %v14530_v7, %v27784_v54  ;;  %v14489_v53 = vsel %vm218_vm0, %v14435_v43, 0.0  ;;  %v27941_v54 = vld [vmem:[#allocation11_spill] sm:$0xff]  ;;  %v27944_v7 = vld [vmem:[#allocation6_spill] sm:$0xff] }
 0x814   :  { %v27943_v46 = vld [vmem:[#allocation27_spill] sm:$0xff]  ;;  %v14536_v31 = vsub.f32 %v27944_v7, %v26047_v55 }
 0x815   :  { %v14476_v29 = vadd.f32 %v14475_v20, %v14474_v11  ;;  %v14567_v11 = vmul.f32 %v14531_v56, %v27785_v59  ;;  %v14402_v20 = vmul.f32 %v14366_v15, %v27939_v2  ;;  %v14535_v59 = vsub.f32 %v27941_v54, %v26047_v55  ;;  %v27945_v15 = vld [vmem:[#allocation59_spill] sm:$0xff] }
 0x817   :  { %v14478_v41 = vadd.f32 %v14477_v40, %v14476_v29  ;;  %v14436_v29 = vmul.f32 %v14400_v28, %v14400_v28  ;;  %v14534_v40 = vsub.f32 %v27940_v58, %v26047_v55  ;;  %v14603_v51 = vmul.f32 %v14567_v11, %v14567_v11 }
 0x818   :  { %v14493_v28 = vsel %vm218_vm0, %v14437_v18, 0.0 }
 0x819   :  { %v14480_v50 = vadd.f32 %v14479_v42, %v14478_v41  ;;  %v14568_v41 = vmul.f32 %v14532_v14, %v27786_v57  ;;  %v14569_v42 = vmul.f32 %v14533_v45, %v27787_v0  ;;  %v14491_v34 = vsel %vm218_vm0, %v14436_v29, 0.0 }
 0x81a   :  { %v14570_v56 = vmul.f32 %v14534_v40, %v27788_v1  ;;  %v14369_v0 = vsub.f32 %v27945_v15, %v26047_v55 }
 0x81b   :  { %v14482_v32 = vadd.f32 %v14481_v8, %v14480_v50  ;;  %v14602_v50 = vmul.f32 %v14566_v6, %v14566_v6  ;;  %v14403_v8 = vmul.f32 %v14367_v24, %v27943_v46  ;;  %v14604_v25 = vmul.f32 %v14568_v41, %v14568_v41  ;;  %v27950_v41 = vld [vmem:[#allocation15_spill] sm:$0xff] }
 0x81c   :  { %v14605_v21 = vmul.f32 %v14569_v42, %v14569_v42  ;;  %v14538_v24 = vsub.f32 %v27948_v9, %v26047_v55  ;;  %v14606_v29 = vmul.f32 %v14570_v56, %v14570_v56  ;;  %v14539_v18 = vsub.f32 %v27950_v41, %v26047_v55  ;;  %v27954_v56 = vld [vmem:[#allocation14_spill] sm:$0xff] }
 0x81d   :  { %v14484_v37 = vadd.f32 %v14483_v22, %v14482_v32  ;;  %v14438_v32 = vmul.f32 %v14402_v20, %v14402_v20  ;;  %v14537_v22 = vsub.f32 %v27946_v39, %v26047_v55  ;;  %v14638_v43 = vsel %vm218_vm0, %v14602_v50, 0.0  ;;  %v27955_v39 = vld [vmem:[#allocation35_spill] sm:$0xff] }
 0x81e   :  { %v14439_v1 = vmul.f32 %v14403_v8, %v14403_v8  ;;  %v14572_v20 = vmul.f32 %v14536_v31, %v27846_v61  ;;  %v14574_v8 = vmul.f32 %v14538_v24, %v23206_v60  ;;  %v14575_v15 = vmul.f32 %v14539_v18, %v27789_v30  ;;  %v27958_v24 = vld [vmem:[#allocation19_spill] sm:$0xff]  ;;  %v27960_v18 = vld [vmem:[#allocation16_spill] sm:$0xff] }
 0x81f   :  { %v14486_v5 = vadd.f32 %v14485_v52, %v14484_v37  ;;  %v14571_v37 = vmul.f32 %v14535_v59, %v23200_v33  ;;  %v14639_v52 = vsel %vm218_vm0, %v14603_v51, 0.0  ;;  %v14495_v6 = vsel %vm218_vm0, %v14438_v32, 0.0 }
 0x820   :  { %v14640_v11 = vadd.f32 %v14639_v52, %v14638_v43  ;;  %v14641_v33 = vsel %vm218_vm0, %v14604_v25, 0.0  ;;  %v14643_v59 = vsel %vm218_vm0, %v14605_v21, 0.0  ;;  %v14497_v61 = vsel %vm218_vm0, %v14439_v1, 0.0  ;;  %v27956_v21 = vld [vmem:[#allocation17_spill] sm:$0xff] }
 0x821   :  { %v14488_v27 = vadd.f32 %v14487_v36, %v14486_v5  ;;  %v27947_v5 = vld [vmem:[#allocation32_spill] sm:$0xff]  ;;  %v27949_v36 = vld [vmem:[#allocation54_spill] sm:$0xff]  ;;  %v14607_v54 = vmul.f32 %v14571_v37, %v14571_v37  ;;  %v14608_v32 = vmul.f32 %v14572_v20, %v14572_v20  ;;  %v14541_v25 = vsub.f32 %v27954_v56, %v26047_v55 }
 0x822   :  { %v14404_v45 = vmul.f32 %v14368_v26, %v27947_v5  ;;  %v14642_v40 = vadd.f32 %v14641_v33, %v14640_v11  ;;  %v14540_v26 = vsub.f32 %v27952_v12, %v26047_v55  ;;  %v14542_v43 = vsub.f32 %v27956_v21, %v26047_v55  ;;  %v27962_v12 = vld [vmem:[#allocation18_spill] sm:$0xff]  ;;  %v27964_v56 = vld [vmem:[#allocation28_spill] sm:$0xff] }
 0x823   :  { %v14490_v62 = vadd.f32 %v14489_v53, %v14488_v27  ;;  %v14370_v27 = vsub.f32 %v27949_v36, %v26047_v55  ;;  %v14573_v53 = vmul.f32 %v14537_v22, %v23204_v48  ;;  %v14649_v1 = vsel %vm218_vm0, %v14608_v32, 0.0 }
 0x824   :  { %v14440_v50 = vmul.f32 %v14404_v45, %v14404_v45  ;;  %v14644_v51 = vadd.f32 %v14643_v59, %v14642_v40  ;;  %v14576_v52 = vmul.f32 %v14540_v26, %v27790_v13  ;;  %v14610_v45 = vmul.f32 %v14574_v8, %v14574_v8 }
 0x825   :  { %v14492_v57 = vadd.f32 %v14491_v34, %v14490_v62  ;;  %v27951_v62 = vld [vmem:[#allocation33_spill] sm:$0xff]  ;;  %v14645_v34 = vsel %vm218_vm0, %v14606_v29, 0.0  ;;  %v14406_v22 = vmul.f32 %v14370_v27, %v27955_v39  ;;  %v14543_v20 = vsub.f32 %v27958_v24, %v26047_v55  ;;  %v27959_v27 = vld [vmem:[#allocation36_spill] sm:$0xff] }
 0x826   :  { %v14405_v42 = vmul.f32 %v14369_v0, %v27951_v62  ;;  %v14646_v31 = vadd.f32 %v14645_v34, %v14644_v51  ;;  %v14609_v0 = vmul.f32 %v14573_v53, %v14573_v53  ;;  %v14499_v60 = vsel %vm218_vm0, %v14440_v50, 0.0  ;;  %v27961_v50 = vld [vmem:[#allocation64_spill] sm:$0xff] }
 0x827   :  { %v14494_v14 = vadd.f32 %v14493_v28, %v14492_v57  ;;  %v27953_v57 = vld [vmem:[#allocation55_spill] sm:$0xff]  ;;  %v14647_v28 = vsel %vm218_vm0, %v14607_v54, 0.0  ;;  %v14577_v29 = vmul.f32 %v14541_v25, %v27791_v19  ;;  %v14611_v33 = vmul.f32 %v14575_v15, %v14575_v15  ;;  %v27968_v24 = vld [vmem:[#allocation20_spill] sm:$0xff] }
 0x828   :  { %v14371_v48 = vsub.f32 %v27953_v57, %v26047_v55  ;;  %v14441_v37 = vmul.f32 %v14405_v42, %v14405_v42  ;;  %v14651_v36 = vsel %vm218_vm0, %v14609_v0, 0.0  ;;  %v14442_v40 = vmul.f32 %v14406_v22, %v14406_v22  ;;  %v27963_v57 = vld [vmem:[#allocation40_spill] sm:$0xff]  ;;  %v27965_v22 = vld [vmem:[#allocation47_spill] sm:$0xff] }
 0x829   :  { %v14496_v58 = vadd.f32 %v14495_v6, %v14494_v14  ;;  %v14648_v14 = vadd.f32 %v14647_v28, %v14646_v31  ;;  %v27957_v6 = vld [vmem:[#allocation53_spill] sm:$0xff]  ;;  %v14544_v53 = vsub.f32 %v27960_v18, %v26047_v55  ;;  %v14578_v54 = vmul.f32 %v14542_v43, %v27792_v16 }
 0x82a   :  { %v14372_v30 = vsub.f32 %v27957_v6, %v26047_v55  ;;  %v14501_v13 = vsel %vm218_vm0, %v14441_v37, 0.0  ;;  %v14612_v59 = vmul.f32 %v14576_v52, %v14576_v52  ;;  %v14653_v42 = vsel %vm218_vm0, %v14610_v45, 0.0 }
 0x82b   :  { %v14498_v7 = vadd.f32 %v14497_v61, %v14496_v58  ;;  %v14650_v9 = vadd.f32 %v14649_v1, %v14648_v14  ;;  %v14407_v58 = vmul.f32 %v14371_v48, %v27959_v27  ;;  %v14373_v19 = vsub.f32 %v27961_v50, %v26047_v55  ;;  %v27966_v14 = vld [vmem:[#allocation29_spill] sm:$0xff] }
 0x82c   :  { %v14545_v26 = vsub.f32 %v27962_v12, %v26047_v55  ;;  %v14579_v8 = vmul.f32 %v14543_v20, %v27793_v49  ;;  %v14613_v32 = vmul.f32 %v14577_v29, %v14577_v29  ;;  %v14655_v34 = vsel %vm218_vm0, %v14611_v33, 0.0  ;;  %v27967_v1 = vld [vmem:[#allocation41_spill] sm:$0xff] }
 0x82d   :  { %v14500_v11 = vadd.f32 %v14499_v60, %v14498_v7  ;;  %v14652_v41 = vadd.f32 %v14651_v36, %v14650_v9  ;;  %v14408_v48 = vmul.f32 %v14372_v30, %v27963_v57  ;;  %v14443_v7 = vmul.f32 %v14407_v58, %v14407_v58  ;;  %v27969_v58 = vld [vmem:[#allocation63_spill] sm:$0xff]  ;;  %v27972_v12 = vld [vmem:[#allocation37_spill] sm:$0xff] }
 0x82e   :  { %v14503_v16 = vsel %vm218_vm0, %v14442_v40, 0.0  ;;  %v14546_v25 = vsub.f32 %v27964_v56, %v26047_v55  ;;  %v14580_v15 = vmul.f32 %v14544_v53, %v27794_v47  ;;  %v14614_v0 = vmul.f32 %v14578_v54, %v14578_v54 }
 0x82f   :  { %v14502_v61 = vadd.f32 %v14501_v13, %v14500_v11  ;;  %v14654_v51 = vadd.f32 %v14653_v42, %v14652_v41  ;;  %v14657_v28 = vsel %vm218_vm0, %v14612_v59, 0.0  ;;  %v14374_v49 = vsub.f32 %v27965_v22, %v26047_v55  ;;  %v27970_v41 = vld [vmem:[#allocation30_spill] sm:$0xff]  ;;  %v27971_v42 = vld [vmem:[#allocation44_spill] sm:$0xff] }
 0x830   :  { %v14547_v21 = vsub.f32 %v27966_v14, %v26047_v55  ;;  %v14581_v43 = vmul.f32 %v14545_v26, %v27795_v23  ;;  %v14615_v52 = vmul.f32 %v14579_v8, %v14579_v8  ;;  %v14659_v45 = vsel %vm218_vm0, %v14613_v32, 0.0 }
 0x831   :  { %v14656_v31 = vadd.f32 %v14655_v34, %v14654_v51  ;;  %v14504_v37 = vadd.f32 %v14503_v16, %v14502_v61  ;;  %v14409_v30 = vmul.f32 %v14373_v19, %v27967_v1  ;;  %v14444_v11 = vmul.f32 %v14408_v48, %v14408_v48  ;;  %v27973_v48 = vld [vmem:[#allocation68_spill] sm:$0xff] }
 0x832   :  { %v14505_v47 = vsel %vm218_vm0, %v14443_v7, 0.0  ;;  %v14548_v20 = vsub.f32 %v27968_v24, %v26047_v55  ;;  %v14582_v29 = vmul.f32 %v14546_v25, %v27796_v10  ;;  %v14616_v33 = vmul.f32 %v14580_v15, %v14580_v15 }
 0x833   :  { %v14658_v60 = vadd.f32 %v14657_v28, %v14656_v31  ;;  %v14661_v36 = vsel %vm218_vm0, %v14614_v0, 0.0  ;;  %v14375_v23 = vsub.f32 %v27969_v58, %v26047_v55  ;;  %v14506_v40 = vadd.f32 %v14505_v47, %v14504_v37  ;;  %v27974_v31 = vld [vmem:[#allocation43_spill] sm:$0xff]  ;;  %v27975_v28 = vld [vmem:[#allocation45_spill] sm:$0xff]  ;;  %v27978_v47 = vld [vmem:[#allocation42_spill] sm:$0xff] }
 0x834   :  { %v14549_v18 = vsub.f32 %v27970_v41, %v26047_v55  ;;  %v14583_v53 = vmul.f32 %v14547_v21, %v27797_v3  ;;  %v14617_v54 = vmul.f32 %v14581_v43, %v14581_v43  ;;  %v14663_v59 = vsel %vm218_vm0, %v14615_v52, 0.0 }
 0x835   :  { %v14660_v9 = vadd.f32 %v14659_v45, %v14658_v60  ;;  %v14410_v19 = vmul.f32 %v14374_v49, %v27971_v42  ;;  %v14445_v61 = vmul.f32 %v14409_v30, %v14409_v30  ;;  %v14507_v10 = vsel %vm218_vm0, %v14444_v11, 0.0  ;;  %v27976_v60 = vld [vmem:[#allocation34_spill] sm:$0xff]  ;;  %v27977_v45 = vld [vmem:[#allocation24_spill] sm:$0xff] }
 0x836   :  { %v14550_v26 = vsub.f32 %v27972_v12, %v26047_v55  ;;  %v14584_v8 = vmul.f32 %v14548_v20, %v27798_v38  ;;  %v14618_v32 = vmul.f32 %v14582_v29, %v14582_v29  ;;  %v14665_v34 = vsel %vm218_vm0, %v14616_v33, 0.0  ;;  %v27979_v33 = vld [vmem:[#allocation51_spill] sm:$0xff] }
 0x837   :  { %v14662_v13 = vadd.f32 %v14661_v36, %v14660_v9  ;;  %v14376_v3 = vsub.f32 %v27973_v48, %v26047_v55  ;;  %v14508_v7 = vadd.f32 %v14507_v10, %v14506_v40  ;;  %v14551_v56 = vsub.f32 %v27974_v31, %v26047_v55  ;;  %v27982_v10 = vld [vmem:[#allocation49_spill] sm:$0xff] }
 0x838   :  { %v14585_v25 = vmul.f32 %v14549_v18, %v27932_v4  ;;  %v14619_v15 = vmul.f32 %v14583_v53, %v14583_v53  ;;  %v14667_v0 = vsel %vm218_vm0, %v14617_v54, 0.0  ;;  %v14411_v22 = vmul.f32 %v14375_v23, %v27975_v28 }
 0x839   :  { %v14664_v51 = vadd.f32 %v14663_v59, %v14662_v13  ;;  %v14446_v49 = vmul.f32 %v14410_v19, %v14410_v19  ;;  %v14509_v38 = vsel %vm218_vm0, %v14445_v61, 0.0  ;;  %v14552_v14 = vsub.f32 %v27976_v60, %v26047_v55  ;;  %v27980_v13 = vld [vmem:[#allocation50_spill] sm:$0xff]  ;;  %v27981_v59 = vld [vmem:[#allocation67_spill] sm:$0xff] }
 0x83a   :  { %v14586_v21 = vmul.f32 %v14550_v26, %v27936_v35  ;;  %v14620_v43 = vmul.f32 %v14584_v8, %v14584_v8  ;;  %v14669_v52 = vsel %vm218_vm0, %v14618_v32, 0.0  ;;  %v14377_v4 = vsub.f32 %v27977_v45, %v26047_v55  ;;  %v27983_v32 = vld [vmem:[#allocation52_spill] sm:$0xff] }
 0x83b   :  { %v14666_v16 = vadd.f32 %v14665_v34, %v14664_v51  ;;  %v14510_v30 = vadd.f32 %v14509_v38, %v14508_v7  ;;  %v14553_v9 = vsub.f32 %v27978_v47, %v26047_v55  ;;  %v14587_v24 = vmul.f32 %v14551_v56, %v27937_v63  ;;  %v27986_v38 = vld [vmem:[#allocation46_spill] sm:$0xff] }
 0x83c   :  { %v14621_v20 = vmul.f32 %v14585_v25, %v14585_v25  ;;  %v14671_v29 = vsel %vm218_vm0, %v14619_v15, 0.0  ;;  %v14412_v36 = vmul.f32 %v14376_v3, %v27979_v33  ;;  %v14447_v23 = vmul.f32 %v14411_v22, %v14411_v22 }
 0x83d   :  { %v14668_v37 = vadd.f32 %v14667_v0, %v14666_v16  ;;  %v14511_v35 = vsel %vm218_vm0, %v14446_v49, 0.0  ;;  %v14554_v41 = vsub.f32 %v27980_v13, %v26047_v55  ;;  %v14588_v18 = vmul.f32 %v14552_v14, %v27939_v2  ;;  %v27984_v16 = vld [vmem:[#allocation48_spill] sm:$0xff] }
 0x83e   :  { %v14622_v53 = vmul.f32 %v14586_v21, %v14586_v21  ;;  %v14673_v54 = vsel %vm218_vm0, %v14620_v43, 0.0  ;;  %v14378_v63 = vsub.f32 %v27981_v59, %v26047_v55  ;;  %v14512_v19 = vadd.f32 %v14511_v35, %v14510_v30  ;;  %v27985_v0 = vld [vmem:[#allocation56_spill] sm:$0xff]  ;;  %v27987_v43 = vld [vmem:[#allocation57_spill] sm:$0xff] }
 0x83f   :  { %v14670_v11 = vadd.f32 %v14669_v52, %v14668_v37  ;;  %v14555_v51 = vsub.f32 %v27982_v10, %v26047_v55  ;;  %v14589_v12 = vmul.f32 %v14553_v9, %v27943_v46  ;;  %v14623_v26 = vmul.f32 %v14587_v24, %v14587_v24 }
 0x840   :  { %v14675_v8 = vsel %vm218_vm0, %v14621_v20, 0.0  ;;  %v14413_v34 = vmul.f32 %v14377_v4, %v27983_v32  ;;  %v14448_v3 = vmul.f32 %v14412_v36, %v14412_v36  ;;  %v14513_v2 = vsel %vm218_vm0, %v14447_v23, 0.0 }
 0x841   :  { %v14672_v40 = vadd.f32 %v14671_v29, %v14670_v11  ;;  %v14556_v31 = vsub.f32 %v27984_v16, %v26047_v55  ;;  %v14590_v56 = vmul.f32 %v14554_v41, %v27947_v5  ;;  %v14624_v25 = vmul.f32 %v14588_v18, %v14588_v18  ;;  %v27988_v11 = vld [vmem:[#allocation62_spill] sm:$0xff]  ;;  %v27990_v41 = vld [vmem:[#allocation60_spill] sm:$0xff] }
 0x842   :  { %v14677_v15 = vsel %vm218_vm0, %v14622_v53, 0.0  ;;  %v14379_v46 = vsub.f32 %v27985_v0, %v26047_v55  ;;  %v14514_v22 = vadd.f32 %v14513_v2, %v14512_v19  ;;  %v14557_v37 = vsub.f32 %v27986_v38, %v26047_v55  ;;  %v27994_v38 = vld [vmem:[#allocation71_spill] sm:$0xff] }
 0x843   :  { %v14674_v61 = vadd.f32 %v14673_v54, %v14672_v40  ;;  %v14591_v60 = vmul.f32 %v14555_v51, %v27951_v62  ;;  %v14625_v14 = vmul.f32 %v14589_v12, %v14589_v12  ;;  %v14679_v21 = vsel %vm218_vm0, %v14623_v26, 0.0  ;;  %v27989_v62 = vld [vmem:[#allocation66_spill] sm:$0xff] }
 0x844   :  { %v14414_v52 = vmul.f32 %v14378_v63, %v27987_v43  ;;  %v14449_v4 = vmul.f32 %v14413_v34, %v14413_v34  ;;  %v14515_v5 = vsel %vm218_vm0, %v14448_v3, 0.0  ;;  %v14558_v47 = vsub.f32 %v27988_v11, %v26047_v55 }
 0x845   :  { %v14676_v7 = vadd.f32 %v14675_v8, %v14674_v61  ;;  %v14592_v9 = vmul.f32 %v14556_v31, %v27955_v39  ;;  %v14626_v24 = vmul.f32 %v14590_v56, %v14590_v56  ;;  %v14681_v20 = vsel %vm218_vm0, %v14624_v25, 0.0  ;;  %v27991_v39 = vld [vmem:[#allocation61_spill] sm:$0xff]  ;;  %v27993_v56 = vld [vmem:[#allocation10_spill] sm:$0xff] }
 0x846   :  { %v14516_v29 = vadd.f32 %v14515_v5, %v14514_v22  ;;  %v14559_v23 = vsub.f32 %v27989_v62, %v26047_v55  ;;  %v14593_v35 = vmul.f32 %v14557_v37, %v27959_v27  ;;  %v14627_v40 = vmul.f32 %v14591_v60, %v14591_v60  ;;  %v27992_v27 = vld [vmem:[#allocation65_spill] sm:$0xff] }
 0x847   :  { %v14678_v49 = vadd.f32 %v14677_v15, %v14676_v7  ;;  %v14683_v13 = vsel %vm218_vm0, %v14625_v14, 0.0  ;;  %v14415_v18 = vmul.f32 %v14379_v46, %v27990_v41  ;;  %v14450_v53 = vmul.f32 %v14414_v52, %v14414_v52 }
 0x848   :  { %v14517_v54 = vsel %vm218_vm0, %v14449_v4, 0.0  ;;  %v14560_v19 = vsub.f32 %v27991_v39, %v26047_v55  ;;  %v14594_v61 = vmul.f32 %v14558_v47, %v27963_v57  ;;  %v14628_v10 = vmul.f32 %v14592_v9, %v14592_v9  ;;  %v27995_v4 = vld [vmem:[#allocation69_spill] sm:$0xff] }
 0x849   :  { %v14680_v30 = vadd.f32 %v14679_v21, %v14678_v49  ;;  %v14685_v51 = vsel %vm218_vm0, %v14626_v24, 0.0  ;;  %v14518_v12 = vadd.f32 %v14517_v54, %v14516_v29  ;;  %v14561_v8 = vsub.f32 %v27992_v27, %v26047_v55  ;;  %v27996_v24 = vld [vmem:[#allocation70_spill] sm:$0xff] }
 0x84a   :  { %v14595_v34 = vmul.f32 %v14559_v23, %v27967_v1  ;;  %v14629_v3 = vmul.f32 %v14593_v35, %v14593_v35  ;;  %v14687_v2 = vsel %vm218_vm0, %v14627_v40, 0.0  ;;  %v14451_v7 = vmul.f32 %v14415_v18, %v14415_v18 }
 0x84b   :  { %v14682_v36 = vadd.f32 %v14681_v20, %v14680_v30  ;;  %v14519_v16 = vsel %vm218_vm0, %v14450_v53, 0.0  ;;  %v14562_v57 = vsub.f32 %v27993_v56, %v26047_v55  ;;  %v14596_v25 = vmul.f32 %v14560_v19, %v27971_v42 }
 0x84c   :  { %v14630_v15 = vmul.f32 %v14594_v61, %v14594_v61  ;;  %v14689_v46 = vsel %vm218_vm0, %v14628_v10, 0.0  ;;  %v14520_v22 = vadd.f32 %v14519_v16, %v14518_v12  ;;  %v14563_v1 = vsub.f32 %v27994_v38, %v26047_v55 }
 0x84d   :  { %v14684_v63 = vadd.f32 %v14683_v13, %v14682_v36  ;;  %v14597_v37 = vmul.f32 %v14561_v8, %v27975_v28  ;;  %v14631_v60 = vmul.f32 %v14595_v34, %v14595_v34  ;;  %v14691_v14 = vsel %vm218_vm0, %v14629_v3, 0.0 }
 0x84e   :  { %v14521_v21 = vsel %vm218_vm0, %v14451_v7, 0.0  ;;  %v14564_v5 = vsub.f32 %v27995_v4, %v26047_v55  ;;  %v14598_v42 = vmul.f32 %v14562_v57, %v27979_v33  ;;  %v14632_v30 = vmul.f32 %v14596_v25, %v14596_v25  ;;  %v20408_v4 = vld [vmem:[#allocation4] sm:$0xff] }
 0x84f   :  { %v14686_v26 = vadd.f32 %v14685_v51, %v14684_v63  ;;  %v14693_v11 = vsel %vm218_vm0, %v14630_v15, 0.0  ;;  %v14522_v47 = vadd.f32 %v14521_v21, %v14520_v22  ;;  %v14565_v20 = vsub.f32 %v27996_v24, %v26047_v55  ;;  %v20412_v24 = vld [vmem:[#allocation4 + $0x20] sm:$0xff] }
 0x850   :  { %v14599_v28 = vmul.f32 %v14563_v1, %v27983_v32  ;;  %v14633_v29 = vmul.f32 %v14597_v37, %v14597_v37  ;;  %v14695_v36 = vsel %vm218_vm0, %v14631_v60, 0.0  ;;  %v14600_v23 = vmul.f32 %v14564_v5, %v27987_v43  ;;  %v26347_v37 = vld [vmem:[%s27435_s6] sm:$0x1] }
 0x851   :  { %v14688_v31 = vadd.f32 %v14687_v2, %v14686_v26  ;;  %v14634_v35 = vmul.f32 %v14598_v42, %v14598_v42  ;;  %v14697_v40 = vsel %vm218_vm0, %v14632_v30, 0.0  ;;  %v14523_v33 = vrot.slane %v14522_v47, 4  ;;  %v20409_v42 = vld [vmem:[#allocation4 + $0x8] sm:$0xff] }
 0x852   :  { %v14601_v18 = vmul.f32 %v14565_v20, %v27990_v41  ;;  %v14635_v53 = vmul.f32 %v14599_v28, %v14599_v28  ;;  %v14699_v54 = vsel %vm218_vm0, %v14633_v29, 0.0  ;;  %v14636_v39 = vmul.f32 %v14600_v23, %v14600_v23  ;;  %v20413_v28 = vld [vmem:[#allocation4 + $0x28] sm:$0xff]  ;;  %v20415_v23 = vld [vmem:[#allocation4 + $0x38] sm:$0xff] }
 0x853   :  { %v14690_v49 = vadd.f32 %v14689_v46, %v14688_v31  ;;  %v14701_v32 = vsel %vm218_vm0, %v14634_v35, 0.0  ;;  %v14524_v19 = vadd.f32 %v14523_v33, %v14522_v47 }
 0x854   :  { %v14637_v10 = vmul.f32 %v14601_v18, %v14601_v18  ;;  %v14703_v51 = vsel %vm218_vm0, %v14635_v53, 0.0  ;;  %v14705_v12 = vsel %vm218_vm0, %v14636_v39, 0.0  ;;  %v20418_v53 = vld [vmem:[#allocation4 + $0x50] sm:$0xff] }
 0x855   :  { %v14692_v52 = vadd.f32 %v14691_v14, %v14690_v49  ;;  %v14525_v26 = vrot.slane %v14524_v19, 2  ;;  %v14717_v49 = vld [vmem:[%s27434_s5] sm:$0x1]  ;;  %v27997_v14 = vld [vmem:[#allocation25_spill] sm:$0xff] }
 0x856   :  { %v14707_v8 = vsel %vm218_vm0, %v14637_v10, 0.0 }
 0x857   :  { %v14694_v9 = vadd.f32 %v14693_v11, %v14692_v52  ;;  %v14526_v34 = vadd.f32 %v14525_v26, %v14524_v19  ;;  %v20410_v11 = vld [vmem:[#allocation4 + $0x10] sm:$0xff] }
 0x859   :  { %v14696_v62 = vadd.f32 %v14695_v36, %v14694_v9  ;;  %v14527_v7 = vrot.slane %v14526_v34, 1  ;;  %v20414_v36 = vld [vmem:[#allocation4 + $0x30] sm:$0xff] }
 0x85b   :  { %v14698_v13 = vadd.f32 %v14697_v40, %v14696_v62  ;;  %v14528_v56 = vadd.f32 %v14527_v7, %v14526_v34  ;;  %v20416_v40 = vld [vmem:[#allocation4 + $0x40] sm:$0xff]  ;;  %v20427_v7 = vld [vmem:[#allocation4 + $0x98] sm:$0xff] }
 0x85d   :  { %v14700_v63 = vadd.f32 %v14699_v54, %v14698_v13  ;;  %v20417_v13 = vld [vmem:[#allocation4 + $0x48] sm:$0xff] }
 0x85f   :  { %v14702_v61 = vadd.f32 %v14701_v32, %v14700_v63  ;;  %v20419_v63 = vld [vmem:[#allocation4 + $0x58] sm:$0xff]  ;;  %v20420_v32 = vld [vmem:[#allocation4 + $0x60] sm:$0xff] }
 0x861   :  { %v14704_v43 = vadd.f32 %v14703_v51, %v14702_v61  ;;  %v20421_v61 = vld [vmem:[#allocation4 + $0x68] sm:$0xff]  ;;  %v20422_v51 = vld [vmem:[#allocation4 + $0x70] sm:$0xff] }
 0x863   :  { %v14706_v27 = vadd.f32 %v14705_v12, %v14704_v43  ;;  %v20423_v12 = vld [vmem:[#allocation4 + $0x78] sm:$0xff] }
 0x865   :  { %v14708_v41 = vadd.f32 %v14707_v8, %v14706_v27  ;;  %v20424_v27 = vld [vmem:[#allocation4 + $0x80] sm:$0xff] }
 0x867   :  { %v14709_v3 = vrot.slane %v14708_v41, 4 }
 0x869   :  { %v14710_v2 = vadd.f32 %v14709_v3, %v14708_v41  ;;  %v20425_v41 = vld [vmem:[#allocation4 + $0x88] sm:$0xff]  ;;  %v20426_v3 = vld [vmem:[#allocation4 + $0x90] sm:$0xff] }
 0x86b   :  { %v14711_v16 = vrot.slane %v14710_v2, 2 }
 0x86d   :  { %v14712_v31 = vadd.f32 %v14711_v16, %v14710_v2 }
 0x86f   :  { %v14713_v57 = vrot.slane %v14712_v31, 1 }
 0x871   :  { %v14714_v25 = vadd.f32 %v14713_v57, %v14712_v31  ;;  %v20428_v31 = vld [vmem:[#allocation4 + $0xa0] sm:$0xff]  ;;  %v20429_v57 = vld [vmem:[#allocation4 + $0xa8] sm:$0xff] }
 0x873   :  { %v14715_v15 = vadd.f32 %v14714_v25, %v14528_v56 }
 0x875   :  { %v14716_v46 = vmul.f32 0.001953125, %v14715_v15  ;;  %v20430_v15 = vld [vmem:[#allocation4 + $0xb0] sm:$0xff] }
 0x877   :  { %v14718_v22 = vadd.f32 1e-05, %v14716_v46 }
 0x879   :  { %20332 = vrsqrt.f32 %v14718_v22  ;;  %v20431_v22 = vld [vmem:[#allocation4 + $0xb8] sm:$0xff] }
 0x883   :  { %v20333_v38 = vpop.eup %20332 }
 0x884   :  { %v14720_v1 = vmul.f32 %v20333_v38, %v14717_v49  ;;  %v20432_v38 = vld [vmem:[#allocation4 + $0xc0] sm:$0xff] }
 0x886   :  { %v26350_v60 = vmul.f32 %v14720_v1, %v26047_v55  ;;  %v26353_v21 = vrot.slane %v14720_v1, %v27997_v14  ;;  %v20411_v55 = vld [vmem:[#allocation4 + $0x18] sm:$0xff] }
 0x888   :  { %27998 = vst [vmem:[#allocation39_spill] sm:$0xff] %v26353_v21  ;;  %v14723_v52 = vsub.f32 %v26347_v37, %v26350_v60  ;;  %v26358_v5 = vmul.f32 %v20408_v4, %v26353_v21  ;;  %v26361_v30 = vmul.f32 %v20409_v42, %v26353_v21  ;;  %v26364_v47 = vmul.f32 %v20410_v11, %v26353_v21  ;;  %v20433_v4 = vld [vmem:[#allocation4 + $0xc8] sm:$0xff]  ;;  %v20434_v11 = vld [vmem:[#allocation4 + $0xd0] sm:$0xff] }
 0x889   :  { %v26367_v9 = vmul.f32 %v20411_v55, %v26353_v21  ;;  %v26370_v20 = vmul.f32 %v20412_v24, %v26353_v21  ;;  %v26373_v29 = vmul.f32 %v20413_v28, %v26353_v21  ;;  %v26376_v62 = vmul.f32 %v20414_v36, %v26353_v21  ;;  %v20435_v24 = vld [vmem:[#allocation4 + $0xd8] sm:$0xff]  ;;  %v20440_v60 = vld [vmem:[#allocation4 + $0x148] sm:$0xff] }
 0x88a   :  { %v26379_v35 = vmul.f32 %v20415_v23, %v26353_v21  ;;  %v26382_v33 = vmul.f32 %v20416_v40, %v26353_v21  ;;  %v26385_v18 = vmul.f32 %v20417_v13, %v26353_v21  ;;  %v26388_v54 = vmul.f32 %v20418_v53, %v26353_v21  ;;  %v20436_v40 = vld [vmem:[#allocation4 + $0xf0] sm:$0xff] }
 0x88b   :  { %v26391_v39 = vmul.f32 %v20419_v63, %v26353_v21  ;;  %v26394_v19 = vmul.f32 %v20420_v32, %v26353_v21  ;;  %v26397_v10 = vmul.f32 %v20421_v61, %v26353_v21  ;;  %v14744_v43 = vmul.f32 %v20422_v51, %v26353_v21 }
 0x88c   :  { %v14745_v26 = vmul.f32 %v20423_v12, %v26353_v21  ;;  %v14746_v8 = vmul.f32 %v20424_v27, %v26353_v21  ;;  %v14747_v34 = vmul.f32 %v20425_v41, %v26353_v21  ;;  %v14748_v2 = vmul.f32 %v20426_v3, %v26353_v21  ;;  %v20439_v12 = vld [vmem:[#allocation4 + $0x140] sm:$0xff] }
 0x88d   :  { %v14749_v16 = vmul.f32 %v20427_v7, %v26353_v21  ;;  %v14750_v56 = vmul.f32 %v20428_v31, %v26353_v21  ;;  %v14751_v25 = vmul.f32 %v20429_v57, %v26353_v21  ;;  %v14752_v46 = vmul.f32 %v20430_v15, %v26353_v21  ;;  %v14812_v57 = vld [vmem:[%s27436_s7 + $0x20] sm:$0xff]  ;;  %v14813_v15 = vld [vmem:[%s27436_s7 + $0x28] sm:$0xff] }
 0x88e   :  { %v14753_v49 = vmul.f32 %v20431_v22, %v26353_v21  ;;  %v14754_v1 = vmul.f32 %v20432_v38, %v26353_v21  ;;  %v14755_v42 = vmul.f32 %v20433_v4, %v26353_v21  ;;  %v14756_v55 = vmul.f32 %v20434_v11, %v26353_v21  ;;  %v14816_v4 = vld [vmem:[%s27436_s7 + $0x40] sm:$0xff]  ;;  %v14817_v11 = vld [vmem:[%s27436_s7 + $0x48] sm:$0xff] }
 0x88f   :  { %v14757_v28 = vmul.f32 %v20435_v24, %v26353_v21  ;;  %v14758_v36 = vmul.f32 %v26353_v21, %v27957_v6  ;;  %v14759_v23 = vmul.f32 %v26353_v21, %v27961_v50  ;;  %v14760_v13 = vmul.f32 %v20436_v40, %v26353_v21 }
 0x890   :  { %v14761_v53 = vmul.f32 %v26353_v21, %v27969_v58  ;;  %v26422_v63 = vmul.f32 %v26353_v21, %v27973_v48  ;;  %v26426_v32 = vmul.f32 %v26353_v21, %v27977_v45  ;;  %v26430_v6 = vmul.f32 %v26353_v21, %v27981_v59  ;;  %v20437_v48 = vld [vmem:[#allocation4 + $0x120] sm:$0xff]  ;;  %v20438_v45 = vld [vmem:[#allocation4 + $0x128] sm:$0xff] }
 0x891   :  { %v26434_v50 = vmul.f32 %v26353_v21, %v27985_v0  ;;  %v26440_v58 = vrot.slane %v14723_v52, %v27997_v14  ;;  %v26443_v61 = vmul.f32 %v20437_v48, %v26353_v21  ;;  %v26446_v51 = vmul.f32 %v20438_v45, %v26353_v21  ;;  %v14820_v48 = vld [vmem:[%s27436_s7 + $0x60] sm:$0xff]  ;;  %v14821_v45 = vld [vmem:[%s27436_s7 + $0x68] sm:$0xff] }
 0x892   :  { %v26450_v59 = vmul.f32 %v26137_v44, %v26353_v21  ;;  %v26454_v0 = vmul.f32 %v26143_v17, %v26353_v21  ;;  %v26457_v37 = vmul.f32 %v20439_v12, %v26353_v21  ;;  %v26460_v14 = vmul.f32 %v20440_v60, %v26353_v21  ;;  %v14822_v12 = vld [vmem:[%s27436_s7 + $0x70] sm:$0xff]  ;;  %v14823_v60 = vld [vmem:[%s27436_s7 + $0x78] sm:$0xff] }
 0x893   :  { %27999 = vst [vmem:[#allocation21_spill] sm:$0xff] %v26440_v58  ;;  %28000 = vst [vmem:[#allocation5_spill] sm:$0xff] %v26443_v61  ;;  %v14772_v52 = vadd.f32 %v26440_v58, %v26358_v5  ;;  %v14773_v27 = vadd.f32 %v26440_v58, %v26361_v30  ;;  %v14774_v44 = vadd.f32 %v26440_v58, %v26364_v47  ;;  %v14829_v61 = vld [vmem:[%s27436_s7 + $0xa8] sm:$0xff]  ;;  %v14831_v21 = vld [vmem:[%s27436_s7 + $0xb8] sm:$0xff] }
 0x894   :  { %28001 = vst [vmem:[#allocation7_spill] sm:$0xff] %v26446_v51  ;;  %28002 = vst [vmem:[#allocation31_spill] sm:$0xff] %v26450_v59  ;;  %v14775_v17 = vadd.f32 %v26440_v58, %v26367_v9  ;;  %v14776_v41 = vadd.f32 %v26440_v58, %v26370_v20  ;;  %v14777_v3 = vadd.f32 %v26440_v58, %v26373_v29 }
 0x895   :  { %28003 = vst [vmem:[#allocation22_spill] sm:$0xff] %v26454_v0  ;;  %28004 = vst [vmem:[#allocation23_spill] sm:$0xff] %v26457_v37  ;;  %v14778_v7 = vadd.f32 %v26440_v58, %v26376_v62  ;;  %v14779_v5 = vadd.f32 %v26440_v58, %v26379_v35  ;;  %v26480_v30 = vadd.f32 %v26440_v58, %v26382_v33 }
 0x896   :  { %28005 = vst [vmem:[#allocation38_spill] sm:$0xff] %v26460_v14  ;;  %v26484_v47 = vadd.f32 %v26440_v58, %v26385_v18  ;;  %v26488_v9 = vadd.f32 %v26440_v58, %v26388_v54  ;;  %v26492_v20 = vadd.f32 %v26440_v58, %v26391_v39  ;;  %v26496_v29 = vadd.f32 %v26440_v58, %v26394_v19  ;;  %v14824_v14 = vld [vmem:[%s27436_s7 + $0x80] sm:$0xff] }
 0x897   :  { %v26500_v62 = vadd.f32 %v26440_v58, %v26397_v10  ;;  %v26503_v35 = vadd.f32 %v26440_v58, %v14744_v43  ;;  %v26506_v33 = vadd.f32 %v26440_v58, %v14745_v26  ;;  %v26509_v18 = vadd.f32 %v26440_v58, %v14746_v8  ;;  %v14808_v10 = vld [vmem:[%s27436_s7] sm:$0xff]  ;;  %v14809_v43 = vld [vmem:[%s27436_s7 + $0x8] sm:$0xff]  ;;  %v14810_v26 = vld [vmem:[%s27436_s7 + $0x10] sm:$0xff] }
 0x898   :  { %v26512_v54 = vadd.f32 %v26440_v58, %v14747_v34  ;;  %v26515_v39 = vadd.f32 %v26440_v58, %v14748_v2  ;;  %v26518_v19 = vadd.f32 %v26440_v58, %v14749_v16  ;;  %v14811_v8 = vld [vmem:[%s27436_s7 + $0x18] sm:$0xff]  ;;  %v26533_v34 = vadd.f32 %v26440_v58, %v14750_v56  ;;  %v14814_v56 = vld [vmem:[%s27436_s7 + $0x30] sm:$0xff] }
 0x899   :  { %v26536_v2 = vadd.f32 %v26440_v58, %v14751_v25  ;;  %v26539_v16 = vadd.f32 %v26440_v58, %v14752_v46  ;;  %v26542_v31 = vadd.f32 %v26440_v58, %v14753_v49  ;;  %v14815_v25 = vld [vmem:[%s27436_s7 + $0x38] sm:$0xff]  ;;  %v26557_v46 = vadd.f32 %v26440_v58, %v14754_v1  ;;  %v14818_v1 = vld [vmem:[%s27436_s7 + $0x50] sm:$0xff] }
 0x89a   :  { %v26560_v22 = vadd.f32 %v26440_v58, %v14755_v42  ;;  %v26563_v49 = vadd.f32 %v26440_v58, %v14756_v55  ;;  %v26566_v38 = vadd.f32 %v26440_v58, %v14757_v28  ;;  %v14819_v42 = vld [vmem:[%s27436_s7 + $0x58] sm:$0xff]  ;;  %v14800_v55 = vadd.f32 %v26440_v58, %v14758_v36 }
 0x89b   :  { %v14801_v24 = vadd.f32 %v26440_v58, %v14759_v23  ;;  %v14802_v28 = vadd.f32 %v26440_v58, %v14760_v13  ;;  %v14803_v40 = vadd.f32 %v26440_v58, %v14761_v53  ;;  %v14804_v36 = vadd.f32 %v26440_v58, %v26422_v63  ;;  %v14825_v63 = vld [vmem:[%s27436_s7 + $0x88] sm:$0xff] }
 0x89c   :  { %v14805_v23 = vadd.f32 %v26440_v58, %v26426_v32  ;;  %v14806_v13 = vadd.f32 %v26440_v58, %v26430_v6  ;;  %v14807_v53 = vadd.f32 %v26440_v58, %v26434_v50  ;;  %v14826_v32 = vld [vmem:[%s27436_s7 + $0x90] sm:$0xff]  ;;  %v14827_v6 = vld [vmem:[%s27436_s7 + $0x98] sm:$0xff]  ;;  %v14828_v50 = vld [vmem:[%s27436_s7 + $0xa0] sm:$0xff]  ;;  %v26619_v37 = vadd.f32 %v14808_v10, %v14772_v52 }
 0x89d   :  { %v26621_v0 = vadd.f32 %v14809_v43, %v14773_v27  ;;  %v26623_v59 = vadd.f32 %v14810_v26, %v14774_v44  ;;  %v26625_v51 = vadd.f32 %v14811_v8, %v14775_v17  ;;  %v14830_v58 = vld [vmem:[%s27436_s7 + $0xb0] sm:$0xff]  ;;  %v26636_v52 = vadd.f32 %v14812_v57, %v14776_v41  ;;  %v14832_v10 = vld [vmem:[%s27436_s7 + $0xc0] sm:$0xff]  ;;  %v14833_v43 = vld [vmem:[%s27436_s7 + $0xc8] sm:$0xff] }
 0x89e   :  { %v26638_v27 = vadd.f32 %v14813_v15, %v14777_v3  ;;  %v26640_v44 = vadd.f32 %v14814_v56, %v14778_v7  ;;  %v26642_v17 = vadd.f32 %v14815_v25, %v14779_v5  ;;  %v14834_v26 = vld [vmem:[%s27436_s7 + $0xd0] sm:$0xff]  ;;  %v26654_v41 = vadd.f32 %v14816_v4, %v26480_v30  ;;  %v14835_v8 = vld [vmem:[%s27436_s7 + $0xd8] sm:$0xff]  ;;  %v14836_v57 = vld [vmem:[%s27436_s7 + $0xe0] sm:$0xff] }
 0x89f   :  { %v26657_v3 = vadd.f32 %v14817_v11, %v26484_v47  ;;  %v26660_v7 = vadd.f32 %v14818_v1, %v26488_v9  ;;  %v26663_v5 = vadd.f32 %v14819_v42, %v26492_v20  ;;  %v14837_v30 = vld [vmem:[%s27436_s7 + $0xe8] sm:$0xff]  ;;  %v26675_v47 = vadd.f32 %v14820_v48, %v26496_v29  ;;  %v14838_v56 = vld [vmem:[%s27436_s7 + $0xf0] sm:$0xff]  ;;  %v14839_v25 = vld [vmem:[%s27436_s7 + $0xf8] sm:$0xff] }
 0x8a0   :  { %v26678_v9 = vadd.f32 %v14821_v45, %v26500_v62  ;;  %v26681_v20 = vadd.f32 %v14822_v12, %v26503_v35  ;;  %v26684_v15 = vadd.f32 %v14823_v60, %v26506_v33  ;;  %v14840_v29 = vld [vmem:[%s27436_s7 + $0x100] sm:$0xff]  ;;  %v26696_v62 = vadd.f32 %v14824_v14, %v26509_v18  ;;  %v14841_v11 = vld [vmem:[%s27436_s7 + $0x108] sm:$0xff]  ;;  %v14842_v1 = vld [vmem:[%s27436_s7 + $0x110] sm:$0xff] }
 0x8a1   :  { %v26699_v35 = vadd.f32 %v14825_v63, %v26512_v54  ;;  %v26702_v33 = vadd.f32 %v14826_v32, %v26515_v39  ;;  %v26705_v4 = vadd.f32 %v14827_v6, %v26518_v19  ;;  %v14843_v14 = vld [vmem:[%s27436_s7 + $0x118] sm:$0xff]  ;;  %v26717_v18 = vadd.f32 %v14828_v50, %v26533_v34 }
 0x8a2   :  { %v26720_v54 = vadd.f32 %v14829_v61, %v26536_v2  ;;  %v26723_v39 = vadd.f32 %v14830_v58, %v26539_v16  ;;  %v26726_v19 = vadd.f32 %v14831_v21, %v26542_v31  ;;  %v26729_v42 = vadd.f32 %v14832_v10, %v26557_v46 }
 0x8a3   :  { %v26732_v48 = vadd.f32 %v14833_v43, %v26560_v22  ;;  %v26735_v45 = vadd.f32 %v14834_v26, %v26563_v49  ;;  %v26738_v34 = vadd.f32 %v14835_v8, %v26566_v38  ;;  %v26740_v61 = vadd.f32 %v14836_v57, %v14800_v55 }
 0x8a4   :  { %v26742_v2 = vadd.f32 %v14837_v30, %v14801_v24  ;;  %v26744_v58 = vadd.f32 %v14838_v56, %v14802_v28  ;;  %v26746_v21 = vadd.f32 %v14839_v25, %v14803_v40  ;;  %v26748_v16 = vadd.f32 %v14840_v29, %v14804_v36  ;;  %v20442_v25 = vld [vmem:[#allocation4 + $0x158] sm:$0xff] }
 0x8a5   :  { %v26750_v31 = vadd.f32 %v14841_v11, %v14805_v23  ;;  %v26752_v46 = vadd.f32 %v14842_v1, %v14806_v13  ;;  %v26754_v22 = vadd.f32 %v14843_v14, %v14807_v53  ;;  %v14880_v49 = vmax.f32 %v26619_v37, 0.0  ;;  %v20445_v11 = vld [vmem:[#allocation4 + $0x170] sm:$0xff]  ;;  %v20446_v14 = vld [vmem:[#allocation4 + $0x178] sm:$0xff] }
 0x8a6   :  { %v14881_v38 = vmax.f32 %v26621_v0, 0.0  ;;  %v14882_v55 = vmax.f32 %v26623_v59, 0.0  ;;  %v14883_v24 = vmax.f32 %v26625_v51, 0.0  ;;  %v14884_v28 = vmax.f32 %v26636_v52, 0.0 }
 0x8a7   :  { %v14885_v40 = vmax.f32 %v26638_v27, 0.0  ;;  %v14886_v12 = vmax.f32 %v26640_v44, 0.0  ;;  %v14887_v36 = vmax.f32 %v26642_v17, 0.0  ;;  %v14888_v23 = vmax.f32 %v26654_v41, 0.0  ;;  %14916 = vst.msk [vmem:[%s27437_s9] sm:$0xff] %vm218_vm0, %v14880_v49 }
 0x8a8   :  { %v14889_v13 = vmax.f32 %v26657_v3, 0.0  ;;  %v14890_v37 = vmax.f32 %v26660_v7, 0.0  ;;  %v14891_v0 = vmax.f32 %v26663_v5, 0.0  ;;  %14917 = vst.msk [vmem:[%s27437_s9 + $0x8] sm:$0xff] %vm218_vm0, %v14881_v38  ;;  %14918 = vst.msk [vmem:[%s27437_s9 + $0x10] sm:$0xff] %vm218_vm0, %v14882_v55  ;;  %v14892_v51 = vmax.f32 %v26675_v47, 0.0 }
 0x8a9   :  { %14919 = vst.msk [vmem:[%s27437_s9 + $0x18] sm:$0xff] %vm218_vm0, %v14883_v24  ;;  %v14893_v59 = vmax.f32 %v26678_v9, 0.0  ;;  %v14894_v53 = vmax.f32 %v26681_v20, 0.0  ;;  %v14895_v60 = vmax.f32 %v26684_v15, 0.0  ;;  %14920 = vst.msk [vmem:[%s27437_s9 + $0x20] sm:$0xff] %vm218_vm0, %v14884_v28  ;;  %v14896_v63 = vmax.f32 %v26696_v62, 0.0 }
 0x8aa   :  { %14921 = vst.msk [vmem:[%s27437_s9 + $0x28] sm:$0xff] %vm218_vm0, %v14885_v40  ;;  %14922 = vst.msk [vmem:[%s27437_s9 + $0x30] sm:$0xff] %vm218_vm0, %v14886_v12  ;;  %v14897_v32 = vmax.f32 %v26699_v35, 0.0  ;;  %v14898_v6 = vmax.f32 %v26702_v33, 0.0  ;;  %v14899_v50 = vmax.f32 %v26705_v4, 0.0  ;;  %v14900_v52 = vmax.f32 %v26717_v18, 0.0 }
 0x8ab   :  { %14923 = vst.msk [vmem:[%s27437_s9 + $0x38] sm:$0xff] %vm218_vm0, %v14887_v36  ;;  %14924 = vst.msk [vmem:[%s27437_s9 + $0x40] sm:$0xff] %vm218_vm0, %v14888_v23  ;;  %v14901_v27 = vmax.f32 %v26720_v54, 0.0  ;;  %v14902_v44 = vmax.f32 %v26723_v39, 0.0  ;;  %v14903_v17 = vmax.f32 %v26726_v19, 0.0  ;;  %v14904_v10 = vmax.f32 %v26729_v42, 0.0 }
 0x8ac   :  { %14925 = vst.msk [vmem:[%s27437_s9 + $0x48] sm:$0xff] %vm218_vm0, %v14889_v13  ;;  %14926 = vst.msk [vmem:[%s27437_s9 + $0x50] sm:$0xff] %vm218_vm0, %v14890_v37  ;;  %v14905_v43 = vmax.f32 %v26732_v48, 0.0  ;;  %v14906_v26 = vmax.f32 %v26735_v45, 0.0  ;;  %v14907_v41 = vmax.f32 %v26738_v34, 0.0  ;;  %v14908_v3 = vmax.f32 %v26740_v61, 0.0 }
 0x8ad   :  { %14927 = vst.msk [vmem:[%s27437_s9 + $0x58] sm:$0xff] %vm218_vm0, %v14891_v0  ;;  %14928 = vst.msk [vmem:[%s27437_s9 + $0x60] sm:$0xff] %vm218_vm0, %v14892_v51  ;;  %v14909_v7 = vmax.f32 %v26742_v2, 0.0  ;;  %v14910_v5 = vmax.f32 %v26744_v58, 0.0  ;;  %v14911_v8 = vmax.f32 %v26746_v21, 0.0  ;;  %v14912_v57 = vmax.f32 %v26748_v16, 0.0 }
 0x8ae   :  { %14929 = vst.msk [vmem:[%s27437_s9 + $0x68] sm:$0xff] %vm218_vm0, %v14893_v59  ;;  %14930 = vst.msk [vmem:[%s27437_s9 + $0x70] sm:$0xff] %vm218_vm0, %v14894_v53  ;;  %v14913_v30 = vmax.f32 %v26750_v31, 0.0  ;;  %v14914_v47 = vmax.f32 %v26752_v46, 0.0  ;;  %v14915_v9 = vmax.f32 %v26754_v22, 0.0  ;;  %v20441_v20 = vld [vmem:[#allocation4 + $0x150] sm:$0xff] }
 0x8af   :  { %14931 = vst.msk [vmem:[%s27437_s9 + $0x78] sm:$0xff] %vm218_vm0, %v14895_v60  ;;  %14932 = vst.msk [vmem:[%s27437_s9 + $0x80] sm:$0xff] %vm218_vm0, %v14896_v63  ;;  %v28006_v15 = vld [vmem:[#allocation39_spill] sm:$0xff]  ;;  %v20443_v62 = vld [vmem:[#allocation4 + $0x160] sm:$0xff] }
 0x8b0   :  { %14933 = vst.msk [vmem:[%s27437_s9 + $0x88] sm:$0xff] %vm218_vm0, %v14897_v32  ;;  %14934 = vst.msk [vmem:[%s27437_s9 + $0x90] sm:$0xff] %vm218_vm0, %v14898_v6  ;;  %v26921_v56 = vmul.f32 %v20441_v20, %v28006_v15  ;;  %v26924_v29 = vmul.f32 %v20442_v25, %v28006_v15  ;;  %v26927_v35 = vmul.f32 %v20443_v62, %v28006_v15  ;;  %v20444_v33 = vld [vmem:[#allocation4 + $0x168] sm:$0xff]  ;;  %v20447_v54 = vld [vmem:[#allocation4 + $0x180] sm:$0xff] }
 0x8b1   :  { %14935 = vst.msk [vmem:[%s27437_s9 + $0x98] sm:$0xff] %vm218_vm0, %v14899_v50  ;;  %14936 = vst.msk [vmem:[%s27437_s9 + $0xa0] sm:$0xff] %vm218_vm0, %v14900_v52  ;;  %v26930_v4 = vmul.f32 %v20444_v33, %v28006_v15  ;;  %v14998_v1 = vmul.f32 %v20445_v11, %v28006_v15  ;;  %v14999_v18 = vmul.f32 %v20446_v14, %v28006_v15  ;;  %v20448_v19 = vld [vmem:[#allocation4 + $0x188] sm:$0xff]  ;;  %v20449_v48 = vld [vmem:[#allocation4 + $0x190] sm:$0xff] }
 0x8b2   :  { %14937 = vst.msk [vmem:[%s27437_s9 + $0xa8] sm:$0xff] %vm218_vm0, %v14901_v27  ;;  %14938 = vst.msk [vmem:[%s27437_s9 + $0xb0] sm:$0xff] %vm218_vm0, %v14902_v44  ;;  %v15000_v39 = vmul.f32 %v20447_v54, %v28006_v15  ;;  %v15001_v42 = vmul.f32 %v20448_v19, %v28006_v15  ;;  %v15002_v45 = vmul.f32 %v20449_v48, %v28006_v15  ;;  %v20450_v34 = vld [vmem:[#allocation4 + $0x198] sm:$0xff]  ;;  %v20451_v2 = vld [vmem:[#allocation4 + $0x1a0] sm:$0xff] }
 0x8b3   :  { %14939 = vst.msk [vmem:[%s27437_s9 + $0xb8] sm:$0xff] %vm218_vm0, %v14903_v17  ;;  %14940 = vst.msk [vmem:[%s27437_s9 + $0xc0] sm:$0xff] %vm218_vm0, %v14904_v10  ;;  %v15003_v61 = vmul.f32 %v20450_v34, %v28006_v15  ;;  %v15004_v58 = vmul.f32 %v20451_v2, %v28006_v15  ;;  %v20452_v21 = vld [vmem:[#allocation4 + $0x1a8] sm:$0xff]  ;;  %v20453_v31 = vld [vmem:[#allocation4 + $0x1b0] sm:$0xff] }
 0x8b4   :  { %14941 = vst.msk [vmem:[%s27437_s9 + $0xc8] sm:$0xff] %vm218_vm0, %v14905_v43  ;;  %14942 = vst.msk [vmem:[%s27437_s9 + $0xd0] sm:$0xff] %vm218_vm0, %v14906_v26  ;;  %v15005_v16 = vmul.f32 %v20452_v21, %v28006_v15  ;;  %v15006_v46 = vmul.f32 %v20453_v31, %v28006_v15  ;;  %v20454_v22 = vld [vmem:[#allocation4 + $0x1b8] sm:$0xff]  ;;  %v20455_v38 = vld [vmem:[#allocation4 + $0x1c0] sm:$0xff] }
 0x8b5   :  { %14943 = vst.msk [vmem:[%s27437_s9 + $0xd8] sm:$0xff] %vm218_vm0, %v14907_v41  ;;  %14944 = vst.msk [vmem:[%s27437_s9 + $0xe0] sm:$0xff] %vm218_vm0, %v14908_v3  ;;  %v15007_v49 = vmul.f32 %v20454_v22, %v28006_v15  ;;  %v15008_v55 = vmul.f32 %v20455_v38, %v28006_v15  ;;  %v20456_v24 = vld [vmem:[#allocation4 + $0x1c8] sm:$0xff]  ;;  %v20457_v40 = vld [vmem:[#allocation4 + $0x1d0] sm:$0xff] }
 0x8b6   :  { %14945 = vst.msk [vmem:[%s27437_s9 + $0xe8] sm:$0xff] %vm218_vm0, %v14909_v7  ;;  %14946 = vst.msk [vmem:[%s27437_s9 + $0xf0] sm:$0xff] %vm218_vm0, %v14910_v5  ;;  %v15009_v28 = vmul.f32 %v20456_v24, %v28006_v15  ;;  %v15010_v12 = vmul.f32 %v20457_v40, %v28006_v15  ;;  %v20458_v36 = vld [vmem:[#allocation4 + $0x1d8] sm:$0xff]  ;;  %v20459_v13 = vld [vmem:[#allocation4 + $0x1e0] sm:$0xff] }
 0x8b7   :  { %14947 = vst.msk [vmem:[%s27437_s9 + $0xf8] sm:$0xff] %vm218_vm0, %v14911_v8  ;;  %14948 = vst.msk [vmem:[%s27437_s9 + $0x100] sm:$0xff] %vm218_vm0, %v14912_v57  ;;  %v15011_v23 = vmul.f32 %v20458_v36, %v28006_v15  ;;  %v15012_v37 = vmul.f32 %v20459_v13, %v28006_v15  ;;  %v20460_v0 = vld [vmem:[#allocation4 + $0x1e8] sm:$0xff]  ;;  %v20461_v53 = vld [vmem:[#allocation4 + $0x1f0] sm:$0xff] }
 0x8b8   :  { %14949 = vst.msk [vmem:[%s27437_s9 + $0x108] sm:$0xff] %vm218_vm0, %v14913_v30  ;;  %14950 = vst.msk [vmem:[%s27437_s9 + $0x110] sm:$0xff] %vm218_vm0, %v14914_v47  ;;  %v15013_v51 = vmul.f32 %v20460_v0, %v28006_v15  ;;  %v14985_v59 = vld [vmem:[#allocation4 + $0x228] sm:$0xff]  ;;  %v15014_v60 = vmul.f32 %v20461_v53, %v28006_v15  ;;  %v20462_v63 = vld [vmem:[#allocation4 + $0x1f8] sm:$0xff] }
 0x8b9   :  { %14951 = vst.msk [vmem:[%s27437_s9 + $0x118] sm:$0xff] %vm218_vm0, %v14915_v9  ;;  %v15015_v32 = vmul.f32 %v20462_v63, %v28006_v15  ;;  %v20463_v6 = vld [vmem:[#allocation4 + $0x200] sm:$0xff]  ;;  %v20464_v52 = vld [vmem:[#allocation4 + $0x208] sm:$0xff]  ;;  %v20465_v44 = vld [vmem:[#allocation4 + $0x210] sm:$0xff]  ;;  %v15021_v3 = vmul.f32 %v14985_v59, %v28006_v15 }
 0x8ba   :  { %v15016_v50 = vmul.f32 %v20463_v6, %v28006_v15  ;;  %v15017_v27 = vmul.f32 %v20464_v52, %v28006_v15  ;;  %v15018_v17 = vmul.f32 %v20465_v44, %v28006_v15  ;;  %v20466_v10 = vld [vmem:[#allocation4 + $0x218] sm:$0xff]  ;;  %v20467_v26 = vld [vmem:[#allocation4 + $0x220] sm:$0xff]  ;;  %v20468_v7 = vld [vmem:[#allocation4 + $0x230] sm:$0xff] }
 0x8bb   :  { %v15019_v43 = vmul.f32 %v20466_v10, %v28006_v15  ;;  %v15020_v41 = vmul.f32 %v20467_v26, %v28006_v15  ;;  %v15022_v5 = vmul.f32 %v20468_v7, %v28006_v15  ;;  %v20469_v8 = vld [vmem:[#allocation4 + $0x238] sm:$0xff]  ;;  %v28007_v30 = vld [vmem:[#allocation21_spill] sm:$0xff]  ;;  %v28009_v20 = vld [vmem:[#allocation7_spill] sm:$0xff] }
 0x8bc   :  { %v15023_v57 = vmul.f32 %v20469_v8, %v28006_v15  ;;  %v28008_v47 = vld [vmem:[#allocation5_spill] sm:$0xff]  ;;  %v15025_v25 = vadd.f32 %v28009_v20, %v28007_v30  ;;  %v28010_v62 = vld [vmem:[#allocation31_spill] sm:$0xff]  ;;  %v28011_v11 = vld [vmem:[#allocation22_spill] sm:$0xff]  ;;  %v15030_v15 = vadd.f32 %v26921_v56, %v28007_v30  ;;  %v15031_v2 = vadd.f32 %v26924_v29, %v28007_v30 }
 0x8bd   :  { %v15024_v9 = vadd.f32 %v28008_v47, %v28007_v30  ;;  %v15026_v33 = vadd.f32 %v28010_v62, %v28007_v30  ;;  %v15027_v14 = vadd.f32 %v28011_v11, %v28007_v30  ;;  %v28012_v54 = vld [vmem:[#allocation23_spill] sm:$0xff]  ;;  %v28013_v48 = vld [vmem:[#allocation38_spill] sm:$0xff]  ;;  %v15032_v21 = vadd.f32 %v26927_v35, %v28007_v30  ;;  %v16588_v0 = vld [vmem:[%s27436_s7 + $0x150] sm:$0xff] }
 0x8be   :  { %v15028_v19 = vadd.f32 %v28012_v54, %v28007_v30  ;;  %v15029_v34 = vadd.f32 %v28013_v48, %v28007_v30  ;;  %v15033_v31 = vadd.f32 %v26930_v4, %v28007_v30  ;;  %v26995_v22 = vadd.f32 %v14998_v1, %v28007_v30  ;;  %v16585_v40 = vld [vmem:[%s27436_s7 + $0x138] sm:$0xff]  ;;  %v16592_v6 = vld [vmem:[%s27436_s7 + $0x170] sm:$0xff]  ;;  %v16594_v44 = vld [vmem:[%s27436_s7 + $0x180] sm:$0xff] }
 0x8bf   :  { %v26998_v38 = vadd.f32 %v14999_v18, %v28007_v30  ;;  %v27001_v24 = vadd.f32 %v15000_v39, %v28007_v30  ;;  %v27004_v56 = vadd.f32 %v15001_v42, %v28007_v30  ;;  %v27007_v29 = vadd.f32 %v15002_v45, %v28007_v30  ;;  %v16582_v18 = vld [vmem:[%s27436_s7 + $0x120] sm:$0xff]  ;;  %v16583_v39 = vld [vmem:[%s27436_s7 + $0x128] sm:$0xff]  ;;  %v16589_v59 = vld [vmem:[%s27436_s7 + $0x158] sm:$0xff] }
 0x8c0   :  { %v27010_v35 = vadd.f32 %v15003_v61, %v28007_v30  ;;  %v27013_v4 = vadd.f32 %v15004_v58, %v28007_v30  ;;  %v27016_v1 = vadd.f32 %v15005_v16, %v28007_v30  ;;  %v27025_v42 = vadd.f32 %v15006_v46, %v28007_v30  ;;  %v16584_v16 = vld [vmem:[%s27436_s7 + $0x130] sm:$0xff]  ;;  %v16586_v46 = vld [vmem:[%s27436_s7 + $0x140] sm:$0xff]  ;;  %v16593_v52 = vld [vmem:[%s27436_s7 + $0x178] sm:$0xff] }
 0x8c1   :  { %v27028_v45 = vadd.f32 %v15007_v49, %v28007_v30  ;;  %v27031_v61 = vadd.f32 %v15008_v55, %v28007_v30  ;;  %v27034_v58 = vadd.f32 %v15009_v28, %v28007_v30  ;;  %v16587_v49 = vld [vmem:[%s27436_s7 + $0x148] sm:$0xff]  ;;  %v27049_v55 = vadd.f32 %v15010_v12, %v28007_v30  ;;  %v16590_v12 = vld [vmem:[%s27436_s7 + $0x160] sm:$0xff]  ;;  %v16596_v26 = vld [vmem:[%s27436_s7 + $0x190] sm:$0xff] }
 0x8c2   :  { %v27052_v28 = vadd.f32 %v15011_v23, %v28007_v30  ;;  %v27055_v36 = vadd.f32 %v15012_v37, %v28007_v30  ;;  %v27058_v13 = vadd.f32 %v15013_v51, %v28007_v30  ;;  %v16591_v23 = vld [vmem:[%s27436_s7 + $0x168] sm:$0xff]  ;;  %v15050_v37 = vadd.f32 %v15014_v60, %v28007_v30  ;;  %v16597_v7 = vld [vmem:[%s27436_s7 + $0x198] sm:$0xff]  ;;  %v16600_v8 = vld [vmem:[%s27436_s7 + $0x1b0] sm:$0xff] }
 0x8c3   :  { %v15051_v51 = vadd.f32 %v15015_v32, %v28007_v30  ;;  %v15052_v53 = vadd.f32 %v15016_v50, %v28007_v30  ;;  %v15053_v63 = vadd.f32 %v15017_v27, %v28007_v30  ;;  %v15054_v60 = vadd.f32 %v15018_v17, %v28007_v30  ;;  %v16595_v10 = vld [vmem:[%s27436_s7 + $0x188] sm:$0xff]  ;;  %v16604_v54 = vld [vmem:[%s27436_s7 + $0x1d0] sm:$0xff]  ;;  %v16605_v48 = vld [vmem:[%s27436_s7 + $0x1d8] sm:$0xff] }
 0x8c4   :  { %v15055_v32 = vadd.f32 %v15019_v43, %v28007_v30  ;;  %v15056_v50 = vadd.f32 %v15020_v41, %v28007_v30  ;;  %v15057_v27 = vadd.f32 %v15021_v3, %v28007_v30  ;;  %v15058_v17 = vadd.f32 %v15022_v5, %v28007_v30  ;;  %v16598_v41 = vld [vmem:[%s27436_s7 + $0x1a0] sm:$0xff]  ;;  %v16599_v3 = vld [vmem:[%s27436_s7 + $0x1a8] sm:$0xff]  ;;  %v16601_v5 = vld [vmem:[%s27436_s7 + $0x1b8] sm:$0xff] }
 0x8c5   :  { %v15059_v43 = vadd.f32 %v15023_v57, %v28007_v30  ;;  %v27109_v47 = vadd.f32 %v16582_v18, %v15024_v9  ;;  %v27111_v20 = vadd.f32 %v16583_v39, %v15025_v25  ;;  %v16602_v57 = vld [vmem:[%s27436_s7 + $0x1c0] sm:$0xff]  ;;  %v16603_v30 = vld [vmem:[%s27436_s7 + $0x1c8] sm:$0xff]  ;;  %v27122_v62 = vadd.f32 %v16584_v16, %v15026_v33  ;;  %v16608_v16 = vld [vmem:[%s27436_s7 + $0x1f0] sm:$0xff] }
 0x8c6   :  { %v27124_v11 = vadd.f32 %v16585_v40, %v15027_v14  ;;  %v27126_v9 = vadd.f32 %v16586_v46, %v15028_v19  ;;  %v27128_v25 = vadd.f32 %v16587_v49, %v15029_v34  ;;  %v16606_v18 = vld [vmem:[%s27436_s7 + $0x1e0] sm:$0xff]  ;;  %v27139_v33 = vadd.f32 %v16588_v0, %v15030_v15  ;;  %v16607_v39 = vld [vmem:[%s27436_s7 + $0x1e8] sm:$0xff]  ;;  %v16609_v40 = vld [vmem:[%s27436_s7 + $0x1f8] sm:$0xff] }
 0x8c7   :  { %v27141_v14 = vadd.f32 %v16589_v59, %v15031_v2  ;;  %v27143_v19 = vadd.f32 %v16590_v12, %v15032_v21  ;;  %v27145_v34 = vadd.f32 %v16591_v23, %v15033_v31  ;;  %v27157_v15 = vadd.f32 %v16592_v6, %v26995_v22  ;;  %v16610_v46 = vld [vmem:[%s27436_s7 + $0x200] sm:$0xff]  ;;  %v16611_v49 = vld [vmem:[%s27436_s7 + $0x208] sm:$0xff]  ;;  %v16612_v22 = vld [vmem:[%s27436_s7 + $0x210] sm:$0xff] }
 0x8c8   :  { %v27160_v2 = vadd.f32 %v16593_v52, %v26998_v38  ;;  %v27163_v21 = vadd.f32 %v16594_v44, %v27001_v24  ;;  %v27166_v31 = vadd.f32 %v16595_v10, %v27004_v56  ;;  %v27178_v38 = vadd.f32 %v16596_v26, %v27007_v29  ;;  %v16613_v59 = vld [vmem:[%s27436_s7 + $0x218] sm:$0xff]  ;;  %v16614_v12 = vld [vmem:[%s27436_s7 + $0x220] sm:$0xff]  ;;  %v16615_v29 = vld [vmem:[%s27436_s7 + $0x228] sm:$0xff] }
 0x8c9   :  { %v27181_v24 = vadd.f32 %v16597_v7, %v27010_v35  ;;  %v27184_v56 = vadd.f32 %v16598_v41, %v27013_v4  ;;  %v27187_v0 = vadd.f32 %v16599_v3, %v27016_v1  ;;  %v27199_v35 = vadd.f32 %v16600_v8, %v27025_v42  ;;  %v16616_v6 = vld [vmem:[%s27436_s7 + $0x230] sm:$0xff]  ;;  %v16617_v52 = vld [vmem:[%s27436_s7 + $0x238] sm:$0xff] }
 0x8ca   :  { %v27202_v4 = vadd.f32 %v16601_v5, %v27028_v45  ;;  %v27205_v1 = vadd.f32 %v16602_v57, %v27031_v61  ;;  %v27208_v23 = vadd.f32 %v16603_v30, %v27034_v58  ;;  %v27217_v42 = vadd.f32 %v16604_v54, %v27049_v55 }
 0x8cb   :  { %v27220_v45 = vadd.f32 %v16605_v48, %v27052_v28  ;;  %v27223_v61 = vadd.f32 %v16606_v18, %v27055_v36  ;;  %v27226_v58 = vadd.f32 %v16607_v39, %v27058_v13  ;;  %v27228_v44 = vadd.f32 %v16608_v16, %v15050_v37 }
 0x8cc   :  { %v27230_v10 = vadd.f32 %v16609_v40, %v15051_v51  ;;  %v27232_v26 = vadd.f32 %v16610_v46, %v15052_v53  ;;  %v27234_v7 = vadd.f32 %v16611_v49, %v15053_v63  ;;  %v27236_v41 = vadd.f32 %v16612_v22, %v15054_v60 }
 0x8cd   :  { %v27238_v55 = vadd.f32 %v16613_v59, %v15055_v32  ;;  %v27240_v28 = vadd.f32 %v16614_v12, %v15056_v50  ;;  %v27242_v3 = vadd.f32 %v16615_v29, %v15057_v27  ;;  %v27244_v36 = vadd.f32 %v16616_v6, %v15058_v17 }
 0x8ce   :  { %v27246_v13 = vadd.f32 %v16617_v52, %v15059_v43  ;;  %v15133_v37 = vmax.f32 %v27109_v47, 0.0  ;;  %v15134_v51 = vmax.f32 %v27111_v20, 0.0  ;;  %v15135_v53 = vmax.f32 %v27122_v62, 0.0 }
 0x8cf   :  { %v15136_v63 = vmax.f32 %v27124_v11, 0.0  ;;  %v15137_v60 = vmax.f32 %v27126_v9, 0.0  ;;  %v15138_v32 = vmax.f32 %v27128_v25, 0.0  ;;  %v15139_v50 = vmax.f32 %v27139_v33, 0.0 }
 0x8d0   :  { %v15140_v27 = vmax.f32 %v27141_v14, 0.0  ;;  %v15141_v17 = vmax.f32 %v27143_v19, 0.0  ;;  %v15142_v43 = vmax.f32 %v27145_v34, 0.0  ;;  %16618 = vst.msk [vmem:[%s27437_s9 + $0x120] sm:$0xff] %vm218_vm0, %v15133_v37  ;;  %16619 = vst.msk [vmem:[%s27437_s9 + $0x128] sm:$0xff] %vm218_vm0, %v15134_v51  ;;  %v15143_v8 = vmax.f32 %v27157_v15, 0.0 }
 0x8d1   :  { %v15144_v47 = vmax.f32 %v27160_v2, 0.0  ;;  %v15145_v20 = vmax.f32 %v27163_v21, 0.0  ;;  %v15146_v5 = vmax.f32 %v27166_v31, 0.0  ;;  %16620 = vst.msk [vmem:[%s27437_s9 + $0x130] sm:$0xff] %vm218_vm0, %v15135_v53  ;;  %16621 = vst.msk [vmem:[%s27437_s9 + $0x138] sm:$0xff] %vm218_vm0, %v15136_v63  ;;  %v15147_v57 = vmax.f32 %v27178_v38, 0.0 }
 0x8d2   :  { %16622 = vst.msk [vmem:[%s27437_s9 + $0x140] sm:$0xff] %vm218_vm0, %v15137_v60  ;;  %16623 = vst.msk [vmem:[%s27437_s9 + $0x148] sm:$0xff] %vm218_vm0, %v15138_v32  ;;  %v15148_v30 = vmax.f32 %v27181_v24, 0.0  ;;  %v15149_v62 = vmax.f32 %v27184_v56, 0.0  ;;  %v15150_v11 = vmax.f32 %v27187_v0, 0.0  ;;  %v15151_v9 = vmax.f32 %v27199_v35, 0.0 }
 0x8d3   :  { %16624 = vst.msk [vmem:[%s27437_s9 + $0x150] sm:$0xff] %vm218_vm0, %v15139_v50  ;;  %16625 = vst.msk [vmem:[%s27437_s9 + $0x158] sm:$0xff] %vm218_vm0, %v15140_v27  ;;  %v15152_v25 = vmax.f32 %v27202_v4, 0.0  ;;  %v15153_v54 = vmax.f32 %v27205_v1, 0.0  ;;  %v15154_v48 = vmax.f32 %v27208_v23, 0.0  ;;  %v15155_v18 = vmax.f32 %v27217_v42, 0.0 }
 0x8d4   :  { %16626 = vst.msk [vmem:[%s27437_s9 + $0x160] sm:$0xff] %vm218_vm0, %v15141_v17  ;;  %16627 = vst.msk [vmem:[%s27437_s9 + $0x168] sm:$0xff] %vm218_vm0, %v15142_v43  ;;  %v15156_v33 = vmax.f32 %v27220_v45, 0.0  ;;  %v15157_v14 = vmax.f32 %v27223_v61, 0.0  ;;  %v15158_v19 = vmax.f32 %v27226_v58, 0.0  ;;  %v15159_v34 = vmax.f32 %v27228_v44, 0.0 }
 0x8d5   :  { %16628 = vst.msk [vmem:[%s27437_s9 + $0x170] sm:$0xff] %vm218_vm0, %v15143_v8  ;;  %16629 = vst.msk [vmem:[%s27437_s9 + $0x178] sm:$0xff] %vm218_vm0, %v15144_v47  ;;  %v15160_v39 = vmax.f32 %v27230_v10, 0.0  ;;  %v15161_v16 = vmax.f32 %v27232_v26, 0.0  ;;  %v15162_v40 = vmax.f32 %v27234_v7, 0.0  ;;  %v15163_v15 = vmax.f32 %v27236_v41, 0.0 }
 0x8d6   :  { %16630 = vst.msk [vmem:[%s27437_s9 + $0x180] sm:$0xff] %vm218_vm0, %v15145_v20  ;;  %16631 = vst.msk [vmem:[%s27437_s9 + $0x188] sm:$0xff] %vm218_vm0, %v15146_v5  ;;  %v15164_v2 = vmax.f32 %v27238_v55, 0.0  ;;  %v15165_v21 = vmax.f32 %v27240_v28, 0.0  ;;  %v15166_v31 = vmax.f32 %v27242_v3, 0.0  ;;  %v15167_v46 = vmax.f32 %v27244_v36, 0.0 }
 0x8d7   :  { %16632 = vst.msk [vmem:[%s27437_s9 + $0x190] sm:$0xff] %vm218_vm0, %v15147_v57  ;;  %16633 = vst.msk [vmem:[%s27437_s9 + $0x198] sm:$0xff] %vm218_vm0, %v15148_v30  ;;  %v15168_v49 = vmax.f32 %v27246_v13, 0.0 }
 0x8d8   :  { %16634 = vst.msk [vmem:[%s27437_s9 + $0x1a0] sm:$0xff] %vm218_vm0, %v15149_v62  ;;  %16635 = vst.msk [vmem:[%s27437_s9 + $0x1a8] sm:$0xff] %vm218_vm0, %v15150_v11 }
 0x8d9   :  { %16636 = vst.msk [vmem:[%s27437_s9 + $0x1b0] sm:$0xff] %vm218_vm0, %v15151_v9  ;;  %16637 = vst.msk [vmem:[%s27437_s9 + $0x1b8] sm:$0xff] %vm218_vm0, %v15152_v25 }
 0x8da   :  { %16638 = vst.msk [vmem:[%s27437_s9 + $0x1c0] sm:$0xff] %vm218_vm0, %v15153_v54  ;;  %16639 = vst.msk [vmem:[%s27437_s9 + $0x1c8] sm:$0xff] %vm218_vm0, %v15154_v48 }
 0x8db   :  { %16640 = vst.msk [vmem:[%s27437_s9 + $0x1d0] sm:$0xff] %vm218_vm0, %v15155_v18  ;;  %16641 = vst.msk [vmem:[%s27437_s9 + $0x1d8] sm:$0xff] %vm218_vm0, %v15156_v33 }
 0x8dc   :  { %16642 = vst.msk [vmem:[%s27437_s9 + $0x1e0] sm:$0xff] %vm218_vm0, %v15157_v14  ;;  %16643 = vst.msk [vmem:[%s27437_s9 + $0x1e8] sm:$0xff] %vm218_vm0, %v15158_v19 }
 0x8dd   :  { %16644 = vst.msk [vmem:[%s27437_s9 + $0x1f0] sm:$0xff] %vm218_vm0, %v15159_v34  ;;  %16645 = vst.msk [vmem:[%s27437_s9 + $0x1f8] sm:$0xff] %vm218_vm0, %v15160_v39 }
 0x8de   :  { %16646 = vst.msk [vmem:[%s27437_s9 + $0x200] sm:$0xff] %vm218_vm0, %v15161_v16  ;;  %16647 = vst.msk [vmem:[%s27437_s9 + $0x208] sm:$0xff] %vm218_vm0, %v15162_v40 }
 0x8df   :  { %16648 = vst.msk [vmem:[%s27437_s9 + $0x210] sm:$0xff] %vm218_vm0, %v15163_v15  ;;  %16649 = vst.msk [vmem:[%s27437_s9 + $0x218] sm:$0xff] %vm218_vm0, %v15164_v2 }
 0x8e0   :  { %16650 = vst.msk [vmem:[%s27437_s9 + $0x220] sm:$0xff] %vm218_vm0, %v15165_v21  ;;  %16651 = vst.msk [vmem:[%s27437_s9 + $0x228] sm:$0xff] %vm218_vm0, %v15166_v31 }
 0x8e1   :  { %16652 = vst.msk [vmem:[%s27437_s9 + $0x230] sm:$0xff] %vm218_vm0, %v15167_v46  ;;  %16653 = vst.msk [vmem:[%s27437_s9 + $0x238] sm:$0xff] %vm218_vm0, %v15168_v49 }

</bundles_post_ra>
